<compile_context>
chip_gen: v5e
topology: v5e:2x2
jax: 0.10.0
libtpu: 0.0.40
codegen_flags: <defaults>
</compile_context>

<pallas_src>
import functools

import numpy as np

import jax
import jax.numpy as jnp
from jax.experimental import pallas as pl
from jax.experimental.pallas import tpu as pltpu


# (Cin, Cout, stride, relu) for conv1..conv4 + bottleneck; all kernel=3, pad=1.
_LAYER_CFG = (
    (3, 32, 2, True),
    (32, 64, 2, True),
    (64, 128, 2, True),
    (128, 256, 2, True),
    (256, 64, 1, False),
)


# ----------------------------------------------------------------------------
# Pallas kernel: the whole encoder in a single call, everything VMEM-resident.
# ----------------------------------------------------------------------------
def _encoder_kernel(*refs, relu_flags):
    """refs = [x, (S_l, W_l, b_l) for each layer, out].

    x   : (R0, C0)          bf16  activations, rows in (n, h, w) raster order
    S_l : (9, R_out, R_in)  bf16  0/1 shift+stride+pad selection per 3x3 tap
    W_l : (9, Cin, Cout)    bf16  per-tap weights (tap t = kh*3 + kw)
    b_l : (1, Cout)         f32   bias
    out : (R_last, C_last)  f32
    """
    x_ref, out_ref = refs[0], refs[-1]
    layer_refs = refs[1:-1]

    a = x_ref[...]                                     # (R_in, Cin) bf16
    acc = None
    for l, apply_relu in enumerate(relu_flags):
        s_ref, w_ref, b_ref = layer_refs[3 * l:3 * l + 3]
        r_out = s_ref.shape[1]
        c_out = w_ref.shape[2]
        acc = jnp.zeros((r_out, c_out), jnp.float32)
        for t in range(9):                             # 3x3 taps, unrolled
            # Rows of S are one-hot (or all-zero where the tap hits padding),
            # so this matmul is an exact shifted / strided copy of `a`'s rows.
            shifted = jnp.dot(s_ref[t], a, preferred_element_type=jnp.float32)
            acc = acc + jnp.dot(shifted.astype(jnp.bfloat16), w_ref[t],
                                preferred_element_type=jnp.float32)
        acc = acc + b_ref[...]                         # (1, Cout) broadcast
        if apply_relu:
            acc = jnp.maximum(acc, 0.0)
        a = acc.astype(jnp.bfloat16)                   # feeds the next layer
    out_ref[...] = acc.astype(out_ref.dtype)


# ----------------------------------------------------------------------------
# Host-side, one-time preparation (cached): tap selection matrices per layer.
# ----------------------------------------------------------------------------
@functools.lru_cache(maxsize=None)
def _conv_plan(batch, height, width):
    """For each layer: (9, R_out, R_in) bf16 selection matrices + (Ho, Wo)."""
    sels, spatial = [], []
    h, w = height, width
    for (_, _, stride, _) in _LAYER_CFG:
        ho = (h + 2 - 3) // stride + 1
        wo = (w + 2 - 3) // stride + 1
        sel = np.zeros((9, batch * ho * wo, batch * h * w), np.float32)
        for kh in range(3):
            for kw in range(3):
                t = kh * 3 + kw
                for n in range(batch):
                    for i in range(ho):
                        hi = i * stride + kh - 1
                        if hi < 0 or hi >= h:
                            continue
                        for j in range(wo):
                            wi = j * stride + kw - 1
                            if wi < 0 or wi >= w:
                                continue
                            sel[t, (n * ho + i) * wo + j,
                                (n * h + hi) * w + wi] = 1.0
        sels.append(jnp.asarray(sel, jnp.bfloat16))
        spatial.append((ho, wo))
        h, w = ho, wo
    return tuple(sels), tuple(spatial)


# ----------------------------------------------------------------------------
# Parameters (PyTorch layout) + one-time prep into kernel layout.
# ----------------------------------------------------------------------------
def init_encoder_params(key):
    """PyTorch-layout params: [(w (Cout,Cin,3,3) f32, b (Cout,) f32), ...]."""
    params = []
    for idx, (cin, cout, _, _) in enumerate(_LAYER_CFG):
        kw_key, kb_key = jax.random.split(jax.random.fold_in(key, idx))
        fan_in = cin * 3 * 3
        bound = 1.0 / float(np.sqrt(fan_in))
        w = jax.random.uniform(kw_key, (cout, cin, 3, 3), jnp.float32, -bound, bound)
        b = jax.random.uniform(kb_key, (cout,), jnp.float32, -bound, bound)
        params.append((w, b))
    return params


def prepare_encoder_params(params):
    """One-time host prep: tap-major (9, Cin, Cout) bf16 weights, (1, Cout) f32 bias."""
    prepared = []
    for w, b in params:
        cout, cin, kh, kw = w.shape
        w_taps = jnp.transpose(w, (2, 3, 1, 0)).reshape(kh * kw, cin, cout)
        prepared.append((w_taps.astype(jnp.bfloat16),
                         jnp.asarray(b, jnp.float32).reshape(1, cout)))
    return prepared


# ----------------------------------------------------------------------------
# Forward pass: single fused pallas_call.
# ----------------------------------------------------------------------------
def encoder_forward(prepared_params, x):
    """x: (N, 3, H, W) f32 NCHW  ->  (N, 64, H//16, W//16) f32 NCHW."""
    n, cin, h, w = x.shape
    sels, spatial = _conv_plan(n, h, w)
    ho, wo = spatial[-1]
    cout_last = _LAYER_CFG[-1][1]

    # One boundary transpose: NCHW -> channels-last rows x channels (bf16).
    x_rows = jnp.transpose(x, (0, 2, 3, 1)).reshape(n * h * w, cin)
    x_rows = x_rows.astype(jnp.bfloat16)

    args = [x_rows]
    for sel, (w_taps, bias) in zip(sels, prepared_params):
        args.extend([sel, w_taps, bias])

    relu_flags = tuple(cfg[3] for cfg in _LAYER_CFG)
    out = pl.pallas_call(
        functools.partial(_encoder_kernel, relu_flags=relu_flags),
        out_shape=jax.ShapeDtypeStruct((n * ho * wo, cout_last), jnp.float32),
        in_specs=[pl.BlockSpec(memory_space=pltpu.MemorySpace.VMEM)
                  for _ in args],
        out_specs=pl.BlockSpec(memory_space=pltpu.MemorySpace.VMEM),
        compiler_params=pltpu.CompilerParams(
            vmem_limit_bytes=32 * 1024 * 1024),
    )(*args)

    # One boundary transpose back to NCHW.
    return out.reshape(n, ho, wo, cout_last).transpose(0, 3, 1, 2)


# ----------------------------------------------------------------------------
# Reference (pure JAX, lax.conv, f32) for the correctness check.
# ----------------------------------------------------------------------------
def encoder_forward_ref(params, x):
    for (w, b), (_, _, stride, relu) in zip(params, _LAYER_CFG):
        y = jax.lax.conv_general_dilated(
            x, w, window_strides=(stride, stride), padding=((1, 1), (1, 1)),
            dimension_numbers=("NCHW", "OIHW", "NCHW"),
        ) + b[None, :, None, None]
        x = jnp.maximum(y, 0.0) if relu else y
    return x


if __name__ == "__main__":
    key = jax.random.PRNGKey(0)
    pkey, xkey = jax.random.split(key)

    params = init_encoder_params(pkey)
    prepared = prepare_encoder_params(params)
    x = jax.random.normal(xkey, (2, 3, 16, 16), jnp.float32)  # NCHW input

    fwd = jax.jit(encoder_forward)
    out = jax.block_until_ready(fwd(prepared, x))
    ref = jax.block_until_ready(encoder_forward_ref(params, x))

    assert out.shape == (2, 64, 1, 1), out.shape
    max_err = float(jnp.max(jnp.abs(out - ref)))
    # bf16 operands / f32 accumulation: looser tolerance than pure-f32 path.
    assert jnp.allclose(out, ref, atol=2e-2, rtol=2e-2), max_err
    print("KERNEL_OK")
</pallas_src>

<mosaic_0001>
module attributes {stable_mosaic.version = 11 : i64} {
  func.func @_encoder_kernel(%arg0: memref<512x3xbf16, #tpu.memory_space<vmem>>, %arg1: memref<9x128x512xbf16, #tpu.memory_space<vmem>>, %arg2: memref<9x3x32xbf16, #tpu.memory_space<vmem>>, %arg3: memref<1x32xf32, #tpu.memory_space<vmem>>, %arg4: memref<9x32x128xbf16, #tpu.memory_space<vmem>>, %arg5: memref<9x32x64xbf16, #tpu.memory_space<vmem>>, %arg6: memref<1x64xf32, #tpu.memory_space<vmem>>, %arg7: memref<9x8x32xbf16, #tpu.memory_space<vmem>>, %arg8: memref<9x64x128xbf16, #tpu.memory_space<vmem>>, %arg9: memref<1x128xf32, #tpu.memory_space<vmem>>, %arg10: memref<9x2x8xbf16, #tpu.memory_space<vmem>>, %arg11: memref<9x128x256xbf16, #tpu.memory_space<vmem>>, %arg12: memref<1x256xf32, #tpu.memory_space<vmem>>, %arg13: memref<9x2x2xbf16, #tpu.memory_space<vmem>>, %arg14: memref<9x256x64xbf16, #tpu.memory_space<vmem>>, %arg15: memref<1x64xf32, #tpu.memory_space<vmem>>, %arg16: memref<2x64xf32, #tpu.memory_space<vmem>>) attributes {dimension_semantics = [], scalar_prefetch = 0 : i64, scratch_operands = 0 : i64, tpu.core_type = #tpu.core_type<tc>} {
    %c0 = arith.constant 0 : index
    %c0_0 = arith.constant 0 : index
    %0 = vector.load %arg0[%c0, %c0_0] : memref<512x3xbf16, #tpu.memory_space<vmem>>, vector<512x3xbf16>
    %cst = arith.constant 0.000000e+00 : f32
    %1 = vector.broadcast %cst : f32 to vector<128x32xf32>
    %c0_1 = arith.constant 0 : index
    %c0_2 = arith.constant 0 : index
    %c0_3 = arith.constant 0 : index
    %2 = vector.load %arg1[%c0_1, %c0_2, %c0_3] : memref<9x128x512xbf16, #tpu.memory_space<vmem>>, vector<1x128x512xbf16>
    %3 = vector.shape_cast %2 : vector<1x128x512xbf16> to vector<128x512xbf16>
    %cst_4 = arith.constant dense<0.000000e+00> : vector<128x3xf32>
    %4 = tpu.matmul %3, %0, %cst_4 {dimension_numbers = #tpu.dot_dimension_numbers<[1], [0], [0], [1], [0, 0, 1, 1], [], []>} : vector<128x512xbf16>, vector<512x3xbf16>, vector<128x3xf32> -> vector<128x3xf32>
    %5 = arith.truncf %4 : vector<128x3xf32> to vector<128x3xbf16>
    %c0_5 = arith.constant 0 : index
    %c0_6 = arith.constant 0 : index
    %c0_7 = arith.constant 0 : index
    %6 = vector.load %arg2[%c0_5, %c0_6, %c0_7] : memref<9x3x32xbf16, #tpu.memory_space<vmem>>, vector<1x3x32xbf16>
    %7 = vector.shape_cast %6 : vector<1x3x32xbf16> to vector<3x32xbf16>
    %cst_8 = arith.constant dense<0.000000e+00> : vector<128x32xf32>
    %8 = tpu.matmul %5, %7, %cst_8 {dimension_numbers = #tpu.dot_dimension_numbers<[1], [0], [0], [1], [0, 0, 1, 1], [], []>} : vector<128x3xbf16>, vector<3x32xbf16>, vector<128x32xf32> -> vector<128x32xf32>
    %9 = arith.addf %1, %8 : vector<128x32xf32>
    %c1 = arith.constant 1 : index
    %c0_9 = arith.constant 0 : index
    %c0_10 = arith.constant 0 : index
    %10 = vector.load %arg1[%c1, %c0_9, %c0_10] : memref<9x128x512xbf16, #tpu.memory_space<vmem>>, vector<1x128x512xbf16>
    %11 = vector.shape_cast %10 : vector<1x128x512xbf16> to vector<128x512xbf16>
    %cst_11 = arith.constant dense<0.000000e+00> : vector<128x3xf32>
    %12 = tpu.matmul %11, %0, %cst_11 {dimension_numbers = #tpu.dot_dimension_numbers<[1], [0], [0], [1], [0, 0, 1, 1], [], []>} : vector<128x512xbf16>, vector<512x3xbf16>, vector<128x3xf32> -> vector<128x3xf32>
    %13 = arith.truncf %12 : vector<128x3xf32> to vector<128x3xbf16>
    %c1_12 = arith.constant 1 : index
    %c0_13 = arith.constant 0 : index
    %c0_14 = arith.constant 0 : index
    %14 = vector.load %arg2[%c1_12, %c0_13, %c0_14] : memref<9x3x32xbf16, #tpu.memory_space<vmem>>, vector<1x3x32xbf16>
    %15 = vector.shape_cast %14 : vector<1x3x32xbf16> to vector<3x32xbf16>
    %cst_15 = arith.constant dense<0.000000e+00> : vector<128x32xf32>
    %16 = tpu.matmul %13, %15, %cst_15 {dimension_numbers = #tpu.dot_dimension_numbers<[1], [0], [0], [1], [0, 0, 1, 1], [], []>} : vector<128x3xbf16>, vector<3x32xbf16>, vector<128x32xf32> -> vector<128x32xf32>
    %17 = arith.addf %9, %16 : vector<128x32xf32>
    %c2 = arith.constant 2 : index
    %c0_16 = arith.constant 0 : index
    %c0_17 = arith.constant 0 : index
    %18 = vector.load %arg1[%c2, %c0_16, %c0_17] : memref<9x128x512xbf16, #tpu.memory_space<vmem>>, vector<1x128x512xbf16>
    %19 = vector.shape_cast %18 : vector<1x128x512xbf16> to vector<128x512xbf16>
    %cst_18 = arith.constant dense<0.000000e+00> : vector<128x3xf32>
    %20 = tpu.matmul %19, %0, %cst_18 {dimension_numbers = #tpu.dot_dimension_numbers<[1], [0], [0], [1], [0, 0, 1, 1], [], []>} : vector<128x512xbf16>, vector<512x3xbf16>, vector<128x3xf32> -> vector<128x3xf32>
    %21 = arith.truncf %20 : vector<128x3xf32> to vector<128x3xbf16>
    %c2_19 = arith.constant 2 : index
    %c0_20 = arith.constant 0 : index
    %c0_21 = arith.constant 0 : index
    %22 = vector.load %arg2[%c2_19, %c0_20, %c0_21] : memref<9x3x32xbf16, #tpu.memory_space<vmem>>, vector<1x3x32xbf16>
    %23 = vector.shape_cast %22 : vector<1x3x32xbf16> to vector<3x32xbf16>
    %cst_22 = arith.constant dense<0.000000e+00> : vector<128x32xf32>
    %24 = tpu.matmul %21, %23, %cst_22 {dimension_numbers = #tpu.dot_dimension_numbers<[1], [0], [0], [1], [0, 0, 1, 1], [], []>} : vector<128x3xbf16>, vector<3x32xbf16>, vector<128x32xf32> -> vector<128x32xf32>
    %25 = arith.addf %17, %24 : vector<128x32xf32>
    %c3 = arith.constant 3 : index
    %c0_23 = arith.constant 0 : index
    %c0_24 = arith.constant 0 : index
    %26 = vector.load %arg1[%c3, %c0_23, %c0_24] : memref<9x128x512xbf16, #tpu.memory_space<vmem>>, vector<1x128x512xbf16>
    %27 = vector.shape_cast %26 : vector<1x128x512xbf16> to vector<128x512xbf16>
    %cst_25 = arith.constant dense<0.000000e+00> : vector<128x3xf32>
    %28 = tpu.matmul %27, %0, %cst_25 {dimension_numbers = #tpu.dot_dimension_numbers<[1], [0], [0], [1], [0, 0, 1, 1], [], []>} : vector<128x512xbf16>, vector<512x3xbf16>, vector<128x3xf32> -> vector<128x3xf32>
    %29 = arith.truncf %28 : vector<128x3xf32> to vector<128x3xbf16>
    %c3_26 = arith.constant 3 : index
    %c0_27 = arith.constant 0 : index
    %c0_28 = arith.constant 0 : index
    %30 = vector.load %arg2[%c3_26, %c0_27, %c0_28] : memref<9x3x32xbf16, #tpu.memory_space<vmem>>, vector<1x3x32xbf16>
    %31 = vector.shape_cast %30 : vector<1x3x32xbf16> to vector<3x32xbf16>
    %cst_29 = arith.constant dense<0.000000e+00> : vector<128x32xf32>
    %32 = tpu.matmul %29, %31, %cst_29 {dimension_numbers = #tpu.dot_dimension_numbers<[1], [0], [0], [1], [0, 0, 1, 1], [], []>} : vector<128x3xbf16>, vector<3x32xbf16>, vector<128x32xf32> -> vector<128x32xf32>
    %33 = arith.addf %25, %32 : vector<128x32xf32>
    %c4 = arith.constant 4 : index
    %c0_30 = arith.constant 0 : index
    %c0_31 = arith.constant 0 : index
    %34 = vector.load %arg1[%c4, %c0_30, %c0_31] : memref<9x128x512xbf16, #tpu.memory_space<vmem>>, vector<1x128x512xbf16>
    %35 = vector.shape_cast %34 : vector<1x128x512xbf16> to vector<128x512xbf16>
    %cst_32 = arith.constant dense<0.000000e+00> : vector<128x3xf32>
    %36 = tpu.matmul %35, %0, %cst_32 {dimension_numbers = #tpu.dot_dimension_numbers<[1], [0], [0], [1], [0, 0, 1, 1], [], []>} : vector<128x512xbf16>, vector<512x3xbf16>, vector<128x3xf32> -> vector<128x3xf32>
    %37 = arith.truncf %36 : vector<128x3xf32> to vector<128x3xbf16>
    %c4_33 = arith.constant 4 : index
    %c0_34 = arith.constant 0 : index
    %c0_35 = arith.constant 0 : index
    %38 = vector.load %arg2[%c4_33, %c0_34, %c0_35] : memref<9x3x32xbf16, #tpu.memory_space<vmem>>, vector<1x3x32xbf16>
    %39 = vector.shape_cast %38 : vector<1x3x32xbf16> to vector<3x32xbf16>
    %cst_36 = arith.constant dense<0.000000e+00> : vector<128x32xf32>
    %40 = tpu.matmul %37, %39, %cst_36 {dimension_numbers = #tpu.dot_dimension_numbers<[1], [0], [0], [1], [0, 0, 1, 1], [], []>} : vector<128x3xbf16>, vector<3x32xbf16>, vector<128x32xf32> -> vector<128x32xf32>
    %41 = arith.addf %33, %40 : vector<128x32xf32>
    %c5 = arith.constant 5 : index
    %c0_37 = arith.constant 0 : index
    %c0_38 = arith.constant 0 : index
    %42 = vector.load %arg1[%c5, %c0_37, %c0_38] : memref<9x128x512xbf16, #tpu.memory_space<vmem>>, vector<1x128x512xbf16>
    %43 = vector.shape_cast %42 : vector<1x128x512xbf16> to vector<128x512xbf16>
    %cst_39 = arith.constant dense<0.000000e+00> : vector<128x3xf32>
    %44 = tpu.matmul %43, %0, %cst_39 {dimension_numbers = #tpu.dot_dimension_numbers<[1], [0], [0], [1], [0, 0, 1, 1], [], []>} : vector<128x512xbf16>, vector<512x3xbf16>, vector<128x3xf32> -> vector<128x3xf32>
    %45 = arith.truncf %44 : vector<128x3xf32> to vector<128x3xbf16>
    %c5_40 = arith.constant 5 : index
    %c0_41 = arith.constant 0 : index
    %c0_42 = arith.constant 0 : index
    %46 = vector.load %arg2[%c5_40, %c0_41, %c0_42] : memref<9x3x32xbf16, #tpu.memory_space<vmem>>, vector<1x3x32xbf16>
    %47 = vector.shape_cast %46 : vector<1x3x32xbf16> to vector<3x32xbf16>
    %cst_43 = arith.constant dense<0.000000e+00> : vector<128x32xf32>
    %48 = tpu.matmul %45, %47, %cst_43 {dimension_numbers = #tpu.dot_dimension_numbers<[1], [0], [0], [1], [0, 0, 1, 1], [], []>} : vector<128x3xbf16>, vector<3x32xbf16>, vector<128x32xf32> -> vector<128x32xf32>
    %49 = arith.addf %41, %48 : vector<128x32xf32>
    %c6 = arith.constant 6 : index
    %c0_44 = arith.constant 0 : index
    %c0_45 = arith.constant 0 : index
    %50 = vector.load %arg1[%c6, %c0_44, %c0_45] : memref<9x128x512xbf16, #tpu.memory_space<vmem>>, vector<1x128x512xbf16>
    %51 = vector.shape_cast %50 : vector<1x128x512xbf16> to vector<128x512xbf16>
    %cst_46 = arith.constant dense<0.000000e+00> : vector<128x3xf32>
    %52 = tpu.matmul %51, %0, %cst_46 {dimension_numbers = #tpu.dot_dimension_numbers<[1], [0], [0], [1], [0, 0, 1, 1], [], []>} : vector<128x512xbf16>, vector<512x3xbf16>, vector<128x3xf32> -> vector<128x3xf32>
    %53 = arith.truncf %52 : vector<128x3xf32> to vector<128x3xbf16>
    %c6_47 = arith.constant 6 : index
    %c0_48 = arith.constant 0 : index
    %c0_49 = arith.constant 0 : index
    %54 = vector.load %arg2[%c6_47, %c0_48, %c0_49] : memref<9x3x32xbf16, #tpu.memory_space<vmem>>, vector<1x3x32xbf16>
    %55 = vector.shape_cast %54 : vector<1x3x32xbf16> to vector<3x32xbf16>
    %cst_50 = arith.constant dense<0.000000e+00> : vector<128x32xf32>
    %56 = tpu.matmul %53, %55, %cst_50 {dimension_numbers = #tpu.dot_dimension_numbers<[1], [0], [0], [1], [0, 0, 1, 1], [], []>} : vector<128x3xbf16>, vector<3x32xbf16>, vector<128x32xf32> -> vector<128x32xf32>
    %57 = arith.addf %49, %56 : vector<128x32xf32>
    %c7 = arith.constant 7 : index
    %c0_51 = arith.constant 0 : index
    %c0_52 = arith.constant 0 : index
    %58 = vector.load %arg1[%c7, %c0_51, %c0_52] : memref<9x128x512xbf16, #tpu.memory_space<vmem>>, vector<1x128x512xbf16>
    %59 = vector.shape_cast %58 : vector<1x128x512xbf16> to vector<128x512xbf16>
    %cst_53 = arith.constant dense<0.000000e+00> : vector<128x3xf32>
    %60 = tpu.matmul %59, %0, %cst_53 {dimension_numbers = #tpu.dot_dimension_numbers<[1], [0], [0], [1], [0, 0, 1, 1], [], []>} : vector<128x512xbf16>, vector<512x3xbf16>, vector<128x3xf32> -> vector<128x3xf32>
    %61 = arith.truncf %60 : vector<128x3xf32> to vector<128x3xbf16>
    %c7_54 = arith.constant 7 : index
    %c0_55 = arith.constant 0 : index
    %c0_56 = arith.constant 0 : index
    %62 = vector.load %arg2[%c7_54, %c0_55, %c0_56] : memref<9x3x32xbf16, #tpu.memory_space<vmem>>, vector<1x3x32xbf16>
    %63 = vector.shape_cast %62 : vector<1x3x32xbf16> to vector<3x32xbf16>
    %cst_57 = arith.constant dense<0.000000e+00> : vector<128x32xf32>
    %64 = tpu.matmul %61, %63, %cst_57 {dimension_numbers = #tpu.dot_dimension_numbers<[1], [0], [0], [1], [0, 0, 1, 1], [], []>} : vector<128x3xbf16>, vector<3x32xbf16>, vector<128x32xf32> -> vector<128x32xf32>
    %65 = arith.addf %57, %64 : vector<128x32xf32>
    %c8 = arith.constant 8 : index
    %c0_58 = arith.constant 0 : index
    %c0_59 = arith.constant 0 : index
    %66 = vector.load %arg1[%c8, %c0_58, %c0_59] : memref<9x128x512xbf16, #tpu.memory_space<vmem>>, vector<1x128x512xbf16>
    %67 = vector.shape_cast %66 : vector<1x128x512xbf16> to vector<128x512xbf16>
    %cst_60 = arith.constant dense<0.000000e+00> : vector<128x3xf32>
    %68 = tpu.matmul %67, %0, %cst_60 {dimension_numbers = #tpu.dot_dimension_numbers<[1], [0], [0], [1], [0, 0, 1, 1], [], []>} : vector<128x512xbf16>, vector<512x3xbf16>, vector<128x3xf32> -> vector<128x3xf32>
    %69 = arith.truncf %68 : vector<128x3xf32> to vector<128x3xbf16>
    %c8_61 = arith.constant 8 : index
    %c0_62 = arith.constant 0 : index
    %c0_63 = arith.constant 0 : index
    %70 = vector.load %arg2[%c8_61, %c0_62, %c0_63] : memref<9x3x32xbf16, #tpu.memory_space<vmem>>, vector<1x3x32xbf16>
    %71 = vector.shape_cast %70 : vector<1x3x32xbf16> to vector<3x32xbf16>
    %cst_64 = arith.constant dense<0.000000e+00> : vector<128x32xf32>
    %72 = tpu.matmul %69, %71, %cst_64 {dimension_numbers = #tpu.dot_dimension_numbers<[1], [0], [0], [1], [0, 0, 1, 1], [], []>} : vector<128x3xbf16>, vector<3x32xbf16>, vector<128x32xf32> -> vector<128x32xf32>
    %73 = arith.addf %65, %72 : vector<128x32xf32>
    %c0_65 = arith.constant 0 : index
    %c0_66 = arith.constant 0 : index
    %74 = vector.load %arg3[%c0_65, %c0_66] : memref<1x32xf32, #tpu.memory_space<vmem>>, vector<1x32xf32>
    %75 = vector.broadcast %74 : vector<1x32xf32> to vector<128x32xf32>
    %76 = arith.addf %73, %75 : vector<128x32xf32>
    %cst_67 = arith.constant 0.000000e+00 : f32
    %77 = vector.broadcast %cst_67 : f32 to vector<128x32xf32>
    %78 = arith.maximumf %76, %77 : vector<128x32xf32>
    %79 = arith.truncf %78 : vector<128x32xf32> to vector<128x32xbf16>
    %cst_68 = arith.constant 0.000000e+00 : f32
    %80 = vector.broadcast %cst_68 : f32 to vector<32x64xf32>
    %c0_69 = arith.constant 0 : index
    %c0_70 = arith.constant 0 : index
    %c0_71 = arith.constant 0 : index
    %81 = vector.load %arg4[%c0_69, %c0_70, %c0_71] : memref<9x32x128xbf16, #tpu.memory_space<vmem>>, vector<1x32x128xbf16>
    %82 = vector.shape_cast %81 : vector<1x32x128xbf16> to vector<32x128xbf16>
    %cst_72 = arith.constant dense<0.000000e+00> : vector<32x32xf32>
    %83 = tpu.matmul %82, %79, %cst_72 {dimension_numbers = #tpu.dot_dimension_numbers<[1], [0], [0], [1], [0, 0, 1, 1], [], []>} : vector<32x128xbf16>, vector<128x32xbf16>, vector<32x32xf32> -> vector<32x32xf32>
    %84 = arith.truncf %83 : vector<32x32xf32> to vector<32x32xbf16>
    %c0_73 = arith.constant 0 : index
    %c0_74 = arith.constant 0 : index
    %c0_75 = arith.constant 0 : index
    %85 = vector.load %arg5[%c0_73, %c0_74, %c0_75] : memref<9x32x64xbf16, #tpu.memory_space<vmem>>, vector<1x32x64xbf16>
    %86 = vector.shape_cast %85 : vector<1x32x64xbf16> to vector<32x64xbf16>
    %cst_76 = arith.constant dense<0.000000e+00> : vector<32x64xf32>
    %87 = tpu.matmul %84, %86, %cst_76 {dimension_numbers = #tpu.dot_dimension_numbers<[1], [0], [0], [1], [0, 0, 1, 1], [], []>} : vector<32x32xbf16>, vector<32x64xbf16>, vector<32x64xf32> -> vector<32x64xf32>
    %88 = arith.addf %80, %87 : vector<32x64xf32>
    %c1_77 = arith.constant 1 : index
    %c0_78 = arith.constant 0 : index
    %c0_79 = arith.constant 0 : index
    %89 = vector.load %arg4[%c1_77, %c0_78, %c0_79] : memref<9x32x128xbf16, #tpu.memory_space<vmem>>, vector<1x32x128xbf16>
    %90 = vector.shape_cast %89 : vector<1x32x128xbf16> to vector<32x128xbf16>
    %cst_80 = arith.constant dense<0.000000e+00> : vector<32x32xf32>
    %91 = tpu.matmul %90, %79, %cst_80 {dimension_numbers = #tpu.dot_dimension_numbers<[1], [0], [0], [1], [0, 0, 1, 1], [], []>} : vector<32x128xbf16>, vector<128x32xbf16>, vector<32x32xf32> -> vector<32x32xf32>
    %92 = arith.truncf %91 : vector<32x32xf32> to vector<32x32xbf16>
    %c1_81 = arith.constant 1 : index
    %c0_82 = arith.constant 0 : index
    %c0_83 = arith.constant 0 : index
    %93 = vector.load %arg5[%c1_81, %c0_82, %c0_83] : memref<9x32x64xbf16, #tpu.memory_space<vmem>>, vector<1x32x64xbf16>
    %94 = vector.shape_cast %93 : vector<1x32x64xbf16> to vector<32x64xbf16>
    %cst_84 = arith.constant dense<0.000000e+00> : vector<32x64xf32>
    %95 = tpu.matmul %92, %94, %cst_84 {dimension_numbers = #tpu.dot_dimension_numbers<[1], [0], [0], [1], [0, 0, 1, 1], [], []>} : vector<32x32xbf16>, vector<32x64xbf16>, vector<32x64xf32> -> vector<32x64xf32>
    %96 = arith.addf %88, %95 : vector<32x64xf32>
    %c2_85 = arith.constant 2 : index
    %c0_86 = arith.constant 0 : index
    %c0_87 = arith.constant 0 : index
    %97 = vector.load %arg4[%c2_85, %c0_86, %c0_87] : memref<9x32x128xbf16, #tpu.memory_space<vmem>>, vector<1x32x128xbf16>
    %98 = vector.shape_cast %97 : vector<1x32x128xbf16> to vector<32x128xbf16>
    %cst_88 = arith.constant dense<0.000000e+00> : vector<32x32xf32>
    %99 = tpu.matmul %98, %79, %cst_88 {dimension_numbers = #tpu.dot_dimension_numbers<[1], [0], [0], [1], [0, 0, 1, 1], [], []>} : vector<32x128xbf16>, vector<128x32xbf16>, vector<32x32xf32> -> vector<32x32xf32>
    %100 = arith.truncf %99 : vector<32x32xf32> to vector<32x32xbf16>
    %c2_89 = arith.constant 2 : index
    %c0_90 = arith.constant 0 : index
    %c0_91 = arith.constant 0 : index
    %101 = vector.load %arg5[%c2_89, %c0_90, %c0_91] : memref<9x32x64xbf16, #tpu.memory_space<vmem>>, vector<1x32x64xbf16>
    %102 = vector.shape_cast %101 : vector<1x32x64xbf16> to vector<32x64xbf16>
    %cst_92 = arith.constant dense<0.000000e+00> : vector<32x64xf32>
    %103 = tpu.matmul %100, %102, %cst_92 {dimension_numbers = #tpu.dot_dimension_numbers<[1], [0], [0], [1], [0, 0, 1, 1], [], []>} : vector<32x32xbf16>, vector<32x64xbf16>, vector<32x64xf32> -> vector<32x64xf32>
    %104 = arith.addf %96, %103 : vector<32x64xf32>
    %c3_93 = arith.constant 3 : index
    %c0_94 = arith.constant 0 : index
    %c0_95 = arith.constant 0 : index
    %105 = vector.load %arg4[%c3_93, %c0_94, %c0_95] : memref<9x32x128xbf16, #tpu.memory_space<vmem>>, vector<1x32x128xbf16>
    %106 = vector.shape_cast %105 : vector<1x32x128xbf16> to vector<32x128xbf16>
    %cst_96 = arith.constant dense<0.000000e+00> : vector<32x32xf32>
    %107 = tpu.matmul %106, %79, %cst_96 {dimension_numbers = #tpu.dot_dimension_numbers<[1], [0], [0], [1], [0, 0, 1, 1], [], []>} : vector<32x128xbf16>, vector<128x32xbf16>, vector<32x32xf32> -> vector<32x32xf32>
    %108 = arith.truncf %107 : vector<32x32xf32> to vector<32x32xbf16>
    %c3_97 = arith.constant 3 : index
    %c0_98 = arith.constant 0 : index
    %c0_99 = arith.constant 0 : index
    %109 = vector.load %arg5[%c3_97, %c0_98, %c0_99] : memref<9x32x64xbf16, #tpu.memory_space<vmem>>, vector<1x32x64xbf16>
    %110 = vector.shape_cast %109 : vector<1x32x64xbf16> to vector<32x64xbf16>
    %cst_100 = arith.constant dense<0.000000e+00> : vector<32x64xf32>
    %111 = tpu.matmul %108, %110, %cst_100 {dimension_numbers = #tpu.dot_dimension_numbers<[1], [0], [0], [1], [0, 0, 1, 1], [], []>} : vector<32x32xbf16>, vector<32x64xbf16>, vector<32x64xf32> -> vector<32x64xf32>
    %112 = arith.addf %104, %111 : vector<32x64xf32>
    %c4_101 = arith.constant 4 : index
    %c0_102 = arith.constant 0 : index
    %c0_103 = arith.constant 0 : index
    %113 = vector.load %arg4[%c4_101, %c0_102, %c0_103] : memref<9x32x128xbf16, #tpu.memory_space<vmem>>, vector<1x32x128xbf16>
    %114 = vector.shape_cast %113 : vector<1x32x128xbf16> to vector<32x128xbf16>
    %cst_104 = arith.constant dense<0.000000e+00> : vector<32x32xf32>
    %115 = tpu.matmul %114, %79, %cst_104 {dimension_numbers = #tpu.dot_dimension_numbers<[1], [0], [0], [1], [0, 0, 1, 1], [], []>} : vector<32x128xbf16>, vector<128x32xbf16>, vector<32x32xf32> -> vector<32x32xf32>
    %116 = arith.truncf %115 : vector<32x32xf32> to vector<32x32xbf16>
    %c4_105 = arith.constant 4 : index
    %c0_106 = arith.constant 0 : index
    %c0_107 = arith.constant 0 : index
    %117 = vector.load %arg5[%c4_105, %c0_106, %c0_107] : memref<9x32x64xbf16, #tpu.memory_space<vmem>>, vector<1x32x64xbf16>
    %118 = vector.shape_cast %117 : vector<1x32x64xbf16> to vector<32x64xbf16>
    %cst_108 = arith.constant dense<0.000000e+00> : vector<32x64xf32>
    %119 = tpu.matmul %116, %118, %cst_108 {dimension_numbers = #tpu.dot_dimension_numbers<[1], [0], [0], [1], [0, 0, 1, 1], [], []>} : vector<32x32xbf16>, vector<32x64xbf16>, vector<32x64xf32> -> vector<32x64xf32>
    %120 = arith.addf %112, %119 : vector<32x64xf32>
    %c5_109 = arith.constant 5 : index
    %c0_110 = arith.constant 0 : index
    %c0_111 = arith.constant 0 : index
    %121 = vector.load %arg4[%c5_109, %c0_110, %c0_111] : memref<9x32x128xbf16, #tpu.memory_space<vmem>>, vector<1x32x128xbf16>
    %122 = vector.shape_cast %121 : vector<1x32x128xbf16> to vector<32x128xbf16>
    %cst_112 = arith.constant dense<0.000000e+00> : vector<32x32xf32>
    %123 = tpu.matmul %122, %79, %cst_112 {dimension_numbers = #tpu.dot_dimension_numbers<[1], [0], [0], [1], [0, 0, 1, 1], [], []>} : vector<32x128xbf16>, vector<128x32xbf16>, vector<32x32xf32> -> vector<32x32xf32>
    %124 = arith.truncf %123 : vector<32x32xf32> to vector<32x32xbf16>
    %c5_113 = arith.constant 5 : index
    %c0_114 = arith.constant 0 : index
    %c0_115 = arith.constant 0 : index
    %125 = vector.load %arg5[%c5_113, %c0_114, %c0_115] : memref<9x32x64xbf16, #tpu.memory_space<vmem>>, vector<1x32x64xbf16>
    %126 = vector.shape_cast %125 : vector<1x32x64xbf16> to vector<32x64xbf16>
    %cst_116 = arith.constant dense<0.000000e+00> : vector<32x64xf32>
    %127 = tpu.matmul %124, %126, %cst_116 {dimension_numbers = #tpu.dot_dimension_numbers<[1], [0], [0], [1], [0, 0, 1, 1], [], []>} : vector<32x32xbf16>, vector<32x64xbf16>, vector<32x64xf32> -> vector<32x64xf32>
    %128 = arith.addf %120, %127 : vector<32x64xf32>
    %c6_117 = arith.constant 6 : index
    %c0_118 = arith.constant 0 : index
    %c0_119 = arith.constant 0 : index
    %129 = vector.load %arg4[%c6_117, %c0_118, %c0_119] : memref<9x32x128xbf16, #tpu.memory_space<vmem>>, vector<1x32x128xbf16>
    %130 = vector.shape_cast %129 : vector<1x32x128xbf16> to vector<32x128xbf16>
    %cst_120 = arith.constant dense<0.000000e+00> : vector<32x32xf32>
    %131 = tpu.matmul %130, %79, %cst_120 {dimension_numbers = #tpu.dot_dimension_numbers<[1], [0], [0], [1], [0, 0, 1, 1], [], []>} : vector<32x128xbf16>, vector<128x32xbf16>, vector<32x32xf32> -> vector<32x32xf32>
    %132 = arith.truncf %131 : vector<32x32xf32> to vector<32x32xbf16>
    %c6_121 = arith.constant 6 : index
    %c0_122 = arith.constant 0 : index
    %c0_123 = arith.constant 0 : index
    %133 = vector.load %arg5[%c6_121, %c0_122, %c0_123] : memref<9x32x64xbf16, #tpu.memory_space<vmem>>, vector<1x32x64xbf16>
    %134 = vector.shape_cast %133 : vector<1x32x64xbf16> to vector<32x64xbf16>
    %cst_124 = arith.constant dense<0.000000e+00> : vector<32x64xf32>
    %135 = tpu.matmul %132, %134, %cst_124 {dimension_numbers = #tpu.dot_dimension_numbers<[1], [0], [0], [1], [0, 0, 1, 1], [], []>} : vector<32x32xbf16>, vector<32x64xbf16>, vector<32x64xf32> -> vector<32x64xf32>
    %136 = arith.addf %128, %135 : vector<32x64xf32>
    %c7_125 = arith.constant 7 : index
    %c0_126 = arith.constant 0 : index
    %c0_127 = arith.constant 0 : index
    %137 = vector.load %arg4[%c7_125, %c0_126, %c0_127] : memref<9x32x128xbf16, #tpu.memory_space<vmem>>, vector<1x32x128xbf16>
    %138 = vector.shape_cast %137 : vector<1x32x128xbf16> to vector<32x128xbf16>
    %cst_128 = arith.constant dense<0.000000e+00> : vector<32x32xf32>
    %139 = tpu.matmul %138, %79, %cst_128 {dimension_numbers = #tpu.dot_dimension_numbers<[1], [0], [0], [1], [0, 0, 1, 1], [], []>} : vector<32x128xbf16>, vector<128x32xbf16>, vector<32x32xf32> -> vector<32x32xf32>
    %140 = arith.truncf %139 : vector<32x32xf32> to vector<32x32xbf16>
    %c7_129 = arith.constant 7 : index
    %c0_130 = arith.constant 0 : index
    %c0_131 = arith.constant 0 : index
    %141 = vector.load %arg5[%c7_129, %c0_130, %c0_131] : memref<9x32x64xbf16, #tpu.memory_space<vmem>>, vector<1x32x64xbf16>
    %142 = vector.shape_cast %141 : vector<1x32x64xbf16> to vector<32x64xbf16>
    %cst_132 = arith.constant dense<0.000000e+00> : vector<32x64xf32>
    %143 = tpu.matmul %140, %142, %cst_132 {dimension_numbers = #tpu.dot_dimension_numbers<[1], [0], [0], [1], [0, 0, 1, 1], [], []>} : vector<32x32xbf16>, vector<32x64xbf16>, vector<32x64xf32> -> vector<32x64xf32>
    %144 = arith.addf %136, %143 : vector<32x64xf32>
    %c8_133 = arith.constant 8 : index
    %c0_134 = arith.constant 0 : index
    %c0_135 = arith.constant 0 : index
    %145 = vector.load %arg4[%c8_133, %c0_134, %c0_135] : memref<9x32x128xbf16, #tpu.memory_space<vmem>>, vector<1x32x128xbf16>
    %146 = vector.shape_cast %145 : vector<1x32x128xbf16> to vector<32x128xbf16>
    %cst_136 = arith.constant dense<0.000000e+00> : vector<32x32xf32>
    %147 = tpu.matmul %146, %79, %cst_136 {dimension_numbers = #tpu.dot_dimension_numbers<[1], [0], [0], [1], [0, 0, 1, 1], [], []>} : vector<32x128xbf16>, vector<128x32xbf16>, vector<32x32xf32> -> vector<32x32xf32>
    %148 = arith.truncf %147 : vector<32x32xf32> to vector<32x32xbf16>
    %c8_137 = arith.constant 8 : index
    %c0_138 = arith.constant 0 : index
    %c0_139 = arith.constant 0 : index
    %149 = vector.load %arg5[%c8_137, %c0_138, %c0_139] : memref<9x32x64xbf16, #tpu.memory_space<vmem>>, vector<1x32x64xbf16>
    %150 = vector.shape_cast %149 : vector<1x32x64xbf16> to vector<32x64xbf16>
    %cst_140 = arith.constant dense<0.000000e+00> : vector<32x64xf32>
    %151 = tpu.matmul %148, %150, %cst_140 {dimension_numbers = #tpu.dot_dimension_numbers<[1], [0], [0], [1], [0, 0, 1, 1], [], []>} : vector<32x32xbf16>, vector<32x64xbf16>, vector<32x64xf32> -> vector<32x64xf32>
    %152 = arith.addf %144, %151 : vector<32x64xf32>
    %c0_141 = arith.constant 0 : index
    %c0_142 = arith.constant 0 : index
    %153 = vector.load %arg6[%c0_141, %c0_142] : memref<1x64xf32, #tpu.memory_space<vmem>>, vector<1x64xf32>
    %154 = vector.broadcast %153 : vector<1x64xf32> to vector<32x64xf32>
    %155 = arith.addf %152, %154 : vector<32x64xf32>
    %cst_143 = arith.constant 0.000000e+00 : f32
    %156 = vector.broadcast %cst_143 : f32 to vector<32x64xf32>
    %157 = arith.maximumf %155, %156 : vector<32x64xf32>
    %158 = arith.truncf %157 : vector<32x64xf32> to vector<32x64xbf16>
    %cst_144 = arith.constant 0.000000e+00 : f32
    %159 = vector.broadcast %cst_144 : f32 to vector<8x128xf32>
    %c0_145 = arith.constant 0 : index
    %c0_146 = arith.constant 0 : index
    %c0_147 = arith.constant 0 : index
    %160 = vector.load %arg7[%c0_145, %c0_146, %c0_147] : memref<9x8x32xbf16, #tpu.memory_space<vmem>>, vector<1x8x32xbf16>
    %161 = vector.shape_cast %160 : vector<1x8x32xbf16> to vector<8x32xbf16>
    %cst_148 = arith.constant dense<0.000000e+00> : vector<8x64xf32>
    %162 = tpu.matmul %161, %158, %cst_148 {dimension_numbers = #tpu.dot_dimension_numbers<[1], [0], [0], [1], [0, 0, 1, 1], [], []>} : vector<8x32xbf16>, vector<32x64xbf16>, vector<8x64xf32> -> vector<8x64xf32>
    %163 = arith.truncf %162 : vector<8x64xf32> to vector<8x64xbf16>
    %c0_149 = arith.constant 0 : index
    %c0_150 = arith.constant 0 : index
    %c0_151 = arith.constant 0 : index
    %164 = vector.load %arg8[%c0_149, %c0_150, %c0_151] : memref<9x64x128xbf16, #tpu.memory_space<vmem>>, vector<1x64x128xbf16>
    %165 = vector.shape_cast %164 : vector<1x64x128xbf16> to vector<64x128xbf16>
    %cst_152 = arith.constant dense<0.000000e+00> : vector<8x128xf32>
    %166 = tpu.matmul %163, %165, %cst_152 {dimension_numbers = #tpu.dot_dimension_numbers<[1], [0], [0], [1], [0, 0, 1, 1], [], []>} : vector<8x64xbf16>, vector<64x128xbf16>, vector<8x128xf32> -> vector<8x128xf32>
    %167 = arith.addf %159, %166 : vector<8x128xf32>
    %c1_153 = arith.constant 1 : index
    %c0_154 = arith.constant 0 : index
    %c0_155 = arith.constant 0 : index
    %168 = vector.load %arg7[%c1_153, %c0_154, %c0_155] : memref<9x8x32xbf16, #tpu.memory_space<vmem>>, vector<1x8x32xbf16>
    %169 = vector.shape_cast %168 : vector<1x8x32xbf16> to vector<8x32xbf16>
    %cst_156 = arith.constant dense<0.000000e+00> : vector<8x64xf32>
    %170 = tpu.matmul %169, %158, %cst_156 {dimension_numbers = #tpu.dot_dimension_numbers<[1], [0], [0], [1], [0, 0, 1, 1], [], []>} : vector<8x32xbf16>, vector<32x64xbf16>, vector<8x64xf32> -> vector<8x64xf32>
    %171 = arith.truncf %170 : vector<8x64xf32> to vector<8x64xbf16>
    %c1_157 = arith.constant 1 : index
    %c0_158 = arith.constant 0 : index
    %c0_159 = arith.constant 0 : index
    %172 = vector.load %arg8[%c1_157, %c0_158, %c0_159] : memref<9x64x128xbf16, #tpu.memory_space<vmem>>, vector<1x64x128xbf16>
    %173 = vector.shape_cast %172 : vector<1x64x128xbf16> to vector<64x128xbf16>
    %cst_160 = arith.constant dense<0.000000e+00> : vector<8x128xf32>
    %174 = tpu.matmul %171, %173, %cst_160 {dimension_numbers = #tpu.dot_dimension_numbers<[1], [0], [0], [1], [0, 0, 1, 1], [], []>} : vector<8x64xbf16>, vector<64x128xbf16>, vector<8x128xf32> -> vector<8x128xf32>
    %175 = arith.addf %167, %174 : vector<8x128xf32>
    %c2_161 = arith.constant 2 : index
    %c0_162 = arith.constant 0 : index
    %c0_163 = arith.constant 0 : index
    %176 = vector.load %arg7[%c2_161, %c0_162, %c0_163] : memref<9x8x32xbf16, #tpu.memory_space<vmem>>, vector<1x8x32xbf16>
    %177 = vector.shape_cast %176 : vector<1x8x32xbf16> to vector<8x32xbf16>
    %cst_164 = arith.constant dense<0.000000e+00> : vector<8x64xf32>
    %178 = tpu.matmul %177, %158, %cst_164 {dimension_numbers = #tpu.dot_dimension_numbers<[1], [0], [0], [1], [0, 0, 1, 1], [], []>} : vector<8x32xbf16>, vector<32x64xbf16>, vector<8x64xf32> -> vector<8x64xf32>
    %179 = arith.truncf %178 : vector<8x64xf32> to vector<8x64xbf16>
    %c2_165 = arith.constant 2 : index
    %c0_166 = arith.constant 0 : index
    %c0_167 = arith.constant 0 : index
    %180 = vector.load %arg8[%c2_165, %c0_166, %c0_167] : memref<9x64x128xbf16, #tpu.memory_space<vmem>>, vector<1x64x128xbf16>
    %181 = vector.shape_cast %180 : vector<1x64x128xbf16> to vector<64x128xbf16>
    %cst_168 = arith.constant dense<0.000000e+00> : vector<8x128xf32>
    %182 = tpu.matmul %179, %181, %cst_168 {dimension_numbers = #tpu.dot_dimension_numbers<[1], [0], [0], [1], [0, 0, 1, 1], [], []>} : vector<8x64xbf16>, vector<64x128xbf16>, vector<8x128xf32> -> vector<8x128xf32>
    %183 = arith.addf %175, %182 : vector<8x128xf32>
    %c3_169 = arith.constant 3 : index
    %c0_170 = arith.constant 0 : index
    %c0_171 = arith.constant 0 : index
    %184 = vector.load %arg7[%c3_169, %c0_170, %c0_171] : memref<9x8x32xbf16, #tpu.memory_space<vmem>>, vector<1x8x32xbf16>
    %185 = vector.shape_cast %184 : vector<1x8x32xbf16> to vector<8x32xbf16>
    %cst_172 = arith.constant dense<0.000000e+00> : vector<8x64xf32>
    %186 = tpu.matmul %185, %158, %cst_172 {dimension_numbers = #tpu.dot_dimension_numbers<[1], [0], [0], [1], [0, 0, 1, 1], [], []>} : vector<8x32xbf16>, vector<32x64xbf16>, vector<8x64xf32> -> vector<8x64xf32>
    %187 = arith.truncf %186 : vector<8x64xf32> to vector<8x64xbf16>
    %c3_173 = arith.constant 3 : index
    %c0_174 = arith.constant 0 : index
    %c0_175 = arith.constant 0 : index
    %188 = vector.load %arg8[%c3_173, %c0_174, %c0_175] : memref<9x64x128xbf16, #tpu.memory_space<vmem>>, vector<1x64x128xbf16>
    %189 = vector.shape_cast %188 : vector<1x64x128xbf16> to vector<64x128xbf16>
    %cst_176 = arith.constant dense<0.000000e+00> : vector<8x128xf32>
    %190 = tpu.matmul %187, %189, %cst_176 {dimension_numbers = #tpu.dot_dimension_numbers<[1], [0], [0], [1], [0, 0, 1, 1], [], []>} : vector<8x64xbf16>, vector<64x128xbf16>, vector<8x128xf32> -> vector<8x128xf32>
    %191 = arith.addf %183, %190 : vector<8x128xf32>
    %c4_177 = arith.constant 4 : index
    %c0_178 = arith.constant 0 : index
    %c0_179 = arith.constant 0 : index
    %192 = vector.load %arg7[%c4_177, %c0_178, %c0_179] : memref<9x8x32xbf16, #tpu.memory_space<vmem>>, vector<1x8x32xbf16>
    %193 = vector.shape_cast %192 : vector<1x8x32xbf16> to vector<8x32xbf16>
    %cst_180 = arith.constant dense<0.000000e+00> : vector<8x64xf32>
    %194 = tpu.matmul %193, %158, %cst_180 {dimension_numbers = #tpu.dot_dimension_numbers<[1], [0], [0], [1], [0, 0, 1, 1], [], []>} : vector<8x32xbf16>, vector<32x64xbf16>, vector<8x64xf32> -> vector<8x64xf32>
    %195 = arith.truncf %194 : vector<8x64xf32> to vector<8x64xbf16>
    %c4_181 = arith.constant 4 : index
    %c0_182 = arith.constant 0 : index
    %c0_183 = arith.constant 0 : index
    %196 = vector.load %arg8[%c4_181, %c0_182, %c0_183] : memref<9x64x128xbf16, #tpu.memory_space<vmem>>, vector<1x64x128xbf16>
    %197 = vector.shape_cast %196 : vector<1x64x128xbf16> to vector<64x128xbf16>
    %cst_184 = arith.constant dense<0.000000e+00> : vector<8x128xf32>
    %198 = tpu.matmul %195, %197, %cst_184 {dimension_numbers = #tpu.dot_dimension_numbers<[1], [0], [0], [1], [0, 0, 1, 1], [], []>} : vector<8x64xbf16>, vector<64x128xbf16>, vector<8x128xf32> -> vector<8x128xf32>
    %199 = arith.addf %191, %198 : vector<8x128xf32>
    %c5_185 = arith.constant 5 : index
    %c0_186 = arith.constant 0 : index
    %c0_187 = arith.constant 0 : index
    %200 = vector.load %arg7[%c5_185, %c0_186, %c0_187] : memref<9x8x32xbf16, #tpu.memory_space<vmem>>, vector<1x8x32xbf16>
    %201 = vector.shape_cast %200 : vector<1x8x32xbf16> to vector<8x32xbf16>
    %cst_188 = arith.constant dense<0.000000e+00> : vector<8x64xf32>
    %202 = tpu.matmul %201, %158, %cst_188 {dimension_numbers = #tpu.dot_dimension_numbers<[1], [0], [0], [1], [0, 0, 1, 1], [], []>} : vector<8x32xbf16>, vector<32x64xbf16>, vector<8x64xf32> -> vector<8x64xf32>
    %203 = arith.truncf %202 : vector<8x64xf32> to vector<8x64xbf16>
    %c5_189 = arith.constant 5 : index
    %c0_190 = arith.constant 0 : index
    %c0_191 = arith.constant 0 : index
    %204 = vector.load %arg8[%c5_189, %c0_190, %c0_191] : memref<9x64x128xbf16, #tpu.memory_space<vmem>>, vector<1x64x128xbf16>
    %205 = vector.shape_cast %204 : vector<1x64x128xbf16> to vector<64x128xbf16>
    %cst_192 = arith.constant dense<0.000000e+00> : vector<8x128xf32>
    %206 = tpu.matmul %203, %205, %cst_192 {dimension_numbers = #tpu.dot_dimension_numbers<[1], [0], [0], [1], [0, 0, 1, 1], [], []>} : vector<8x64xbf16>, vector<64x128xbf16>, vector<8x128xf32> -> vector<8x128xf32>
    %207 = arith.addf %199, %206 : vector<8x128xf32>
    %c6_193 = arith.constant 6 : index
    %c0_194 = arith.constant 0 : index
    %c0_195 = arith.constant 0 : index
    %208 = vector.load %arg7[%c6_193, %c0_194, %c0_195] : memref<9x8x32xbf16, #tpu.memory_space<vmem>>, vector<1x8x32xbf16>
    %209 = vector.shape_cast %208 : vector<1x8x32xbf16> to vector<8x32xbf16>
    %cst_196 = arith.constant dense<0.000000e+00> : vector<8x64xf32>
    %210 = tpu.matmul %209, %158, %cst_196 {dimension_numbers = #tpu.dot_dimension_numbers<[1], [0], [0], [1], [0, 0, 1, 1], [], []>} : vector<8x32xbf16>, vector<32x64xbf16>, vector<8x64xf32> -> vector<8x64xf32>
    %211 = arith.truncf %210 : vector<8x64xf32> to vector<8x64xbf16>
    %c6_197 = arith.constant 6 : index
    %c0_198 = arith.constant 0 : index
    %c0_199 = arith.constant 0 : index
    %212 = vector.load %arg8[%c6_197, %c0_198, %c0_199] : memref<9x64x128xbf16, #tpu.memory_space<vmem>>, vector<1x64x128xbf16>
    %213 = vector.shape_cast %212 : vector<1x64x128xbf16> to vector<64x128xbf16>
    %cst_200 = arith.constant dense<0.000000e+00> : vector<8x128xf32>
    %214 = tpu.matmul %211, %213, %cst_200 {dimension_numbers = #tpu.dot_dimension_numbers<[1], [0], [0], [1], [0, 0, 1, 1], [], []>} : vector<8x64xbf16>, vector<64x128xbf16>, vector<8x128xf32> -> vector<8x128xf32>
    %215 = arith.addf %207, %214 : vector<8x128xf32>
    %c7_201 = arith.constant 7 : index
    %c0_202 = arith.constant 0 : index
    %c0_203 = arith.constant 0 : index
    %216 = vector.load %arg7[%c7_201, %c0_202, %c0_203] : memref<9x8x32xbf16, #tpu.memory_space<vmem>>, vector<1x8x32xbf16>
    %217 = vector.shape_cast %216 : vector<1x8x32xbf16> to vector<8x32xbf16>
    %cst_204 = arith.constant dense<0.000000e+00> : vector<8x64xf32>
    %218 = tpu.matmul %217, %158, %cst_204 {dimension_numbers = #tpu.dot_dimension_numbers<[1], [0], [0], [1], [0, 0, 1, 1], [], []>} : vector<8x32xbf16>, vector<32x64xbf16>, vector<8x64xf32> -> vector<8x64xf32>
    %219 = arith.truncf %218 : vector<8x64xf32> to vector<8x64xbf16>
    %c7_205 = arith.constant 7 : index
    %c0_206 = arith.constant 0 : index
    %c0_207 = arith.constant 0 : index
    %220 = vector.load %arg8[%c7_205, %c0_206, %c0_207] : memref<9x64x128xbf16, #tpu.memory_space<vmem>>, vector<1x64x128xbf16>
    %221 = vector.shape_cast %220 : vector<1x64x128xbf16> to vector<64x128xbf16>
    %cst_208 = arith.constant dense<0.000000e+00> : vector<8x128xf32>
    %222 = tpu.matmul %219, %221, %cst_208 {dimension_numbers = #tpu.dot_dimension_numbers<[1], [0], [0], [1], [0, 0, 1, 1], [], []>} : vector<8x64xbf16>, vector<64x128xbf16>, vector<8x128xf32> -> vector<8x128xf32>
    %223 = arith.addf %215, %222 : vector<8x128xf32>
    %c8_209 = arith.constant 8 : index
    %c0_210 = arith.constant 0 : index
    %c0_211 = arith.constant 0 : index
    %224 = vector.load %arg7[%c8_209, %c0_210, %c0_211] : memref<9x8x32xbf16, #tpu.memory_space<vmem>>, vector<1x8x32xbf16>
    %225 = vector.shape_cast %224 : vector<1x8x32xbf16> to vector<8x32xbf16>
    %cst_212 = arith.constant dense<0.000000e+00> : vector<8x64xf32>
    %226 = tpu.matmul %225, %158, %cst_212 {dimension_numbers = #tpu.dot_dimension_numbers<[1], [0], [0], [1], [0, 0, 1, 1], [], []>} : vector<8x32xbf16>, vector<32x64xbf16>, vector<8x64xf32> -> vector<8x64xf32>
    %227 = arith.truncf %226 : vector<8x64xf32> to vector<8x64xbf16>
    %c8_213 = arith.constant 8 : index
    %c0_214 = arith.constant 0 : index
    %c0_215 = arith.constant 0 : index
    %228 = vector.load %arg8[%c8_213, %c0_214, %c0_215] : memref<9x64x128xbf16, #tpu.memory_space<vmem>>, vector<1x64x128xbf16>
    %229 = vector.shape_cast %228 : vector<1x64x128xbf16> to vector<64x128xbf16>
    %cst_216 = arith.constant dense<0.000000e+00> : vector<8x128xf32>
    %230 = tpu.matmul %227, %229, %cst_216 {dimension_numbers = #tpu.dot_dimension_numbers<[1], [0], [0], [1], [0, 0, 1, 1], [], []>} : vector<8x64xbf16>, vector<64x128xbf16>, vector<8x128xf32> -> vector<8x128xf32>
    %231 = arith.addf %223, %230 : vector<8x128xf32>
    %c0_217 = arith.constant 0 : index
    %c0_218 = arith.constant 0 : index
    %232 = vector.load %arg9[%c0_217, %c0_218] : memref<1x128xf32, #tpu.memory_space<vmem>>, vector<1x128xf32>
    %233 = vector.broadcast %232 : vector<1x128xf32> to vector<8x128xf32>
    %234 = arith.addf %231, %233 : vector<8x128xf32>
    %cst_219 = arith.constant 0.000000e+00 : f32
    %235 = vector.broadcast %cst_219 : f32 to vector<8x128xf32>
    %236 = arith.maximumf %234, %235 : vector<8x128xf32>
    %237 = arith.truncf %236 : vector<8x128xf32> to vector<8x128xbf16>
    %cst_220 = arith.constant 0.000000e+00 : f32
    %238 = vector.broadcast %cst_220 : f32 to vector<2x256xf32>
    %c0_221 = arith.constant 0 : index
    %c0_222 = arith.constant 0 : index
    %c0_223 = arith.constant 0 : index
    %239 = vector.load %arg10[%c0_221, %c0_222, %c0_223] : memref<9x2x8xbf16, #tpu.memory_space<vmem>>, vector<1x2x8xbf16>
    %240 = vector.shape_cast %239 : vector<1x2x8xbf16> to vector<2x8xbf16>
    %cst_224 = arith.constant dense<0.000000e+00> : vector<2x128xf32>
    %241 = tpu.matmul %240, %237, %cst_224 {dimension_numbers = #tpu.dot_dimension_numbers<[1], [0], [0], [1], [0, 0, 1, 1], [], []>} : vector<2x8xbf16>, vector<8x128xbf16>, vector<2x128xf32> -> vector<2x128xf32>
    %242 = arith.truncf %241 : vector<2x128xf32> to vector<2x128xbf16>
    %c0_225 = arith.constant 0 : index
    %c0_226 = arith.constant 0 : index
    %c0_227 = arith.constant 0 : index
    %243 = vector.load %arg11[%c0_225, %c0_226, %c0_227] : memref<9x128x256xbf16, #tpu.memory_space<vmem>>, vector<1x128x256xbf16>
    %244 = vector.shape_cast %243 : vector<1x128x256xbf16> to vector<128x256xbf16>
    %cst_228 = arith.constant dense<0.000000e+00> : vector<2x256xf32>
    %245 = tpu.matmul %242, %244, %cst_228 {dimension_numbers = #tpu.dot_dimension_numbers<[1], [0], [0], [1], [0, 0, 1, 1], [], []>} : vector<2x128xbf16>, vector<128x256xbf16>, vector<2x256xf32> -> vector<2x256xf32>
    %246 = arith.addf %238, %245 : vector<2x256xf32>
    %c1_229 = arith.constant 1 : index
    %c0_230 = arith.constant 0 : index
    %c0_231 = arith.constant 0 : index
    %247 = vector.load %arg10[%c1_229, %c0_230, %c0_231] : memref<9x2x8xbf16, #tpu.memory_space<vmem>>, vector<1x2x8xbf16>
    %248 = vector.shape_cast %247 : vector<1x2x8xbf16> to vector<2x8xbf16>
    %cst_232 = arith.constant dense<0.000000e+00> : vector<2x128xf32>
    %249 = tpu.matmul %248, %237, %cst_232 {dimension_numbers = #tpu.dot_dimension_numbers<[1], [0], [0], [1], [0, 0, 1, 1], [], []>} : vector<2x8xbf16>, vector<8x128xbf16>, vector<2x128xf32> -> vector<2x128xf32>
    %250 = arith.truncf %249 : vector<2x128xf32> to vector<2x128xbf16>
    %c1_233 = arith.constant 1 : index
    %c0_234 = arith.constant 0 : index
    %c0_235 = arith.constant 0 : index
    %251 = vector.load %arg11[%c1_233, %c0_234, %c0_235] : memref<9x128x256xbf16, #tpu.memory_space<vmem>>, vector<1x128x256xbf16>
    %252 = vector.shape_cast %251 : vector<1x128x256xbf16> to vector<128x256xbf16>
    %cst_236 = arith.constant dense<0.000000e+00> : vector<2x256xf32>
    %253 = tpu.matmul %250, %252, %cst_236 {dimension_numbers = #tpu.dot_dimension_numbers<[1], [0], [0], [1], [0, 0, 1, 1], [], []>} : vector<2x128xbf16>, vector<128x256xbf16>, vector<2x256xf32> -> vector<2x256xf32>
    %254 = arith.addf %246, %253 : vector<2x256xf32>
    %c2_237 = arith.constant 2 : index
    %c0_238 = arith.constant 0 : index
    %c0_239 = arith.constant 0 : index
    %255 = vector.load %arg10[%c2_237, %c0_238, %c0_239] : memref<9x2x8xbf16, #tpu.memory_space<vmem>>, vector<1x2x8xbf16>
    %256 = vector.shape_cast %255 : vector<1x2x8xbf16> to vector<2x8xbf16>
    %cst_240 = arith.constant dense<0.000000e+00> : vector<2x128xf32>
    %257 = tpu.matmul %256, %237, %cst_240 {dimension_numbers = #tpu.dot_dimension_numbers<[1], [0], [0], [1], [0, 0, 1, 1], [], []>} : vector<2x8xbf16>, vector<8x128xbf16>, vector<2x128xf32> -> vector<2x128xf32>
    %258 = arith.truncf %257 : vector<2x128xf32> to vector<2x128xbf16>
    %c2_241 = arith.constant 2 : index
    %c0_242 = arith.constant 0 : index
    %c0_243 = arith.constant 0 : index
    %259 = vector.load %arg11[%c2_241, %c0_242, %c0_243] : memref<9x128x256xbf16, #tpu.memory_space<vmem>>, vector<1x128x256xbf16>
    %260 = vector.shape_cast %259 : vector<1x128x256xbf16> to vector<128x256xbf16>
    %cst_244 = arith.constant dense<0.000000e+00> : vector<2x256xf32>
    %261 = tpu.matmul %258, %260, %cst_244 {dimension_numbers = #tpu.dot_dimension_numbers<[1], [0], [0], [1], [0, 0, 1, 1], [], []>} : vector<2x128xbf16>, vector<128x256xbf16>, vector<2x256xf32> -> vector<2x256xf32>
    %262 = arith.addf %254, %261 : vector<2x256xf32>
    %c3_245 = arith.constant 3 : index
    %c0_246 = arith.constant 0 : index
    %c0_247 = arith.constant 0 : index
    %263 = vector.load %arg10[%c3_245, %c0_246, %c0_247] : memref<9x2x8xbf16, #tpu.memory_space<vmem>>, vector<1x2x8xbf16>
    %264 = vector.shape_cast %263 : vector<1x2x8xbf16> to vector<2x8xbf16>
    %cst_248 = arith.constant dense<0.000000e+00> : vector<2x128xf32>
    %265 = tpu.matmul %264, %237, %cst_248 {dimension_numbers = #tpu.dot_dimension_numbers<[1], [0], [0], [1], [0, 0, 1, 1], [], []>} : vector<2x8xbf16>, vector<8x128xbf16>, vector<2x128xf32> -> vector<2x128xf32>
    %266 = arith.truncf %265 : vector<2x128xf32> to vector<2x128xbf16>
    %c3_249 = arith.constant 3 : index
    %c0_250 = arith.constant 0 : index
    %c0_251 = arith.constant 0 : index
    %267 = vector.load %arg11[%c3_249, %c0_250, %c0_251] : memref<9x128x256xbf16, #tpu.memory_space<vmem>>, vector<1x128x256xbf16>
    %268 = vector.shape_cast %267 : vector<1x128x256xbf16> to vector<128x256xbf16>
    %cst_252 = arith.constant dense<0.000000e+00> : vector<2x256xf32>
    %269 = tpu.matmul %266, %268, %cst_252 {dimension_numbers = #tpu.dot_dimension_numbers<[1], [0], [0], [1], [0, 0, 1, 1], [], []>} : vector<2x128xbf16>, vector<128x256xbf16>, vector<2x256xf32> -> vector<2x256xf32>
    %270 = arith.addf %262, %269 : vector<2x256xf32>
    %c4_253 = arith.constant 4 : index
    %c0_254 = arith.constant 0 : index
    %c0_255 = arith.constant 0 : index
    %271 = vector.load %arg10[%c4_253, %c0_254, %c0_255] : memref<9x2x8xbf16, #tpu.memory_space<vmem>>, vector<1x2x8xbf16>
    %272 = vector.shape_cast %271 : vector<1x2x8xbf16> to vector<2x8xbf16>
    %cst_256 = arith.constant dense<0.000000e+00> : vector<2x128xf32>
    %273 = tpu.matmul %272, %237, %cst_256 {dimension_numbers = #tpu.dot_dimension_numbers<[1], [0], [0], [1], [0, 0, 1, 1], [], []>} : vector<2x8xbf16>, vector<8x128xbf16>, vector<2x128xf32> -> vector<2x128xf32>
    %274 = arith.truncf %273 : vector<2x128xf32> to vector<2x128xbf16>
    %c4_257 = arith.constant 4 : index
    %c0_258 = arith.constant 0 : index
    %c0_259 = arith.constant 0 : index
    %275 = vector.load %arg11[%c4_257, %c0_258, %c0_259] : memref<9x128x256xbf16, #tpu.memory_space<vmem>>, vector<1x128x256xbf16>
    %276 = vector.shape_cast %275 : vector<1x128x256xbf16> to vector<128x256xbf16>
    %cst_260 = arith.constant dense<0.000000e+00> : vector<2x256xf32>
    %277 = tpu.matmul %274, %276, %cst_260 {dimension_numbers = #tpu.dot_dimension_numbers<[1], [0], [0], [1], [0, 0, 1, 1], [], []>} : vector<2x128xbf16>, vector<128x256xbf16>, vector<2x256xf32> -> vector<2x256xf32>
    %278 = arith.addf %270, %277 : vector<2x256xf32>
    %c5_261 = arith.constant 5 : index
    %c0_262 = arith.constant 0 : index
    %c0_263 = arith.constant 0 : index
    %279 = vector.load %arg10[%c5_261, %c0_262, %c0_263] : memref<9x2x8xbf16, #tpu.memory_space<vmem>>, vector<1x2x8xbf16>
    %280 = vector.shape_cast %279 : vector<1x2x8xbf16> to vector<2x8xbf16>
    %cst_264 = arith.constant dense<0.000000e+00> : vector<2x128xf32>
    %281 = tpu.matmul %280, %237, %cst_264 {dimension_numbers = #tpu.dot_dimension_numbers<[1], [0], [0], [1], [0, 0, 1, 1], [], []>} : vector<2x8xbf16>, vector<8x128xbf16>, vector<2x128xf32> -> vector<2x128xf32>
    %282 = arith.truncf %281 : vector<2x128xf32> to vector<2x128xbf16>
    %c5_265 = arith.constant 5 : index
    %c0_266 = arith.constant 0 : index
    %c0_267 = arith.constant 0 : index
    %283 = vector.load %arg11[%c5_265, %c0_266, %c0_267] : memref<9x128x256xbf16, #tpu.memory_space<vmem>>, vector<1x128x256xbf16>
    %284 = vector.shape_cast %283 : vector<1x128x256xbf16> to vector<128x256xbf16>
    %cst_268 = arith.constant dense<0.000000e+00> : vector<2x256xf32>
    %285 = tpu.matmul %282, %284, %cst_268 {dimension_numbers = #tpu.dot_dimension_numbers<[1], [0], [0], [1], [0, 0, 1, 1], [], []>} : vector<2x128xbf16>, vector<128x256xbf16>, vector<2x256xf32> -> vector<2x256xf32>
    %286 = arith.addf %278, %285 : vector<2x256xf32>
    %c6_269 = arith.constant 6 : index
    %c0_270 = arith.constant 0 : index
    %c0_271 = arith.constant 0 : index
    %287 = vector.load %arg10[%c6_269, %c0_270, %c0_271] : memref<9x2x8xbf16, #tpu.memory_space<vmem>>, vector<1x2x8xbf16>
    %288 = vector.shape_cast %287 : vector<1x2x8xbf16> to vector<2x8xbf16>
    %cst_272 = arith.constant dense<0.000000e+00> : vector<2x128xf32>
    %289 = tpu.matmul %288, %237, %cst_272 {dimension_numbers = #tpu.dot_dimension_numbers<[1], [0], [0], [1], [0, 0, 1, 1], [], []>} : vector<2x8xbf16>, vector<8x128xbf16>, vector<2x128xf32> -> vector<2x128xf32>
    %290 = arith.truncf %289 : vector<2x128xf32> to vector<2x128xbf16>
    %c6_273 = arith.constant 6 : index
    %c0_274 = arith.constant 0 : index
    %c0_275 = arith.constant 0 : index
    %291 = vector.load %arg11[%c6_273, %c0_274, %c0_275] : memref<9x128x256xbf16, #tpu.memory_space<vmem>>, vector<1x128x256xbf16>
    %292 = vector.shape_cast %291 : vector<1x128x256xbf16> to vector<128x256xbf16>
    %cst_276 = arith.constant dense<0.000000e+00> : vector<2x256xf32>
    %293 = tpu.matmul %290, %292, %cst_276 {dimension_numbers = #tpu.dot_dimension_numbers<[1], [0], [0], [1], [0, 0, 1, 1], [], []>} : vector<2x128xbf16>, vector<128x256xbf16>, vector<2x256xf32> -> vector<2x256xf32>
    %294 = arith.addf %286, %293 : vector<2x256xf32>
    %c7_277 = arith.constant 7 : index
    %c0_278 = arith.constant 0 : index
    %c0_279 = arith.constant 0 : index
    %295 = vector.load %arg10[%c7_277, %c0_278, %c0_279] : memref<9x2x8xbf16, #tpu.memory_space<vmem>>, vector<1x2x8xbf16>
    %296 = vector.shape_cast %295 : vector<1x2x8xbf16> to vector<2x8xbf16>
    %cst_280 = arith.constant dense<0.000000e+00> : vector<2x128xf32>
    %297 = tpu.matmul %296, %237, %cst_280 {dimension_numbers = #tpu.dot_dimension_numbers<[1], [0], [0], [1], [0, 0, 1, 1], [], []>} : vector<2x8xbf16>, vector<8x128xbf16>, vector<2x128xf32> -> vector<2x128xf32>
    %298 = arith.truncf %297 : vector<2x128xf32> to vector<2x128xbf16>
    %c7_281 = arith.constant 7 : index
    %c0_282 = arith.constant 0 : index
    %c0_283 = arith.constant 0 : index
    %299 = vector.load %arg11[%c7_281, %c0_282, %c0_283] : memref<9x128x256xbf16, #tpu.memory_space<vmem>>, vector<1x128x256xbf16>
    %300 = vector.shape_cast %299 : vector<1x128x256xbf16> to vector<128x256xbf16>
    %cst_284 = arith.constant dense<0.000000e+00> : vector<2x256xf32>
    %301 = tpu.matmul %298, %300, %cst_284 {dimension_numbers = #tpu.dot_dimension_numbers<[1], [0], [0], [1], [0, 0, 1, 1], [], []>} : vector<2x128xbf16>, vector<128x256xbf16>, vector<2x256xf32> -> vector<2x256xf32>
    %302 = arith.addf %294, %301 : vector<2x256xf32>
    %c8_285 = arith.constant 8 : index
    %c0_286 = arith.constant 0 : index
    %c0_287 = arith.constant 0 : index
    %303 = vector.load %arg10[%c8_285, %c0_286, %c0_287] : memref<9x2x8xbf16, #tpu.memory_space<vmem>>, vector<1x2x8xbf16>
    %304 = vector.shape_cast %303 : vector<1x2x8xbf16> to vector<2x8xbf16>
    %cst_288 = arith.constant dense<0.000000e+00> : vector<2x128xf32>
    %305 = tpu.matmul %304, %237, %cst_288 {dimension_numbers = #tpu.dot_dimension_numbers<[1], [0], [0], [1], [0, 0, 1, 1], [], []>} : vector<2x8xbf16>, vector<8x128xbf16>, vector<2x128xf32> -> vector<2x128xf32>
    %306 = arith.truncf %305 : vector<2x128xf32> to vector<2x128xbf16>
    %c8_289 = arith.constant 8 : index
    %c0_290 = arith.constant 0 : index
    %c0_291 = arith.constant 0 : index
    %307 = vector.load %arg11[%c8_289, %c0_290, %c0_291] : memref<9x128x256xbf16, #tpu.memory_space<vmem>>, vector<1x128x256xbf16>
    %308 = vector.shape_cast %307 : vector<1x128x256xbf16> to vector<128x256xbf16>
    %cst_292 = arith.constant dense<0.000000e+00> : vector<2x256xf32>
    %309 = tpu.matmul %306, %308, %cst_292 {dimension_numbers = #tpu.dot_dimension_numbers<[1], [0], [0], [1], [0, 0, 1, 1], [], []>} : vector<2x128xbf16>, vector<128x256xbf16>, vector<2x256xf32> -> vector<2x256xf32>
    %310 = arith.addf %302, %309 : vector<2x256xf32>
    %c0_293 = arith.constant 0 : index
    %c0_294 = arith.constant 0 : index
    %311 = vector.load %arg12[%c0_293, %c0_294] : memref<1x256xf32, #tpu.memory_space<vmem>>, vector<1x256xf32>
    %312 = vector.broadcast %311 : vector<1x256xf32> to vector<2x256xf32>
    %313 = arith.addf %310, %312 : vector<2x256xf32>
    %cst_295 = arith.constant 0.000000e+00 : f32
    %314 = vector.broadcast %cst_295 : f32 to vector<2x256xf32>
    %315 = arith.maximumf %313, %314 : vector<2x256xf32>
    %316 = arith.truncf %315 : vector<2x256xf32> to vector<2x256xbf16>
    %cst_296 = arith.constant 0.000000e+00 : f32
    %317 = vector.broadcast %cst_296 : f32 to vector<2x64xf32>
    %c0_297 = arith.constant 0 : index
    %c0_298 = arith.constant 0 : index
    %c0_299 = arith.constant 0 : index
    %318 = vector.load %arg13[%c0_297, %c0_298, %c0_299] : memref<9x2x2xbf16, #tpu.memory_space<vmem>>, vector<1x2x2xbf16>
    %319 = vector.shape_cast %318 : vector<1x2x2xbf16> to vector<2x2xbf16>
    %cst_300 = arith.constant dense<0.000000e+00> : vector<2x256xf32>
    %320 = tpu.matmul %319, %316, %cst_300 {dimension_numbers = #tpu.dot_dimension_numbers<[1], [0], [0], [1], [0, 0, 1, 1], [], []>} : vector<2x2xbf16>, vector<2x256xbf16>, vector<2x256xf32> -> vector<2x256xf32>
    %321 = arith.truncf %320 : vector<2x256xf32> to vector<2x256xbf16>
    %c0_301 = arith.constant 0 : index
    %c0_302 = arith.constant 0 : index
    %c0_303 = arith.constant 0 : index
    %322 = vector.load %arg14[%c0_301, %c0_302, %c0_303] : memref<9x256x64xbf16, #tpu.memory_space<vmem>>, vector<1x256x64xbf16>
    %323 = vector.shape_cast %322 : vector<1x256x64xbf16> to vector<256x64xbf16>
    %cst_304 = arith.constant dense<0.000000e+00> : vector<2x64xf32>
    %324 = tpu.matmul %321, %323, %cst_304 {dimension_numbers = #tpu.dot_dimension_numbers<[1], [0], [0], [1], [0, 0, 1, 1], [], []>} : vector<2x256xbf16>, vector<256x64xbf16>, vector<2x64xf32> -> vector<2x64xf32>
    %325 = arith.addf %317, %324 : vector<2x64xf32>
    %c1_305 = arith.constant 1 : index
    %c0_306 = arith.constant 0 : index
    %c0_307 = arith.constant 0 : index
    %326 = vector.load %arg13[%c1_305, %c0_306, %c0_307] : memref<9x2x2xbf16, #tpu.memory_space<vmem>>, vector<1x2x2xbf16>
    %327 = vector.shape_cast %326 : vector<1x2x2xbf16> to vector<2x2xbf16>
    %cst_308 = arith.constant dense<0.000000e+00> : vector<2x256xf32>
    %328 = tpu.matmul %327, %316, %cst_308 {dimension_numbers = #tpu.dot_dimension_numbers<[1], [0], [0], [1], [0, 0, 1, 1], [], []>} : vector<2x2xbf16>, vector<2x256xbf16>, vector<2x256xf32> -> vector<2x256xf32>
    %329 = arith.truncf %328 : vector<2x256xf32> to vector<2x256xbf16>
    %c1_309 = arith.constant 1 : index
    %c0_310 = arith.constant 0 : index
    %c0_311 = arith.constant 0 : index
    %330 = vector.load %arg14[%c1_309, %c0_310, %c0_311] : memref<9x256x64xbf16, #tpu.memory_space<vmem>>, vector<1x256x64xbf16>
    %331 = vector.shape_cast %330 : vector<1x256x64xbf16> to vector<256x64xbf16>
    %cst_312 = arith.constant dense<0.000000e+00> : vector<2x64xf32>
    %332 = tpu.matmul %329, %331, %cst_312 {dimension_numbers = #tpu.dot_dimension_numbers<[1], [0], [0], [1], [0, 0, 1, 1], [], []>} : vector<2x256xbf16>, vector<256x64xbf16>, vector<2x64xf32> -> vector<2x64xf32>
    %333 = arith.addf %325, %332 : vector<2x64xf32>
    %c2_313 = arith.constant 2 : index
    %c0_314 = arith.constant 0 : index
    %c0_315 = arith.constant 0 : index
    %334 = vector.load %arg13[%c2_313, %c0_314, %c0_315] : memref<9x2x2xbf16, #tpu.memory_space<vmem>>, vector<1x2x2xbf16>
    %335 = vector.shape_cast %334 : vector<1x2x2xbf16> to vector<2x2xbf16>
    %cst_316 = arith.constant dense<0.000000e+00> : vector<2x256xf32>
    %336 = tpu.matmul %335, %316, %cst_316 {dimension_numbers = #tpu.dot_dimension_numbers<[1], [0], [0], [1], [0, 0, 1, 1], [], []>} : vector<2x2xbf16>, vector<2x256xbf16>, vector<2x256xf32> -> vector<2x256xf32>
    %337 = arith.truncf %336 : vector<2x256xf32> to vector<2x256xbf16>
    %c2_317 = arith.constant 2 : index
    %c0_318 = arith.constant 0 : index
    %c0_319 = arith.constant 0 : index
    %338 = vector.load %arg14[%c2_317, %c0_318, %c0_319] : memref<9x256x64xbf16, #tpu.memory_space<vmem>>, vector<1x256x64xbf16>
    %339 = vector.shape_cast %338 : vector<1x256x64xbf16> to vector<256x64xbf16>
    %cst_320 = arith.constant dense<0.000000e+00> : vector<2x64xf32>
    %340 = tpu.matmul %337, %339, %cst_320 {dimension_numbers = #tpu.dot_dimension_numbers<[1], [0], [0], [1], [0, 0, 1, 1], [], []>} : vector<2x256xbf16>, vector<256x64xbf16>, vector<2x64xf32> -> vector<2x64xf32>
    %341 = arith.addf %333, %340 : vector<2x64xf32>
    %c3_321 = arith.constant 3 : index
    %c0_322 = arith.constant 0 : index
    %c0_323 = arith.constant 0 : index
    %342 = vector.load %arg13[%c3_321, %c0_322, %c0_323] : memref<9x2x2xbf16, #tpu.memory_space<vmem>>, vector<1x2x2xbf16>
    %343 = vector.shape_cast %342 : vector<1x2x2xbf16> to vector<2x2xbf16>
    %cst_324 = arith.constant dense<0.000000e+00> : vector<2x256xf32>
    %344 = tpu.matmul %343, %316, %cst_324 {dimension_numbers = #tpu.dot_dimension_numbers<[1], [0], [0], [1], [0, 0, 1, 1], [], []>} : vector<2x2xbf16>, vector<2x256xbf16>, vector<2x256xf32> -> vector<2x256xf32>
    %345 = arith.truncf %344 : vector<2x256xf32> to vector<2x256xbf16>
    %c3_325 = arith.constant 3 : index
    %c0_326 = arith.constant 0 : index
    %c0_327 = arith.constant 0 : index
    %346 = vector.load %arg14[%c3_325, %c0_326, %c0_327] : memref<9x256x64xbf16, #tpu.memory_space<vmem>>, vector<1x256x64xbf16>
    %347 = vector.shape_cast %346 : vector<1x256x64xbf16> to vector<256x64xbf16>
    %cst_328 = arith.constant dense<0.000000e+00> : vector<2x64xf32>
    %348 = tpu.matmul %345, %347, %cst_328 {dimension_numbers = #tpu.dot_dimension_numbers<[1], [0], [0], [1], [0, 0, 1, 1], [], []>} : vector<2x256xbf16>, vector<256x64xbf16>, vector<2x64xf32> -> vector<2x64xf32>
    %349 = arith.addf %341, %348 : vector<2x64xf32>
    %c4_329 = arith.constant 4 : index
    %c0_330 = arith.constant 0 : index
    %c0_331 = arith.constant 0 : index
    %350 = vector.load %arg13[%c4_329, %c0_330, %c0_331] : memref<9x2x2xbf16, #tpu.memory_space<vmem>>, vector<1x2x2xbf16>
    %351 = vector.shape_cast %350 : vector<1x2x2xbf16> to vector<2x2xbf16>
    %cst_332 = arith.constant dense<0.000000e+00> : vector<2x256xf32>
    %352 = tpu.matmul %351, %316, %cst_332 {dimension_numbers = #tpu.dot_dimension_numbers<[1], [0], [0], [1], [0, 0, 1, 1], [], []>} : vector<2x2xbf16>, vector<2x256xbf16>, vector<2x256xf32> -> vector<2x256xf32>
    %353 = arith.truncf %352 : vector<2x256xf32> to vector<2x256xbf16>
    %c4_333 = arith.constant 4 : index
    %c0_334 = arith.constant 0 : index
    %c0_335 = arith.constant 0 : index
    %354 = vector.load %arg14[%c4_333, %c0_334, %c0_335] : memref<9x256x64xbf16, #tpu.memory_space<vmem>>, vector<1x256x64xbf16>
    %355 = vector.shape_cast %354 : vector<1x256x64xbf16> to vector<256x64xbf16>
    %cst_336 = arith.constant dense<0.000000e+00> : vector<2x64xf32>
    %356 = tpu.matmul %353, %355, %cst_336 {dimension_numbers = #tpu.dot_dimension_numbers<[1], [0], [0], [1], [0, 0, 1, 1], [], []>} : vector<2x256xbf16>, vector<256x64xbf16>, vector<2x64xf32> -> vector<2x64xf32>
    %357 = arith.addf %349, %356 : vector<2x64xf32>
    %c5_337 = arith.constant 5 : index
    %c0_338 = arith.constant 0 : index
    %c0_339 = arith.constant 0 : index
    %358 = vector.load %arg13[%c5_337, %c0_338, %c0_339] : memref<9x2x2xbf16, #tpu.memory_space<vmem>>, vector<1x2x2xbf16>
    %359 = vector.shape_cast %358 : vector<1x2x2xbf16> to vector<2x2xbf16>
    %cst_340 = arith.constant dense<0.000000e+00> : vector<2x256xf32>
    %360 = tpu.matmul %359, %316, %cst_340 {dimension_numbers = #tpu.dot_dimension_numbers<[1], [0], [0], [1], [0, 0, 1, 1], [], []>} : vector<2x2xbf16>, vector<2x256xbf16>, vector<2x256xf32> -> vector<2x256xf32>
    %361 = arith.truncf %360 : vector<2x256xf32> to vector<2x256xbf16>
    %c5_341 = arith.constant 5 : index
    %c0_342 = arith.constant 0 : index
    %c0_343 = arith.constant 0 : index
    %362 = vector.load %arg14[%c5_341, %c0_342, %c0_343] : memref<9x256x64xbf16, #tpu.memory_space<vmem>>, vector<1x256x64xbf16>
    %363 = vector.shape_cast %362 : vector<1x256x64xbf16> to vector<256x64xbf16>
    %cst_344 = arith.constant dense<0.000000e+00> : vector<2x64xf32>
    %364 = tpu.matmul %361, %363, %cst_344 {dimension_numbers = #tpu.dot_dimension_numbers<[1], [0], [0], [1], [0, 0, 1, 1], [], []>} : vector<2x256xbf16>, vector<256x64xbf16>, vector<2x64xf32> -> vector<2x64xf32>
    %365 = arith.addf %357, %364 : vector<2x64xf32>
    %c6_345 = arith.constant 6 : index
    %c0_346 = arith.constant 0 : index
    %c0_347 = arith.constant 0 : index
    %366 = vector.load %arg13[%c6_345, %c0_346, %c0_347] : memref<9x2x2xbf16, #tpu.memory_space<vmem>>, vector<1x2x2xbf16>
    %367 = vector.shape_cast %366 : vector<1x2x2xbf16> to vector<2x2xbf16>
    %cst_348 = arith.constant dense<0.000000e+00> : vector<2x256xf32>
    %368 = tpu.matmul %367, %316, %cst_348 {dimension_numbers = #tpu.dot_dimension_numbers<[1], [0], [0], [1], [0, 0, 1, 1], [], []>} : vector<2x2xbf16>, vector<2x256xbf16>, vector<2x256xf32> -> vector<2x256xf32>
    %369 = arith.truncf %368 : vector<2x256xf32> to vector<2x256xbf16>
    %c6_349 = arith.constant 6 : index
    %c0_350 = arith.constant 0 : index
    %c0_351 = arith.constant 0 : index
    %370 = vector.load %arg14[%c6_349, %c0_350, %c0_351] : memref<9x256x64xbf16, #tpu.memory_space<vmem>>, vector<1x256x64xbf16>
    %371 = vector.shape_cast %370 : vector<1x256x64xbf16> to vector<256x64xbf16>
    %cst_352 = arith.constant dense<0.000000e+00> : vector<2x64xf32>
    %372 = tpu.matmul %369, %371, %cst_352 {dimension_numbers = #tpu.dot_dimension_numbers<[1], [0], [0], [1], [0, 0, 1, 1], [], []>} : vector<2x256xbf16>, vector<256x64xbf16>, vector<2x64xf32> -> vector<2x64xf32>
    %373 = arith.addf %365, %372 : vector<2x64xf32>
    %c7_353 = arith.constant 7 : index
    %c0_354 = arith.constant 0 : index
    %c0_355 = arith.constant 0 : index
    %374 = vector.load %arg13[%c7_353, %c0_354, %c0_355] : memref<9x2x2xbf16, #tpu.memory_space<vmem>>, vector<1x2x2xbf16>
    %375 = vector.shape_cast %374 : vector<1x2x2xbf16> to vector<2x2xbf16>
    %cst_356 = arith.constant dense<0.000000e+00> : vector<2x256xf32>
    %376 = tpu.matmul %375, %316, %cst_356 {dimension_numbers = #tpu.dot_dimension_numbers<[1], [0], [0], [1], [0, 0, 1, 1], [], []>} : vector<2x2xbf16>, vector<2x256xbf16>, vector<2x256xf32> -> vector<2x256xf32>
    %377 = arith.truncf %376 : vector<2x256xf32> to vector<2x256xbf16>
    %c7_357 = arith.constant 7 : index
    %c0_358 = arith.constant 0 : index
    %c0_359 = arith.constant 0 : index
    %378 = vector.load %arg14[%c7_357, %c0_358, %c0_359] : memref<9x256x64xbf16, #tpu.memory_space<vmem>>, vector<1x256x64xbf16>
    %379 = vector.shape_cast %378 : vector<1x256x64xbf16> to vector<256x64xbf16>
    %cst_360 = arith.constant dense<0.000000e+00> : vector<2x64xf32>
    %380 = tpu.matmul %377, %379, %cst_360 {dimension_numbers = #tpu.dot_dimension_numbers<[1], [0], [0], [1], [0, 0, 1, 1], [], []>} : vector<2x256xbf16>, vector<256x64xbf16>, vector<2x64xf32> -> vector<2x64xf32>
    %381 = arith.addf %373, %380 : vector<2x64xf32>
    %c8_361 = arith.constant 8 : index
    %c0_362 = arith.constant 0 : index
    %c0_363 = arith.constant 0 : index
    %382 = vector.load %arg13[%c8_361, %c0_362, %c0_363] : memref<9x2x2xbf16, #tpu.memory_space<vmem>>, vector<1x2x2xbf16>
    %383 = vector.shape_cast %382 : vector<1x2x2xbf16> to vector<2x2xbf16>
    %cst_364 = arith.constant dense<0.000000e+00> : vector<2x256xf32>
    %384 = tpu.matmul %383, %316, %cst_364 {dimension_numbers = #tpu.dot_dimension_numbers<[1], [0], [0], [1], [0, 0, 1, 1], [], []>} : vector<2x2xbf16>, vector<2x256xbf16>, vector<2x256xf32> -> vector<2x256xf32>
    %385 = arith.truncf %384 : vector<2x256xf32> to vector<2x256xbf16>
    %c8_365 = arith.constant 8 : index
    %c0_366 = arith.constant 0 : index
    %c0_367 = arith.constant 0 : index
    %386 = vector.load %arg14[%c8_365, %c0_366, %c0_367] : memref<9x256x64xbf16, #tpu.memory_space<vmem>>, vector<1x256x64xbf16>
    %387 = vector.shape_cast %386 : vector<1x256x64xbf16> to vector<256x64xbf16>
    %cst_368 = arith.constant dense<0.000000e+00> : vector<2x64xf32>
    %388 = tpu.matmul %385, %387, %cst_368 {dimension_numbers = #tpu.dot_dimension_numbers<[1], [0], [0], [1], [0, 0, 1, 1], [], []>} : vector<2x256xbf16>, vector<256x64xbf16>, vector<2x64xf32> -> vector<2x64xf32>
    %389 = arith.addf %381, %388 : vector<2x64xf32>
    %c0_369 = arith.constant 0 : index
    %c0_370 = arith.constant 0 : index
    %390 = vector.load %arg15[%c0_369, %c0_370] : memref<1x64xf32, #tpu.memory_space<vmem>>, vector<1x64xf32>
    %391 = vector.broadcast %390 : vector<1x64xf32> to vector<2x64xf32>
    %392 = arith.addf %389, %391 : vector<2x64xf32>
    %c0_371 = arith.constant 0 : index
    %c0_372 = arith.constant 0 : index
    %393 = vector.load %arg16[%c0_371, %c0_372] : memref<2x64xf32, #tpu.memory_space<vmem>>, vector<2x64xf32>
    tpu.vector_store %arg16[%c0_371, %c0_372], %392 {strides = array<i32>} : memref<2x64xf32, #tpu.memory_space<vmem>>, vector<2x64xf32>,
    return
  }
}

</mosaic_0001>

<bundles_post_ra>
// kernel: encoder_forward.1
= control target key start
LH: loop header
LB: loop body
LE: loop exit
PB: predicated region body
PF: predicated region fallthrough
CT: control target
= control target key end

     0   :  { %s15964_s0 = inlined_call_operand.vmem [shape: bf16[512,3], index: 0, kind: input, shape index: {}]   ;;  %s15965_s1 = inlined_call_operand.hbm [shape: bf16[9,128,512], index: 1, kind: input, shape index: {}]   ;;  %s15966_s2 = inlined_call_operand.hbm [shape: bf16[9,3,32], index: 2, kind: input, shape index: {}]   ;;  %s15967_s3 = inlined_call_operand.hbm [shape: f32[1,32], index: 3, kind: input, shape index: {}]   ;;  %s15968_s4 = inlined_call_operand.hbm [shape: bf16[9,32,128], index: 4, kind: input, shape index: {}]   ;;  %s15969_s5 = inlined_call_operand.hbm [shape: bf16[9,32,64], index: 5, kind: input, shape index: {}]   ;;  %s15970_s6 = inlined_call_operand.hbm [shape: f32[1,64], index: 6, kind: input, shape index: {}]   ;;  %s15971_s7 = inlined_call_operand.hbm [shape: bf16[9,8,32], index: 7, kind: input, shape index: {}]   ;;  %s15972_s8 = inlined_call_operand.hbm [shape: bf16[9,64,128], index: 8, kind: input, shape index: {}]   ;;  %s15973_s9 = inlined_call_operand.hbm [shape: f32[1,128], index: 9, kind: input, shape index: {}]   ;;  %s15974_s10 = inlined_call_operand.hbm [shape: bf16[9,2,8], index: 10, kind: input, shape index: {}]   ;;  %s15975_s11 = inlined_call_operand.hbm [shape: bf16[9,128,256], index: 11, kind: input, shape index: {}]   ;;  %s15976_s12 = inlined_call_operand.hbm [shape: f32[1,256], index: 12, kind: input, shape index: {}]   ;;  %s15977_s13 = inlined_call_operand.hbm [shape: bf16[9,2,2], index: 13, kind: input, shape index: {}]   ;;  %s15978_s14 = inlined_call_operand.vmem [shape: bf16[9,256,64], index: 14, kind: input, shape index: {}]   ;;  %s15979_s15 = inlined_call_operand.hbm [shape: f32[1,64], index: 15, kind: input, shape index: {}]   ;;  %s15980_s16 = inlined_call_operand.hbm [shape: f32[2,64], index: 16, kind: output, shape index: {}]  }
   0x1   :  { %15987 = sst [smem:[#allocation55_spill]] %s15964_s0 }
   0x2   :  { %21 = vsyncpa [#allocation3], 0 }
   0x3   :  { %22 = vsyncpa [#allocation6], 0 }
   0x4   :  { %23 = vsyncpa [#allocation9], 0 }
   0x5   :  { %24 = vsyncpa [#allocation12], 0 }
   0x6   :  { %25 = vsyncpa [#allocation15], 0 }
   0x7   :  { %26 = vsyncpa [#allocation18], 0 }
   0x8   :  { %27 = vsyncpa [#allocation21], 0 }
   0x9   :  { %28 = vsyncpa [#allocation24], 0  ;;  %s49_s23 = sshll.u32 %s15966_s2, 4  ;;  %s50_s23 = int_to_ptr.hbm [resolvable:$true] %s49_s23 }
   0xa   :  { %29 = vsyncpa [#allocation4], 0  ;;  %s13683_s24 = smov [#allocation5]   ;;  %s73_s28 = sshll.u32 %s15968_s4, 4  ;;  %s74_s28 = int_to_ptr.hbm [resolvable:$true] %s73_s28 }
   0xb   :  { %s51_s25 = sshll.u32 %s13683_s24, 4  ;;  %s13684_s29 = smov 32   ;;  %s52_s25 = int_to_ptr.vmem [resolvable:$true] %s51_s25 }
   0xc   :  { %s13685_s30 = smov 2   ;;  %s13686_s0 = smov [#allocation8]  }
   0xd   :  { %57 = dma.hbm_to_vmem [thread:$0]  %s50_s23, 288, %s52_s25, [#allocation6], %s13684_s29, %s13684_s29, %s13685_s30  }
   0xe   :  { %s75_s17 = sshll.u32 %s13686_s0, 4  ;;  %s13687_s18 = smov 64   ;;  %s76_s17 = int_to_ptr.vmem [resolvable:$true] %s75_s17 }
   0xf   :  { %s13688_s19 = smov 4   ;;  %s100_s21 = sshll.u32 %s15970_s6, 4  ;;  %s101_s21 = int_to_ptr.hbm [resolvable:$true] %s100_s21 }
  0x10   :  { %81 = dma.hbm_to_vmem [thread:$0]  %s74_s28, 2304, %s76_s17, [#allocation9], %s13687_s18, %s13687_s18, %s13688_s19  }
  0x11   :  { %s13689_s22 = smov [#allocation11]   ;;  %s123_s25 = sshll.u32 %s15972_s8, 4  ;;  %s124_s25 = int_to_ptr.hbm [resolvable:$true] %s123_s25 }
  0x12   :  { %s102_s4 = sshll.u32 %s13689_s22, 4  ;;  %s13690_s26 = smov [#allocation14]   ;;  %s103_s4 = int_to_ptr.vmem [resolvable:$true] %s102_s4 }
  0x13   :  { %105 = dma.hbm_to_vmem [thread:$0]  %s101_s21, 16, %s103_s4, [#allocation12]  }
  0x14   :  { %s125_s27 = sshll.u32 %s13690_s26, 4  ;;  %s147_s28 = sshll.u32 %s15974_s10, 4  ;;  %s126_s27 = int_to_ptr.vmem [resolvable:$true] %s125_s27  ;;  %s148_s28 = int_to_ptr.hbm [resolvable:$true] %s147_s28 }
  0x15   :  { %131 = dma.hbm_to_vmem [thread:$0]  %s124_s25, 4608, %s126_s27, [#allocation15], %s13687_s18, %s13687_s18, %s13688_s19  }
  0x16   :  { %s13691_s6 = smov [#allocation17]   ;;  %s174_s8 = sshll.u32 %s15976_s12, 4  ;;  %s175_s8 = int_to_ptr.hbm [resolvable:$true] %s174_s8 }
  0x17   :  { %s149_s0 = sshll.u32 %s13691_s6, 4  ;;  %s13692_s20 = smov 16   ;;  %s150_s0 = int_to_ptr.vmem [resolvable:$true] %s149_s0 }
  0x18   :  { %s13693_s21 = smov 1   ;;  %s13694_s10 = smov [#allocation20]  }
  0x19   :  { %155 = dma.hbm_to_vmem [thread:$0]  %s148_s28, 144, %s150_s0, [#allocation18], %s13692_s20, %s13692_s20, %s13693_s21  }
  0x1a   :  { %s176_s22 = sshll.u32 %s13694_s10, 4  ;;  %s36_s23 = sshll.u32 %s15965_s1, 4  ;;  %s177_s22 = int_to_ptr.vmem [resolvable:$true] %s176_s22  ;;  %s37_s23 = int_to_ptr.hbm [resolvable:$true] %s36_s23 }
  0x1b   :  { %179 = dma.hbm_to_vmem [thread:$0]  %s175_s8, 32, %s177_s22, [#allocation21]  }
  0x1c   :  { %s13695_s25 = smov [#allocation2]   ;;  %s63_s29 = sshll.u32 %s15967_s3, 4  ;;  %s64_s29 = int_to_ptr.hbm [resolvable:$true] %s63_s29 }
  0x1d   :  { %s38_s26 = sshll.u32 %s13695_s25, 4  ;;  %s13696_s30 = smov 256   ;;  %s39_s26 = int_to_ptr.vmem [resolvable:$true] %s38_s26 }
  0x1e   :  { %44 = dma.hbm_to_vmem [thread:$0]  %s37_s23, 36864, %s39_s26, [#allocation3], %s13696_s30, %s13696_s30, %s13692_s20  }
  0x1f   :  { %s86_s0 = sshll.u32 %s15969_s5, 4  ;;  %s13697_s17 = smov [#allocation7]   ;;  %s87_s0 = int_to_ptr.hbm [resolvable:$true] %s86_s0 }
  0x20   :  { %s65_s1 = sshll.u32 %s13697_s17, 4  ;;  %s13698_s2 = smov [#allocation10]   ;;  %s66_s1 = int_to_ptr.vmem [resolvable:$true] %s65_s1 }
  0x21   :  { %68 = dma.hbm_to_vmem [thread:$0]  %s64_s29, 16, %s66_s1, [#allocation6]  }
  0x22   :  { %s88_s8 = sshll.u32 %s13698_s2, 4  ;;  %s110_s3 = sshll.u32 %s15971_s7, 4  ;;  %s89_s8 = int_to_ptr.vmem [resolvable:$true] %s88_s8  ;;  %s111_s3 = int_to_ptr.hbm [resolvable:$true] %s110_s3 }
  0x23   :  { %94 = dma.hbm_to_vmem [thread:$0]  %s87_s0, 2304, %s89_s8, [#allocation9], %s13687_s18, %s13687_s18, %s13688_s19  }
  0x24   :  { %s137_s5 = sshll.u32 %s15973_s9, 4  ;;  %s13699_s23 = smov [#allocation13]   ;;  %s138_s5 = int_to_ptr.hbm [resolvable:$true] %s137_s5 }
  0x25   :  { %s112_s25 = sshll.u32 %s13699_s23, 4  ;;  %s13700_s26 = smov [#allocation16]   ;;  %s113_s25 = int_to_ptr.vmem [resolvable:$true] %s112_s25 }
  0x26   :  { %118 = dma.hbm_to_vmem [thread:$0]  %s111_s3, 576, %s113_s25, [#allocation12], %s13687_s18, %s13687_s18, %s13688_s19  }
  0x27   :  { %s139_s7 = sshll.u32 %s13700_s26, 4  ;;  %s160_s29 = sshll.u32 %s15975_s11, 4  ;;  %s140_s7 = int_to_ptr.vmem [resolvable:$true] %s139_s7  ;;  %s161_s29 = int_to_ptr.hbm [resolvable:$true] %s160_s29 }
  0x28   :  { %142 = dma.hbm_to_vmem [thread:$0]  %s138_s5, 16, %s140_s7, [#allocation15]  }
  0x29   :  { %s13701_s30 = smov [#allocation19]   ;;  %s184_s0 = sshll.u32 %s15977_s13, 4  ;;  %s185_s0 = int_to_ptr.hbm [resolvable:$true] %s184_s0 }
  0x2a   :  { %s162_s28 = sshll.u32 %s13701_s30, 4  ;;  %s13702_s17 = smov 128   ;;  %s163_s28 = int_to_ptr.vmem [resolvable:$true] %s162_s28 }
  0x2b   :  { %s13703_s1 = smov 8   ;;  %s13704_s18 = smov [#allocation22]  }
  0x2c   :  { %168 = dma.hbm_to_vmem [thread:$0]  %s161_s29, 18432, %s163_s28, [#allocation18], %s13702_s17, %s13702_s17, %s13703_s1  }
  0x2d   :  { %s186_s19 = sshll.u32 %s13704_s18, 4  ;;  %s200_s11 = sshll.u32 %s15979_s15, 4  ;;  %s187_s19 = int_to_ptr.vmem [resolvable:$true] %s186_s19  ;;  %s201_s11 = int_to_ptr.hbm [resolvable:$true] %s200_s11 }
  0x2e   :  { %192 = dma.hbm_to_vmem [thread:$0]  %s185_s0, 144, %s187_s19, [#allocation21], %s13692_s20, %s13692_s20, %s13693_s21  }
  0x2f   :  { %s13705_s10 = smov [#allocation23]  }
  0x30   :  { %s202_s22 = sshll.u32 %s13705_s10, 4  ;;  %s203_s22 = int_to_ptr.vmem [resolvable:$true] %s202_s22 }
  0x31   :  { %205 = dma.hbm_to_vmem [thread:$0]  %s201_s11, 16, %s203_s22, [#allocation24]  }
  0x32   :  { %13665 = dma.done.wait [#allocation3], 36864  }
  0x33   :  { %13666 = vsyncadd [#allocation3], 4294930432 }
  0x34   :  { %13667 = dma.done.wait [#allocation6], 304  }
  0x35   :  { %13668 = vsyncadd [#allocation6], 4294966992 }
  0x36   :  { %13669 = dma.done.wait [#allocation9], 4608  }
  0x37   :  { %13670 = vsyncadd [#allocation9], 4294962688 }
  0x38   :  { %13671 = dma.done.wait [#allocation12], 592  }
  0x39   :  { %13672 = vsyncadd [#allocation12], 4294966704 }
  0x3a   :  { %13673 = dma.done.wait [#allocation15], 4624  }
  0x3b   :  { %13674 = vsyncadd [#allocation15], 4294962672 }
  0x3c   :  { %13675 = dma.done.wait [#allocation18], 18576  }
  0x3d   :  { %13676 = vsyncadd [#allocation18], 4294948720 }
  0x3e   :  { %13677 = dma.done.wait [#allocation21], 176  }
  0x3f   :  { %13678 = vsyncadd [#allocation21], 4294967120 }
  0x40   :  { %13679 = dma.done.wait [#allocation24], 16  }
  0x41   :  { %13680 = vsyncadd [#allocation24], 4294967280  ;;  %s15988_s20 = sld [smem:[#allocation55_spill]]  ;;  %v9383_v32 = vld [vmem:[#allocation2] sm:$0xf]  ;;  %vm1340_vm0 = vcmask 1040384  }
  0x42   :  { %v12526_v33 = vld [vmem:[#allocation2 + $0xc] sm:$0xf0]  ;;  %v12524_v34 = vld [vmem:[#allocation2 + $0x4] sm:$0xf]  ;;  %v9385_v35 = vld [vmem:[#allocation2 + $0x10] sm:$0xf0] }
  0x43   :  { %v9391_v36 = vld [vmem:[#allocation2 + $0x8] sm:$0xf]  ;;  %v12527_v37 = vld [vmem:[#allocation2 + $0x14] sm:$0xf0]  ;;  %v12525_v38 = vld [vmem:[#allocation2 + $0xc] sm:$0xf]  ;;  %v9384_v40 = vor.u32 %v12526_v33, %v9383_v32  ;;  %v9388_v41 = vor.u32 %v12524_v34, %v9385_v35 }
  0x44   :  { %v9393_v39 = vld [vmem:[#allocation2 + $0x18] sm:$0xf0]  ;;  %v9392_v42 = vor.u32 %v12527_v37, %v9391_v36  ;;  %v9399_v44 = vld [vmem:[#allocation2 + $0x20] sm:$0xf]  ;;  %v12530_v45 = vld [vmem:[#allocation2 + $0x2c] sm:$0xf0] }
  0x45   :  { %v9396_v43 = vor.u32 %v12525_v38, %v9393_v39  ;;  %v12528_v46 = vld [vmem:[#allocation2 + $0x24] sm:$0xf]  ;;  %v9401_v47 = vld [vmem:[#allocation2 + $0x30] sm:$0xf0]  ;;  %v9407_v48 = vld [vmem:[#allocation2 + $0x28] sm:$0xf]  ;;  %v9400_v52 = vor.u32 %v12530_v45, %v9399_v44 }
  0x46   :  { %v12531_v49 = vld [vmem:[#allocation2 + $0x34] sm:$0xf0]  ;;  %v12529_v50 = vld [vmem:[#allocation2 + $0x2c] sm:$0xf]  ;;  %v9409_v51 = vld [vmem:[#allocation2 + $0x38] sm:$0xf0]  ;;  %v9404_v53 = vor.u32 %v12528_v46, %v9401_v47 }
  0x47   :  { %v13857_v0 = vld [vmem:[%s15988_s20 + $0x38] sm:$0xff]  ;;  %v13879_v4 = vld [vmem:[%s15988_s20 + $0x30] sm:$0xff]  ;;  %v13903_v8 = vld [vmem:[%s15988_s20 + $0x28] sm:$0xff]  ;;  %v9408_v54 = vor.u32 %v12531_v49, %v9407_v48  ;;  %v9412_v55 = vor.u32 %v12529_v50, %v9409_v51  ;;  %vm1341_vm1 = vcmask 1041408   ;;  %vm1315_vm2 = vcmask 23552   ;;  %s9364_s4 = sshll.u32 %s15980_s16, 4  ;;  %s9365_s4 = int_to_ptr.hbm [resolvable:$true] %s9364_s4 }
  0x48   :  { %v13862_v1 = vld [vmem:[%s15988_s20 + $0x78] sm:$0xff]  ;;  %711 = vmatpush.bf16.msra.mxu0 %v13857_v0  ;;  %v13884_v5 = vld [vmem:[%s15988_s20 + $0x70] sm:$0xff]  ;;  %v13908_v9 = vld [vmem:[%s15988_s20 + $0x68] sm:$0xff]  ;;  %vm5049_vm3 = vcmask 261120   ;;  %vm5792_vm4 = vcmask 523264   ;;  %vm6344_vm5 = vcmask 1043456  }
  0x49   :  { %v13867_v2 = vld [vmem:[%s15988_s20 + $0xb8] sm:$0xff]  ;;  %760 = vmatpush.bf16.msra.mxu1 %v13862_v1  ;;  %v13891_v6 = vld [vmem:[%s15988_s20 + $0xb0] sm:$0xff]  ;;  %v13915_v10 = vld [vmem:[%s15988_s20 + $0xa8] sm:$0xff]  ;;  %vm6340_vm6 = vcmask 64512   ;;  %vm7647_vm7 = vcmask 15360   ;;  %vm9355_vm8 = vcmask 517120  }
  0x4a   :  { %v13872_v3 = vld [vmem:[%s15988_s20 + $0xf8] sm:$0xff]  ;;  %809 = vmatpush.bf16.msra.mxu2 %v13867_v2  ;;  %v13896_v7 = vld [vmem:[%s15988_s20 + $0xf0] sm:$0xff]  ;;  %v13920_v11 = vld [vmem:[%s15988_s20 + $0xe8] sm:$0xff] }
  0x4b   :  { %858 = vmatpush.bf16.msra.mxu3 %v13872_v3  ;;  %v13927_v12 = vld [vmem:[%s15988_s20 + $0x20] sm:$0xff]  ;;  %v13949_v16 = vld [vmem:[%s15988_s20 + $0x18] sm:$0xff]  ;;  %v13975_v20 = vld [vmem:[%s15988_s20 + $0x10] sm:$0xff] }
  0x4c   :  { %712 = vmatpush.bf16.msra.mxu0 %v13879_v4  ;;  %v13932_v13 = vld [vmem:[%s15988_s20 + $0x60] sm:$0xff]  ;;  %v13954_v17 = vld [vmem:[%s15988_s20 + $0x58] sm:$0xff]  ;;  %v13980_v21 = vld [vmem:[%s15988_s20 + $0x50] sm:$0xff] }
  0x4d   :  { %761 = vmatpush.bf16.msra.mxu1 %v13884_v5  ;;  %v13939_v14 = vld [vmem:[%s15988_s20 + $0xa0] sm:$0xff]  ;;  %v13963_v18 = vld [vmem:[%s15988_s20 + $0x98] sm:$0xff]  ;;  %v13987_v22 = vld [vmem:[%s15988_s20 + $0x90] sm:$0xff] }
  0x4e   :  { %810 = vmatpush.bf16.msra.mxu2 %v13891_v6  ;;  %v13944_v15 = vld [vmem:[%s15988_s20 + $0xe0] sm:$0xff]  ;;  %v13968_v19 = vld [vmem:[%s15988_s20 + $0xd8] sm:$0xff]  ;;  %v13992_v23 = vld [vmem:[%s15988_s20 + $0xd0] sm:$0xff] }
  0x4f   :  { %859 = vmatpush.bf16.msra.mxu3 %v13896_v7  ;;  %v13999_v24 = vld [vmem:[%s15988_s20 + $0x8] sm:$0xff]  ;;  %v14021_v28 = vld [vmem:[%s15988_s20] sm:$0xff]  ;;  %v12534_v57 = vld [vmem:[#allocation2 + $0x4c] sm:$0xf0] }
  0x50   :  { %713 = vmatpush.bf16.msra.mxu0 %v13903_v8  ;;  %v14004_v25 = vld [vmem:[%s15988_s20 + $0x48] sm:$0xff]  ;;  %v14026_v29 = vld [vmem:[%s15988_s20 + $0x40] sm:$0xff]  ;;  %v9417_v59 = vld [vmem:[#allocation2 + $0x50] sm:$0xf0] }
  0x51   :  { %762 = vmatpush.bf16.msra.mxu1 %v13908_v9  ;;  %v14011_v26 = vld [vmem:[%s15988_s20 + $0x88] sm:$0xff]  ;;  %v14031_v30 = vld [vmem:[%s15988_s20 + $0x80] sm:$0xff]  ;;  %v12535_v61 = vld [vmem:[#allocation2 + $0x54] sm:$0xf0] }
  0x52   :  { %811 = vmatpush.bf16.msra.mxu2 %v13915_v10  ;;  %v14016_v27 = vld [vmem:[%s15988_s20 + $0xc8] sm:$0xff]  ;;  %v14036_v31 = vld [vmem:[%s15988_s20 + $0xc0] sm:$0xff]  ;;  %v9425_v63 = vld [vmem:[#allocation2 + $0x58] sm:$0xf0] }
  0x53   :  { %860 = vmatpush.bf16.msra.mxu3 %v13920_v11  ;;  %v9415_v56 = vld [vmem:[#allocation2 + $0x40] sm:$0xf]  ;;  %v12532_v58 = vld [vmem:[#allocation2 + $0x44] sm:$0xf]  ;;  %v9423_v60 = vld [vmem:[#allocation2 + $0x48] sm:$0xf] }
  0x54   :  { %714 = vmatpush.bf16.msra.mxu0 %v13927_v12  ;;  %v12533_v62 = vld [vmem:[#allocation2 + $0x4c] sm:$0xf]  ;;  %v9416_v32 = vor.u32 %v12534_v57, %v9415_v56  ;;  %v9420_v33 = vor.u32 %v12532_v58, %v9417_v59  ;;  %v9424_v34 = vor.u32 %v12535_v61, %v9423_v60  ;;  %v9431_v36 = vld [vmem:[#allocation2 + $0x60] sm:$0xf]  ;;  %v12538_v37 = vld [vmem:[#allocation2 + $0x6c] sm:$0xf0] }
  0x55   :  { %763 = vmatpush.bf16.msra.mxu1 %v13932_v13  ;;  %v9428_v35 = vor.u32 %v12533_v62, %v9425_v63  ;;  %v12536_v38 = vld [vmem:[#allocation2 + $0x64] sm:$0xf]  ;;  %v9433_v39 = vld [vmem:[#allocation2 + $0x70] sm:$0xf0]  ;;  %v9455_v48 = vld [vmem:[#allocation2 + $0x88] sm:$0xf] }
  0x56   :  { %812 = vmatpush.bf16.msra.mxu2 %v13939_v14  ;;  %v9436_v44 = vor.u32 %v12536_v38, %v9433_v39  ;;  %v12540_v46 = vld [vmem:[#allocation2 + $0x84] sm:$0xf]  ;;  %v9449_v47 = vld [vmem:[#allocation2 + $0x90] sm:$0xf0]  ;;  %v12543_v49 = vld [vmem:[#allocation2 + $0x94] sm:$0xf0] }
  0x57   :  { %861 = vmatpush.bf16.msra.mxu3 %v13944_v15  ;;  %v12541_v50 = vld [vmem:[#allocation2 + $0x8c] sm:$0xf]  ;;  %v9465_v56 = vld [vmem:[#allocation2 + $0xb0] sm:$0xf0]  ;;  %v9471_v57 = vld [vmem:[#allocation2 + $0xa8] sm:$0xf] }
  0x58   :  { %715 = vmatpush.bf16.msra.mxu0 %v13949_v16  ;;  %v12547_v58 = vld [vmem:[#allocation2 + $0xb4] sm:$0xf0]  ;;  %v12545_v59 = vld [vmem:[#allocation2 + $0xac] sm:$0xf]  ;;  %v9473_v60 = vld [vmem:[#allocation2 + $0xb8] sm:$0xf0] }
  0x59   :  { %764 = vmatpush.bf16.msra.mxu1 %v13954_v17  ;;  %v9472_v63 = vor.u32 %v12547_v58, %v9471_v57  ;;  %v12549_v38 = vld [vmem:[#allocation2 + $0xcc] sm:$0xf]  ;;  %v9489_v39 = vld [vmem:[#allocation2 + $0xd8] sm:$0xf0] }
  0x5a   :  { %813 = vmatpush.bf16.msra.mxu2 %v13963_v18 }
  0x5b   :  { %862 = vmatpush.bf16.msra.mxu3 %v13968_v19 }
  0x5c   :  { %716 = vmatpush.bf16.msra.mxu0 %v13975_v20 }
  0x5d   :  { %765 = vmatpush.bf16.msra.mxu1 %v13980_v21 }
  0x5e   :  { %814 = vmatpush.bf16.msra.mxu2 %v13987_v22 }
  0x5f   :  { %863 = vmatpush.bf16.msra.mxu3 %v13992_v23 }
  0x60   :  { %717 = vmatpush.bf16.msra.mxu0 %v13999_v24 }
  0x61   :  { %766 = vmatpush.bf16.msra.mxu1 %v14004_v25 }
  0x62   :  { %815 = vmatpush.bf16.msra.mxu2 %v14011_v26 }
  0x63   :  { %864 = vmatpush.bf16.msra.mxu3 %v14016_v27 }
  0x64   :  { %718 = vmatpush.bf16.msra.mxu0 %v14021_v28 }
  0x65   :  { %767 = vmatpush.bf16.msra.mxu1 %v14026_v29 }
  0x66   :  { %816 = vmatpush.bf16.msra.mxu2 %v14031_v30 }
  0x67   :  { %865 = vmatpush.bf16.msra.mxu3 %v14036_v31  ;;  %719 = vmatmul.bf16.vlgmr.msra.gmra.mxu0 %v9384_v40  ;;  %v9439_v40 = vld [vmem:[#allocation2 + $0x68] sm:$0xf] }
  0x68   :  { %1109 = vmatpush.bf16.msrb.mxu0 %v13857_v0  ;;  %768 = vmatmul.bf16.vlgmr.msra.gmra.mxu1 %v9388_v41  ;;  %v12539_v41 = vld [vmem:[#allocation2 + $0x74] sm:$0xf0] }
  0x69   :  { %1158 = vmatpush.bf16.msrb.mxu1 %v13862_v1  ;;  %817 = vmatmul.bf16.vlgmr.msra.gmra.mxu2 %v9392_v42  ;;  %v12537_v42 = vld [vmem:[#allocation2 + $0x6c] sm:$0xf]  ;;  %v9440_v45 = vor.u32 %v12539_v41, %v9439_v40 }
  0x6a   :  { %866 = vmatmul.bf16.vlgmr.msra.gmra.mxu3 %v9396_v43  ;;  %1207 = vmatpush.bf16.msrb.mxu2 %v13867_v2  ;;  %v9432_v43 = vor.u32 %v12538_v37, %v9431_v36  ;;  %v9487_v36 = vld [vmem:[#allocation2 + $0xc8] sm:$0xf]  ;;  %v12551_v37 = vld [vmem:[#allocation2 + $0xd4] sm:$0xf0] }
  0x6b   :  { %1256 = vmatpush.bf16.msrb.mxu3 %v13872_v3 }
  0x6c   :  { %1110 = vmatpush.bf16.msrb.mxu0 %v13879_v4 }
  0x6d   :  { %1159 = vmatpush.bf16.msrb.mxu1 %v13884_v5 }
  0x6e   :  { %1208 = vmatpush.bf16.msrb.mxu2 %v13891_v6 }
  0x6f   :  { %1257 = vmatpush.bf16.msrb.mxu3 %v13896_v7 }
  0x70   :  { %1111 = vmatpush.bf16.msrb.mxu0 %v13903_v8 }
  0x71   :  { %1160 = vmatpush.bf16.msrb.mxu1 %v13908_v9 }
  0x72   :  { %1209 = vmatpush.bf16.msrb.mxu2 %v13915_v10 }
  0x73   :  { %1258 = vmatpush.bf16.msrb.mxu3 %v13920_v11 }
  0x74   :  { %1112 = vmatpush.bf16.msrb.mxu0 %v13927_v12 }
  0x75   :  { %1161 = vmatpush.bf16.msrb.mxu1 %v13932_v13 }
  0x76   :  { %1210 = vmatpush.bf16.msrb.mxu2 %v13939_v14 }
  0x77   :  { %1259 = vmatpush.bf16.msrb.mxu3 %v13944_v15  ;;  %724 = vmatmul.bf16.gmra.mxu0 %v9400_v52  ;;  %v9452_v52 = vor.u32 %v12540_v46, %v9449_v47  ;;  %v12553_v46 = vld [vmem:[#allocation2 + $0xec] sm:$0xf]  ;;  %v9505_v47 = vld [vmem:[#allocation2 + $0xf8] sm:$0xf0] }
  0x78   :  { %1113 = vmatpush.bf16.msrb.mxu0 %v13949_v16  ;;  %773 = vmatmul.bf16.gmra.mxu1 %v9404_v53  ;;  %v9456_v53 = vor.u32 %v12543_v49, %v9455_v48 }
  0x79   :  { %1162 = vmatpush.bf16.msrb.mxu1 %v13954_v17  ;;  %822 = vmatmul.bf16.gmra.mxu2 %v9408_v54  ;;  %v12546_v54 = vld [vmem:[#allocation2 + $0xac] sm:$0xf0] }
  0x7a   :  { %871 = vmatmul.bf16.gmra.mxu3 %v9412_v55  ;;  %1211 = vmatpush.bf16.msrb.mxu2 %v13963_v18  ;;  %v12544_v55 = vld [vmem:[#allocation2 + $0xa4] sm:$0xf] }
  0x7b   :  { %1260 = vmatpush.bf16.msrb.mxu3 %v13968_v19  ;;  %v9468_v62 = vor.u32 %v12544_v55, %v9465_v56  ;;  %v12557_v55 = vld [vmem:[#allocation2 + $0x10c] sm:$0xf]  ;;  %v9649_v56 = vld [vmem:[#allocation2 + $0x118] sm:$0xf0] }
  0x7c   :  { %1114 = vmatpush.bf16.msrb.mxu0 %v13975_v20 }
  0x7d   :  { %1163 = vmatpush.bf16.msrb.mxu1 %v13980_v21 }
  0x7e   :  { %1212 = vmatpush.bf16.msrb.mxu2 %v13987_v22 }
  0x7f   :  { %1261 = vmatpush.bf16.msrb.mxu3 %v13992_v23 }
  0x80   :  { %1115 = vmatpush.bf16.msrb.mxu0 %v13999_v24 }
  0x81   :  { %1164 = vmatpush.bf16.msrb.mxu1 %v14004_v25 }
  0x82   :  { %1213 = vmatpush.bf16.msrb.mxu2 %v14011_v26 }
  0x83   :  { %1262 = vmatpush.bf16.msrb.mxu3 %v14016_v27 }
  0x84   :  { %1116 = vmatpush.bf16.msrb.mxu0 %v14021_v28 }
  0x85   :  { %1165 = vmatpush.bf16.msrb.mxu1 %v14026_v29 }
  0x86   :  { %1214 = vmatpush.bf16.msrb.mxu2 %v14031_v30 }
  0x87   :  { %1263 = vmatpush.bf16.msrb.mxu3 %v14036_v31  ;;  %729 = vmatmul.bf16.gmra.mxu0 %v9416_v32  ;;  %v9479_v32 = vld [vmem:[#allocation2 + $0xc0] sm:$0xf] }
  0x88   :  { %778 = vmatmul.bf16.gmra.mxu1 %v9420_v33  ;;  %v12550_v33 = vld [vmem:[#allocation2 + $0xcc] sm:$0xf0] }
  0x89   :  { %827 = vmatmul.bf16.gmra.mxu2 %v9424_v34  ;;  %v12548_v34 = vld [vmem:[#allocation2 + $0xc4] sm:$0xf]  ;;  %v9480_v40 = vor.u32 %v12550_v33, %v9479_v32 }
  0x8a   :  { %1665 = vmatpush.bf16.msra.mxu2 %v13857_v0  ;;  %876 = vmatmul.bf16.gmra.mxu3 %v9428_v35  ;;  %v9481_v35 = vld [vmem:[#allocation2 + $0xd0] sm:$0xf0] }
  0x8b   :  { %1714 = vmatpush.bf16.msra.mxu3 %v13862_v1  ;;  %v9441_v1 = vld [vmem:[#allocation2 + $0x78] sm:$0xf0]  ;;  %v9484_v41 = vor.u32 %v12548_v34, %v9481_v35 }
  0x8e   :  { %1666 = vmatpush.bf16.msra.mxu2 %v13879_v4 }
  0x8f   :  { %1715 = vmatpush.bf16.msra.mxu3 %v13884_v5  ;;  %v9444_v5 = vor.u32 %v12537_v42, %v9441_v1  ;;  %v9488_v42 = vor.u32 %v12551_v37, %v9487_v36  ;;  %v9492_v1 = vor.u32 %v12549_v38, %v9489_v39  ;;  %v9655_v38 = vld [vmem:[#allocation2 + $0x120] sm:$0xf]  ;;  %v12562_v39 = vld [vmem:[#allocation2 + $0x12c] sm:$0xf0] }
  0x92   :  { %1667 = vmatpush.bf16.msra.mxu2 %v13903_v8 }
  0x93   :  { %1716 = vmatpush.bf16.msra.mxu3 %v13908_v9  ;;  %v9447_v9 = vld [vmem:[#allocation2 + $0x80] sm:$0xf] }
  0x96   :  { %1668 = vmatpush.bf16.msra.mxu2 %v13927_v12 }
  0x97   :  { %1717 = vmatpush.bf16.msra.mxu3 %v13932_v13  ;;  %734 = vmatmul.bf16.gmra.mxu0 %v9432_v43  ;;  %v12542_v13 = vld [vmem:[#allocation2 + $0x8c] sm:$0xf0]  ;;  %v9495_v43 = vld [vmem:[#allocation2 + $0xe0] sm:$0xf] }
  0x98   :  { %783 = vmatmul.bf16.gmra.mxu1 %v9436_v44  ;;  %v9448_v51 = vor.u32 %v12542_v13, %v9447_v9  ;;  %v12554_v44 = vld [vmem:[#allocation2 + $0xec] sm:$0xf0]  ;;  %v9503_v9 = vld [vmem:[#allocation2 + $0xe8] sm:$0xf]  ;;  %v12555_v13 = vld [vmem:[#allocation2 + $0xf4] sm:$0xf0] }
  0x99   :  { %832 = vmatmul.bf16.gmra.mxu2 %v9440_v45  ;;  %v12552_v45 = vld [vmem:[#allocation2 + $0xe4] sm:$0xf]  ;;  %v9496_v48 = vor.u32 %v12554_v44, %v9495_v43  ;;  %v12561_v43 = vld [vmem:[#allocation2 + $0x12c] sm:$0xf]  ;;  %v9665_v44 = vld [vmem:[#allocation2 + $0x138] sm:$0xf0] }
  0x9a   :  { %1669 = vmatpush.bf16.msra.mxu2 %v13949_v16  ;;  %881 = vmatmul.bf16.gmra.mxu3 %v9444_v5  ;;  %v9497_v5 = vld [vmem:[#allocation2 + $0xf0] sm:$0xf0] }
  0x9b   :  { %1718 = vmatpush.bf16.msra.mxu3 %v13954_v17  ;;  %v9457_v17 = vld [vmem:[#allocation2 + $0x98] sm:$0xf0]  ;;  %v9500_v49 = vor.u32 %v12552_v45, %v9497_v5  ;;  %v9656_v5 = vor.u32 %v12562_v39, %v9655_v38 }
  0x9e   :  { %1670 = vmatpush.bf16.msra.mxu2 %v13975_v20 }
  0x9f   :  { %1719 = vmatpush.bf16.msra.mxu3 %v13980_v21  ;;  %v9460_v21 = vor.u32 %v12541_v50, %v9457_v17  ;;  %v9504_v50 = vor.u32 %v12555_v13, %v9503_v9  ;;  %v9508_v17 = vor.u32 %v12553_v46, %v9505_v47 }
  0xa2   :  { %1671 = vmatpush.bf16.msra.mxu2 %v13999_v24 }
  0xa3   :  { %1720 = vmatpush.bf16.msra.mxu3 %v14004_v25  ;;  %v9463_v25 = vld [vmem:[#allocation2 + $0xa0] sm:$0xf] }
  0xa4   :  { %v9464_v61 = vor.u32 %v12546_v54, %v9463_v25  ;;  %v9647_v25 = vld [vmem:[#allocation2 + $0x108] sm:$0xf]  ;;  %v12559_v54 = vld [vmem:[#allocation2 + $0x114] sm:$0xf0] }
  0xa6   :  { %1672 = vmatpush.bf16.msra.mxu2 %v14021_v28 }
  0xa7   :  { %1721 = vmatpush.bf16.msra.mxu3 %v14026_v29  ;;  %739 = vmatmul.bf16.gmra.mxu0 %v9448_v51  ;;  %v9476_v29 = vor.u32 %v12545_v59, %v9473_v60  ;;  %v9639_v51 = vld [vmem:[#allocation2 + $0x100] sm:$0xf] }
  0xa8   :  { %788 = vmatmul.bf16.gmra.mxu1 %v9452_v52  ;;  %v12558_v52 = vld [vmem:[#allocation2 + $0x10c] sm:$0xf0] }
  0xa9   :  { %837 = vmatmul.bf16.gmra.mxu2 %v9456_v53  ;;  %v12556_v53 = vld [vmem:[#allocation2 + $0x104] sm:$0xf]  ;;  %v9640_v57 = vor.u32 %v12558_v52, %v9639_v51 }
  0xaa   :  { %886 = vmatmul.bf16.gmra.mxu3 %v9460_v21  ;;  %v9641_v21 = vld [vmem:[#allocation2 + $0x110] sm:$0xf0] }
  0xab   :  { %v9644_v58 = vor.u32 %v12556_v53, %v9641_v21 }
  0xb7   :  { %744 = vmatmul.bf16.gmra.mxu0 %v9464_v61  ;;  %v9648_v61 = vor.u32 %v12559_v54, %v9647_v25  ;;  %v9671_v54 = vld [vmem:[#allocation2 + $0x140] sm:$0xf] }
  0xb8   :  { %793 = vmatmul.bf16.gmra.mxu1 %v9468_v62  ;;  %v9652_v62 = vor.u32 %v12557_v55, %v9649_v56  ;;  %v12566_v55 = vld [vmem:[#allocation2 + $0x14c] sm:$0xf0]  ;;  %v12564_v56 = vld [vmem:[#allocation2 + $0x144] sm:$0xf] }
  0xb9   :  { %842 = vmatmul.bf16.gmra.mxu2 %v9472_v63 }
  0xba   :  { %891 = vmatmul.bf16.gmra.mxu3 %v9476_v29 }
  0xc7   :  { %749 = vmatmul.bf16.gmra.mxu0 %v9480_v40  ;;  %v12560_v40 = vld [vmem:[#allocation2 + $0x124] sm:$0xf] }
  0xc8   :  { %798 = vmatmul.bf16.gmra.mxu1 %v9484_v41  ;;  %v9657_v41 = vld [vmem:[#allocation2 + $0x130] sm:$0xf0] }
  0xc9   :  { %847 = vmatmul.bf16.gmra.mxu2 %v9488_v42  ;;  %v9663_v42 = vld [vmem:[#allocation2 + $0x128] sm:$0xf]  ;;  %v9660_v9 = vor.u32 %v12560_v40, %v9657_v41 }
  0xca   :  { %896 = vmatmul.bf16.gmra.mxu3 %v9492_v1  ;;  %v12563_v1 = vld [vmem:[#allocation2 + $0x134] sm:$0xf0] }
  0xd7   :  { %754 = vmatmul.bf16.gmra.mxu0 %v9496_v48  ;;  %v9668_v48 = vor.u32 %v12561_v43, %v9665_v44 }
  0xd8   :  { %803 = vmatmul.bf16.gmra.mxu1 %v9500_v49 }
  0xd9   :  { %852 = vmatmul.bf16.gmra.mxu2 %v9504_v50 }
  0xda   :  { %901 = vmatmul.bf16.gmra.mxu3 %v9508_v17 }
  0xe4   :  { %v720_v59 = vpop.f32.mrf.mxu0 }
  0xe5   :  { %v769_v60 = vpop.f32.mrf.mxu1 }
  0xe6   :  { %v770_v63 = vadd.f32 %v769_v60, %v720_v59  ;;  %v12567_v59 = vld [vmem:[#allocation2 + $0x154] sm:$0xf0]  ;;  %v12565_v60 = vld [vmem:[#allocation2 + $0x14c] sm:$0xf] }
  0xe7   :  { %1117 = vmatmul.bf16.vlgmr.msrb.gmra.mxu0 %v9640_v57  ;;  %v9673_v57 = vld [vmem:[#allocation2 + $0x150] sm:$0xf0] }
  0xe8   :  { %1166 = vmatmul.bf16.vlgmr.msrb.gmra.mxu1 %v9644_v58  ;;  %v9679_v58 = vld [vmem:[#allocation2 + $0x148] sm:$0xf] }
  0xe9   :  { %1215 = vmatmul.bf16.vlgmr.msrb.gmra.mxu2 %v9648_v61  ;;  %v9681_v61 = vld [vmem:[#allocation2 + $0x158] sm:$0xf0] }
  0xea   :  { %1264 = vmatmul.bf16.vlgmr.msrb.gmra.mxu3 %v9652_v62 }
  0xeb   :  { %2156 = vmatpush.bf16.msrb.mxu3 %v13857_v0 }
  0xec   :  { %v818_v29 = vpop.f32.mrf.mxu2  ;;  %v722_v34 = vpop.f32.mrf.mxu0 }
  0xed   :  { %v867_v32 = vpop.f32.mrf.mxu3  ;;  %v819_v33 = vadd.f32 %v818_v29, %v770_v63  ;;  %v771_v35 = vpop.f32.mrf.mxu1  ;;  %v9672_v63 = vor.u32 %v12566_v55, %v9671_v54  ;;  %v9676_v29 = vor.u32 %v12564_v56, %v9673_v57 }
  0xee   :  { %v772_v36 = vadd.f32 %v771_v35, %v722_v34  ;;  %v9684_v35 = vor.u32 %v12565_v60, %v9681_v61 }
  0xef   :  { %2157 = vmatpush.bf16.msrb.mxu3 %v13879_v4  ;;  %v14096_v37 = vadd.f32 %v867_v32, %v819_v33  ;;  %v9664_v4 = vor.u32 %v12563_v1, %v9663_v42 }
  0xf3   :  { %2158 = vmatpush.bf16.msrb.mxu3 %v13903_v8 }
  0xf4   :  { %v820_v0 = vpop.f32.mrf.mxu2  ;;  %v725_v46 = vpop.f32.mrf.mxu0 }
  0xf5   :  { %v869_v45 = vpop.f32.mrf.mxu3  ;;  %v821_v13 = vadd.f32 %v820_v0, %v772_v36  ;;  %v774_v47 = vpop.f32.mrf.mxu1  ;;  %v9687_v0 = vld [vmem:[#allocation2 + $0x160] sm:$0xf] }
  0xf6   :  { %v775_v49 = vadd.f32 %v774_v47, %v725_v46  ;;  %v12569_v46 = vld [vmem:[#allocation2 + $0x16c] sm:$0xf]  ;;  %v9697_v47 = vld [vmem:[#allocation2 + $0x178] sm:$0xf0] }
  0xf7   :  { %2159 = vmatpush.bf16.msrb.mxu3 %v13927_v12  ;;  %v14100_v50 = vadd.f32 %v869_v45, %v821_v13  ;;  %1122 = vmatmul.bf16.gmra.mxu0 %v9656_v5  ;;  %v12570_v45 = vld [vmem:[#allocation2 + $0x16c] sm:$0xf0]  ;;  %v9689_v5 = vld [vmem:[#allocation2 + $0x170] sm:$0xf0]  ;;  %v12571_v13 = vld [vmem:[#allocation2 + $0x174] sm:$0xf0] }
  0xf8   :  { %1171 = vmatmul.bf16.gmra.mxu1 %v9660_v9  ;;  %v9695_v9 = vld [vmem:[#allocation2 + $0x168] sm:$0xf] }
  0xf9   :  { %v907_v17 = vpack.c.bf16 %v14100_v50, %v14096_v37  ;;  %1220 = vmatmul.bf16.gmra.mxu2 %v9664_v4  ;;  %v14184_v37 = vld [vmem:[%s15988_s20 + $0xb0] sm:$0xff] }
  0xfa   :  { %1269 = vmatmul.bf16.gmra.mxu3 %v9668_v48 }
  0xfb   :  { %2160 = vmatpush.bf16.msrb.mxu3 %v13949_v16 }
  0xfc   :  { %v823_v8 = vpop.f32.mrf.mxu2  ;;  %v727_v53 = vpop.f32.mrf.mxu0 }
  0xfd   :  { %v872_v51 = vpop.f32.mrf.mxu3  ;;  %v824_v52 = vadd.f32 %v823_v8, %v775_v49  ;;  %v776_v21 = vpop.f32.mrf.mxu1  ;;  %v9688_v49 = vor.u32 %v12570_v45, %v9687_v0 }
  0xfe   :  { %v777_v25 = vadd.f32 %v776_v21, %v727_v53  ;;  %v9696_v21 = vor.u32 %v12571_v13, %v9695_v9 }
  0xff   :  { %2161 = vmatpush.bf16.msrb.mxu3 %v13975_v20  ;;  %v14106_v12 = vadd.f32 %v872_v51, %v824_v52  ;;  %v9680_v20 = vor.u32 %v12567_v59, %v9679_v58 }
 0x103   :  { %2162 = vmatpush.bf16.msrb.mxu3 %v13999_v24 }
 0x104   :  { %v825_v16 = vpop.f32.mrf.mxu2  ;;  %v730_v33 = vpop.f32.mrf.mxu0 }
 0x105   :  { %v874_v62 = vpop.f32.mrf.mxu3  ;;  %v826_v32 = vadd.f32 %v825_v16, %v777_v25  ;;  %v779_v34 = vpop.f32.mrf.mxu1  ;;  %v9700_v25 = vor.u32 %v12569_v46, %v9697_v47 }
 0x106   :  { %v780_v36 = vadd.f32 %v779_v34, %v730_v33  ;;  %v9705_v33 = vld [vmem:[#allocation2 + $0x190] sm:$0xf0]  ;;  %v9711_v34 = vld [vmem:[#allocation2 + $0x188] sm:$0xf] }
 0x107   :  { %2163 = vmatpush.bf16.msrb.mxu3 %v14021_v28  ;;  %v14110_v38 = vadd.f32 %v874_v62, %v826_v32  ;;  %1127 = vmatmul.bf16.gmra.mxu0 %v9672_v63  ;;  %v12568_v28 = vld [vmem:[#allocation2 + $0x164] sm:$0xf]  ;;  %v9703_v63 = vld [vmem:[#allocation2 + $0x180] sm:$0xf] }
 0x108   :  { %1176 = vmatmul.bf16.gmra.mxu1 %v9676_v29  ;;  %v9692_v8 = vor.u32 %v12568_v28, %v9689_v5  ;;  %v12574_v29 = vld [vmem:[#allocation2 + $0x18c] sm:$0xf0]  ;;  %v12572_v32 = vld [vmem:[#allocation2 + $0x184] sm:$0xf] }
 0x109   :  { %v908_v39 = vpack.c.bf16 %v14110_v38, %v14106_v12  ;;  %1225 = vmatmul.bf16.gmra.mxu2 %v9680_v20  ;;  %v12575_v20 = vld [vmem:[#allocation2 + $0x194] sm:$0xf0] }
 0x10a   :  { %1274 = vmatmul.bf16.gmra.mxu3 %v9684_v35  ;;  %v12573_v35 = vld [vmem:[#allocation2 + $0x18c] sm:$0xf]  ;;  %v9712_v45 = vor.u32 %v12575_v20, %v9711_v34 }
 0x10c   :  { %v828_v24 = vpop.f32.mrf.mxu2  ;;  %v732_v42 = vpop.f32.mrf.mxu0 }
 0x10d   :  { %v877_v40 = vpop.f32.mrf.mxu3  ;;  %v829_v41 = vadd.f32 %v828_v24, %v780_v36  ;;  %v781_v1 = vpop.f32.mrf.mxu1  ;;  %v9713_v36 = vld [vmem:[#allocation2 + $0x198] sm:$0xf0] }
 0x10e   :  { %v782_v43 = vadd.f32 %v781_v1, %v732_v42  ;;  %v9708_v42 = vor.u32 %v12572_v32, %v9705_v33  ;;  %v9716_v28 = vor.u32 %v12573_v35, %v9713_v36 }
 0x10f   :  { %v14114_v44 = vadd.f32 %v877_v40, %v829_v41  ;;  %v9704_v41 = vor.u32 %v12574_v29, %v9703_v63 }
 0x114   :  { %v830_v4 = vpop.f32.mrf.mxu2  ;;  %v735_v52 = vpop.f32.mrf.mxu0 }
 0x115   :  { %v879_v48 = vpop.f32.mrf.mxu3  ;;  %v831_v51 = vadd.f32 %v830_v4, %v782_v43  ;;  %v784_v53 = vpop.f32.mrf.mxu1 }
 0x116   :  { %v785_v54 = vadd.f32 %v784_v53, %v735_v52  ;;  %v12578_v52 = vld [vmem:[#allocation2 + $0x1ac] sm:$0xf0]  ;;  %v12576_v53 = vld [vmem:[#allocation2 + $0x1a4] sm:$0xf] }
 0x117   :  { %v14116_v55 = vadd.f32 %v879_v48, %v831_v51  ;;  %1132 = vmatmul.bf16.gmra.mxu0 %v9688_v49  ;;  %v9719_v51 = vld [vmem:[#allocation2 + $0x1a0] sm:$0xf] }
 0x118   :  { %1181 = vmatmul.bf16.gmra.mxu1 %v9692_v8 }
 0x119   :  { %v909_v56 = vpack.c.bf16 %v14116_v55, %v14114_v44  ;;  %1230 = vmatmul.bf16.gmra.mxu2 %v9696_v21  ;;  %v9721_v21 = vld [vmem:[#allocation2 + $0x1b0] sm:$0xf0] }
 0x11a   :  { %1279 = vmatmul.bf16.gmra.mxu3 %v9700_v25  ;;  %v9727_v25 = vld [vmem:[#allocation2 + $0x1a8] sm:$0xf]  ;;  %v9724_v63 = vor.u32 %v12576_v53, %v9721_v21  ;;  %v12583_v53 = vld [vmem:[#allocation2 + $0x1d4] sm:$0xf0]  ;;  %v12581_v21 = vld [vmem:[#allocation2 + $0x1cc] sm:$0xf] }
 0x11c   :  { %v833_v57 = vpop.f32.mrf.mxu2  ;;  %v737_v60 = vpop.f32.mrf.mxu0 }
 0x11d   :  { %v882_v58 = vpop.f32.mrf.mxu3  ;;  %v834_v59 = vadd.f32 %v833_v57, %v785_v54  ;;  %v786_v61 = vpop.f32.mrf.mxu1  ;;  %v12579_v54 = vld [vmem:[#allocation2 + $0x1b4] sm:$0xf0]  ;;  %v12577_v57 = vld [vmem:[#allocation2 + $0x1ac] sm:$0xf] }
 0x11e   :  { %v787_v16 = vadd.f32 %v786_v61, %v737_v60  ;;  %v9728_v34 = vor.u32 %v12579_v54, %v9727_v25  ;;  %v9745_v25 = vld [vmem:[#allocation2 + $0x1d8] sm:$0xf0] }
 0x11f   :  { %v14120_v62 = vadd.f32 %v882_v58, %v834_v59  ;;  %v9729_v58 = vld [vmem:[#allocation2 + $0x1b8] sm:$0xf0] }
 0x120   :  { %v9732_v20 = vor.u32 %v12577_v57, %v9729_v58 }
 0x124   :  { %v835_v24 = vpop.f32.mrf.mxu2  ;;  %v740_v43 = vpop.f32.mrf.mxu0 }
 0x125   :  { %v884_v40 = vpop.f32.mrf.mxu3  ;;  %v836_v1 = vadd.f32 %v835_v24, %v787_v16  ;;  %v789_v0 = vpop.f32.mrf.mxu1  ;;  %v9720_v16 = vor.u32 %v12578_v52, %v9719_v51  ;;  %v9743_v51 = vld [vmem:[#allocation2 + $0x1c8] sm:$0xf] }
 0x126   :  { %v790_v5 = vadd.f32 %v789_v0, %v740_v43 }
 0x127   :  { %v14122_v9 = vadd.f32 %v884_v40, %v836_v1  ;;  %1137 = vmatmul.bf16.gmra.mxu0 %v9704_v41 }
 0x128   :  { %1186 = vmatmul.bf16.gmra.mxu1 %v9708_v42 }
 0x129   :  { %v910_v13 = vpack.c.bf16 %v14122_v9, %v14120_v62  ;;  %1235 = vmatmul.bf16.gmra.mxu2 %v9712_v45  ;;  %v9735_v45 = vld [vmem:[#allocation2 + $0x1c0] sm:$0xf] }
 0x12a   :  { %1284 = vmatmul.bf16.gmra.mxu3 %v9716_v28  ;;  %v12582_v28 = vld [vmem:[#allocation2 + $0x1cc] sm:$0xf0] }
 0x12c   :  { %v838_v46 = vpop.f32.mrf.mxu2  ;;  %v742_v48 = vpop.f32.mrf.mxu0 }
 0x12d   :  { %v887_v47 = vpop.f32.mrf.mxu3  ;;  %v839_v4 = vadd.f32 %v838_v46, %v790_v5  ;;  %v791_v49 = vpop.f32.mrf.mxu1  ;;  %v1314_v5 = vld [vmem:[#allocation5 + $0x2] sm:$0x3]  ;;  %v12580_v46 = vld [vmem:[#allocation2 + $0x1c4] sm:$0xf] }
 0x12e   :  { %v792_v59 = vadd.f32 %v791_v49, %v742_v48  ;;  %v915_v48 = vld [vmem:[#allocation5] sm:$0x3]  ;;  %v9737_v49 = vld [vmem:[#allocation2 + $0x1d0] sm:$0xf0] }
 0x12f   :  { %v14126_v8 = vadd.f32 %v887_v47, %v839_v4  ;;  %v13706_v47 = vmov 65535  }
 0x130   :  { %v1342_v4 = vsel %vm1340_vm0, 4294967295, %v13706_v47  ;;  %v9759_v47 = vld [vmem:[#allocation2 + $0x1e8] sm:$0xf] }
 0x131   :  { %v14135_v52 = vsel %vm1341_vm1, %v1342_v4, 0  ;;  %v12587_v4 = vld [vmem:[#allocation2 + $0x1f4] sm:$0xf0] }
 0x132   :  { %v1345_v54 = vand.u32 %v14135_v52, %v1314_v5  ;;  %v1421_v57 = vand.u32 %v14135_v52, %v915_v48  ;;  %v12584_v5 = vld [vmem:[#allocation2 + $0x1e4] sm:$0xf]  ;;  %v9761_v48 = vld [vmem:[#allocation2 + $0x1f8] sm:$0xf0] }
 0x134   :  { %v840_v60 = vpop.f32.mrf.mxu2  ;;  %v745_v32 = vpop.f32.mrf.mxu0  ;;  %1354 = vmatpush.bf16.msra.mxu0 %v1345_v54  ;;  %1430 = vmatpush.bf16.msra.mxu1 %v1421_v57  ;;  %v9760_v54 = vor.u32 %v12587_v4, %v9759_v47  ;;  %v14196_v47 = vld [vmem:[%s15988_s20 + $0xa0] sm:$0xff] }
 0x135   :  { %v889_v61 = vpop.f32.mrf.mxu3  ;;  %v841_v29 = vadd.f32 %v840_v60, %v792_v59  ;;  %v794_v33 = vpop.f32.mrf.mxu1 }
 0x136   :  { %v795_v35 = vadd.f32 %v794_v33, %v745_v32  ;;  %v9744_v33 = vor.u32 %v12583_v53, %v9743_v51 }
 0x137   :  { %v14128_v36 = vadd.f32 %v889_v61, %v841_v29  ;;  %1142 = vmatmul.bf16.gmra.mxu0 %v9720_v16  ;;  %v9736_v61 = vor.u32 %v12582_v28, %v9735_v45  ;;  %v9740_v16 = vor.u32 %v12580_v46, %v9737_v49  ;;  %v9751_v45 = vld [vmem:[#allocation2 + $0x1e0] sm:$0xf]  ;;  %v12586_v28 = vld [vmem:[#allocation2 + $0x1ec] sm:$0xf0]  ;;  %v9753_v46 = vld [vmem:[#allocation2 + $0x1f0] sm:$0xf0] }
 0x138   :  { %1191 = vmatmul.bf16.gmra.mxu1 %v9724_v63  ;;  %1763 = vmatpush.bf16.msrb.mxu0 %v13867_v2  ;;  %v9756_v53 = vor.u32 %v12584_v5, %v9753_v46 }
 0x139   :  { %v911_v24 = vpack.c.bf16 %v14128_v36, %v14126_v8  ;;  %1240 = vmatmul.bf16.gmra.mxu2 %v9728_v34  ;;  %v9748_v34 = vor.u32 %v12581_v21, %v9745_v25  ;;  %1812 = vmatpush.bf16.msrb.mxu1 %v13872_v3 }
 0x13a   :  { %1289 = vmatmul.bf16.gmra.mxu3 %v9732_v20 }
 0x13c   :  { %v843_v40 = vpop.f32.mrf.mxu2  ;;  %v747_v1 = vpop.f32.mrf.mxu0  ;;  %1764 = vmatpush.bf16.msrb.mxu0 %v13891_v6 }
 0x13d   :  { %v892_v41 = vpop.f32.mrf.mxu3  ;;  %v844_v42 = vadd.f32 %v843_v40, %v795_v35  ;;  %v796_v43 = vpop.f32.mrf.mxu1  ;;  %1813 = vmatpush.bf16.msrb.mxu1 %v13896_v7  ;;  %v12585_v7 = vld [vmem:[#allocation2 + $0x1ec] sm:$0xf] }
 0x13e   :  { %v797_v58 = vadd.f32 %v796_v43, %v747_v1  ;;  %v9764_v57 = vor.u32 %v12585_v7, %v9761_v48 }
 0x13f   :  { %v14132_v0 = vadd.f32 %v892_v41, %v844_v42 }
 0x140   :  { %1765 = vmatpush.bf16.msrb.mxu0 %v13915_v10 }
 0x141   :  { %1814 = vmatpush.bf16.msrb.mxu1 %v13920_v11  ;;  %v9752_v11 = vor.u32 %v12586_v28, %v9751_v45 }
 0x144   :  { %v845_v59 = vpop.f32.mrf.mxu2  ;;  %v750_v29 = vpop.f32.mrf.mxu0  ;;  %1766 = vmatpush.bf16.msrb.mxu0 %v13939_v14 }
 0x145   :  { %v894_v60 = vpop.f32.mrf.mxu3  ;;  %v846_v63 = vadd.f32 %v845_v59, %v797_v58  ;;  %v799_v32 = vpop.f32.mrf.mxu1  ;;  %1815 = vmatpush.bf16.msrb.mxu1 %v13944_v15 }
 0x146   :  { %v800_v20 = vadd.f32 %v799_v32, %v750_v29 }
 0x147   :  { %v14141_v35 = vadd.f32 %v894_v60, %v846_v63  ;;  %1147 = vmatmul.bf16.gmra.mxu0 %v9736_v61 }
 0x148   :  { %1196 = vmatmul.bf16.gmra.mxu1 %v9740_v16  ;;  %1767 = vmatpush.bf16.msrb.mxu0 %v13963_v18 }
 0x149   :  { %v912_v40 = vpack.c.bf16 %v14141_v35, %v14132_v0  ;;  %1245 = vmatmul.bf16.gmra.mxu2 %v9744_v33  ;;  %1816 = vmatpush.bf16.msrb.mxu1 %v13968_v19  ;;  %v9783_v0 = vld [vmem:[#allocation2 + $0x200] sm:$0xf]  ;;  %v12590_v35 = vld [vmem:[#allocation2 + $0x20c] sm:$0xf0] }
 0x14a   :  { %1294 = vmatmul.bf16.gmra.mxu3 %v9748_v34 }
 0x14c   :  { %v848_v41 = vpop.f32.mrf.mxu2  ;;  %v752_v3 = vpop.f32.mrf.mxu0  ;;  %1768 = vmatpush.bf16.msrb.mxu0 %v13987_v22 }
 0x14d   :  { %v897_v42 = vpop.f32.mrf.mxu3  ;;  %v849_v1 = vadd.f32 %v848_v41, %v800_v20  ;;  %v801_v43 = vpop.f32.mrf.mxu1  ;;  %1817 = vmatpush.bf16.msrb.mxu1 %v13992_v23 }
 0x14e   :  { %v802_v6 = vadd.f32 %v801_v43, %v752_v3 }
 0x14f   :  { %v14149_v2 = vadd.f32 %v897_v42, %v849_v1 }
 0x150   :  { %1769 = vmatpush.bf16.msrb.mxu0 %v14011_v26 }
 0x151   :  { %1818 = vmatpush.bf16.msrb.mxu1 %v14016_v27 }
 0x154   :  { %v850_v49 = vpop.f32.mrf.mxu2  ;;  %v755_v21 = vpop.f32.mrf.mxu0  ;;  %1770 = vmatpush.bf16.msrb.mxu0 %v14031_v30  ;;  %v14178_v30 = vld [vmem:[%s15988_s20 + $0xb8] sm:$0xff] }
 0x155   :  { %v899_v51 = vpop.f32.mrf.mxu3  ;;  %v851_v10 = vadd.f32 %v850_v49, %v802_v6  ;;  %v804_v25 = vpop.f32.mrf.mxu1  ;;  %1819 = vmatpush.bf16.msrb.mxu1 %v14036_v31  ;;  %v14206_v6 = vld [vmem:[%s15988_s20 + $0x98] sm:$0xff] }
 0x156   :  { %v805_v58 = vadd.f32 %v804_v25, %v755_v21 }
 0x157   :  { %v14155_v59 = vadd.f32 %v899_v51, %v851_v10  ;;  %1152 = vmatmul.bf16.gmra.mxu0 %v9752_v11  ;;  %v14213_v11 = vld [vmem:[%s15988_s20 + $0x78] sm:$0xff]  ;;  %v14225_v10 = vld [vmem:[%s15988_s20 + $0x70] sm:$0xff] }
 0x158   :  { %1201 = vmatmul.bf16.gmra.mxu1 %v9756_v53 }
 0x159   :  { %v913_v14 = vpack.c.bf16 %v14155_v59, %v14149_v2  ;;  %1250 = vmatmul.bf16.gmra.mxu2 %v9760_v54 }
 0x15a   :  { %1299 = vmatmul.bf16.gmra.mxu3 %v9764_v57 }
 0x15c   :  { %v853_v15 = vpop.f32.mrf.mxu2  ;;  %v757_v16 = vpop.f32.mrf.mxu0 }
 0x15d   :  { %v902_v60 = vpop.f32.mrf.mxu3  ;;  %v854_v61 = vadd.f32 %v853_v15, %v805_v58  ;;  %v806_v19 = vpop.f32.mrf.mxu1  ;;  %v14232_v58 = vld [vmem:[%s15988_s20 + $0x68] sm:$0xff] }
 0x15e   :  { %v807_v63 = vadd.f32 %v806_v19, %v757_v16  ;;  %v14238_v16 = vld [vmem:[%s15988_s20 + $0x80] sm:$0xff] }
 0x15f   :  { %v14163_v18 = vadd.f32 %v902_v60, %v854_v61 }
 0x164   :  { %v855_v29 = vpop.f32.mrf.mxu2  ;;  %v1118_v22 = vpop.f32.mrf.mxu0 }
 0x165   :  { %v904_v23 = vpop.f32.mrf.mxu3  ;;  %v856_v32 = vadd.f32 %v855_v29, %v807_v63  ;;  %v1167_v33 = vpop.f32.mrf.mxu1  ;;  %v14248_v63 = vld [vmem:[%s15988_s20 + $0x60] sm:$0xff] }
 0x166   :  { %v1168_v50 = vadd.f32 %v1167_v33, %v1118_v22  ;;  %v14255_v22 = vld [vmem:[%s15988_s20 + $0x58] sm:$0xff]  ;;  %v14261_v33 = vld [vmem:[%s15988_s20 + $0x50] sm:$0xff] }
 0x167   :  { %v14167_v34 = vadd.f32 %v904_v23, %v856_v32 }
 0x168   :  { %9773 = vmatmul.msk.bf16.vlgmr.msra.gmra.mxu1 %vm1315_vm2, %v907_v17  ;;  %v14190_v17 = vld [vmem:[%s15988_s20 + $0xa8] sm:$0xff] }
 0x169   :  { %v914_v27 = vpack.c.bf16 %v14167_v34, %v14163_v18  ;;  %2254 = vmatpush.bf16.msra.mxu1 %v14178_v30  ;;  %v9793_v18 = vld [vmem:[#allocation2 + $0x218] sm:$0xf0] }
 0x16c   :  { %v1216_v31 = vpop.f32.mrf.mxu2  ;;  %v1120_v41 = vpop.f32.mrf.mxu0 }
 0x16d   :  { %v1265_v20 = vpop.f32.mrf.mxu3  ;;  %v1169_v42 = vpop.f32.mrf.mxu1  ;;  %2255 = vmatpush.bf16.msra.mxu1 %v14184_v37  ;;  %v1217_v1 = vadd.f32 %v1216_v31, %v1168_v50  ;;  %v14267_v50 = vld [vmem:[%s15988_s20 + $0x48] sm:$0xff] }
 0x16e   :  { %v1170_v3 = vadd.f32 %v1169_v42, %v1120_v41 }
 0x16f   :  { %v1266_v4 = vadd.f32 %v1265_v20, %v1217_v1 }
 0x171   :  { %2256 = vmatpush.bf16.msra.mxu1 %v14190_v17 }
 0x174   :  { %v1218_v43 = vpop.f32.mrf.mxu2  ;;  %v1123_v5 = vpop.f32.mrf.mxu0 }
 0x175   :  { %v1267_v45 = vpop.f32.mrf.mxu3  ;;  %v1219_v28 = vadd.f32 %v1218_v43, %v1170_v3  ;;  %v1172_v46 = vpop.f32.mrf.mxu1  ;;  %2257 = vmatpush.bf16.msra.mxu1 %v14196_v47 }
 0x176   :  { %v1173_v53 = vadd.f32 %v1172_v46, %v1123_v5  ;;  %v14277_v5 = vld [vmem:[%s15988_s20 + $0x40] sm:$0xff] }
 0x177   :  { %v1268_v7 = vadd.f32 %v1267_v45, %v1219_v28 }
 0x178   :  { %9774 = vmatmul.msk.bf16.gmra.mxu1 %vm1315_vm2, %v908_v39  ;;  %v14219_v39 = vld [vmem:[%s15988_s20 + $0x90] sm:$0xff] }
 0x179   :  { %v1305_v48 = vpack.c.bf16 %v1268_v7, %v1266_v4  ;;  %2258 = vmatpush.bf16.msra.mxu1 %v14206_v6 }
 0x17b   :  { %9765 = vmatmul.msk.bf16.vlgmr.msra.gmra.mxu0 %vm1315_vm2, %v1305_v48 }
 0x17c   :  { %v1221_v49 = vpop.f32.mrf.mxu2  ;;  %2205 = vmatpush.bf16.msra.mxu0 %v14213_v11  ;;  %v1125_v12 = vpop.f32.mrf.mxu0 }
 0x17d   :  { %v1270_v51 = vpop.f32.mrf.mxu3  ;;  %v1174_v38 = vpop.f32.mrf.mxu1  ;;  %2259 = vmatpush.bf16.msra.mxu1 %v14219_v39  ;;  %v1222_v21 = vadd.f32 %v1221_v49, %v1173_v53 }
 0x17e   :  { %v1175_v25 = vadd.f32 %v1174_v38, %v1125_v12 }
 0x180   :  { %2206 = vmatpush.bf16.msra.mxu0 %v14225_v10 }
 0x181   :  { %2260 = vmatpush.bf16.msra.mxu1 %v14011_v26  ;;  %v1271_v26 = vadd.f32 %v1270_v51, %v1222_v21 }
 0x184   :  { %v1223_v54 = vpop.f32.mrf.mxu2  ;;  %2207 = vmatpush.bf16.msra.mxu0 %v14232_v58  ;;  %v1128_v60 = vpop.f32.mrf.mxu0 }
 0x185   :  { %v1272_v57 = vpop.f32.mrf.mxu3  ;;  %v1224_v15 = vadd.f32 %v1223_v54, %v1175_v25  ;;  %v1177_v61 = vpop.f32.mrf.mxu1  ;;  %2261 = vmatpush.bf16.msra.mxu1 %v14238_v16 }
 0x187   :  { %v1273_v19 = vadd.f32 %v1272_v57, %v1224_v15 }
 0x188   :  { %9775 = vmatmul.msk.bf16.gmra.mxu1 %vm1315_vm2, %v909_v56  ;;  %2208 = vmatpush.bf16.msra.mxu0 %v14248_v63  ;;  %v1178_v56 = vadd.f32 %v1177_v61, %v1128_v60 }
 0x189   :  { %v1306_v29 = vpack.c.bf16 %v1273_v19, %v1271_v26 }
 0x18b   :  { %9766 = vmatmul.msk.bf16.gmra.mxu0 %vm1315_vm2, %v1306_v29 }
 0x18c   :  { %v1226_v23 = vpop.f32.mrf.mxu2  ;;  %2209 = vmatpush.bf16.msra.mxu0 %v14255_v22  ;;  %v1130_v44 = vpop.f32.mrf.mxu0 }
 0x18d   :  { %v1275_v32 = vpop.f32.mrf.mxu3  ;;  %v1179_v55 = vpop.f32.mrf.mxu1  ;;  %v1227_v31 = vadd.f32 %v1226_v23, %v1178_v56 }
 0x18e   :  { %v1180_v20 = vadd.f32 %v1179_v55, %v1130_v44 }
 0x18f   :  { %v1276_v45 = vadd.f32 %v1275_v32, %v1227_v31 }
 0x190   :  { %2210 = vmatpush.bf16.msra.mxu0 %v14261_v33 }
 0x194   :  { %v1228_v41 = vpop.f32.mrf.mxu2  ;;  %2211 = vmatpush.bf16.msra.mxu0 %v14267_v50  ;;  %v1133_v3 = vpop.f32.mrf.mxu0 }
 0x195   :  { %v1277_v42 = vpop.f32.mrf.mxu3  ;;  %v1229_v1 = vadd.f32 %v1228_v41, %v1180_v20  ;;  %v1182_v43 = vpop.f32.mrf.mxu1 }
 0x196   :  { %v1183_v51 = vadd.f32 %v1182_v43, %v1133_v3 }
 0x197   :  { %v1278_v28 = vadd.f32 %v1277_v42, %v1229_v1 }
 0x198   :  { %9776 = vmatmul.msk.bf16.gmra.mxu1 %vm1315_vm2, %v910_v13  ;;  %2212 = vmatpush.bf16.msra.mxu0 %v14277_v5 }
 0x199   :  { %v1307_v46 = vpack.c.bf16 %v1278_v28, %v1276_v45 }
 0x19b   :  { %9767 = vmatmul.msk.bf16.gmra.mxu0 %vm1315_vm2, %v1307_v46 }
 0x19c   :  { %v1231_v4 = vpop.f32.mrf.mxu2  ;;  %v1135_v48 = vpop.f32.mrf.mxu0 }
 0x19d   :  { %v1280_v7 = vpop.f32.mrf.mxu3  ;;  %v1184_v49 = vpop.f32.mrf.mxu1  ;;  %v1232_v12 = vadd.f32 %v1231_v4, %v1183_v51 }
 0x19e   :  { %v1185_v38 = vadd.f32 %v1184_v49, %v1135_v48 }
 0x19f   :  { %v1281_v25 = vadd.f32 %v1280_v7, %v1232_v12 }
 0x1a4   :  { %v1233_v62 = vpop.f32.mrf.mxu2  ;;  %v1138_v53 = vpop.f32.mrf.mxu0 }
 0x1a5   :  { %v1282_v9 = vpop.f32.mrf.mxu3  ;;  %v1234_v13 = vadd.f32 %v1233_v62, %v1185_v38  ;;  %v1187_v21 = vpop.f32.mrf.mxu1  ;;  %v9784_v38 = vor.u32 %v12590_v35, %v9783_v0  ;;  %v9785_v62 = vld [vmem:[#allocation2 + $0x210] sm:$0xf0] }
 0x1a6   :  { %v1188_v19 = vadd.f32 %v1187_v21, %v1138_v53  ;;  %v9817_v35 = vld [vmem:[#allocation2 + $0x250] sm:$0xf0] }
 0x1a7   :  { %v1283_v54 = vadd.f32 %v1282_v9, %v1234_v13  ;;  %1673 = vmatmul.bf16.vlgmr.msra.gmra.mxu2 %v9784_v38  ;;  %v12593_v38 = vld [vmem:[#allocation2 + $0x22c] sm:$0xf] }
 0x1a8   :  { %9777 = vmatmul.msk.bf16.gmra.mxu1 %vm1315_vm2, %v911_v24 }
 0x1a9   :  { %v1308_v57 = vpack.c.bf16 %v1283_v54, %v1281_v25 }
 0x1ab   :  { %9768 = vmatmul.msk.bf16.gmra.mxu0 %vm1315_vm2, %v1308_v57 }
 0x1ac   :  { %v1236_v15 = vpop.f32.mrf.mxu2  ;;  %v1140_v61 = vpop.f32.mrf.mxu0 }
 0x1ad   :  { %v1285_v60 = vpop.f32.mrf.mxu3  ;;  %v1189_v26 = vpop.f32.mrf.mxu1  ;;  %v1237_v29 = vadd.f32 %v1236_v15, %v1188_v19 }
 0x1ae   :  { %v1190_v23 = vadd.f32 %v1189_v26, %v1140_v61 }
 0x1af   :  { %v1286_v20 = vadd.f32 %v1285_v60, %v1237_v29  ;;  %v9799_v29 = vld [vmem:[#allocation2 + $0x220] sm:$0xf] }
 0x1b4   :  { %v1238_v32 = vpop.f32.mrf.mxu2  ;;  %v1143_v56 = vpop.f32.mrf.mxu0 }
 0x1b5   :  { %v1287_v44 = vpop.f32.mrf.mxu3  ;;  %v1239_v55 = vadd.f32 %v1238_v32, %v1190_v23  ;;  %v1192_v31 = vpop.f32.mrf.mxu1  ;;  %v12594_v23 = vld [vmem:[#allocation2 + $0x22c] sm:$0xf0]  ;;  %v12592_v32 = vld [vmem:[#allocation2 + $0x224] sm:$0xf] }
 0x1b6   :  { %v1193_v3 = vadd.f32 %v1192_v31, %v1143_v56  ;;  %v9801_v56 = vld [vmem:[#allocation2 + $0x230] sm:$0xf0] }
 0x1b7   :  { %v1288_v41 = vadd.f32 %v1287_v44, %v1239_v55  ;;  %v9800_v55 = vor.u32 %v12594_v23, %v9799_v29  ;;  %v9804_v31 = vor.u32 %v12592_v32, %v9801_v56  ;;  %v12597_v23 = vld [vmem:[#allocation2 + $0x24c] sm:$0xf]  ;;  %v9825_v32 = vld [vmem:[#allocation2 + $0x258] sm:$0xf0] }
 0x1b8   :  { %9778 = vmatmul.msk.bf16.gmra.mxu1 %vm1315_vm2, %v912_v40  ;;  %v12588_v40 = vld [vmem:[#allocation2 + $0x204] sm:$0xf]  ;;  %v9828_v56 = vor.u32 %v12597_v23, %v9825_v32  ;;  %v9879_v32 = vld [vmem:[#allocation2 + $0x2c0] sm:$0xf] }
 0x1b9   :  { %v1309_v8 = vpack.c.bf16 %v1288_v41, %v1286_v20  ;;  %v9788_v9 = vor.u32 %v12588_v40, %v9785_v62  ;;  %1678 = vmatmul.bf16.gmra.mxu2 %v9800_v55  ;;  %v9809_v62 = vld [vmem:[#allocation2 + $0x238] sm:$0xf0]  ;;  %v12595_v55 = vld [vmem:[#allocation2 + $0x234] sm:$0xf0] }
 0x1bb   :  { %9769 = vmatmul.msk.bf16.gmra.mxu0 %vm1315_vm2, %v1309_v8  ;;  %1722 = vmatmul.bf16.vlgmr.msra.gmra.mxu3 %v9788_v9  ;;  %v9791_v9 = vld [vmem:[#allocation2 + $0x208] sm:$0xf] }
 0x1bc   :  { %v1241_v36 = vpop.f32.mrf.mxu2  ;;  %v1145_v42 = vpop.f32.mrf.mxu0 }
 0x1bd   :  { %v1290_v24 = vpop.f32.mrf.mxu3  ;;  %v1194_v1 = vpop.f32.mrf.mxu1  ;;  %v1242_v43 = vadd.f32 %v1241_v36, %v1193_v3 }
 0x1be   :  { %v1195_v45 = vadd.f32 %v1194_v1, %v1145_v42  ;;  %v12589_v42 = vld [vmem:[#allocation2 + $0x20c] sm:$0xf] }
 0x1bf   :  { %v1291_v49 = vadd.f32 %v1290_v24, %v1242_v43  ;;  %v9796_v3 = vor.u32 %v12589_v42, %v9793_v18 }
 0x1c4   :  { %v1243_v28 = vpop.f32.mrf.mxu2  ;;  %v1148_v7 = vpop.f32.mrf.mxu0 }
 0x1c5   :  { %v1292_v46 = vpop.f32.mrf.mxu3  ;;  %v1244_v4 = vadd.f32 %v1243_v28, %v1195_v45  ;;  %v1197_v48 = vpop.f32.mrf.mxu1 }
 0x1c6   :  { %v1198_v54 = vadd.f32 %v1197_v48, %v1148_v7  ;;  %v9815_v7 = vld [vmem:[#allocation2 + $0x240] sm:$0xf]  ;;  %v12598_v48 = vld [vmem:[#allocation2 + $0x24c] sm:$0xf0] }
 0x1c7   :  { %v1293_v51 = vadd.f32 %v1292_v46, %v1244_v4  ;;  %v9816_v0 = vor.u32 %v12598_v48, %v9815_v7  ;;  %v12599_v7 = vld [vmem:[#allocation2 + $0x254] sm:$0xf0] }
 0x1c8   :  { %9779 = vmatmul.msk.bf16.gmra.mxu1 %vm1315_vm2, %v913_v14 }
 0x1c9   :  { %v1310_v12 = vpack.c.bf16 %v1293_v51, %v1291_v49  ;;  %v12596_v49 = vld [vmem:[#allocation2 + $0x244] sm:$0xf]  ;;  %1683 = vmatmul.bf16.gmra.mxu2 %v9816_v0 }
 0x1ca   :  { %v9820_v40 = vor.u32 %v12596_v49, %v9817_v35  ;;  %v14357_v49 = vld [vmem:[%s15988_s20 + $0x8] sm:$0xff] }
 0x1cb   :  { %9770 = vmatmul.msk.bf16.gmra.mxu0 %vm1315_vm2, %v1310_v12  ;;  %1727 = vmatmul.bf16.gmra.mxu3 %v9804_v31 }
 0x1cc   :  { %v1246_v13 = vpop.f32.mrf.mxu2  ;;  %v1150_v21 = vpop.f32.mrf.mxu0 }
 0x1cd   :  { %v1295_v53 = vpop.f32.mrf.mxu3  ;;  %v1199_v25 = vpop.f32.mrf.mxu1  ;;  %v1247_v57 = vadd.f32 %v1246_v13, %v1198_v54  ;;  %v12591_v13 = vld [vmem:[#allocation2 + $0x214] sm:$0xf0] }
 0x1ce   :  { %v1200_v2 = vadd.f32 %v1199_v25, %v1150_v21  ;;  %v9792_v25 = vor.u32 %v12591_v13, %v9791_v9 }
 0x1cf   :  { %v1296_v26 = vadd.f32 %v1295_v53, %v1247_v57  ;;  %v9812_v53 = vor.u32 %v12593_v38, %v9809_v62  ;;  %v9831_v57 = vld [vmem:[#allocation2 + $0x260] sm:$0xf]  ;;  %v12608_v38 = vld [vmem:[#allocation2 + $0x2a4] sm:$0xf] }
 0x1d0   :  { %v14363_v62 = vld [vmem:[%s15988_s20] sm:$0xff] }
 0x1d4   :  { %v1248_v59 = vpop.f32.mrf.mxu2  ;;  %v1153_v61 = vpop.f32.mrf.mxu0 }
 0x1d5   :  { %v1297_v14 = vpop.f32.mrf.mxu3  ;;  %v1249_v15 = vadd.f32 %v1248_v59, %v1200_v2  ;;  %v1202_v60 = vpop.f32.mrf.mxu1  ;;  %v12602_v2 = vld [vmem:[#allocation2 + $0x26c] sm:$0xf0]  ;;  %v12600_v59 = vld [vmem:[#allocation2 + $0x264] sm:$0xf] }
 0x1d6   :  { %v1203_v36 = vadd.f32 %v1202_v60, %v1153_v61 }
 0x1d7   :  { %v1298_v19 = vadd.f32 %v1297_v14, %v1249_v15  ;;  %v9832_v15 = vor.u32 %v12602_v2, %v9831_v57  ;;  %v12605_v2 = vld [vmem:[#allocation2 + $0x28c] sm:$0xf] }
 0x1d8   :  { %9780 = vmatmul.msk.bf16.gmra.mxu1 %vm1315_vm2, %v914_v27 }
 0x1d9   :  { %v1311_v44 = vpack.c.bf16 %v1298_v19, %v1296_v26  ;;  %1688 = vmatmul.bf16.gmra.mxu2 %v9832_v15  ;;  %v14319_v19 = vld [vmem:[%s15988_s20 + $0x30] sm:$0xff]  ;;  %v9839_v15 = vld [vmem:[#allocation2 + $0x268] sm:$0xf] }
 0x1db   :  { %9771 = vmatmul.msk.bf16.gmra.mxu0 %vm1315_vm2, %v1311_v44  ;;  %1732 = vmatmul.bf16.gmra.mxu3 %v9820_v40  ;;  %v9807_v44 = vld [vmem:[#allocation2 + $0x228] sm:$0xf]  ;;  %v9863_v40 = vld [vmem:[#allocation2 + $0x2a0] sm:$0xf] }
 0x1dc   :  { %v1251_v20 = vpop.f32.mrf.mxu2  ;;  %v1155_v24 = vpop.f32.mrf.mxu0 }
 0x1dd   :  { %v1300_v41 = vpop.f32.mrf.mxu3  ;;  %v1204_v8 = vpop.f32.mrf.mxu1  ;;  %v1252_v34 = vadd.f32 %v1251_v20, %v1203_v36  ;;  %v9808_v20 = vor.u32 %v12595_v55, %v9807_v44  ;;  %v12606_v36 = vld [vmem:[#allocation2 + $0x28c] sm:$0xf0]  ;;  %v12612_v55 = vld [vmem:[#allocation2 + $0x2c4] sm:$0xf] }
 0x1de   :  { %v1205_v27 = vadd.f32 %v1204_v8, %v1155_v24  ;;  %v9847_v8 = vld [vmem:[#allocation2 + $0x280] sm:$0xf]  ;;  %v12604_v24 = vld [vmem:[#allocation2 + $0x284] sm:$0xf]  ;;  %v12614_v44 = vld [vmem:[#allocation2 + $0x2cc] sm:$0xf0] }
 0x1df   :  { %v1301_v46 = vadd.f32 %v1300_v41, %v1252_v34  ;;  %v9848_v18 = vor.u32 %v12606_v36, %v9847_v8  ;;  %v9849_v34 = vld [vmem:[#allocation2 + $0x290] sm:$0xf0] }
 0x1e4   :  { %v1253_v1 = vpop.f32.mrf.mxu2 }
 0x1e5   :  { %v1254_v43 = vadd.f32 %v1253_v1, %v1205_v27  ;;  %v1432_v45 = vpop.f32.mrf.mxu1  ;;  %v1302_v28 = vpop.f32.mrf.mxu3  ;;  %v9852_v27 = vor.u32 %v12604_v24, %v9849_v34  ;;  %v9873_v34 = vld [vmem:[#allocation2 + $0x2b8] sm:$0xf0] }
 0x1e7   :  { %v1303_v4 = vadd.f32 %v1302_v28, %v1254_v43  ;;  %v14349_v43 = vld [vmem:[%s15988_s20 + $0x10] sm:$0xff]  ;;  %v12601_v28 = vld [vmem:[#allocation2 + $0x26c] sm:$0xf] }
 0x1e8   :  { %1820 = vmatmul.bf16.vlgmr.msrb.gmra.mxu1 %v9796_v3 }
 0x1e9   :  { %v1312_v51 = vpack.c.bf16 %v1303_v4, %v1301_v46  ;;  %2696 = vmatpush.bf16.msrb.mxu1 %v14213_v11  ;;  %1693 = vmatmul.bf16.gmra.mxu2 %v9848_v18  ;;  %v9841_v46 = vld [vmem:[#allocation2 + $0x278] sm:$0xf0]  ;;  %v9823_v4 = vld [vmem:[#allocation2 + $0x248] sm:$0xf]  ;;  %v12609_v18 = vld [vmem:[#allocation2 + $0x2ac] sm:$0xf] }
 0x1ea   :  { %v9844_v48 = vor.u32 %v12601_v28, %v9841_v46  ;;  %v9824_v0 = vor.u32 %v12599_v7, %v9823_v4  ;;  %v9895_v7 = vld [vmem:[#allocation2 + $0x2e0] sm:$0xf] }
 0x1eb   :  { %9772 = vmatmul.msk.bf16.gmra.mxu0 %vm1315_vm2, %v1312_v51 }
 0x1ed   :  { %v1434_v12 = vpop.f32.mrf.mxu1  ;;  %2697 = vmatpush.bf16.msrb.mxu1 %v14225_v10  ;;  %v9833_v10 = vld [vmem:[#allocation2 + $0x270] sm:$0xf0] }
 0x1ee   :  { %v9836_v60 = vor.u32 %v12600_v59, %v9833_v10  ;;  %v9857_v59 = vld [vmem:[#allocation2 + $0x298] sm:$0xf0]  ;;  %v12603_v10 = vld [vmem:[#allocation2 + $0x274] sm:$0xf0] }
 0x1f0   :  { %1737 = vmatmul.bf16.gmra.mxu3 %v9836_v60  ;;  %v9860_v60 = vor.u32 %v12605_v2, %v9857_v59 }
 0x1f1   :  { %2698 = vmatpush.bf16.msrb.mxu1 %v14232_v58  ;;  %v14312_v58 = vld [vmem:[%s15988_s20 + $0x38] sm:$0xff] }
 0x1f5   :  { %v1437_v21 = vpop.f32.mrf.mxu1  ;;  %2699 = vmatpush.bf16.msrb.mxu1 %v14248_v63 }
 0x1f8   :  { %v1356_v54 = vpop.f32.mrf.mxu0  ;;  %1825 = vmatmul.bf16.gmra.mxu1 %v9812_v53  ;;  %v9865_v53 = vld [vmem:[#allocation2 + $0x2b0] sm:$0xf0] }
 0x1f9   :  { %v14306_v14 = vadd.f32 %v1432_v45, %v1356_v54  ;;  %2700 = vmatpush.bf16.msrb.mxu1 %v14255_v22 }
 0x1fb   :  { %1771 = vmatmul.bf16.vlgmr.msrb.gmra.mxu0 %v9792_v25 }
 0x1fc   :  { %2647 = vmatpush.bf16.msrb.mxu0 %v14312_v58 }
 0x1fd   :  { %v1439_v61 = vpop.f32.mrf.mxu1  ;;  %2701 = vmatpush.bf16.msrb.mxu1 %v14261_v33  ;;  %v14328_v33 = vld [vmem:[%s15988_s20 + $0x28] sm:$0xff] }
 0x200   :  { %v1358_v26 = vpop.f32.mrf.mxu0  ;;  %2648 = vmatpush.bf16.msrb.mxu0 %v14319_v19  ;;  %1742 = vmatmul.bf16.gmra.mxu3 %v9852_v27  ;;  %v9855_v27 = vld [vmem:[#allocation2 + $0x288] sm:$0xf] }
 0x201   :  { %v14322_v29 = vadd.f32 %v1434_v12, %v1358_v26  ;;  %2702 = vmatpush.bf16.msrb.mxu1 %v14267_v50  ;;  %v14335_v50 = vld [vmem:[%s15988_s20 + $0x20] sm:$0xff]  ;;  %v12610_v12 = vld [vmem:[#allocation2 + $0x2ac] sm:$0xf0]  ;;  %v9840_v26 = vor.u32 %v12603_v10, %v9839_v15 }
 0x202   :  { %v9864_v13 = vor.u32 %v12610_v12, %v9863_v40  ;;  %v9897_v40 = vld [vmem:[#allocation2 + $0x2f0] sm:$0xf0] }
 0x204   :  { %2649 = vmatpush.bf16.msrb.mxu0 %v14328_v33  ;;  %1698 = vmatmul.bf16.gmra.mxu2 %v9864_v13 }
 0x205   :  { %v1442_v31 = vpop.f32.mrf.mxu1  ;;  %2703 = vmatpush.bf16.msrb.mxu1 %v14277_v5  ;;  %v14343_v5 = vld [vmem:[%s15988_s20 + $0x18] sm:$0xff] }
 0x208   :  { %v1361_v41 = vpop.f32.mrf.mxu0  ;;  %1830 = vmatmul.bf16.gmra.mxu1 %v9828_v56  ;;  %2650 = vmatpush.bf16.msrb.mxu0 %v14335_v50 }
 0x209   :  { %v14338_v42 = vadd.f32 %v1437_v21, %v1361_v41  ;;  %v9868_v21 = vor.u32 %v12608_v38, %v9865_v53  ;;  %v12613_v53 = vld [vmem:[#allocation2 + $0x2cc] sm:$0xf] }
 0x20b   :  { %1776 = vmatmul.bf16.gmra.mxu0 %v9808_v20  ;;  %v9881_v20 = vld [vmem:[#allocation2 + $0x2d0] sm:$0xf0] }
 0x20c   :  { %2651 = vmatpush.bf16.msrb.mxu0 %v14343_v5  ;;  %v9884_v41 = vor.u32 %v12612_v55, %v9881_v20  ;;  %v12617_v55 = vld [vmem:[#allocation2 + $0x2ec] sm:$0xf]  ;;  %v14398_v20 = vld [vmem:[%s15988_s20 + $0xf0] sm:$0xff] }
 0x20d   :  { %v1444_v1 = vpop.f32.mrf.mxu1 }
 0x210   :  { %v1363_v3 = vpop.f32.mrf.mxu0  ;;  %2652 = vmatpush.bf16.msrb.mxu0 %v14349_v43  ;;  %1747 = vmatmul.bf16.gmra.mxu3 %v9868_v21  ;;  %v9889_v21 = vld [vmem:[#allocation2 + $0x2d8] sm:$0xf0] }
 0x211   :  { %v14352_v45 = vadd.f32 %v1439_v61, %v1363_v3  ;;  %v9876_v3 = vor.u32 %v12609_v18, %v9873_v34  ;;  %v9892_v2 = vor.u32 %v12613_v53, %v9889_v21  ;;  %v14428_v53 = vld [vmem:[%s15988_s20 + $0xd0] sm:$0xff]  ;;  %v9903_v21 = vld [vmem:[#allocation2 + $0x2e8] sm:$0xf] }
 0x214   :  { %2653 = vmatpush.bf16.msrb.mxu0 %v14357_v49 }
 0x215   :  { %v1447_v51 = vpop.f32.mrf.mxu1 }
 0x218   :  { %v1366_v35 = vpop.f32.mrf.mxu0  ;;  %1835 = vmatmul.bf16.gmra.mxu1 %v9844_v48  ;;  %2654 = vmatpush.bf16.msrb.mxu0 %v14363_v62  ;;  %v12618_v48 = vld [vmem:[#allocation2 + $0x2ec] sm:$0xf0] }
 0x219   :  { %v14366_v9 = vadd.f32 %v1442_v31, %v1366_v35  ;;  %v9880_v31 = vor.u32 %v12614_v44, %v9879_v32  ;;  %v9896_v35 = vor.u32 %v12618_v48, %v9895_v7  ;;  %v14390_v32 = vld [vmem:[%s15988_s20 + $0xf8] sm:$0xff]  ;;  %v14412_v7 = vld [vmem:[%s15988_s20 + $0xe0] sm:$0xff] }
 0x21b   :  { %1781 = vmatmul.bf16.gmra.mxu0 %v9824_v0  ;;  %1703 = vmatmul.bf16.gmra.mxu2 %v9880_v31  ;;  %v9905_v31 = vld [vmem:[#allocation2 + $0x2f8] sm:$0xf0] }
 0x21c   :  { %v9908_v18 = vor.u32 %v12617_v55, %v9905_v31 }
 0x21d   :  { %v1449_v25 = vpop.f32.mrf.mxu1 }
 0x220   :  { %v1368_v54 = vpop.f32.mrf.mxu0  ;;  %1752 = vmatmul.bf16.gmra.mxu3 %v9884_v41  ;;  %v9887_v41 = vld [vmem:[#allocation2 + $0x2c8] sm:$0xf] }
 0x221   :  { %v14368_v57 = vadd.f32 %v1444_v1, %v1368_v54  ;;  %v12607_v1 = vld [vmem:[#allocation2 + $0x294] sm:$0xf0] }
 0x222   :  { %v9856_v46 = vor.u32 %v12607_v1, %v9855_v27  ;;  %v12611_v54 = vld [vmem:[#allocation2 + $0x2b4] sm:$0xf0]  ;;  %v14404_v1 = vld [vmem:[%s15988_s20 + $0xe8] sm:$0xff] }
 0x225   :  { %v1452_v61 = vpop.f32.mrf.mxu1 }
 0x228   :  { %v1371_v23 = vpop.f32.mrf.mxu0  ;;  %1840 = vmatmul.bf16.gmra.mxu1 %v9860_v60 }
 0x229   :  { %v14370_v56 = vadd.f32 %v1447_v51, %v1371_v23  ;;  %v12616_v51 = vld [vmem:[#allocation2 + $0x2e4] sm:$0xf] }
 0x22a   :  { %v9900_v12 = vor.u32 %v12616_v51, %v9897_v40  ;;  %v1674_v27 = vpop.f32.mrf.mxu2  ;;  %v14420_v51 = vld [vmem:[%s15988_s20 + $0xd8] sm:$0xff] }
 0x22b   :  { %1786 = vmatmul.bf16.gmra.mxu0 %v9840_v26  ;;  %1708 = vmatmul.bf16.gmra.mxu2 %v9896_v35 }
 0x22d   :  { %v14372_v8 = vpop.f32.mrf.mxu1 }
 0x22e   :  { %15989 = vst [vmem:[#allocation35_spill] sm:$0xff] %v14372_v8 }
 0x230   :  { %v1373_v36 = vpop.f32.mrf.mxu0  ;;  %1757 = vmatmul.bf16.gmra.mxu3 %v9900_v12 }
 0x231   :  { %v14374_v24 = vadd.f32 %v1449_v25, %v1373_v36  ;;  %v9871_v25 = vld [vmem:[#allocation2 + $0x2a8] sm:$0xf]  ;;  %v12615_v36 = vld [vmem:[#allocation2 + $0x2d4] sm:$0xf0] }
 0x232   :  { %v9872_v15 = vor.u32 %v12611_v54, %v9871_v25  ;;  %v1676_v35 = vpop.f32.mrf.mxu2  ;;  %v12619_v25 = vld [vmem:[#allocation2 + $0x2f4] sm:$0xf0] }
 0x235   :  { %v1457_v28 = vpop.f32.mrf.mxu1 }
 0x238   :  { %v1376_v4 = vpop.f32.mrf.mxu0  ;;  %1845 = vmatmul.bf16.gmra.mxu1 %v9876_v3 }
 0x239   :  { %v14376_v0 = vadd.f32 %v1452_v61, %v1376_v4  ;;  %v1870_v61 = vld [vmem:[#allocation5 + $0x4] sm:$0x3] }
 0x23a   :  { %v1896_v26 = vand.u32 %v1870_v61, %v14135_v52 }
 0x23b   :  { %1791 = vmatmul.bf16.gmra.mxu0 %v9856_v46 }
 0x23c   :  { %1905 = vmatpush.bf16.msrb.mxu2 %v1896_v26  ;;  %v1679_v61 = vpop.f32.mrf.mxu2  ;;  %v14442_v26 = vld [vmem:[%s15988_s20 + $0xc0] sm:$0xff] }
 0x23d   :  { %v14378_v38 = vpop.f32.mrf.mxu1  ;;  %15998 = vst [vmem:[#allocation44_spill] sm:$0xff] %v14442_v26 }
 0x23e   :  { %15990 = vst [vmem:[#allocation36_spill] sm:$0xff] %v14378_v38  ;;  %v1723_v3 = vpop.f32.mrf.mxu3 }
 0x240   :  { %v14380_v13 = vpop.f32.mrf.mxu0  ;;  %2303 = vmatpush.bf16.msra.mxu2 %v14390_v32 }
 0x241   :  { %15991 = vst [vmem:[#allocation37_spill] sm:$0xff] %v14380_v13 }
 0x244   :  { %2304 = vmatpush.bf16.msra.mxu2 %v14398_v20 }
 0x245   :  { %v1462_v59 = vpop.f32.mrf.mxu1 }
 0x246   :  { %v1725_v12 = vpop.f32.mrf.mxu3 }
 0x247   :  { %v1726_v8 = vadd.f32 %v1725_v12, %v1676_v35 }
 0x248   :  { %v1381_v10 = vpop.f32.mrf.mxu0  ;;  %1850 = vmatmul.bf16.gmra.mxu1 %v9892_v2  ;;  %2305 = vmatpush.bf16.msra.mxu2 %v14404_v1  ;;  %v14434_v2 = vld [vmem:[%s15988_s20 + $0xc8] sm:$0xff] }
 0x249   :  { %v14382_v60 = vadd.f32 %v1457_v28, %v1381_v10  ;;  %v9888_v28 = vor.u32 %v12615_v36, %v9887_v41  ;;  %15996 = vst [vmem:[#allocation42_spill] sm:$0xff] %v14434_v2  ;;  %v1681_v36 = vpop.f32.mrf.mxu2 }
 0x24b   :  { %1796 = vmatmul.bf16.gmra.mxu0 %v9872_v15 }
 0x24c   :  { %2306 = vmatpush.bf16.msra.mxu2 %v14412_v7 }
 0x24d   :  { %v14385_v23 = vpop.f32.mrf.mxu1 }
 0x24e   :  { %15992 = vst [vmem:[#allocation38_spill] sm:$0xff] %v14385_v23  ;;  %v1728_v55 = vpop.f32.mrf.mxu3 }
 0x250   :  { %v14393_v44 = vpop.f32.mrf.mxu0  ;;  %2307 = vmatpush.bf16.msra.mxu2 %v14420_v51 }
 0x251   :  { %15993 = vst [vmem:[#allocation39_spill] sm:$0xff] %v14393_v44 }
 0x254   :  { %2308 = vmatpush.bf16.msra.mxu2 %v14428_v53 }
 0x255   :  { %v1467_v34 = vpop.f32.mrf.mxu1 }
 0x258   :  { %v1386_v46 = vpop.f32.mrf.mxu0  ;;  %1855 = vmatmul.bf16.gmra.mxu1 %v9908_v18  ;;  %2309 = vmatpush.bf16.msra.mxu2 %v14434_v2  ;;  %v1730_v18 = vpop.f32.mrf.mxu3  ;;  %v1729_v2 = vadd.f32 %v1728_v55, %v1679_v61 }
 0x259   :  { %v14407_v4 = vadd.f32 %v1462_v59, %v1386_v46  ;;  %v9904_v59 = vor.u32 %v12619_v25, %v9903_v21  ;;  %v1724_v21 = vadd.f32 %v1723_v3, %v1674_v27  ;;  %v1684_v25 = vpop.f32.mrf.mxu2  ;;  %v1731_v3 = vadd.f32 %v1730_v18, %v1681_v36 }
 0x25b   :  { %1801 = vmatmul.bf16.gmra.mxu0 %v9888_v28 }
 0x25c   :  { %2310 = vmatpush.bf16.msra.mxu2 %v14442_v26 }
 0x25d   :  { %v14415_v48 = vpop.f32.mrf.mxu1 }
 0x25e   :  { %15994 = vst [vmem:[#allocation40_spill] sm:$0xff] %v14415_v48 }
 0x260   :  { %v14423_v40 = vpop.f32.mrf.mxu0 }
 0x261   :  { %15995 = vst [vmem:[#allocation41_spill] sm:$0xff] %v14423_v40 }
 0x265   :  { %v1821_v54 = vpop.f32.mrf.mxu1 }
 0x268   :  { %v1391_v15 = vpop.f32.mrf.mxu0 }
 0x269   :  { %v14437_v10 = vadd.f32 %v1467_v34, %v1391_v15  ;;  %v1733_v15 = vpop.f32.mrf.mxu3 }
 0x26b   :  { %15997 = vst [vmem:[#allocation43_spill] sm:$0xff] %v14437_v10  ;;  %1806 = vmatmul.bf16.gmra.mxu0 %v9904_v59  ;;  %v1686_v59 = vpop.f32.mrf.mxu2 }
 0x26d   :  { %v1823_v31 = vpop.f32.mrf.mxu1 }
 0x270   :  { %v14445_v41 = vpop.f32.mrf.mxu0 }
 0x271   :  { %15999 = vst [vmem:[#allocation45_spill] sm:$0xff] %v14445_v41  ;;  %v1735_v26 = vpop.f32.mrf.mxu3 }
 0x275   :  { %v1826_v28 = vpop.f32.mrf.mxu1 }
 0x278   :  { %v1772_v46 = vpop.f32.mrf.mxu0 }
 0x279   :  { %v1773_v13 = vadd.f32 %v1772_v46, %v1724_v21 }
 0x27b   :  { %v1822_v48 = vadd.f32 %v1821_v54, %v1773_v13  ;;  %v1738_v13 = vpop.f32.mrf.mxu3 }
 0x27d   :  { %v1828_v34 = vpop.f32.mrf.mxu1 }
 0x280   :  { %v1774_v38 = vpop.f32.mrf.mxu0 }
 0x281   :  { %v1775_v44 = vadd.f32 %v1774_v38, %v1726_v8  ;;  %v1689_v38 = vpop.f32.mrf.mxu2 }
 0x283   :  { %v1824_v23 = vadd.f32 %v1823_v31, %v1775_v44  ;;  %v14458_v31 = vld [vmem:[%s15988_s20 + $0x88] sm:$0xff] }
 0x285   :  { %v1861_v40 = vpack.c.bf16 %v1824_v23, %v1822_v48  ;;  %v1831_v10 = vpop.f32.mrf.mxu1 }
 0x287   :  { %9909 = vmatmul.msk.bf16.vlgmr.msrb.gmra.mxu2 %vm1315_vm2, %v1861_v40 }
 0x288   :  { %v1777_v41 = vpop.f32.mrf.mxu0  ;;  %2745 = vmatpush.bf16.msrb.mxu2 %v14178_v30 }
 0x289   :  { %v1778_v35 = vadd.f32 %v1777_v41, %v1729_v2  ;;  %v1691_v54 = vpop.f32.mrf.mxu2  ;;  %v1740_v2 = vpop.f32.mrf.mxu3 }
 0x28b   :  { %v1827_v23 = vadd.f32 %v1826_v28, %v1778_v35 }
 0x28c   :  { %2746 = vmatpush.bf16.msrb.mxu2 %v14184_v37  ;;  %v1734_v37 = vadd.f32 %v1733_v15, %v1684_v25 }
 0x28d   :  { %v1833_v27 = vpop.f32.mrf.mxu1 }
 0x290   :  { %v1779_v12 = vpop.f32.mrf.mxu0  ;;  %2747 = vmatpush.bf16.msrb.mxu2 %v14190_v17  ;;  %v1736_v17 = vadd.f32 %v1735_v26, %v1686_v59  ;;  %v1739_v26 = vadd.f32 %v1738_v13, %v1689_v38 }
 0x291   :  { %v1780_v8 = vadd.f32 %v1779_v12, %v1731_v3  ;;  %v1694_v28 = vpop.f32.mrf.mxu2  ;;  %v1743_v46 = vpop.f32.mrf.mxu3 }
 0x293   :  { %v1829_v44 = vadd.f32 %v1828_v34, %v1780_v8  ;;  %v1741_v34 = vadd.f32 %v1740_v2, %v1691_v54 }
 0x294   :  { %2748 = vmatpush.bf16.msrb.mxu2 %v14196_v47 }
 0x295   :  { %v1862_v48 = vpack.c.bf16 %v1829_v44, %v1827_v23  ;;  %v1836_v40 = vpop.f32.mrf.mxu1 }
 0x297   :  { %9910 = vmatmul.msk.bf16.gmra.mxu2 %vm1315_vm2, %v1862_v48  ;;  %v1744_v48 = vadd.f32 %v1743_v46, %v1694_v28 }
 0x298   :  { %v1782_v30 = vpop.f32.mrf.mxu0  ;;  %2749 = vmatpush.bf16.msrb.mxu2 %v14206_v6 }
 0x299   :  { %v1783_v61 = vadd.f32 %v1782_v30, %v1734_v37  ;;  %v1696_v15 = vpop.f32.mrf.mxu2  ;;  %v1745_v3 = vpop.f32.mrf.mxu3 }
 0x29a   :  { %v1746_v30 = vadd.f32 %v1745_v3, %v1696_v15  ;;  %v9919_v3 = vld [vmem:[#allocation2 + $0x300] sm:$0xf] }
 0x29b   :  { %v1832_v36 = vadd.f32 %v1831_v10, %v1783_v61 }
 0x29c   :  { %2750 = vmatpush.bf16.msrb.mxu2 %v14219_v39 }
 0x29d   :  { %v1838_v41 = vpop.f32.mrf.mxu1 }
 0x2a0   :  { %v1784_v55 = vpop.f32.mrf.mxu0  ;;  %2751 = vmatpush.bf16.msrb.mxu2 %v14458_v31 }
 0x2a1   :  { %v1785_v47 = vadd.f32 %v1784_v55, %v1736_v17  ;;  %v1699_v23 = vpop.f32.mrf.mxu2  ;;  %v1748_v44 = vpop.f32.mrf.mxu3 }
 0x2a3   :  { %v1834_v18 = vadd.f32 %v1833_v27, %v1785_v47 }
 0x2a4   :  { %2752 = vmatpush.bf16.msrb.mxu2 %v14238_v16 }
 0x2a5   :  { %v1863_v6 = vpack.c.bf16 %v1834_v18, %v1832_v36  ;;  %v1841_v21 = vpop.f32.mrf.mxu1  ;;  %v1749_v36 = vadd.f32 %v1748_v44, %v1699_v23  ;;  %v9927_v23 = vld [vmem:[#allocation2 + $0x308] sm:$0xf]  ;;  %v12623_v44 = vld [vmem:[#allocation2 + $0x314] sm:$0xf0] }
 0x2a7   :  { %9911 = vmatmul.msk.bf16.gmra.mxu2 %vm1315_vm2, %v1863_v6 }
 0x2a8   :  { %v1787_v39 = vpop.f32.mrf.mxu0 }
 0x2a9   :  { %v1788_v25 = vadd.f32 %v1787_v39, %v1739_v26  ;;  %v1701_v61 = vpop.f32.mrf.mxu2  ;;  %v1750_v55 = vpop.f32.mrf.mxu3 }
 0x2aa   :  { %v1751_v39 = vadd.f32 %v1750_v55, %v1701_v61 }
 0x2ab   :  { %v1837_v12 = vadd.f32 %v1836_v40, %v1788_v25 }
 0x2ad   :  { %v1843_v27 = vpop.f32.mrf.mxu1 }
 0x2b0   :  { %v1789_v59 = vpop.f32.mrf.mxu0 }
 0x2b1   :  { %v1790_v35 = vadd.f32 %v1789_v59, %v1741_v34  ;;  %v1704_v18 = vpop.f32.mrf.mxu2  ;;  %v1753_v6 = vpop.f32.mrf.mxu3 }
 0x2b3   :  { %v1839_v8 = vadd.f32 %v1838_v41, %v1790_v35  ;;  %v12622_v35 = vld [vmem:[#allocation2 + $0x30c] sm:$0xf0] }
 0x2b5   :  { %v1864_v10 = vpack.c.bf16 %v1839_v8, %v1837_v12  ;;  %v1846_v13 = vpop.f32.mrf.mxu1  ;;  %v12620_v12 = vld [vmem:[#allocation2 + $0x304] sm:$0xf] }
 0x2b7   :  { %9912 = vmatmul.msk.bf16.gmra.mxu2 %vm1315_vm2, %v1864_v10 }
 0x2b8   :  { %v1792_v16 = vpop.f32.mrf.mxu0 }
 0x2b9   :  { %v1793_v37 = vadd.f32 %v1792_v16, %v1744_v48  ;;  %v1755_v8 = vpop.f32.mrf.mxu3  ;;  %v9921_v16 = vld [vmem:[#allocation2 + $0x310] sm:$0xf0] }
 0x2ba   :  { %v9924_v48 = vor.u32 %v12620_v12, %v9921_v16  ;;  %v12630_v16 = vld [vmem:[#allocation2 + $0x34c] sm:$0xf0] }
 0x2bb   :  { %v1842_v2 = vadd.f32 %v1841_v21, %v1793_v37  ;;  %v1706_v21 = vpop.f32.mrf.mxu2  ;;  %v1754_v37 = vadd.f32 %v1753_v6, %v1704_v18  ;;  %v9935_v6 = vld [vmem:[#allocation2 + $0x320] sm:$0xf] }
 0x2bc   :  { %2213 = vmatmul.bf16.vlgmr.msra.gmra.mxu0 %v9924_v48  ;;  %v9953_v48 = vld [vmem:[#allocation2 + $0x350] sm:$0xf0] }
 0x2bd   :  { %v1848_v41 = vpop.f32.mrf.mxu1 }
 0x2c0   :  { %v1794_v38 = vpop.f32.mrf.mxu0 }
 0x2c1   :  { %v1795_v54 = vadd.f32 %v1794_v38, %v1746_v30  ;;  %v9928_v30 = vor.u32 %v12623_v44, %v9927_v23  ;;  %v1758_v55 = vpop.f32.mrf.mxu3  ;;  %v12628_v44 = vld [vmem:[#allocation2 + $0x344] sm:$0xf] }
 0x2c3   :  { %v1844_v17 = vadd.f32 %v1843_v27, %v1795_v54  ;;  %v9920_v27 = vor.u32 %v12622_v35, %v9919_v3  ;;  %2262 = vmatmul.bf16.vlgmr.msra.gmra.mxu1 %v9928_v30  ;;  %v1709_v61 = vpop.f32.mrf.mxu2  ;;  %v12627_v3 = vld [vmem:[#allocation2 + $0x334] sm:$0xf0]  ;;  %v12621_v30 = vld [vmem:[#allocation2 + $0x30c] sm:$0xf] }
 0x2c4   :  { %3138 = vmatpush.bf16.msra.mxu1 %v14312_v58  ;;  %v12626_v58 = vld [vmem:[#allocation2 + $0x32c] sm:$0xf0] }
 0x2c5   :  { %v1865_v47 = vpack.c.bf16 %v1844_v17, %v1842_v2  ;;  %v1851_v15 = vpop.f32.mrf.mxu1  ;;  %2164 = vmatmul.bf16.vlgmr.msrb.gmra.mxu3 %v9920_v27 }
 0x2c7   :  { %9913 = vmatmul.msk.bf16.gmra.mxu2 %vm1315_vm2, %v1865_v47 }
 0x2c8   :  { %v1797_v40 = vpop.f32.mrf.mxu0  ;;  %3139 = vmatpush.bf16.msra.mxu1 %v14319_v19  ;;  %v12624_v19 = vld [vmem:[#allocation2 + $0x324] sm:$0xf] }
 0x2c9   :  { %v1798_v26 = vadd.f32 %v1797_v40, %v1749_v36 }
 0x2cb   :  { %v1847_v34 = vadd.f32 %v1846_v13, %v1798_v26  ;;  %v1756_v13 = vadd.f32 %v1755_v8, %v1706_v21  ;;  %v1759_v26 = vadd.f32 %v1758_v55, %v1709_v61  ;;  %v9943_v21 = vld [vmem:[#allocation2 + $0x328] sm:$0xf] }
 0x2cc   :  { %3140 = vmatpush.bf16.msra.mxu1 %v14328_v33 }
 0x2cd   :  { %v1853_v38 = vpop.f32.mrf.mxu1 }
 0x2d0   :  { %v1799_v28 = vpop.f32.mrf.mxu0  ;;  %3141 = vmatpush.bf16.msra.mxu1 %v14335_v50  ;;  %v9944_v50 = vor.u32 %v12627_v3, %v9943_v21  ;;  %v9985_v21 = vld [vmem:[#allocation2 + $0x390] sm:$0xf0] }
 0x2d1   :  { %v1800_v46 = vadd.f32 %v1799_v28, %v1751_v39  ;;  %v9936_v39 = vor.u32 %v12626_v58, %v9935_v6  ;;  %v9937_v28 = vld [vmem:[#allocation2 + $0x330] sm:$0xf0]  ;;  %v9945_v6 = vld [vmem:[#allocation2 + $0x338] sm:$0xf0]  ;;  %v12635_v58 = vld [vmem:[#allocation2 + $0x374] sm:$0xf0] }
 0x2d3   :  { %v1849_v25 = vadd.f32 %v1848_v41, %v1800_v46  ;;  %v1711_v46 = vpop.f32.mrf.mxu2  ;;  %2267 = vmatmul.bf16.gmra.mxu1 %v9944_v50  ;;  %v12639_v50 = vld [vmem:[#allocation2 + $0x394] sm:$0xf0] }
 0x2d4   :  { %3142 = vmatpush.bf16.msra.mxu1 %v14343_v5  ;;  %v9951_v5 = vld [vmem:[#allocation2 + $0x340] sm:$0xf] }
 0x2d5   :  { %v1866_v59 = vpack.c.bf16 %v1849_v25, %v1847_v34  ;;  %v1856_v36 = vpop.f32.mrf.mxu1  ;;  %2169 = vmatmul.bf16.gmra.mxu3 %v9936_v39  ;;  %v1760_v34 = vpop.f32.mrf.mxu3  ;;  %v9940_v25 = vor.u32 %v12624_v19, %v9937_v28  ;;  %v9952_v23 = vor.u32 %v12630_v16, %v9951_v5  ;;  %v14518_v5 = vld [vmem:[%s15988_s20 + $0x40] sm:$0xff] }
 0x2d6   :  { %v1761_v33 = vadd.f32 %v1760_v34, %v1711_v46  ;;  %v9983_v46 = vld [vmem:[#allocation2 + $0x380] sm:$0xf]  ;;  %v12638_v34 = vld [vmem:[#allocation2 + $0x38c] sm:$0xf0] }
 0x2d7   :  { %9914 = vmatmul.msk.bf16.gmra.mxu2 %vm1315_vm2, %v1866_v59  ;;  %2218 = vmatmul.bf16.gmra.mxu0 %v9940_v25  ;;  %v9984_v25 = vor.u32 %v12638_v34, %v9983_v46  ;;  %v9999_v16 = vld [vmem:[#allocation2 + $0x3a0] sm:$0xf] }
 0x2d8   :  { %v1802_v10 = vpop.f32.mrf.mxu0  ;;  %3143 = vmatpush.bf16.msra.mxu1 %v14349_v43  ;;  %v9956_v43 = vor.u32 %v12628_v44, %v9953_v48 }
 0x2d9   :  { %v1803_v54 = vadd.f32 %v1802_v10, %v1754_v37  ;;  %v9929_v37 = vld [vmem:[#allocation2 + $0x318] sm:$0xf0] }
 0x2db   :  { %v1852_v47 = vadd.f32 %v1851_v15, %v1803_v54 }
 0x2dc   :  { %3144 = vmatpush.bf16.msra.mxu1 %v14357_v49  ;;  %v9967_v49 = vld [vmem:[#allocation2 + $0x360] sm:$0xf] }
 0x2dd   :  { %v1858_v12 = vpop.f32.mrf.mxu1 }
 0x2e0   :  { %v1804_v2 = vpop.f32.mrf.mxu0  ;;  %3145 = vmatpush.bf16.msra.mxu1 %v14363_v62 }
 0x2e1   :  { %v1805_v17 = vadd.f32 %v1804_v2, %v1756_v13  ;;  %v12631_v13 = vld [vmem:[#allocation2 + $0x354] sm:$0xf0]  ;;  %v9932_v2 = vor.u32 %v12621_v30, %v9929_v37  ;;  %v10001_v30 = vld [vmem:[#allocation2 + $0x3b0] sm:$0xf0] }
 0x2e3   :  { %v1854_v40 = vadd.f32 %v1853_v38, %v1805_v17  ;;  %v9959_v38 = vld [vmem:[#allocation2 + $0x348] sm:$0xf]  ;;  %v12634_v17 = vld [vmem:[#allocation2 + $0x36c] sm:$0xf0] }
 0x2e4   :  { %v9960_v54 = vor.u32 %v12631_v13, %v9959_v38  ;;  %v9968_v61 = vor.u32 %v12634_v17, %v9967_v49  ;;  %v12633_v38 = vld [vmem:[#allocation2 + $0x36c] sm:$0xf]  ;;  %v9977_v13 = vld [vmem:[#allocation2 + $0x378] sm:$0xf0] }
 0x2e5   :  { %v1867_v41 = vpack.c.bf16 %v1854_v40, %v1852_v47  ;;  %2174 = vmatmul.bf16.gmra.mxu3 %v9952_v23  ;;  %v12632_v47 = vld [vmem:[#allocation2 + $0x364] sm:$0xf]  ;;  %v9969_v40 = vld [vmem:[#allocation2 + $0x370] sm:$0xf0]  ;;  %v12642_v23 = vld [vmem:[#allocation2 + $0x3ac] sm:$0xf0] }
 0x2e6   :  { %2272 = vmatmul.bf16.gmra.mxu1 %v9960_v54  ;;  %v10000_v44 = vor.u32 %v12642_v23, %v9999_v16  ;;  %v10007_v54 = vld [vmem:[#allocation2 + $0x3a8] sm:$0xf] }
 0x2e7   :  { %9915 = vmatmul.msk.bf16.gmra.mxu2 %vm1315_vm2, %v1867_v41  ;;  %2223 = vmatmul.bf16.gmra.mxu0 %v9956_v43  ;;  %v9972_v41 = vor.u32 %v12632_v47, %v9969_v40  ;;  %v10015_v47 = vld [vmem:[#allocation2 + $0x3c0] sm:$0xf] }
 0x2e8   :  { %v1807_v18 = vpop.f32.mrf.mxu0 }
 0x2e9   :  { %v1808_v15 = vadd.f32 %v1807_v18, %v1759_v26  ;;  %v12625_v18 = vld [vmem:[#allocation2 + $0x32c] sm:$0xf] }
 0x2ea   :  { %v9948_v28 = vor.u32 %v12625_v18, %v9945_v6  ;;  %v12644_v6 = vld [vmem:[#allocation2 + $0x3c4] sm:$0xf] }
 0x2eb   :  { %v1857_v8 = vadd.f32 %v1856_v36, %v1808_v15  ;;  %v14483_v36 = vld [vmem:[%s15988_s20 + $0x70] sm:$0xff] }
 0x2f0   :  { %v1809_v59 = vpop.f32.mrf.mxu0 }
 0x2f1   :  { %v1810_v35 = vadd.f32 %v1809_v59, %v1761_v33  ;;  %v12636_v59 = vld [vmem:[#allocation2 + $0x384] sm:$0xf] }
 0x2f2   :  { %v9988_v3 = vor.u32 %v12636_v59, %v9985_v21  ;;  %v10031_v59 = vld [vmem:[#allocation2 + $0x3e0] sm:$0xf] }
 0x2f3   :  { %v1859_v10 = vadd.f32 %v1858_v12, %v1810_v35  ;;  %v9961_v35 = vld [vmem:[#allocation2 + $0x358] sm:$0xf0] }
 0x2f5   :  { %v1868_v27 = vpack.c.bf16 %v1859_v10, %v1857_v8  ;;  %2179 = vmatmul.bf16.gmra.mxu3 %v9968_v61 }
 0x2f7   :  { %9916 = vmatmul.msk.bf16.gmra.mxu2 %vm1315_vm2, %v1868_v27  ;;  %2228 = vmatmul.bf16.gmra.mxu0 %v9972_v41 }
 0x305   :  { %2184 = vmatmul.bf16.gmra.mxu3 %v9984_v25 }
 0x307   :  { %2311 = vmatmul.bf16.vlgmr.msra.gmra.mxu2 %v9932_v2  ;;  %2233 = vmatmul.bf16.gmra.mxu0 %v9988_v3  ;;  %v12643_v2 = vld [vmem:[#allocation2 + $0x3b4] sm:$0xf0] }
 0x308   :  { %3187 = vmatpush.bf16.msra.mxu2 %v14213_v11  ;;  %v9975_v11 = vld [vmem:[#allocation2 + $0x368] sm:$0xf]  ;;  %v10008_v49 = vor.u32 %v12643_v2, %v10007_v54 }
 0x309   :  { %v9976_v39 = vor.u32 %v12635_v58, %v9975_v11  ;;  %v10017_v11 = vld [vmem:[#allocation2 + $0x3d0] sm:$0xf0] }
 0x30a   :  { %v1907_v62 = vpop.f32.mrf.mxu2  ;;  %v10020_v58 = vor.u32 %v12644_v6, %v10017_v11  ;;  %v16003_v6 = vld [vmem:[#allocation42_spill] sm:$0xff]  ;;  %v16004_v11 = vld [vmem:[#allocation44_spill] sm:$0xff] }
 0x30b   :  { %v14478_v55 = vadd.f32 %v1907_v62, %v14306_v14  ;;  %v14489_v14 = vld [vmem:[%s15988_s20 + $0x68] sm:$0xff]  ;;  %2277 = vmatmul.bf16.gmra.mxu1 %v9976_v39  ;;  %v9980_v62 = vor.u32 %v12633_v38, %v9977_v13  ;;  %v10025_v38 = vld [vmem:[#allocation2 + $0x3d8] sm:$0xf0] }
 0x30c   :  { %3188 = vmatpush.bf16.msra.mxu2 %v14483_v36  ;;  %v12637_v39 = vld [vmem:[#allocation2 + $0x38c] sm:$0xf] }
 0x310   :  { %3189 = vmatpush.bf16.msra.mxu2 %v14489_v14 }
 0x312   :  { %v1909_v26 = vpop.f32.mrf.mxu2 }
 0x313   :  { %v14493_v19 = vadd.f32 %v1909_v26, %v14322_v29  ;;  %v14503_v29 = vld [vmem:[%s15988_s20 + $0x50] sm:$0xff]  ;;  %v9993_v26 = vld [vmem:[#allocation2 + $0x398] sm:$0xf0] }
 0x314   :  { %3190 = vmatpush.bf16.msra.mxu2 %v14248_v63  ;;  %v12629_v63 = vld [vmem:[#allocation2 + $0x34c] sm:$0xf] }
 0x315   :  { %v9964_v27 = vor.u32 %v12629_v63, %v9961_v35  ;;  %2189 = vmatmul.bf16.gmra.mxu3 %v10000_v44  ;;  %v12648_v35 = vld [vmem:[#allocation2 + $0x3e4] sm:$0xf] }
 0x317   :  { %2316 = vmatmul.bf16.gmra.mxu2 %v9948_v28  ;;  %v10023_v28 = vld [vmem:[#allocation2 + $0x3c8] sm:$0xf] }
 0x318   :  { %3191 = vmatpush.bf16.msra.mxu2 %v14255_v22  ;;  %v9991_v22 = vld [vmem:[#allocation2 + $0x388] sm:$0xf] }
 0x319   :  { %v9992_v12 = vor.u32 %v12639_v50, %v9991_v22  ;;  %v10033_v22 = vld [vmem:[#allocation2 + $0x3f0] sm:$0xf0] }
 0x31a   :  { %v1912_v33 = vpop.f32.mrf.mxu2  ;;  %v10036_v50 = vor.u32 %v12648_v35, %v10033_v22 }
 0x31b   :  { %v14498_v15 = vadd.f32 %v1912_v33, %v14338_v42  ;;  %v14509_v42 = vld [vmem:[%s15988_s20 + $0x48] sm:$0xff]  ;;  %2282 = vmatmul.bf16.gmra.mxu1 %v9992_v12  ;;  %v9996_v33 = vor.u32 %v12637_v39, %v9993_v26  ;;  %v16005_v39 = vld [vmem:[#allocation43_spill] sm:$0xff] }
 0x31c   :  { %3192 = vmatpush.bf16.msra.mxu2 %v14503_v29  ;;  %v12641_v12 = vld [vmem:[#allocation2 + $0x3ac] sm:$0xf] }
 0x320   :  { %3193 = vmatpush.bf16.msra.mxu2 %v14509_v42 }
 0x322   :  { %v1914_v8 = vpop.f32.mrf.mxu2 }
 0x323   :  { %v14513_v10 = vadd.f32 %v1914_v8, %v14352_v45  ;;  %v12640_v45 = vld [vmem:[#allocation2 + $0x3a4] sm:$0xf]  ;;  %v10009_v8 = vld [vmem:[#allocation2 + $0x3b8] sm:$0xf0] }
 0x324   :  { %3194 = vmatpush.bf16.msra.mxu2 %v14518_v5  ;;  %v10004_v37 = vor.u32 %v12640_v45, %v10001_v30  ;;  %v10012_v44 = vor.u32 %v12641_v12, %v10009_v8 }
 0x326   :  { %2238 = vmatmul.bf16.gmra.mxu0 %v10004_v37  ;;  %v12645_v37 = vld [vmem:[#allocation2 + $0x3cc] sm:$0xf] }
 0x327   :  { %2321 = vmatmul.bf16.gmra.mxu2 %v9964_v27  ;;  %v10039_v27 = vld [vmem:[#allocation2 + $0x3e8] sm:$0xf]  ;;  %v10028_v54 = vor.u32 %v12645_v37, %v10025_v38  ;;  %v14572_v37 = vld [vmem:[%s15988_s20 + $0xb0] sm:$0xff] }
 0x32a   :  { %v1917_v48 = vpop.f32.mrf.mxu2 }
 0x32b   :  { %v14522_v43 = vadd.f32 %v1917_v48, %v14366_v9  ;;  %2287 = vmatmul.bf16.gmra.mxu1 %v10008_v49  ;;  %v12646_v9 = vld [vmem:[#allocation2 + $0x3cc] sm:$0xf0]  ;;  %v2361_v48 = vld [vmem:[#allocation5 + $0x6] sm:$0x3] }
 0x32c   :  { %v10016_v40 = vor.u32 %v12646_v9, %v10015_v47  ;;  %v2387_v45 = vand.u32 %v2361_v48, %v14135_v52  ;;  %v12649_v47 = vld [vmem:[#allocation2 + $0x3ec] sm:$0xf]  ;;  %v10041_v9 = vld [vmem:[#allocation2 + $0x3f8] sm:$0xf0] }
 0x32e   :  { %2194 = vmatmul.bf16.gmra.mxu3 %v10016_v40 }
 0x32f   :  { %2396 = vmatpush.bf16.msra.mxu3 %v2387_v45 }
 0x332   :  { %v1919_v17 = vpop.f32.mrf.mxu2 }
 0x333   :  { %v14525_v61 = vadd.f32 %v1919_v17, %v14368_v57  ;;  %v12647_v57 = vld [vmem:[#allocation2 + $0x3d4] sm:$0xf0]  ;;  %2794 = vmatpush.bf16.msrb.mxu3 %v14390_v32 }
 0x334   :  { %v10024_v46 = vor.u32 %v12647_v57, %v10023_v28 }
 0x336   :  { %2243 = vmatmul.bf16.gmra.mxu0 %v10020_v58 }
 0x337   :  { %2326 = vmatmul.bf16.gmra.mxu2 %v9980_v62  ;;  %2795 = vmatpush.bf16.msrb.mxu3 %v14398_v20 }
 0x339   :  { %v2214_v2 = vpop.f32.mrf.mxu0 }
 0x33a   :  { %v1922_v41 = vpop.f32.mrf.mxu2 }
 0x33b   :  { %v14528_v18 = vadd.f32 %v1922_v41, %v14370_v56  ;;  %2292 = vmatmul.bf16.gmra.mxu1 %v10024_v46  ;;  %v12650_v56 = vld [vmem:[#allocation2 + $0x3ec] sm:$0xf0]  ;;  %2796 = vmatpush.bf16.msrb.mxu3 %v14404_v1  ;;  %v10044_v41 = vor.u32 %v12649_v47, %v10041_v9 }
 0x33c   :  { %v10032_v21 = vor.u32 %v12650_v56, %v10031_v59 }
 0x33e   :  { %2199 = vmatmul.bf16.gmra.mxu3 %v10032_v21 }
 0x33f   :  { %2797 = vmatpush.bf16.msrb.mxu3 %v14412_v7 }
 0x340   :  { %v2263_v17 = vpop.f32.mrf.mxu1 }
 0x341   :  { %v2216_v32 = vpop.f32.mrf.mxu0 }
 0x342   :  { %v1924_v34 = vpop.f32.mrf.mxu2 }
 0x343   :  { %v14531_v25 = vadd.f32 %v1924_v34, %v14374_v24  ;;  %v12651_v24 = vld [vmem:[#allocation2 + $0x3f4] sm:$0xf0]  ;;  %2798 = vmatpush.bf16.msrb.mxu3 %v14420_v51 }
 0x344   :  { %v10040_v16 = vor.u32 %v12651_v24, %v10039_v27 }
 0x346   :  { %2248 = vmatmul.bf16.gmra.mxu0 %v10036_v50 }
 0x347   :  { %2331 = vmatmul.bf16.gmra.mxu2 %v9996_v33  ;;  %2799 = vmatpush.bf16.msrb.mxu3 %v14428_v53 }
 0x348   :  { %v2165_v49 = vpop.f32.mrf.mxu3  ;;  %v2265_v1 = vpop.f32.mrf.mxu1 }
 0x349   :  { %v2215_v33 = vadd.f32 %v2214_v2, %v2165_v49 }
 0x34a   :  { %v1927_v3 = vpop.f32.mrf.mxu2 }
 0x34b   :  { %v14534_v63 = vadd.f32 %v1927_v3, %v14376_v0  ;;  %2297 = vmatmul.bf16.gmra.mxu1 %v10040_v16  ;;  %2800 = vmatpush.bf16.msrb.mxu3 %v16003_v6  ;;  %v2264_v3 = vadd.f32 %v2263_v17, %v2215_v33  ;;  %v14578_v17 = vld [vmem:[%s15988_s20 + $0xa8] sm:$0xff]  ;;  %v14591_v6 = vld [vmem:[%s15988_s20 + $0x98] sm:$0xff] }
 0x34f   :  { %2801 = vmatpush.bf16.msrb.mxu3 %v16004_v11 }
 0x350   :  { %v2167_v20 = vpop.f32.mrf.mxu3  ;;  %v2268_v26 = vpop.f32.mrf.mxu1 }
 0x351   :  { %v2217_v21 = vadd.f32 %v2216_v32, %v2167_v20 }
 0x352   :  { %v14536_v23 = vpop.f32.mrf.mxu2 }
 0x353   :  { %16000 = vst [vmem:[#allocation46_spill] sm:$0xff] %v14536_v23  ;;  %v2266_v22 = vadd.f32 %v2265_v1, %v2217_v21  ;;  %v14584_v1 = vld [vmem:[%s15988_s20 + $0xa0] sm:$0xff] }
 0x354   :  { %v2219_v7 = vpop.f32.mrf.mxu0 }
 0x357   :  { %2336 = vmatmul.bf16.gmra.mxu2 %v10012_v44  ;;  %v14566_v44 = vld [vmem:[%s15988_s20 + $0xb8] sm:$0xff] }
 0x358   :  { %v2270_v46 = vpop.f32.mrf.mxu1 }
 0x35a   :  { %v1932_v0 = vpop.f32.mrf.mxu2 }
 0x35b   :  { %v14540_v30 = vadd.f32 %v1932_v0, %v14382_v60 }
 0x35c   :  { %v2221_v28 = vpop.f32.mrf.mxu0 }
 0x362   :  { %v14544_v13 = vpop.f32.mrf.mxu2 }
 0x363   :  { %16001 = vst [vmem:[#allocation47_spill] sm:$0xff] %v14544_v13  ;;  %v2273_v35 = vpop.f32.mrf.mxu1 }
 0x364   :  { %v2224_v59 = vpop.f32.mrf.mxu0 }
 0x367   :  { %2341 = vmatmul.bf16.gmra.mxu2 %v10028_v54 }
 0x36a   :  { %v1937_v62 = vpop.f32.mrf.mxu2 }
 0x36b   :  { %v14549_v60 = vadd.f32 %v1937_v62, %v14407_v4  ;;  %v2170_v4 = vpop.f32.mrf.mxu3  ;;  %v2275_v45 = vpop.f32.mrf.mxu1 }
 0x36c   :  { %v2226_v24 = vpop.f32.mrf.mxu0  ;;  %v2220_v0 = vadd.f32 %v2219_v7, %v2170_v4 }
 0x36e   :  { %v2269_v54 = vadd.f32 %v2268_v26, %v2220_v0 }
 0x372   :  { %v14553_v40 = vpop.f32.mrf.mxu2 }
 0x373   :  { %16002 = vst [vmem:[#allocation48_spill] sm:$0xff] %v14553_v40  ;;  %v2172_v57 = vpop.f32.mrf.mxu3 }
 0x374   :  { %v2222_v38 = vadd.f32 %v2221_v28, %v2172_v57  ;;  %v2229_v2 = vpop.f32.mrf.mxu0 }
 0x376   :  { %v2271_v62 = vadd.f32 %v2270_v46, %v2222_v38 }
 0x377   :  { %2346 = vmatmul.bf16.gmra.mxu2 %v10044_v41 }
 0x37a   :  { %v1942_v58 = vpop.f32.mrf.mxu2 }
 0x37b   :  { %v14558_v51 = vadd.f32 %v1942_v58, %v16005_v39  ;;  %v2175_v56 = vpop.f32.mrf.mxu3  ;;  %v14597_v39 = vld [vmem:[%s15988_s20 + $0x90] sm:$0xff] }
 0x37c   :  { %v2231_v7 = vpop.f32.mrf.mxu0  ;;  %v2225_v58 = vadd.f32 %v2224_v59, %v2175_v56  ;;  %v14604_v59 = vld [vmem:[%s15988_s20 + $0x80] sm:$0xff] }
 0x37e   :  { %v2274_v57 = vadd.f32 %v2273_v35, %v2225_v58 }
 0x382   :  { %v14560_v53 = vpop.f32.mrf.mxu2 }
 0x383   :  { %16006 = vst [vmem:[#allocation42_spill] sm:$0xff] %v14560_v53  ;;  %v2177_v16 = vpop.f32.mrf.mxu3 }
 0x384   :  { %v2227_v26 = vadd.f32 %v2226_v24, %v2177_v16 }
 0x386   :  { %v2276_v46 = vadd.f32 %v2275_v45, %v2227_v26 }
 0x388   :  { %v2278_v9 = vpop.f32.mrf.mxu1 }
 0x38a   :  { %v2312_v34 = vpop.f32.mrf.mxu2 }
 0x38b   :  { %v2313_v12 = vadd.f32 %v2312_v34, %v2264_v3  ;;  %v2180_v49 = vpop.f32.mrf.mxu3  ;;  %v2234_v3 = vpop.f32.mrf.mxu0 }
 0x390   :  { %v2280_v28 = vpop.f32.mrf.mxu1 }
 0x392   :  { %v2314_v50 = vpop.f32.mrf.mxu2 }
 0x393   :  { %v2315_v8 = vadd.f32 %v2314_v50, %v2266_v22  ;;  %v2182_v4 = vpop.f32.mrf.mxu3 }
 0x395   :  { %v2352_v27 = vpack.c.bf16 %v2315_v8, %v2313_v12  ;;  %v2230_v12 = vadd.f32 %v2229_v2, %v2180_v49  ;;  %v2236_v8 = vpop.f32.mrf.mxu0 }
 0x397   :  { %10045 = vmatmul.msk.bf16.vlgmr.msra.gmra.mxu3 %vm1315_vm2, %v2352_v27  ;;  %v2279_v24 = vadd.f32 %v2278_v9, %v2230_v12 }
 0x398   :  { %3236 = vmatpush.bf16.msra.mxu3 %v14566_v44  ;;  %v2283_v50 = vpop.f32.mrf.mxu1 }
 0x39a   :  { %v2317_v48 = vpop.f32.mrf.mxu2 }
 0x39b   :  { %v2318_v20 = vadd.f32 %v2317_v48, %v2269_v54  ;;  %v2185_v22 = vpop.f32.mrf.mxu3 }
 0x39c   :  { %3237 = vmatpush.bf16.msra.mxu3 %v14572_v37 }
 0x3a0   :  { %3238 = vmatpush.bf16.msra.mxu3 %v14578_v17  ;;  %v2285_v45 = vpop.f32.mrf.mxu1 }
 0x3a2   :  { %v2319_v32 = vpop.f32.mrf.mxu2 }
 0x3a3   :  { %v2320_v47 = vadd.f32 %v2319_v32, %v2271_v62  ;;  %v2187_v27 = vpop.f32.mrf.mxu3  ;;  %v2239_v62 = vpop.f32.mrf.mxu0 }
 0x3a4   :  { %3239 = vmatpush.bf16.msra.mxu3 %v14584_v1 }
 0x3a5   :  { %v2353_v41 = vpack.c.bf16 %v2320_v47, %v2318_v20  ;;  %v2235_v47 = vadd.f32 %v2234_v3, %v2185_v22 }
 0x3a7   :  { %10046 = vmatmul.msk.bf16.gmra.mxu3 %vm1315_vm2, %v2353_v41  ;;  %v2284_v58 = vadd.f32 %v2283_v50, %v2235_v47 }
 0x3a8   :  { %3240 = vmatpush.bf16.msra.mxu3 %v14591_v6  ;;  %v2288_v41 = vpop.f32.mrf.mxu1 }
 0x3aa   :  { %v2322_v11 = vpop.f32.mrf.mxu2 }
 0x3ab   :  { %v2323_v33 = vadd.f32 %v2322_v11, %v2274_v57  ;;  %v2190_v32 = vpop.f32.mrf.mxu3  ;;  %v2237_v11 = vadd.f32 %v2236_v8, %v2187_v27  ;;  %v2241_v49 = vpop.f32.mrf.mxu0 }
 0x3ac   :  { %3241 = vmatpush.bf16.msra.mxu3 %v14597_v39 }
 0x3ad   :  { %v2286_v2 = vadd.f32 %v2285_v45, %v2237_v11  ;;  %v10055_v45 = vld [vmem:[#allocation2 + $0x400] sm:$0xf] }
 0x3b0   :  { %3242 = vmatpush.bf16.msra.mxu3 %v14458_v31  ;;  %v2232_v31 = vadd.f32 %v2231_v7, %v2182_v4  ;;  %v2290_v57 = vpop.f32.mrf.mxu1 }
 0x3b2   :  { %v2324_v34 = vpop.f32.mrf.mxu2  ;;  %v2281_v16 = vadd.f32 %v2280_v28, %v2232_v31 }
 0x3b3   :  { %v2325_v21 = vadd.f32 %v2324_v34, %v2276_v46  ;;  %v2192_v4 = vpop.f32.mrf.mxu3  ;;  %v2240_v34 = vadd.f32 %v2239_v62, %v2190_v32  ;;  %v10057_v62 = vld [vmem:[#allocation2 + $0x410] sm:$0xf0] }
 0x3b4   :  { %3243 = vmatpush.bf16.msra.mxu3 %v14604_v59 }
 0x3b5   :  { %v2354_v56 = vpack.c.bf16 %v2325_v21, %v2323_v33  ;;  %v2244_v33 = vpop.f32.mrf.mxu0 }
 0x3b7   :  { %10047 = vmatmul.msk.bf16.gmra.mxu3 %vm1315_vm2, %v2354_v56  ;;  %v2242_v56 = vadd.f32 %v2241_v49, %v2192_v4 }
 0x3b8   :  { %v2293_v3 = vpop.f32.mrf.mxu1 }
 0x3b9   :  { %v2291_v22 = vadd.f32 %v2290_v57, %v2242_v56  ;;  %v14633_v56 = vld [vmem:[%s15988_s20 + $0x20] sm:$0xff] }
 0x3ba   :  { %v2327_v35 = vpop.f32.mrf.mxu2 }
 0x3bb   :  { %v2328_v0 = vadd.f32 %v2327_v35, %v2279_v24  ;;  %v2195_v21 = vpop.f32.mrf.mxu3  ;;  %v2289_v35 = vadd.f32 %v2288_v41, %v2240_v34 }
 0x3bc   :  { %v2245_v11 = vadd.f32 %v2244_v33, %v2195_v21  ;;  %v14626_v33 = vld [vmem:[%s15988_s20 + $0x28] sm:$0xff] }
 0x3bd   :  { %v2246_v27 = vpop.f32.mrf.mxu0 }
 0x3be   :  { %v2294_v49 = vadd.f32 %v2293_v3, %v2245_v11 }
 0x3c0   :  { %v2295_v47 = vpop.f32.mrf.mxu1 }
 0x3c2   :  { %v2329_v48 = vpop.f32.mrf.mxu2 }
 0x3c3   :  { %v2330_v38 = vadd.f32 %v2329_v48, %v2281_v16  ;;  %v2197_v24 = vpop.f32.mrf.mxu3  ;;  %v10063_v16 = vld [vmem:[#allocation2 + $0x408] sm:$0xf]  ;;  %v12655_v48 = vld [vmem:[#allocation2 + $0x414] sm:$0xf0] }
 0x3c5   :  { %v2355_v54 = vpack.c.bf16 %v2330_v38, %v2328_v0  ;;  %v10064_v0 = vor.u32 %v12655_v48, %v10063_v16  ;;  %v12654_v38 = vld [vmem:[#allocation2 + $0x40c] sm:$0xf0]  ;;  %v12656_v16 = vld [vmem:[#allocation2 + $0x424] sm:$0xf] }
 0x3c6   :  { %v10056_v32 = vor.u32 %v12654_v38, %v10055_v45  ;;  %v10073_v45 = vld [vmem:[#allocation2 + $0x430] sm:$0xf0] }
 0x3c7   :  { %10048 = vmatmul.msk.bf16.gmra.mxu3 %vm1315_vm2, %v2355_v54  ;;  %v12652_v54 = vld [vmem:[#allocation2 + $0x404] sm:$0xf]  ;;  %2753 = vmatmul.bf16.vlgmr.msrb.gmra.mxu2 %v10064_v0  ;;  %v14639_v0 = vld [vmem:[%s15988_s20 + $0x18] sm:$0xff] }
 0x3c8   :  { %2655 = vmatmul.bf16.vlgmr.msrb.gmra.mxu0 %v10056_v32  ;;  %v2298_v34 = vpop.f32.mrf.mxu1 }
 0x3ca   :  { %v2332_v20 = vpop.f32.mrf.mxu2 }
 0x3cb   :  { %v2333_v9 = vadd.f32 %v2332_v20, %v2284_v58  ;;  %v10060_v20 = vor.u32 %v12652_v54, %v10057_v62  ;;  %v14614_v58 = vld [vmem:[%s15988_s20 + $0x38] sm:$0xff]  ;;  %v2200_v4 = vpop.f32.mrf.mxu3  ;;  %v10076_v54 = vor.u32 %v12656_v16, %v10073_v45 }
 0x3cc   :  { %3629 = vmatpush.bf16.msrb.mxu2 %v14614_v58  ;;  %v12667_v16 = vld [vmem:[#allocation2 + $0x474] sm:$0xf0] }
 0x3cd   :  { %2704 = vmatmul.bf16.vlgmr.msrb.gmra.mxu1 %v10060_v20  ;;  %v14645_v20 = vld [vmem:[%s15988_s20 + $0x10] sm:$0xff] }
 0x3d0   :  { %v2300_v62 = vpop.f32.mrf.mxu1 }
 0x3d2   :  { %v2334_v7 = vpop.f32.mrf.mxu2 }
 0x3d3   :  { %v2335_v26 = vadd.f32 %v2334_v7, %v2286_v2  ;;  %v2247_v2 = vadd.f32 %v2246_v27, %v2197_v24  ;;  %v2249_v7 = vpop.f32.mrf.mxu0  ;;  %v2202_v3 = vpop.f32.mrf.mxu3  ;;  %v10071_v27 = vld [vmem:[#allocation2 + $0x420] sm:$0xf]  ;;  %v12658_v24 = vld [vmem:[#allocation2 + $0x42c] sm:$0xf0] }
 0x3d4   :  { %v10072_v48 = vor.u32 %v12658_v24, %v10071_v27  ;;  %v10111_v24 = vld [vmem:[#allocation2 + $0x468] sm:$0xf] }
 0x3d5   :  { %v2356_v28 = vpack.c.bf16 %v2335_v26, %v2333_v9  ;;  %v14620_v9 = vld [vmem:[%s15988_s20 + $0x30] sm:$0xff]  ;;  %v2296_v26 = vadd.f32 %v2295_v47, %v2247_v2  ;;  %v10112_v45 = vor.u32 %v12667_v16, %v10111_v24 }
 0x3d6   :  { %3630 = vmatpush.bf16.msrb.mxu2 %v14620_v9 }
 0x3d7   :  { %10049 = vmatmul.msk.bf16.gmra.mxu3 %vm1315_vm2, %v2356_v28 }
 0x3d8   :  { %2660 = vmatmul.bf16.gmra.mxu0 %v10072_v48 }
 0x3da   :  { %v2337_v46 = vpop.f32.mrf.mxu2  ;;  %3631 = vmatpush.bf16.msrb.mxu2 %v14626_v33 }
 0x3db   :  { %v2338_v50 = vadd.f32 %v2337_v46, %v2289_v35  ;;  %v2251_v35 = vpop.f32.mrf.mxu0 }
 0x3dc   :  { %v2252_v38 = vadd.f32 %v2251_v35, %v2202_v3  ;;  %v10089_v3 = vld [vmem:[#allocation2 + $0x450] sm:$0xf0] }
 0x3dd   :  { %2709 = vmatmul.bf16.gmra.mxu1 %v10076_v54  ;;  %v12666_v54 = vld [vmem:[#allocation2 + $0x46c] sm:$0xf0] }
 0x3de   :  { %3632 = vmatpush.bf16.msrb.mxu2 %v14633_v56  ;;  %v2301_v47 = vadd.f32 %v2300_v62, %v2252_v38  ;;  %v10103_v38 = vld [vmem:[#allocation2 + $0x460] sm:$0xf]  ;;  %v12664_v62 = vld [vmem:[#allocation2 + $0x464] sm:$0xf] }
 0x3e2   :  { %v2339_v12 = vpop.f32.mrf.mxu2  ;;  %3633 = vmatpush.bf16.msrb.mxu2 %v14639_v0 }
 0x3e3   :  { %v2340_v31 = vadd.f32 %v2339_v12, %v2291_v22  ;;  %v10079_v12 = vld [vmem:[#allocation2 + $0x428] sm:$0xf] }
 0x3e5   :  { %v2357_v8 = vpack.c.bf16 %v2340_v31, %v2338_v50  ;;  %v12659_v50 = vld [vmem:[#allocation2 + $0x434] sm:$0xf0]  ;;  %v2250_v31 = vadd.f32 %v2249_v7, %v2200_v4  ;;  %v14658_v4 = vld [vmem:[%s15988_s20] sm:$0xff] }
 0x3e6   :  { %3634 = vmatpush.bf16.msrb.mxu2 %v14645_v20 }
 0x3e7   :  { %10050 = vmatmul.msk.bf16.gmra.mxu3 %vm1315_vm2, %v2357_v8  ;;  %v10080_v8 = vor.u32 %v12659_v50, %v10079_v12  ;;  %v2299_v32 = vadd.f32 %v2298_v34, %v2250_v31  ;;  %v12662_v34 = vld [vmem:[#allocation2 + $0x44c] sm:$0xf0]  ;;  %v12653_v12 = vld [vmem:[#allocation2 + $0x40c] sm:$0xf]  ;;  %v10065_v50 = vld [vmem:[#allocation2 + $0x418] sm:$0xf0] }
 0x3e8   :  { %v10068_v31 = vor.u32 %v12653_v12, %v10065_v50  ;;  %v10121_v12 = vld [vmem:[#allocation2 + $0x490] sm:$0xf0] }
 0x3e9   :  { %2758 = vmatmul.bf16.gmra.mxu2 %v10080_v8  ;;  %v14664_v8 = vld [vmem:[%s15988_s20 + $0x78] sm:$0xff] }
 0x3ea   :  { %v2342_v41 = vpop.f32.mrf.mxu2 }
 0x3eb   :  { %v2343_v57 = vadd.f32 %v2342_v41, %v2294_v49  ;;  %v14651_v49 = vld [vmem:[%s15988_s20 + $0x8] sm:$0xff] }
 0x3ec   :  { %3635 = vmatpush.bf16.msrb.mxu2 %v14651_v49 }
 0x3f0   :  { %3636 = vmatpush.bf16.msrb.mxu2 %v14658_v4 }
 0x3f2   :  { %v2344_v28 = vpop.f32.mrf.mxu2 }
 0x3f3   :  { %v2345_v46 = vadd.f32 %v2344_v28, %v2296_v26  ;;  %v10095_v26 = vld [vmem:[#allocation2 + $0x448] sm:$0xf]  ;;  %v12663_v28 = vld [vmem:[#allocation2 + $0x454] sm:$0xf0] }
 0x3f5   :  { %v2358_v21 = vpack.c.bf16 %v2345_v46, %v2343_v57  ;;  %v10096_v57 = vor.u32 %v12663_v28, %v10095_v26  ;;  %v10087_v46 = vld [vmem:[#allocation2 + $0x440] sm:$0xf] }
 0x3f6   :  { %v10088_v35 = vor.u32 %v12662_v34, %v10087_v46  ;;  %v14678_v28 = vld [vmem:[%s15988_s20 + $0x60] sm:$0xff] }
 0x3f7   :  { %10051 = vmatmul.msk.bf16.gmra.mxu3 %vm1315_vm2, %v2358_v21  ;;  %v12660_v21 = vld [vmem:[#allocation2 + $0x444] sm:$0xf] }
 0x3f8   :  { %2665 = vmatmul.bf16.gmra.mxu0 %v10088_v35  ;;  %v12670_v35 = vld [vmem:[#allocation2 + $0x48c] sm:$0xf0] }
 0x3f9   :  { %2763 = vmatmul.bf16.gmra.mxu2 %v10096_v57  ;;  %v10127_v57 = vld [vmem:[#allocation2 + $0x488] sm:$0xf] }
 0x3fa   :  { %v2347_v22 = vpop.f32.mrf.mxu2 }
 0x3fb   :  { %v2348_v11 = vadd.f32 %v2347_v22, %v2299_v32  ;;  %v10092_v22 = vor.u32 %v12660_v21, %v10089_v3  ;;  %v10104_v32 = vor.u32 %v12666_v54, %v10103_v38  ;;  %v10119_v21 = vld [vmem:[#allocation2 + $0x480] sm:$0xf]  ;;  %v12668_v3 = vld [vmem:[#allocation2 + $0x484] sm:$0xf]  ;;  %v10143_v38 = vld [vmem:[#allocation2 + $0x4a8] sm:$0xf] }
 0x3fc   :  { %v10124_v50 = vor.u32 %v12668_v3, %v10121_v12  ;;  %v12675_v54 = vld [vmem:[#allocation2 + $0x4b4] sm:$0xf0]  ;;  %v12678_v3 = vld [vmem:[#allocation2 + $0x4cc] sm:$0xf0] }
 0x3fd   :  { %2714 = vmatmul.bf16.gmra.mxu1 %v10092_v22  ;;  %v10120_v22 = vor.u32 %v12670_v35, %v10119_v21  ;;  %v10151_v35 = vld [vmem:[#allocation2 + $0x4c0] sm:$0xf] }
 0x3fe   :  { %v10152_v12 = vor.u32 %v12678_v3, %v10151_v35  ;;  %v14726_v35 = vld [vmem:[%s15988_s20 + $0xf0] sm:$0xff]  ;;  %v12677_v3 = vld [vmem:[#allocation2 + $0x4cc] sm:$0xf] }
 0x402   :  { %v2349_v41 = vpop.f32.mrf.mxu2 }
 0x403   :  { %v2350_v2 = vadd.f32 %v2349_v41, %v2301_v47  ;;  %v10105_v47 = vld [vmem:[#allocation2 + $0x470] sm:$0xf0] }
 0x404   :  { %v10108_v41 = vor.u32 %v12664_v62, %v10105_v47  ;;  %v10144_v62 = vor.u32 %v12675_v54, %v10143_v38  ;;  %v12674_v47 = vld [vmem:[#allocation2 + $0x4ac] sm:$0xf0]  ;;  %v10175_v38 = vld [vmem:[#allocation2 + $0x4e8] sm:$0xf]  ;;  %v12683_v54 = vld [vmem:[#allocation2 + $0x4f4] sm:$0xf0] }
 0x405   :  { %v2359_v7 = vpack.c.bf16 %v2350_v2, %v2348_v11  ;;  %v12657_v11 = vld [vmem:[#allocation2 + $0x42c] sm:$0xf]  ;;  %v10081_v2 = vld [vmem:[#allocation2 + $0x438] sm:$0xf0] }
 0x406   :  { %v10084_v26 = vor.u32 %v12657_v11, %v10081_v2 }
 0x407   :  { %10052 = vmatmul.msk.bf16.gmra.mxu3 %vm1315_vm2, %v2359_v7 }
 0x408   :  { %2670 = vmatmul.bf16.gmra.mxu0 %v10104_v32  ;;  %v10135_v32 = vld [vmem:[#allocation2 + $0x4a0] sm:$0xf] }
 0x409   :  { %2768 = vmatmul.bf16.gmra.mxu2 %v10112_v45  ;;  %v10136_v11 = vor.u32 %v12674_v47, %v10135_v32  ;;  %v10176_v32 = vor.u32 %v12683_v54, %v10175_v38  ;;  %v10167_v47 = vld [vmem:[#allocation2 + $0x4e0] sm:$0xf]  ;;  %v14749_v38 = vld [vmem:[%s15988_s20 + $0xd8] sm:$0xff] }
 0x40d   :  { %2719 = vmatmul.bf16.gmra.mxu1 %v10108_v41  ;;  %v12672_v41 = vld [vmem:[#allocation2 + $0x4a4] sm:$0xf] }
 0x417   :  { %2802 = vmatmul.bf16.vlgmr.msrb.gmra.mxu3 %v10068_v31  ;;  %v12661_v31 = vld [vmem:[#allocation2 + $0x44c] sm:$0xf] }
 0x418   :  { %3678 = vmatpush.bf16.msrb.mxu3 %v14664_v8  ;;  %2675 = vmatmul.bf16.gmra.mxu0 %v10120_v22  ;;  %v12676_v22 = vld [vmem:[#allocation2 + $0x4c4] sm:$0xf] }
 0x41a   :  { %v2398_v27 = vpop.f32.mrf.mxu3 }
 0x41b   :  { %v14668_v48 = vadd.f32 %v2398_v27, %v14478_v55  ;;  %v10097_v27 = vld [vmem:[#allocation2 + $0x458] sm:$0xf0] }
 0x41c   :  { %3679 = vmatpush.bf16.msrb.mxu3 %v14483_v36  ;;  %v14684_v36 = vld [vmem:[%s15988_s20 + $0x58] sm:$0xff]  ;;  %v10100_v16 = vor.u32 %v12661_v31, %v10097_v27 }
 0x41d   :  { %2724 = vmatmul.bf16.gmra.mxu1 %v10124_v50  ;;  %v10153_v50 = vld [vmem:[#allocation2 + $0x4d0] sm:$0xf0]  ;;  %v10129_v27 = vld [vmem:[#allocation2 + $0x498] sm:$0xf0] }
 0x41e   :  { %v10156_v31 = vor.u32 %v12676_v22, %v10153_v50  ;;  %v10161_v22 = vld [vmem:[#allocation2 + $0x4d8] sm:$0xf0] }
 0x420   :  { %3680 = vmatpush.bf16.msrb.mxu3 %v14489_v14 }
 0x422   :  { %v2400_v7 = vpop.f32.mrf.mxu3 }
 0x423   :  { %v14673_v55 = vadd.f32 %v2400_v7, %v14493_v19  ;;  %v12671_v19 = vld [vmem:[#allocation2 + $0x494] sm:$0xf0]  ;;  %v10113_v7 = vld [vmem:[#allocation2 + $0x478] sm:$0xf0] }
 0x424   :  { %3681 = vmatpush.bf16.msrb.mxu3 %v14678_v28  ;;  %v10128_v34 = vor.u32 %v12671_v19, %v10127_v57  ;;  %v10159_v57 = vld [vmem:[#allocation2 + $0x4c8] sm:$0xf]  ;;  %v12679_v19 = vld [vmem:[#allocation2 + $0x4d4] sm:$0xf0] }
 0x425   :  { %v10160_v21 = vor.u32 %v12679_v19, %v10159_v57 }
 0x426   :  { %2773 = vmatmul.bf16.gmra.mxu2 %v10128_v34 }
 0x427   :  { %2807 = vmatmul.bf16.gmra.mxu3 %v10084_v26 }
 0x428   :  { %3682 = vmatpush.bf16.msrb.mxu3 %v14684_v36  ;;  %2680 = vmatmul.bf16.gmra.mxu0 %v10136_v11  ;;  %v12680_v11 = vld [vmem:[#allocation2 + $0x4e4] sm:$0xf] }
 0x42a   :  { %v2403_v14 = vpop.f32.mrf.mxu3 }
 0x42b   :  { %v14688_v46 = vadd.f32 %v2403_v14, %v14498_v15 }
 0x42c   :  { %3683 = vmatpush.bf16.msrb.mxu3 %v14503_v29 }
 0x430   :  { %3684 = vmatpush.bf16.msrb.mxu3 %v14509_v42  ;;  %v10137_v42 = vld [vmem:[#allocation2 + $0x4b0] sm:$0xf0] }
 0x431   :  { %v10140_v2 = vor.u32 %v12672_v41, %v10137_v42  ;;  %v12682_v41 = vld [vmem:[#allocation2 + $0x4ec] sm:$0xf0] }
 0x432   :  { %v2405_v24 = vpop.f32.mrf.mxu3  ;;  %v10168_v42 = vor.u32 %v12682_v41, %v10167_v47  ;;  %v14755_v47 = vld [vmem:[%s15988_s20 + $0xd0] sm:$0xff]  ;;  %v12681_v41 = vld [vmem:[#allocation2 + $0x4ec] sm:$0xf] }
 0x433   :  { %v14693_v15 = vadd.f32 %v2405_v24, %v14513_v10  ;;  %2729 = vmatmul.bf16.gmra.mxu1 %v10140_v2  ;;  %v12665_v10 = vld [vmem:[#allocation2 + $0x46c] sm:$0xf]  ;;  %v10169_v2 = vld [vmem:[#allocation2 + $0x4f0] sm:$0xf0]  ;;  %16009 = vst [vmem:[#allocation49_spill] sm:$0xff] %v14755_v47 }
 0x434   :  { %3685 = vmatpush.bf16.msrb.mxu3 %v14518_v5  ;;  %v10116_v14 = vor.u32 %v12665_v10, %v10113_v7  ;;  %v10172_v10 = vor.u32 %v12680_v11, %v10169_v2  ;;  %v10145_v7 = vld [vmem:[#allocation2 + $0x4b8] sm:$0xf0] }
 0x435   :  { %v10177_v11 = vld [vmem:[#allocation2 + $0x4f8] sm:$0xf0] }
 0x436   :  { %2778 = vmatmul.bf16.gmra.mxu2 %v10144_v62  ;;  %v10180_v2 = vor.u32 %v12681_v41, %v10177_v11 }
 0x437   :  { %2812 = vmatmul.bf16.gmra.mxu3 %v10100_v16 }
 0x438   :  { %2685 = vmatmul.bf16.gmra.mxu0 %v10152_v12 }
 0x43a   :  { %v2408_v45 = vpop.f32.mrf.mxu3 }
 0x43b   :  { %v14697_v29 = vadd.f32 %v2408_v45, %v14522_v43 }
 0x442   :  { %v2410_v5 = vpop.f32.mrf.mxu3 }
 0x443   :  { %v14700_v26 = vadd.f32 %v2410_v5, %v14525_v61  ;;  %2734 = vmatmul.bf16.gmra.mxu1 %v10156_v31  ;;  %v12669_v61 = vld [vmem:[#allocation2 + $0x48c] sm:$0xf] }
 0x444   :  { %v10132_v45 = vor.u32 %v12669_v61, %v10129_v27  ;;  %v14734_v31 = vld [vmem:[%s15988_s20 + $0xe8] sm:$0xff]  ;;  %v14740_v27 = vld [vmem:[%s15988_s20 + $0xe0] sm:$0xff] }
 0x445   :  { %v2656_v50 = vpop.f32.mrf.mxu0 }
 0x446   :  { %2783 = vmatmul.bf16.gmra.mxu2 %v10160_v21  ;;  %v14720_v21 = vld [vmem:[%s15988_s20 + $0xf8] sm:$0xff] }
 0x447   :  { %2817 = vmatmul.bf16.gmra.mxu3 %v10116_v14 }
 0x448   :  { %2690 = vmatmul.bf16.gmra.mxu0 %v10168_v42 }
 0x44a   :  { %v2413_v43 = vpop.f32.mrf.mxu3  ;;  %v2705_v61 = vpop.f32.mrf.mxu1 }
 0x44b   :  { %v14703_v34 = vadd.f32 %v2413_v43, %v14528_v18  ;;  %v2852_v43 = vld [vmem:[#allocation5 + $0x8] sm:$0x3]  ;;  %v2706_v11 = vadd.f32 %v2705_v61, %v2656_v50 }
 0x44d   :  { %v2658_v54 = vpop.f32.mrf.mxu0 }
 0x452   :  { %v2415_v24 = vpop.f32.mrf.mxu3 }
 0x453   :  { %v14706_v16 = vadd.f32 %v2415_v24, %v14531_v25  ;;  %2739 = vmatmul.bf16.gmra.mxu1 %v10172_v10  ;;  %v12673_v25 = vld [vmem:[#allocation2 + $0x4ac] sm:$0xf]  ;;  %v2754_v24 = vpop.f32.mrf.mxu2 }
 0x454   :  { %v10148_v14 = vor.u32 %v12673_v25, %v10145_v7  ;;  %v14763_v10 = vld [vmem:[%s15988_s20 + $0xc8] sm:$0xff]  ;;  %v14769_v7 = vld [vmem:[%s15988_s20 + $0xc0] sm:$0xff] }
 0x455   :  { %16011 = vst [vmem:[#allocation51_spill] sm:$0xff] %v14763_v10  ;;  %v2661_v25 = vpop.f32.mrf.mxu0 }
 0x456   :  { %2788 = vmatmul.bf16.gmra.mxu2 %v10176_v32  ;;  %v2707_v32 = vpop.f32.mrf.mxu1  ;;  %16012 = vst [vmem:[#allocation52_spill] sm:$0xff] %v14769_v7 }
 0x457   :  { %2822 = vmatmul.bf16.gmra.mxu3 %v10132_v45  ;;  %v2708_v23 = vadd.f32 %v2707_v32, %v2658_v54 }
 0x45a   :  { %v2418_v18 = vpop.f32.mrf.mxu3 }
 0x45b   :  { %v14709_v62 = vadd.f32 %v2418_v18, %v14534_v63  ;;  %v2878_v63 = vand.u32 %v2852_v43, %v14135_v52  ;;  %v2756_v42 = vpop.f32.mrf.mxu2 }
 0x45d   :  { %2887 = vmatpush.bf16.msra.mxu0 %v2878_v63 }
 0x461   :  { %3285 = vmatpush.bf16.msrb.mxu0 %v14720_v21 }
 0x462   :  { %v14711_v5 = vpop.f32.mrf.mxu3 }
 0x463   :  { %16007 = vst [vmem:[#allocation44_spill] sm:$0xff] %v14711_v5 }
 0x465   :  { %3286 = vmatpush.bf16.msrb.mxu0 %v14726_v35 }
 0x467   :  { %2827 = vmatmul.bf16.gmra.mxu3 %v10148_v14  ;;  %v2710_v14 = vpop.f32.mrf.mxu1 }
 0x469   :  { %3287 = vmatpush.bf16.msrb.mxu0 %v14734_v31 }
 0x46a   :  { %v2423_v57 = vpop.f32.mrf.mxu3 }
 0x46b   :  { %v14715_v19 = vadd.f32 %v2423_v57, %v14540_v30  ;;  %v10164_v30 = vor.u32 %v12677_v3, %v10161_v22  ;;  %v2663_v3 = vpop.f32.mrf.mxu0 }
 0x46c   :  { %v2759_v57 = vpop.f32.mrf.mxu2 }
 0x46d   :  { %3288 = vmatpush.bf16.msrb.mxu0 %v14740_v27 }
 0x471   :  { %3289 = vmatpush.bf16.msrb.mxu0 %v14749_v38 }
 0x472   :  { %v14729_v12 = vpop.f32.mrf.mxu3 }
 0x473   :  { %16008 = vst [vmem:[#allocation43_spill] sm:$0xff] %v14729_v12  ;;  %v2755_v12 = vadd.f32 %v2754_v24, %v2706_v11 }
 0x475   :  { %3290 = vmatpush.bf16.msrb.mxu0 %v14755_v47  ;;  %v2711_v47 = vadd.f32 %v2710_v14, %v2661_v25 }
 0x477   :  { %2832 = vmatmul.bf16.gmra.mxu3 %v10164_v30  ;;  %v2712_v30 = vpop.f32.mrf.mxu1  ;;  %v2760_v61 = vadd.f32 %v2759_v57, %v2711_v47 }
 0x478   :  { %v2713_v50 = vadd.f32 %v2712_v30, %v2663_v3 }
 0x479   :  { %3291 = vmatpush.bf16.msrb.mxu0 %v14763_v10 }
 0x47a   :  { %v2428_v45 = vpop.f32.mrf.mxu3 }
 0x47b   :  { %v14744_v18 = vadd.f32 %v2428_v45, %v14549_v60  ;;  %v2761_v45 = vpop.f32.mrf.mxu2 }
 0x47d   :  { %3292 = vmatpush.bf16.msrb.mxu0 %v14769_v7 }
 0x47f   :  { %v2715_v5 = vpop.f32.mrf.mxu1 }
 0x482   :  { %v14758_v60 = vpop.f32.mrf.mxu3 }
 0x483   :  { %16010 = vst [vmem:[#allocation50_spill] sm:$0xff] %v14758_v60  ;;  %v2764_v13 = vpop.f32.mrf.mxu2  ;;  %v2757_v60 = vadd.f32 %v2756_v42, %v2708_v23  ;;  %v2762_v23 = vadd.f32 %v2761_v45, %v2713_v50 }
 0x487   :  { %2837 = vmatmul.bf16.gmra.mxu3 %v10180_v2  ;;  %v2666_v2 = vpop.f32.mrf.mxu0 }
 0x488   :  { %v2716_v47 = vadd.f32 %v2715_v5, %v2666_v2 }
 0x48a   :  { %v2433_v43 = vpop.f32.mrf.mxu3  ;;  %v2765_v25 = vadd.f32 %v2764_v13, %v2716_v47 }
 0x48b   :  { %v14773_v63 = vadd.f32 %v2433_v43, %v14558_v51  ;;  %v2717_v43 = vpop.f32.mrf.mxu1 }
 0x48d   :  { %16013 = vst [vmem:[#allocation53_spill] sm:$0xff] %v14773_v63  ;;  %v2766_v63 = vpop.f32.mrf.mxu2 }
 0x48f   :  { %v2668_v51 = vpop.f32.mrf.mxu0 }
 0x492   :  { %v14775_v22 = vpop.f32.mrf.mxu3 }
 0x493   :  { %16014 = vst [vmem:[#allocation54_spill] sm:$0xff] %v14775_v22  ;;  %v2720_v54 = vpop.f32.mrf.mxu1 }
 0x495   :  { %v2769_v32 = vpop.f32.mrf.mxu2 }
 0x497   :  { %v2671_v24 = vpop.f32.mrf.mxu0 }
 0x498   :  { %v2721_v30 = vadd.f32 %v2720_v54, %v2671_v24 }
 0x49a   :  { %v2803_v41 = vpop.f32.mrf.mxu3  ;;  %v2770_v2 = vadd.f32 %v2769_v32, %v2721_v30 }
 0x49b   :  { %v2804_v40 = vadd.f32 %v2803_v41, %v2755_v12  ;;  %v2722_v42 = vpop.f32.mrf.mxu1 }
 0x4a2   :  { %v2805_v53 = vpop.f32.mrf.mxu3 }
 0x4a3   :  { %v2806_v7 = vadd.f32 %v2805_v53, %v2757_v60 }
 0x4a5   :  { %v2843_v10 = vpack.c.bf16 %v2806_v7, %v2804_v40  ;;  %v14788_v7 = vld [vmem:[%s15988_s20 + $0x88] sm:$0xff] }
 0x4a7   :  { %10181 = vmatmul.msk.bf16.vlgmr.msra.gmra.mxu0 %vm1315_vm2, %v2843_v10  ;;  %v2718_v10 = vadd.f32 %v2717_v43, %v2668_v51 }
 0x4a8   :  { %3727 = vmatpush.bf16.msra.mxu0 %v14566_v44  ;;  %v2673_v44 = vpop.f32.mrf.mxu0 }
 0x4a9   :  { %v2723_v45 = vadd.f32 %v2722_v42, %v2673_v44 }
 0x4aa   :  { %v2808_v22 = vpop.f32.mrf.mxu3 }
 0x4ab   :  { %v2809_v40 = vadd.f32 %v2808_v22, %v2760_v61  ;;  %v2725_v22 = vpop.f32.mrf.mxu1 }
 0x4ac   :  { %3728 = vmatpush.bf16.msra.mxu0 %v14572_v37 }
 0x4b0   :  { %3729 = vmatpush.bf16.msra.mxu0 %v14578_v17  ;;  %v2771_v17 = vpop.f32.mrf.mxu2  ;;  %v2676_v3 = vpop.f32.mrf.mxu0 }
 0x4b1   :  { %v2772_v51 = vadd.f32 %v2771_v17, %v2723_v45  ;;  %v10193_v45 = vld [vmem:[#allocation2 + $0x510] sm:$0xf0] }
 0x4b2   :  { %v2810_v53 = vpop.f32.mrf.mxu3 }
 0x4b3   :  { %v2811_v12 = vadd.f32 %v2810_v53, %v2762_v23  ;;  %v2727_v11 = vpop.f32.mrf.mxu1 }
 0x4b4   :  { %3730 = vmatpush.bf16.msra.mxu0 %v14584_v1  ;;  %v2767_v1 = vadd.f32 %v2766_v63, %v2718_v10 }
 0x4b5   :  { %v2844_v60 = vpack.c.bf16 %v2811_v12, %v2809_v40  ;;  %v2726_v12 = vadd.f32 %v2725_v22, %v2676_v3 }
 0x4b7   :  { %10182 = vmatmul.msk.bf16.gmra.mxu0 %vm1315_vm2, %v2844_v60 }
 0x4b8   :  { %3731 = vmatpush.bf16.msra.mxu0 %v14591_v6  ;;  %v2678_v41 = vpop.f32.mrf.mxu0 }
 0x4ba   :  { %v2813_v37 = vpop.f32.mrf.mxu3 }
 0x4bb   :  { %v2814_v57 = vadd.f32 %v2813_v37, %v2765_v25  ;;  %v2728_v37 = vadd.f32 %v2727_v11, %v2678_v41 }
 0x4bc   :  { %3732 = vmatpush.bf16.msra.mxu0 %v14597_v39  ;;  %v2774_v39 = vpop.f32.mrf.mxu2 }
 0x4bd   :  { %v2775_v47 = vadd.f32 %v2774_v39, %v2726_v12  ;;  %v12684_v39 = vld [vmem:[#allocation2 + $0x504] sm:$0xf] }
 0x4c0   :  { %3733 = vmatpush.bf16.msra.mxu0 %v14788_v7  ;;  %v2681_v53 = vpop.f32.mrf.mxu0 }
 0x4c2   :  { %v2815_v14 = vpop.f32.mrf.mxu3 }
 0x4c3   :  { %v2816_v6 = vadd.f32 %v2815_v14, %v2767_v1 }
 0x4c4   :  { %3734 = vmatpush.bf16.msra.mxu0 %v14604_v59  ;;  %v2776_v63 = vpop.f32.mrf.mxu2  ;;  %v2730_v59 = vpop.f32.mrf.mxu1 }
 0x4c5   :  { %v2845_v5 = vpack.c.bf16 %v2816_v6, %v2814_v57  ;;  %v2777_v24 = vadd.f32 %v2776_v63, %v2728_v37  ;;  %v2731_v14 = vadd.f32 %v2730_v59, %v2681_v53  ;;  %v10191_v53 = vld [vmem:[#allocation2 + $0x500] sm:$0xf]  ;;  %v12686_v59 = vld [vmem:[#allocation2 + $0x50c] sm:$0xf0] }
 0x4c7   :  { %10183 = vmatmul.msk.bf16.gmra.mxu0 %vm1315_vm2, %v2845_v5 }
 0x4c8   :  { %v2683_v54 = vpop.f32.mrf.mxu0 }
 0x4ca   :  { %v2818_v13 = vpop.f32.mrf.mxu3 }
 0x4cb   :  { %v2819_v50 = vadd.f32 %v2818_v13, %v2770_v2  ;;  %v10196_v2 = vor.u32 %v12684_v39, %v10193_v45 }
 0x4cc   :  { %v2779_v60 = vpop.f32.mrf.mxu2  ;;  %v2732_v42 = vpop.f32.mrf.mxu1 }
 0x4cd   :  { %v2733_v5 = vadd.f32 %v2732_v42, %v2683_v54  ;;  %v2780_v13 = vadd.f32 %v2779_v60, %v2731_v14  ;;  %3195 = vmatmul.bf16.vlgmr.msra.gmra.mxu2 %v10196_v2 }
 0x4d0   :  { %v2686_v57 = vpop.f32.mrf.mxu0 }
 0x4d2   :  { %v2820_v43 = vpop.f32.mrf.mxu3 }
 0x4d3   :  { %v2821_v61 = vadd.f32 %v2820_v43, %v2772_v51  ;;  %v10199_v51 = vld [vmem:[#allocation2 + $0x508] sm:$0xf]  ;;  %v12687_v43 = vld [vmem:[#allocation2 + $0x514] sm:$0xf0] }
 0x4d4   :  { %v2781_v25 = vpop.f32.mrf.mxu2  ;;  %v2735_v6 = vpop.f32.mrf.mxu1 }
 0x4d5   :  { %v2846_v23 = vpack.c.bf16 %v2821_v61, %v2819_v50  ;;  %v2782_v22 = vadd.f32 %v2781_v25, %v2733_v5  ;;  %v10200_v61 = vor.u32 %v12687_v43, %v10199_v51  ;;  %v2736_v37 = vadd.f32 %v2735_v6, %v2686_v57  ;;  %v10215_v5 = vld [vmem:[#allocation2 + $0x528] sm:$0xf]  ;;  %v10207_v6 = vld [vmem:[#allocation2 + $0x520] sm:$0xf]  ;;  %v12692_v43 = vld [vmem:[#allocation2 + $0x544] sm:$0xf] }
 0x4d7   :  { %10184 = vmatmul.msk.bf16.gmra.mxu0 %vm1315_vm2, %v2846_v23  ;;  %3244 = vmatmul.bf16.vlgmr.msra.gmra.mxu3 %v10200_v61 }
 0x4d8   :  { %v2688_v50 = vpop.f32.mrf.mxu0  ;;  %4120 = vmatpush.bf16.msra.mxu3 %v14614_v58 }
 0x4da   :  { %v2823_v40 = vpop.f32.mrf.mxu3 }
 0x4db   :  { %v2824_v32 = vadd.f32 %v2823_v40, %v2775_v47  ;;  %v10192_v40 = vor.u32 %v12686_v59, %v10191_v53  ;;  %v12695_v53 = vld [vmem:[#allocation2 + $0x554] sm:$0xf0] }
 0x4dc   :  { %v2784_v3 = vpop.f32.mrf.mxu2  ;;  %v2737_v23 = vpop.f32.mrf.mxu1  ;;  %4121 = vmatpush.bf16.msra.mxu3 %v14620_v9 }
 0x4dd   :  { %3146 = vmatmul.bf16.vlgmr.msra.gmra.mxu1 %v10192_v40  ;;  %v2738_v47 = vadd.f32 %v2737_v23, %v2688_v50 }
 0x4e0   :  { %v2691_v54 = vpop.f32.mrf.mxu0  ;;  %4122 = vmatpush.bf16.msra.mxu3 %v14626_v33  ;;  %v12690_v33 = vld [vmem:[#allocation2 + $0x52c] sm:$0xf0] }
 0x4e2   :  { %v2825_v44 = vpop.f32.mrf.mxu3 }
 0x4e3   :  { %v2826_v10 = vadd.f32 %v2825_v44, %v2777_v24  ;;  %v2785_v24 = vadd.f32 %v2784_v3, %v2736_v37  ;;  %v10208_v3 = vor.u32 %v12690_v33, %v10207_v6  ;;  %v10201_v37 = vld [vmem:[#allocation2 + $0x518] sm:$0xf0]  ;;  %v10257_v6 = vld [vmem:[#allocation2 + $0x590] sm:$0xf0] }
 0x4e4   :  { %v2786_v12 = vpop.f32.mrf.mxu2  ;;  %v2740_v44 = vpop.f32.mrf.mxu1  ;;  %4123 = vmatpush.bf16.msra.mxu3 %v14633_v56 }
 0x4e5   :  { %v2847_v17 = vpack.c.bf16 %v2826_v10, %v2824_v32  ;;  %v2787_v42 = vadd.f32 %v2786_v12, %v2738_v47  ;;  %v12688_v10 = vld [vmem:[#allocation2 + $0x524] sm:$0xf]  ;;  %v2741_v45 = vadd.f32 %v2740_v44, %v2691_v54  ;;  %v12694_v12 = vld [vmem:[#allocation2 + $0x54c] sm:$0xf0] }
 0x4e6   :  { %v12696_v47 = vld [vmem:[#allocation2 + $0x564] sm:$0xf] }
 0x4e7   :  { %10185 = vmatmul.msk.bf16.gmra.mxu0 %vm1315_vm2, %v2847_v17  ;;  %v10209_v17 = vld [vmem:[#allocation2 + $0x530] sm:$0xf0] }
 0x4e8   :  { %v10212_v14 = vor.u32 %v12688_v10, %v10209_v17  ;;  %4124 = vmatpush.bf16.msra.mxu3 %v14639_v0  ;;  %v10231_v0 = vld [vmem:[#allocation2 + $0x548] sm:$0xf]  ;;  %v12699_v10 = vld [vmem:[#allocation2 + $0x574] sm:$0xf0] }
 0x4e9   :  { %v10232_v40 = vor.u32 %v12695_v53, %v10231_v0  ;;  %v10279_v53 = vld [vmem:[#allocation2 + $0x5a8] sm:$0xf] }
 0x4ea   :  { %v2828_v1 = vpop.f32.mrf.mxu3  ;;  %3200 = vmatmul.bf16.gmra.mxu2 %v10212_v14 }
 0x4eb   :  { %v2829_v41 = vadd.f32 %v2828_v1, %v2780_v13  ;;  %v12691_v13 = vld [vmem:[#allocation2 + $0x534] sm:$0xf0] }
 0x4ec   :  { %v2789_v58 = vpop.f32.mrf.mxu2  ;;  %v10216_v9 = vor.u32 %v12691_v13, %v10215_v5  ;;  %4125 = vmatpush.bf16.msra.mxu3 %v14645_v20  ;;  %v10223_v20 = vld [vmem:[#allocation2 + $0x540] sm:$0xf]  ;;  %v14813_v5 = vld [vmem:[%s15988_s20 + $0x70] sm:$0xff]  ;;  %v12689_v13 = vld [vmem:[#allocation2 + $0x52c] sm:$0xf] }
 0x4ed   :  { %3151 = vmatmul.bf16.gmra.mxu1 %v10208_v3 }
 0x4ee   :  { %3249 = vmatmul.bf16.gmra.mxu3 %v10216_v9  ;;  %v14822_v9 = vld [vmem:[%s15988_s20 + $0x68] sm:$0xff] }
 0x4f0   :  { %4126 = vmatpush.bf16.msra.mxu3 %v14651_v49  ;;  %v10224_v49 = vor.u32 %v12694_v12, %v10223_v20  ;;  %v10271_v12 = vld [vmem:[#allocation2 + $0x5a0] sm:$0xf] }
 0x4f2   :  { %v2830_v30 = vpop.f32.mrf.mxu3 }
 0x4f3   :  { %v2831_v11 = vadd.f32 %v2830_v30, %v2782_v22  ;;  %v2693_v22 = vpop.f32.mrf.mxu0  ;;  %v2742_v30 = vpop.f32.mrf.mxu1 }
 0x4f4   :  { %v2791_v56 = vpop.f32.mrf.mxu2  ;;  %4127 = vmatpush.bf16.msra.mxu3 %v14658_v4 }
 0x4f5   :  { %v2848_v63 = vpack.c.bf16 %v2831_v11, %v2829_v41  ;;  %v2743_v41 = vadd.f32 %v2742_v30, %v2693_v22  ;;  %v2790_v11 = vadd.f32 %v2789_v58, %v2741_v45  ;;  %v10263_v30 = vld [vmem:[#allocation2 + $0x588] sm:$0xf] }
 0x4f7   :  { %10186 = vmatmul.msk.bf16.gmra.mxu0 %vm1315_vm2, %v2848_v63  ;;  %v2792_v2 = vadd.f32 %v2791_v56, %v2743_v41  ;;  %v10225_v63 = vld [vmem:[#allocation2 + $0x550] sm:$0xf0]  ;;  %v10255_v41 = vld [vmem:[#allocation2 + $0x580] sm:$0xf]  ;;  %v12702_v56 = vld [vmem:[#allocation2 + $0x58c] sm:$0xf0] }
 0x4f8   :  { %v10228_v23 = vor.u32 %v12692_v43, %v10225_v63  ;;  %v10233_v43 = vld [vmem:[#allocation2 + $0x558] sm:$0xf0]  ;;  %v14842_v63 = vld [vmem:[%s15988_s20 + $0x48] sm:$0xff] }
 0x4fa   :  { %v2833_v60 = vpop.f32.mrf.mxu3  ;;  %3205 = vmatmul.bf16.gmra.mxu2 %v10228_v23 }
 0x4fb   :  { %v2834_v25 = vadd.f32 %v2833_v60, %v2785_v24  ;;  %v12685_v60 = vld [vmem:[#allocation2 + $0x50c] sm:$0xf]  ;;  %v10241_v24 = vld [vmem:[#allocation2 + $0x570] sm:$0xf0] }
 0x4fc   :  { %v10204_v54 = vor.u32 %v12685_v60, %v10201_v37  ;;  %v10244_v44 = vor.u32 %v12696_v47, %v10241_v24  ;;  %v12697_v24 = vld [vmem:[#allocation2 + $0x56c] sm:$0xf] }
 0x4fd   :  { %3156 = vmatmul.bf16.gmra.mxu1 %v10224_v49  ;;  %v12706_v49 = vld [vmem:[#allocation2 + $0x5ac] sm:$0xf0] }
 0x4fe   :  { %3254 = vmatmul.bf16.gmra.mxu3 %v10232_v40  ;;  %v10272_v60 = vor.u32 %v12706_v49, %v10271_v12  ;;  %v12709_v49 = vld [vmem:[#allocation2 + $0x5cc] sm:$0xf] }
 0x502   :  { %v2835_v32 = vpop.f32.mrf.mxu3 }
 0x503   :  { %v2836_v1 = vadd.f32 %v2835_v32, %v2787_v42  ;;  %v10247_v32 = vld [vmem:[#allocation2 + $0x568] sm:$0xf] }
 0x504   :  { %v10248_v17 = vor.u32 %v12699_v10, %v10247_v32 }
 0x505   :  { %v2849_v57 = vpack.c.bf16 %v2836_v1, %v2834_v25  ;;  %v10239_v25 = vld [vmem:[#allocation2 + $0x560] sm:$0xf]  ;;  %v12698_v1 = vld [vmem:[#allocation2 + $0x56c] sm:$0xf0] }
 0x506   :  { %v10240_v14 = vor.u32 %v12698_v1, %v10239_v25  ;;  %v12711_v25 = vld [vmem:[#allocation2 + $0x5d4] sm:$0xf0] }
 0x507   :  { %10187 = vmatmul.msk.bf16.gmra.mxu0 %vm1315_vm2, %v2849_v57  ;;  %v10217_v57 = vld [vmem:[#allocation2 + $0x538] sm:$0xf0] }
 0x508   :  { %v10220_v33 = vor.u32 %v12689_v13, %v10217_v57  ;;  %v12710_v13 = vld [vmem:[#allocation2 + $0x5cc] sm:$0xf0] }
 0x50a   :  { %v2838_v39 = vpop.f32.mrf.mxu3  ;;  %3210 = vmatmul.bf16.gmra.mxu2 %v10244_v44  ;;  %v12708_v44 = vld [vmem:[#allocation2 + $0x5c4] sm:$0xf] }
 0x50b   :  { %v2839_v50 = vadd.f32 %v2838_v39, %v2790_v11  ;;  %v12703_v39 = vld [vmem:[#allocation2 + $0x594] sm:$0xf0]  ;;  %v10256_v11 = vor.u32 %v12702_v56, %v10255_v41 }
 0x50c   :  { %v10264_v45 = vor.u32 %v12703_v39, %v10263_v30  ;;  %v12715_v41 = vld [vmem:[#allocation2 + $0x5f4] sm:$0xf0] }
 0x50d   :  { %3161 = vmatmul.bf16.gmra.mxu1 %v10240_v14 }
 0x50e   :  { %3259 = vmatmul.bf16.gmra.mxu3 %v10248_v17  ;;  %v10295_v17 = vld [vmem:[#allocation2 + $0x5c8] sm:$0xf] }
 0x50f   :  { %v10296_v14 = vor.u32 %v12711_v25, %v10295_v17 }
 0x512   :  { %v2840_v51 = vpop.f32.mrf.mxu3 }
 0x513   :  { %v2841_v61 = vadd.f32 %v2840_v51, %v2792_v2  ;;  %v14833_v51 = vld [vmem:[%s15988_s20 + $0x50] sm:$0xff] }
 0x515   :  { %v2850_v59 = vpack.c.bf16 %v2841_v61, %v2839_v50  ;;  %v10273_v50 = vld [vmem:[#allocation2 + $0x5b0] sm:$0xf0] }
 0x517   :  { %10188 = vmatmul.msk.bf16.gmra.mxu0 %vm1315_vm2, %v2850_v59  ;;  %v12707_v59 = vld [vmem:[#allocation2 + $0x5b4] sm:$0xf0] }
 0x518   :  { %v10280_v20 = vor.u32 %v12707_v59, %v10279_v53 }
 0x51d   :  { %3166 = vmatmul.bf16.gmra.mxu1 %v10256_v11 }
 0x51e   :  { %3264 = vmatmul.bf16.gmra.mxu3 %v10264_v45  ;;  %v10311_v45 = vld [vmem:[#allocation2 + $0x5e8] sm:$0xf] }
 0x51f   :  { %v10312_v11 = vor.u32 %v12715_v41, %v10311_v45 }
 0x524   :  { %v2889_v42 = vpop.f32.mrf.mxu0 }
 0x525   :  { %v14807_v4 = vadd.f32 %v2889_v42, %v14668_v48  ;;  %v10289_v42 = vld [vmem:[#allocation2 + $0x5d0] sm:$0xf0] }
 0x526   :  { %v10292_v10 = vor.u32 %v12708_v44, %v10289_v42  ;;  %v16016_v44 = vld [vmem:[#allocation51_spill] sm:$0xff] }
 0x527   :  { %3293 = vmatmul.bf16.vlgmr.msrb.gmra.mxu0 %v10204_v54  ;;  %v10249_v54 = vld [vmem:[#allocation2 + $0x578] sm:$0xf0] }
 0x528   :  { %4169 = vmatpush.bf16.msrb.mxu0 %v14664_v8  ;;  %v12700_v8 = vld [vmem:[#allocation2 + $0x584] sm:$0xf]  ;;  %v10252_v32 = vor.u32 %v12697_v24, %v10249_v54 }
 0x529   :  { %v10260_v3 = vor.u32 %v12700_v8, %v10257_v6  ;;  %v12701_v6 = vld [vmem:[#allocation2 + $0x58c] sm:$0xf] }
 0x52b   :  { %3215 = vmatmul.bf16.gmra.mxu2 %v10260_v3  ;;  %v12712_v3 = vld [vmem:[#allocation2 + $0x5e4] sm:$0xf] }
 0x52c   :  { %v2891_v58 = vpop.f32.mrf.mxu0  ;;  %4170 = vmatpush.bf16.msrb.mxu0 %v14813_v5 }
 0x52d   :  { %v14817_v48 = vadd.f32 %v2891_v58, %v14673_v55  ;;  %3171 = vmatmul.bf16.gmra.mxu1 %v10272_v60  ;;  %v10287_v58 = vld [vmem:[#allocation2 + $0x5c0] sm:$0xf]  ;;  %v10297_v60 = vld [vmem:[#allocation2 + $0x5d8] sm:$0xf0] }
 0x52e   :  { %3269 = vmatmul.bf16.gmra.mxu3 %v10280_v20 }
 0x530   :  { %4171 = vmatpush.bf16.msrb.mxu0 %v14822_v9 }
 0x534   :  { %v2894_v22 = vpop.f32.mrf.mxu0  ;;  %4172 = vmatpush.bf16.msrb.mxu0 %v14678_v28 }
 0x535   :  { %v14827_v55 = vadd.f32 %v2894_v22, %v14688_v46  ;;  %v12693_v46 = vld [vmem:[#allocation2 + $0x54c] sm:$0xf]  ;;  %v10305_v22 = vld [vmem:[#allocation2 + $0x5f0] sm:$0xf0] }
 0x536   :  { %v10236_v61 = vor.u32 %v12693_v46, %v10233_v43  ;;  %v10308_v39 = vor.u32 %v12712_v3, %v10305_v22  ;;  %v12714_v46 = vld [vmem:[#allocation2 + $0x5ec] sm:$0xf0] }
 0x537   :  { %3298 = vmatmul.bf16.gmra.mxu0 %v10220_v33  ;;  %v10265_v33 = vld [vmem:[#allocation2 + $0x598] sm:$0xf0] }
 0x538   :  { %4173 = vmatpush.bf16.msrb.mxu0 %v14684_v36  ;;  %v12704_v36 = vld [vmem:[#allocation2 + $0x5a4] sm:$0xf]  ;;  %v10268_v30 = vor.u32 %v12701_v6, %v10265_v33 }
 0x539   :  { %v10276_v23 = vor.u32 %v12704_v36, %v10273_v50  ;;  %v3343_v36 = vld [vmem:[#allocation5 + $0xa] sm:$0x3] }
 0x53a   :  { %v3369_v50 = vand.u32 %v3343_v36, %v14135_v52 }
 0x53b   :  { %3220 = vmatmul.bf16.gmra.mxu2 %v10276_v23  ;;  %v10281_v23 = vld [vmem:[#allocation2 + $0x5b8] sm:$0xf0] }
 0x53c   :  { %v2896_v2 = vpop.f32.mrf.mxu0  ;;  %4174 = vmatpush.bf16.msrb.mxu0 %v14833_v51  ;;  %3378 = vmatpush.bf16.msrb.mxu1 %v3369_v50 }
 0x53d   :  { %v14837_v28 = vadd.f32 %v2896_v2, %v14693_v15  ;;  %v14848_v15 = vld [vmem:[%s15988_s20 + $0x40] sm:$0xff] }
 0x53e   :  { %3274 = vmatmul.bf16.gmra.mxu3 %v10296_v14  ;;  %v10303_v2 = vld [vmem:[#allocation2 + $0x5e0] sm:$0xf] }
 0x540   :  { %4175 = vmatpush.bf16.msrb.mxu0 %v14842_v63  ;;  %3776 = vmatpush.bf16.msra.mxu1 %v14720_v21 }
 0x544   :  { %v2899_v0 = vpop.f32.mrf.mxu0  ;;  %4176 = vmatpush.bf16.msrb.mxu0 %v14848_v15  ;;  %3777 = vmatpush.bf16.msra.mxu1 %v14726_v35  ;;  %v16015_v35 = vld [vmem:[#allocation49_spill] sm:$0xff] }
 0x545   :  { %v14852_v40 = vadd.f32 %v2899_v0, %v14697_v29 }
 0x547   :  { %3303 = vmatmul.bf16.gmra.mxu0 %v10236_v61  ;;  %v12705_v61 = vld [vmem:[#allocation2 + $0x5ac] sm:$0xf] }
 0x548   :  { %3778 = vmatpush.bf16.msra.mxu1 %v14734_v31 }
 0x54b   :  { %3225 = vmatmul.bf16.gmra.mxu2 %v10292_v10  ;;  %v12713_v10 = vld [vmem:[#allocation2 + $0x5ec] sm:$0xf] }
 0x54c   :  { %v2901_v37 = vpop.f32.mrf.mxu0  ;;  %3779 = vmatpush.bf16.msra.mxu1 %v14740_v27 }
 0x54d   :  { %v14855_v47 = vadd.f32 %v2901_v37, %v14700_v26  ;;  %v10288_v26 = vor.u32 %v12710_v13, %v10287_v58  ;;  %v10300_v37 = vor.u32 %v12709_v49, %v10297_v60 }
 0x54e   :  { %3279 = vmatmul.bf16.gmra.mxu3 %v10312_v11 }
 0x54f   :  { %3176 = vmatmul.bf16.gmra.mxu1 %v10288_v26 }
 0x550   :  { %v3196_v12 = vpop.f32.mrf.mxu2  ;;  %3780 = vmatpush.bf16.msra.mxu1 %v14749_v38  ;;  %v10313_v38 = vld [vmem:[#allocation2 + $0x5f8] sm:$0xf0] }
 0x551   :  { %v10316_v25 = vor.u32 %v12713_v10, %v10313_v38  ;;  %v14921_v38 = vld [vmem:[%s15988_s20 + $0x98] sm:$0xff] }
 0x554   :  { %v2904_v29 = vpop.f32.mrf.mxu0  ;;  %3781 = vmatpush.bf16.msra.mxu1 %v16015_v35 }
 0x555   :  { %v14858_v1 = vadd.f32 %v2904_v29, %v14703_v34 }
 0x557   :  { %3308 = vmatmul.bf16.gmra.mxu0 %v10252_v32  ;;  %v16017_v32 = vld [vmem:[#allocation52_spill] sm:$0xff] }
 0x558   :  { %v3198_v54 = vpop.f32.mrf.mxu2  ;;  %3782 = vmatpush.bf16.msra.mxu1 %v16016_v44 }
 0x55a   :  { %v3147_v20 = vpop.f32.mrf.mxu1  ;;  %v3245_v21 = vpop.f32.mrf.mxu3 }
 0x55b   :  { %3230 = vmatmul.bf16.gmra.mxu2 %v10308_v39  ;;  %v3197_v22 = vadd.f32 %v3196_v12, %v3147_v20  ;;  %v14902_v12 = vld [vmem:[%s15988_s20 + $0xb0] sm:$0xff] }
 0x55c   :  { %v2906_v57 = vpop.f32.mrf.mxu0  ;;  %3783 = vmatpush.bf16.msra.mxu1 %v16017_v32  ;;  %v14914_v32 = vld [vmem:[%s15988_s20 + $0xa0] sm:$0xff] }
 0x55d   :  { %v14861_v8 = vadd.f32 %v2906_v57, %v14706_v16  ;;  %v10304_v16 = vor.u32 %v12714_v46, %v10303_v2  ;;  %v3246_v45 = vadd.f32 %v3245_v21, %v3197_v22 }
 0x55f   :  { %3181 = vmatmul.bf16.gmra.mxu1 %v10304_v16 }
 0x562   :  { %v3149_v31 = vpop.f32.mrf.mxu1  ;;  %v3247_v27 = vpop.f32.mrf.mxu3 }
 0x564   :  { %v2909_v34 = vpop.f32.mrf.mxu0 }
 0x565   :  { %v14864_v56 = vadd.f32 %v2909_v34, %v14709_v62  ;;  %v10284_v62 = vor.u32 %v12705_v61, %v10281_v23  ;;  %v3199_v34 = vadd.f32 %v3198_v54, %v3149_v31  ;;  %v14896_v23 = vld [vmem:[%s15988_s20 + $0xb8] sm:$0xff] }
 0x567   :  { %3313 = vmatmul.bf16.gmra.mxu0 %v10268_v30  ;;  %v3248_v11 = vadd.f32 %v3247_v27, %v3199_v34 }
 0x56a   :  { %v3152_v29 = vpop.f32.mrf.mxu1 }
 0x56c   :  { %v14866_v43 = vpop.f32.mrf.mxu0 }
 0x56d   :  { %v3201_v17 = vpop.f32.mrf.mxu2 }
 0x56e   :  { %v3202_v20 = vadd.f32 %v3201_v17, %v3152_v29 }
 0x571   :  { %v3250_v13 = vpop.f32.mrf.mxu3 }
 0x572   :  { %v3154_v26 = vpop.f32.mrf.mxu1  ;;  %v3251_v60 = vadd.f32 %v3250_v13, %v3202_v20 }
 0x574   :  { %v2914_v0 = vpop.f32.mrf.mxu0 }
 0x575   :  { %v14871_v53 = vadd.f32 %v2914_v0, %v14715_v19  ;;  %v3203_v6 = vpop.f32.mrf.mxu2 }
 0x576   :  { %v3204_v49 = vadd.f32 %v3203_v6, %v3154_v26 }
 0x577   :  { %3318 = vmatmul.bf16.gmra.mxu0 %v10284_v62 }
 0x579   :  { %v3252_v33 = vpop.f32.mrf.mxu3 }
 0x57a   :  { %v3157_v30 = vpop.f32.mrf.mxu1  ;;  %v3253_v35 = vadd.f32 %v3252_v33, %v3204_v49 }
 0x57c   :  { %v14875_v59 = vpop.f32.mrf.mxu0 }
 0x57d   :  { %v3206_v39 = vpop.f32.mrf.mxu2 }
 0x581   :  { %v3255_v41 = vpop.f32.mrf.mxu3 }
 0x582   :  { %v3159_v50 = vpop.f32.mrf.mxu1 }
 0x584   :  { %v2919_v24 = vpop.f32.mrf.mxu0 }
 0x585   :  { %v14880_v19 = vadd.f32 %v2919_v24, %v14744_v18  ;;  %v16018_v18 = vld [vmem:[#allocation53_spill] sm:$0xff]  ;;  %v3208_v61 = vpop.f32.mrf.mxu2 }
 0x586   :  { %v14908_v24 = vld [vmem:[%s15988_s20 + $0xa8] sm:$0xff]  ;;  %v3209_v13 = vadd.f32 %v3208_v61, %v3159_v50 }
 0x587   :  { %3323 = vmatmul.bf16.gmra.mxu0 %v10300_v37 }
 0x589   :  { %v3257_v0 = vpop.f32.mrf.mxu3 }
 0x58a   :  { %v3162_v21 = vpop.f32.mrf.mxu1  ;;  %v3258_v33 = vadd.f32 %v3257_v0, %v3209_v13 }
 0x58c   :  { %v14884_v42 = vpop.f32.mrf.mxu0 }
 0x58d   :  { %v3211_v37 = vpop.f32.mrf.mxu2 }
 0x591   :  { %v3260_v27 = vpop.f32.mrf.mxu3 }
 0x592   :  { %v3164_v29 = vpop.f32.mrf.mxu1 }
 0x594   :  { %v2924_v14 = vpop.f32.mrf.mxu0 }
 0x595   :  { %v14888_v58 = vadd.f32 %v2924_v14, %v16018_v18  ;;  %v3207_v14 = vadd.f32 %v3206_v39, %v3157_v30  ;;  %v14927_v18 = vld [vmem:[%s15988_s20 + $0x90] sm:$0xff]  ;;  %v14934_v30 = vld [vmem:[%s15988_s20 + $0x80] sm:$0xff] }
 0x597   :  { %3328 = vmatmul.bf16.gmra.mxu0 %v10316_v25  ;;  %v3213_v25 = vpop.f32.mrf.mxu2  ;;  %v3256_v6 = vadd.f32 %v3255_v41, %v3207_v14 }
 0x599   :  { %v3262_v26 = vpop.f32.mrf.mxu3 }
 0x59c   :  { %v14890_v57 = vpop.f32.mrf.mxu0 }
 0x5a4   :  { %v3294_v3 = vpop.f32.mrf.mxu0 }
 0x5a5   :  { %v3295_v46 = vadd.f32 %v3294_v3, %v3246_v45  ;;  %v3167_v45 = vpop.f32.mrf.mxu1 }
 0x5ac   :  { %v3296_v2 = vpop.f32.mrf.mxu0 }
 0x5ad   :  { %v3297_v16 = vadd.f32 %v3296_v2, %v3248_v11  ;;  %v3265_v2 = vpop.f32.mrf.mxu3 }
 0x5ae   :  { %v3216_v11 = vpop.f32.mrf.mxu2 }
 0x5af   :  { %v3334_v36 = vpack.c.bf16 %v3297_v16, %v3295_v46  ;;  %v3212_v46 = vadd.f32 %v3211_v37, %v3162_v21  ;;  %v3169_v16 = vpop.f32.mrf.mxu1 }
 0x5b1   :  { %10317 = vmatmul.msk.bf16.vlgmr.msrb.gmra.mxu1 %vm1315_vm2, %v3334_v36  ;;  %v3261_v50 = vadd.f32 %v3260_v27, %v3212_v46 }
 0x5b2   :  { %4218 = vmatpush.bf16.msrb.mxu1 %v14896_v23 }
 0x5b4   :  { %v3299_v62 = vpop.f32.mrf.mxu0 }
 0x5b5   :  { %v3300_v54 = vadd.f32 %v3299_v62, %v3251_v60  ;;  %v3267_v0 = vpop.f32.mrf.mxu3 }
 0x5b6   :  { %4219 = vmatpush.bf16.msrb.mxu1 %v14902_v12  ;;  %v3218_v36 = vpop.f32.mrf.mxu2 }
 0x5ba   :  { %4220 = vmatpush.bf16.msrb.mxu1 %v14908_v24 }
 0x5bc   :  { %v3301_v31 = vpop.f32.mrf.mxu0 }
 0x5bd   :  { %v3302_v44 = vadd.f32 %v3301_v31, %v3253_v35  ;;  %v3172_v35 = vpop.f32.mrf.mxu1 }
 0x5be   :  { %4221 = vmatpush.bf16.msrb.mxu1 %v14914_v32  ;;  %v3221_v31 = vpop.f32.mrf.mxu2 }
 0x5bf   :  { %v3335_v10 = vpack.c.bf16 %v3302_v44, %v3300_v54  ;;  %v3217_v44 = vadd.f32 %v3216_v11, %v3167_v45 }
 0x5c1   :  { %10318 = vmatmul.msk.bf16.gmra.mxu1 %vm1315_vm2, %v3335_v10  ;;  %v3270_v10 = vpop.f32.mrf.mxu3  ;;  %v3266_v14 = vadd.f32 %v3265_v2, %v3217_v44  ;;  %v10327_v2 = vld [vmem:[#allocation2 + $0x600] sm:$0xf] }
 0x5c2   :  { %4222 = vmatpush.bf16.msrb.mxu1 %v14921_v38 }
 0x5c4   :  { %v3304_v17 = vpop.f32.mrf.mxu0 }
 0x5c5   :  { %v3305_v22 = vadd.f32 %v3304_v17, %v3256_v6  ;;  %v3219_v17 = vadd.f32 %v3218_v36, %v3169_v16  ;;  %v3174_v37 = vpop.f32.mrf.mxu1  ;;  %v12716_v16 = vld [vmem:[#allocation2 + $0x604] sm:$0xf] }
 0x5c6   :  { %4223 = vmatpush.bf16.msrb.mxu1 %v14927_v18 }
 0x5c7   :  { %v3268_v21 = vadd.f32 %v3267_v0, %v3219_v17 }
 0x5c9   :  { %v3272_v6 = vpop.f32.mrf.mxu3 }
 0x5ca   :  { %4224 = vmatpush.bf16.msrb.mxu1 %v14788_v7  ;;  %v3214_v7 = vadd.f32 %v3213_v25, %v3164_v29  ;;  %v3223_v25 = vpop.f32.mrf.mxu2 }
 0x5cc   :  { %v3306_v3 = vpop.f32.mrf.mxu0  ;;  %v3263_v61 = vadd.f32 %v3262_v26, %v3214_v7  ;;  %v12718_v7 = vld [vmem:[#allocation2 + $0x60c] sm:$0xf0] }
 0x5cd   :  { %v3307_v34 = vadd.f32 %v3306_v3, %v3258_v33  ;;  %v3222_v3 = vadd.f32 %v3221_v31, %v3172_v35  ;;  %v10335_v35 = vld [vmem:[#allocation2 + $0x608] sm:$0xf]  ;;  %v12719_v31 = vld [vmem:[#allocation2 + $0x614] sm:$0xf0] }
 0x5ce   :  { %4225 = vmatpush.bf16.msrb.mxu1 %v14934_v30 }
 0x5cf   :  { %v3336_v39 = vpack.c.bf16 %v3307_v34, %v3305_v22  ;;  %v3177_v22 = vpop.f32.mrf.mxu1 }
 0x5d1   :  { %10319 = vmatmul.msk.bf16.gmra.mxu1 %vm1315_vm2, %v3336_v39  ;;  %v3224_v39 = vadd.f32 %v3223_v25, %v3174_v37  ;;  %v3275_v45 = vpop.f32.mrf.mxu3  ;;  %v13286_v25 = vld [vmem:[%s15988_s20 + $0x30] sm:$0xff] }
 0x5d2   :  { %v3226_v34 = vpop.f32.mrf.mxu2 }
 0x5d3   :  { %v3273_v11 = vadd.f32 %v3272_v6, %v3224_v39  ;;  %v3227_v17 = vadd.f32 %v3226_v34, %v3177_v22  ;;  %v10343_v6 = vld [vmem:[#allocation2 + $0x620] sm:$0xf] }
 0x5d4   :  { %v3309_v41 = vpop.f32.mrf.mxu0 }
 0x5d5   :  { %v3310_v20 = vadd.f32 %v3309_v41, %v3261_v50  ;;  %v3271_v41 = vadd.f32 %v3270_v10, %v3222_v3  ;;  %v3276_v37 = vadd.f32 %v3275_v45, %v3227_v17  ;;  %v12720_v3 = vld [vmem:[#allocation2 + $0x624] sm:$0xf]  ;;  %v13287_v45 = vld [vmem:[%s15988_s20 + $0x28] sm:$0xff]  ;;  %v10359_v17 = vld [vmem:[#allocation2 + $0x640] sm:$0xf] }
 0x5d9   :  { %v3277_v44 = vpop.f32.mrf.mxu3 }
 0x5dc   :  { %v3311_v62 = vpop.f32.mrf.mxu0 }
 0x5dd   :  { %v3312_v49 = vadd.f32 %v3311_v62, %v3263_v61  ;;  %v10328_v61 = vor.u32 %v12718_v7, %v10327_v2  ;;  %v10329_v62 = vld [vmem:[#allocation2 + $0x610] sm:$0xf0]  ;;  %v13288_v7 = vld [vmem:[%s15988_s20 + $0x20] sm:$0xff] }
 0x5de   :  { %v10332_v0 = vor.u32 %v12716_v16, %v10329_v62  ;;  %v12723_v62 = vld [vmem:[#allocation2 + $0x634] sm:$0xf0] }
 0x5df   :  { %v3337_v60 = vpack.c.bf16 %v3312_v49, %v3310_v20  ;;  %v3179_v49 = vpop.f32.mrf.mxu1  ;;  %3637 = vmatmul.bf16.vlgmr.msrb.gmra.mxu2 %v10328_v61  ;;  %v10351_v61 = vld [vmem:[#allocation2 + $0x628] sm:$0xf] }
 0x5e0   :  { %3686 = vmatmul.bf16.vlgmr.msrb.gmra.mxu3 %v10332_v0 }
 0x5e1   :  { %10320 = vmatmul.msk.bf16.gmra.mxu1 %vm1315_vm2, %v3337_v60  ;;  %v3228_v60 = vpop.f32.mrf.mxu2 }
 0x5e4   :  { %v3314_v54 = vpop.f32.mrf.mxu0 }
 0x5e5   :  { %v3315_v27 = vadd.f32 %v3314_v54, %v3266_v14  ;;  %v10336_v54 = vor.u32 %v12719_v31, %v10335_v35  ;;  %v13285_v14 = vld [vmem:[%s15988_s20 + $0x38] sm:$0xff] }
 0x5e7   :  { %3735 = vmatmul.bf16.vlgmr.msra.gmra.mxu0 %v10336_v54  ;;  %v13290_v54 = vld [vmem:[%s15988_s20 + $0x10] sm:$0xff] }
 0x5e8   :  { %4611 = vmatpush.bf16.msra.mxu0 %v13285_v14  ;;  %v12726_v14 = vld [vmem:[#allocation2 + $0x64c] sm:$0xf0] }
 0x5ec   :  { %v3316_v29 = vpop.f32.mrf.mxu0  ;;  %4612 = vmatpush.bf16.msra.mxu0 %v13286_v25  ;;  %v10360_v25 = vor.u32 %v12726_v14, %v10359_v17 }
 0x5ed   :  { %v3317_v13 = vadd.f32 %v3316_v29, %v3268_v21  ;;  %v3229_v21 = vadd.f32 %v3228_v60, %v3179_v49  ;;  %v3182_v29 = vpop.f32.mrf.mxu1  ;;  %v13289_v49 = vld [vmem:[%s15988_s20 + $0x18] sm:$0xff] }
 0x5ef   :  { %v3338_v26 = vpack.c.bf16 %v3317_v13, %v3315_v27  ;;  %v3231_v27 = vpop.f32.mrf.mxu2  ;;  %v3278_v13 = vadd.f32 %v3277_v44, %v3229_v21  ;;  %v12724_v21 = vld [vmem:[#allocation2 + $0x644] sm:$0xf] }
 0x5f0   :  { %4613 = vmatpush.bf16.msra.mxu0 %v13287_v45  ;;  %v3232_v0 = vadd.f32 %v3231_v27, %v3182_v29  ;;  %v10361_v27 = vld [vmem:[#allocation2 + $0x650] sm:$0xf0]  ;;  %v10375_v45 = vld [vmem:[#allocation2 + $0x660] sm:$0xf] }
 0x5f1   :  { %10321 = vmatmul.msk.bf16.gmra.mxu1 %vm1315_vm2, %v3338_v26 }
 0x5f4   :  { %v3319_v33 = vpop.f32.mrf.mxu0  ;;  %4614 = vmatpush.bf16.msra.mxu0 %v13288_v7 }
 0x5f5   :  { %v3320_v36 = vadd.f32 %v3319_v33, %v3271_v41  ;;  %v12722_v33 = vld [vmem:[#allocation2 + $0x62c] sm:$0xf0]  ;;  %v10345_v41 = vld [vmem:[#allocation2 + $0x630] sm:$0xf0]  ;;  %v3184_v16 = vpop.f32.mrf.mxu1 }
 0x5f6   :  { %v10344_v39 = vor.u32 %v12722_v33, %v10343_v6  ;;  %v13292_v33 = vld [vmem:[%s15988_s20] sm:$0xff] }
 0x5f8   :  { %3642 = vmatmul.bf16.gmra.mxu2 %v10344_v39  ;;  %4615 = vmatpush.bf16.msra.mxu0 %v13289_v49  ;;  %v12717_v39 = vld [vmem:[#allocation2 + $0x60c] sm:$0xf] }
 0x5fc   :  { %v3321_v46 = vpop.f32.mrf.mxu0  ;;  %4616 = vmatpush.bf16.msra.mxu0 %v13290_v54  ;;  %v10391_v54 = vld [vmem:[#allocation2 + $0x680] sm:$0xf] }
 0x5fd   :  { %v3322_v50 = vadd.f32 %v3321_v46, %v3273_v11  ;;  %v3280_v11 = vpop.f32.mrf.mxu3  ;;  %v10348_v46 = vor.u32 %v12720_v3, %v10345_v41  ;;  %v10367_v3 = vld [vmem:[#allocation2 + $0x648] sm:$0xf]  ;;  %v10337_v41 = vld [vmem:[#allocation2 + $0x618] sm:$0xf0] }
 0x5fe   :  { %v3281_v31 = vadd.f32 %v3280_v11, %v3232_v0  ;;  %v12730_v11 = vld [vmem:[#allocation2 + $0x66c] sm:$0xf0]  ;;  %v10383_v0 = vld [vmem:[#allocation2 + $0x668] sm:$0xf] }
 0x5ff   :  { %v3339_v20 = vpack.c.bf16 %v3322_v50, %v3320_v36  ;;  %3691 = vmatmul.bf16.gmra.mxu3 %v10348_v46  ;;  %v3233_v36 = vpop.f32.mrf.mxu2  ;;  %v12728_v46 = vld [vmem:[#allocation2 + $0x664] sm:$0xf]  ;;  %v10376_v7 = vor.u32 %v12730_v11, %v10375_v45  ;;  %v10409_v45 = vld [vmem:[#allocation2 + $0x6b0] sm:$0xf0] }
 0x600   :  { %v3234_v60 = vadd.f32 %v3233_v36, %v3184_v16  ;;  %v10377_v16 = vld [vmem:[#allocation2 + $0x670] sm:$0xf0] }
 0x601   :  { %10322 = vmatmul.msk.bf16.gmra.mxu1 %vm1315_vm2, %v3339_v20  ;;  %v10352_v20 = vor.u32 %v12723_v62, %v10351_v61  ;;  %v13293_v62 = vld [vmem:[%s15988_s20 + $0x78] sm:$0xff] }
 0x603   :  { %3740 = vmatmul.bf16.gmra.mxu0 %v10352_v20  ;;  %v12731_v20 = vld [vmem:[#allocation2 + $0x674] sm:$0xf0] }
 0x604   :  { %v3324_v10 = vpop.f32.mrf.mxu0  ;;  %v10384_v49 = vor.u32 %v12731_v20, %v10383_v0  ;;  %v12742_v0 = vld [vmem:[#allocation2 + $0x6cc] sm:$0xf0]  ;;  %v12740_v20 = vld [vmem:[#allocation2 + $0x6c4] sm:$0xf] }
 0x605   :  { %v3325_v22 = vadd.f32 %v3324_v10, %v3276_v37  ;;  %v3282_v35 = vpop.f32.mrf.mxu3 }
 0x606   :  { %v3283_v44 = vadd.f32 %v3282_v35, %v3234_v60 }
 0x608   :  { %3647 = vmatmul.bf16.gmra.mxu2 %v10360_v25  ;;  %v10399_v25 = vld [vmem:[#allocation2 + $0x688] sm:$0xf] }
 0x60c   :  { %v3326_v26 = vpop.f32.mrf.mxu0 }
 0x60d   :  { %v3327_v34 = vadd.f32 %v3326_v26, %v3278_v13  ;;  %v13291_v13 = vld [vmem:[%s15988_s20 + $0x8] sm:$0xff]  ;;  %v10364_v26 = vor.u32 %v12724_v21, %v10361_v27  ;;  %v10393_v21 = vld [vmem:[#allocation2 + $0x690] sm:$0xf0]  ;;  %v12735_v27 = vld [vmem:[#allocation2 + $0x694] sm:$0xf0] }
 0x60e   :  { %4617 = vmatpush.bf16.msra.mxu0 %v13291_v13  ;;  %v10400_v13 = vor.u32 %v12735_v27, %v10399_v25 }
 0x60f   :  { %v3340_v2 = vpack.c.bf16 %v3327_v34, %v3325_v22  ;;  %3696 = vmatmul.bf16.gmra.mxu3 %v10364_v26  ;;  %v12727_v22 = vld [vmem:[#allocation2 + $0x654] sm:$0xf0] }
 0x610   :  { %v10368_v34 = vor.u32 %v12727_v22, %v10367_v3  ;;  %v10407_v3 = vld [vmem:[#allocation2 + $0x6a0] sm:$0xf]  ;;  %v12738_v22 = vld [vmem:[#allocation2 + $0x6ac] sm:$0xf0] }
 0x611   :  { %10323 = vmatmul.msk.bf16.gmra.mxu1 %vm1315_vm2, %v3340_v2  ;;  %v10340_v2 = vor.u32 %v12717_v39, %v10337_v41  ;;  %v10408_v41 = vor.u32 %v12738_v22, %v10407_v3  ;;  %v3834_v22 = vld [vmem:[#allocation5 + $0xc] sm:$0x3] }
 0x612   :  { %4618 = vmatpush.bf16.msra.mxu0 %v13292_v33  ;;  %v10369_v33 = vld [vmem:[#allocation2 + $0x658] sm:$0xf0] }
 0x613   :  { %3745 = vmatmul.bf16.gmra.mxu0 %v10368_v34  ;;  %v12736_v34 = vld [vmem:[#allocation2 + $0x6a4] sm:$0xf] }
 0x614   :  { %v3329_v50 = vpop.f32.mrf.mxu0 }
 0x615   :  { %v3330_v37 = vadd.f32 %v3329_v50, %v3281_v31  ;;  %v10380_v50 = vor.u32 %v12728_v46, %v10377_v16  ;;  %v10353_v31 = vld [vmem:[#allocation2 + $0x638] sm:$0xf0]  ;;  %v10412_v46 = vor.u32 %v12736_v34, %v10409_v45  ;;  %v3860_v34 = vand.u32 %v3834_v22, %v14135_v52 }
 0x617   :  { %3869 = vmatpush.bf16.msra.mxu2 %v3860_v34 }
 0x618   :  { %3652 = vmatmul.bf16.gmra.mxu2 %v10376_v7 }
 0x61c   :  { %v3331_v10 = vpop.f32.mrf.mxu0 }
 0x61d   :  { %v3332_v29 = vadd.f32 %v3331_v10, %v3283_v44  ;;  %v12734_v44 = vld [vmem:[#allocation2 + $0x68c] sm:$0xf0]  ;;  %v12732_v10 = vld [vmem:[#allocation2 + $0x684] sm:$0xf] }
 0x61e   :  { %v10392_v14 = vor.u32 %v12734_v44, %v10391_v54  ;;  %v10431_v54 = vld [vmem:[#allocation2 + $0x6c8] sm:$0xf] }
 0x61f   :  { %v3341_v6 = vpack.c.bf16 %v3332_v29, %v3330_v37  ;;  %3701 = vmatmul.bf16.gmra.mxu3 %v10380_v50  ;;  %v10396_v29 = vor.u32 %v12732_v10, %v10393_v21  ;;  %v10385_v50 = vld [vmem:[#allocation2 + $0x678] sm:$0xf0] }
 0x620   :  { %v10401_v21 = vld [vmem:[#allocation2 + $0x698] sm:$0xf0] }
 0x621   :  { %10324 = vmatmul.msk.bf16.gmra.mxu1 %vm1315_vm2, %v3341_v6 }
 0x623   :  { %3750 = vmatmul.bf16.gmra.mxu0 %v10384_v49 }
 0x628   :  { %3657 = vmatmul.bf16.gmra.mxu2 %v10392_v14  ;;  %v12733_v14 = vld [vmem:[#allocation2 + $0x68c] sm:$0xf] }
 0x62e   :  { %v3380_v36 = vpop.f32.mrf.mxu1 }
 0x62f   :  { %v14968_v61 = vadd.f32 %v3380_v36, %v14807_v4  ;;  %v12721_v4 = vld [vmem:[#allocation2 + $0x62c] sm:$0xf]  ;;  %3706 = vmatmul.bf16.gmra.mxu3 %v10396_v29  ;;  %v12746_v29 = vld [vmem:[#allocation2 + $0x6ec] sm:$0xf0] }
 0x630   :  { %v10356_v17 = vor.u32 %v12721_v4, %v10353_v31  ;;  %v12729_v36 = vld [vmem:[#allocation2 + $0x66c] sm:$0xf] }
 0x631   :  { %3784 = vmatmul.bf16.vlgmr.msra.gmra.mxu1 %v10340_v2  ;;  %v12739_v2 = vld [vmem:[#allocation2 + $0x6b4] sm:$0xf0] }
 0x632   :  { %4660 = vmatpush.bf16.msra.mxu1 %v13293_v62  ;;  %v10423_v62 = vld [vmem:[#allocation2 + $0x6c0] sm:$0xf] }
 0x633   :  { %3755 = vmatmul.bf16.gmra.mxu0 %v10400_v13  ;;  %v10424_v49 = vor.u32 %v12742_v0, %v10423_v62  ;;  %v10433_v62 = vld [vmem:[#allocation2 + $0x6d8] sm:$0xf0] }
 0x634   :  { %v15043_v0 = vld [vmem:[%s15988_s20 + $0xd8] sm:$0xff] }
 0x636   :  { %v3382_v60 = vpop.f32.mrf.mxu1  ;;  %4661 = vmatpush.bf16.msra.mxu1 %v14813_v5  ;;  %v13294_v5 = vld [vmem:[%s15988_s20 + $0x60] sm:$0xff] }
 0x637   :  { %v14975_v35 = vadd.f32 %v3382_v60, %v14817_v48 }
 0x638   :  { %3662 = vmatmul.bf16.gmra.mxu2 %v10408_v41  ;;  %v10417_v41 = vld [vmem:[#allocation2 + $0x6b8] sm:$0xf0] }
 0x63a   :  { %4662 = vmatpush.bf16.msra.mxu1 %v14822_v9  ;;  %v13295_v9 = vld [vmem:[%s15988_s20 + $0x58] sm:$0xff] }
 0x63e   :  { %v3385_v37 = vpop.f32.mrf.mxu1  ;;  %4663 = vmatpush.bf16.msra.mxu1 %v13294_v5  ;;  %v12744_v5 = vld [vmem:[#allocation2 + $0x6e4] sm:$0xf] }
 0x63f   :  { %v14982_v48 = vadd.f32 %v3385_v37, %v14827_v55  ;;  %v12725_v55 = vld [vmem:[#allocation2 + $0x64c] sm:$0xf]  ;;  %3711 = vmatmul.bf16.gmra.mxu3 %v10412_v46  ;;  %v10439_v37 = vld [vmem:[#allocation2 + $0x6e0] sm:$0xf] }
 0x640   :  { %v10372_v39 = vor.u32 %v12725_v55, %v10369_v33  ;;  %v10440_v25 = vor.u32 %v12746_v29, %v10439_v37  ;;  %v10447_v55 = vld [vmem:[#allocation2 + $0x6e8] sm:$0xf] }
 0x641   :  { %3789 = vmatmul.bf16.gmra.mxu1 %v10356_v17 }
 0x642   :  { %4664 = vmatpush.bf16.msra.mxu1 %v13295_v9  ;;  %v10404_v9 = vor.u32 %v12733_v14, %v10401_v21  ;;  %v12745_v14 = vld [vmem:[#allocation2 + $0x6ec] sm:$0xf]  ;;  %v10449_v21 = vld [vmem:[#allocation2 + $0x6f8] sm:$0xf0] }
 0x646   :  { %v3387_v26 = vpop.f32.mrf.mxu1  ;;  %4665 = vmatpush.bf16.msra.mxu1 %v14833_v51 }
 0x647   :  { %v14989_v6 = vadd.f32 %v3387_v26, %v14837_v28  ;;  %v10415_v28 = vld [vmem:[#allocation2 + $0x6a8] sm:$0xf] }
 0x648   :  { %v10416_v7 = vor.u32 %v12739_v2, %v10415_v28  ;;  %3667 = vmatmul.bf16.gmra.mxu2 %v10424_v49  ;;  %v15023_v28 = vld [vmem:[%s15988_s20 + $0xf0] sm:$0xff]  ;;  %v15029_v2 = vld [vmem:[%s15988_s20 + $0xe8] sm:$0xff] }
 0x64a   :  { %4666 = vmatpush.bf16.msra.mxu1 %v14842_v63  ;;  %3760 = vmatmul.bf16.gmra.mxu0 %v10416_v7 }
 0x64e   :  { %v3390_v11 = vpop.f32.mrf.mxu1  ;;  %4667 = vmatpush.bf16.msra.mxu1 %v14848_v15  ;;  %v10388_v15 = vor.u32 %v12729_v36, %v10385_v50  ;;  %v12741_v50 = vld [vmem:[#allocation2 + $0x6cc] sm:$0xf] }
 0x64f   :  { %v14994_v51 = vadd.f32 %v3390_v11, %v14852_v40  ;;  %v10425_v40 = vld [vmem:[#allocation2 + $0x6d0] sm:$0xf0] }
 0x650   :  { %v10428_v4 = vor.u32 %v12740_v20, %v10425_v40 }
 0x651   :  { %3794 = vmatmul.bf16.gmra.mxu1 %v10372_v39  ;;  %v12737_v39 = vld [vmem:[#allocation2 + $0x6ac] sm:$0xf] }
 0x652   :  { %3716 = vmatmul.bf16.gmra.mxu3 %v10428_v4  ;;  %v10420_v45 = vor.u32 %v12737_v39, %v10417_v41 }
 0x656   :  { %v3392_v63 = vpop.f32.mrf.mxu1 }
 0x657   :  { %v14997_v16 = vadd.f32 %v3392_v63, %v14855_v47  ;;  %v12743_v47 = vld [vmem:[#allocation2 + $0x6d4] sm:$0xf0] }
 0x658   :  { %v10432_v44 = vor.u32 %v12743_v47, %v10431_v54  ;;  %3672 = vmatmul.bf16.gmra.mxu2 %v10440_v25  ;;  %v15058_v47 = vld [vmem:[%s15988_s20 + $0xc8] sm:$0xff] }
 0x65a   :  { %3765 = vmatmul.bf16.gmra.mxu0 %v10432_v44 }
 0x65e   :  { %v3395_v60 = vpop.f32.mrf.mxu1 }
 0x65f   :  { %v15000_v31 = vadd.f32 %v3395_v60, %v14858_v1  ;;  %v10441_v1 = vld [vmem:[#allocation2 + $0x6f0] sm:$0xf0] }
 0x660   :  { %v10444_v13 = vor.u32 %v12744_v5, %v10441_v1  ;;  %v15052_v60 = vld [vmem:[%s15988_s20 + $0xd0] sm:$0xff]  ;;  %v10452_v5 = vor.u32 %v12745_v14, %v10449_v21 }
 0x661   :  { %3799 = vmatmul.bf16.gmra.mxu1 %v10388_v15  ;;  %v10436_v15 = vor.u32 %v12741_v50, %v10433_v62 }
 0x662   :  { %3721 = vmatmul.bf16.gmra.mxu3 %v10444_v13  ;;  %v3638_v63 = vpop.f32.mrf.mxu2 }
 0x663   :  { %v3687_v36 = vpop.f32.mrf.mxu3 }
 0x664   :  { %v3736_v20 = vpop.f32.mrf.mxu0  ;;  %v3688_v22 = vadd.f32 %v3687_v36, %v3638_v63 }
 0x666   :  { %v3397_v10 = vpop.f32.mrf.mxu1 }
 0x667   :  { %v15003_v17 = vadd.f32 %v3397_v10, %v14861_v8  ;;  %v12747_v8 = vld [vmem:[#allocation2 + $0x6f4] sm:$0xf0]  ;;  %v15066_v10 = vld [vmem:[%s15988_s20 + $0xc0] sm:$0xff] }
 0x668   :  { %v10448_v33 = vor.u32 %v12747_v8, %v10447_v55 }
 0x66a   :  { %3770 = vmatmul.bf16.gmra.mxu0 %v10448_v33  ;;  %v3640_v4 = vpop.f32.mrf.mxu2 }
 0x66b   :  { %v3689_v54 = vpop.f32.mrf.mxu3 }
 0x66c   :  { %v3690_v41 = vadd.f32 %v3689_v54, %v3640_v4 }
 0x66e   :  { %v3400_v27 = vpop.f32.mrf.mxu1 }
 0x66f   :  { %v15006_v26 = vadd.f32 %v3400_v27, %v14864_v56  ;;  %v15014_v56 = vld [vmem:[%s15988_s20 + $0xf8] sm:$0xff] }
 0x670   :  { %4267 = vmatpush.bf16.msrb.mxu2 %v15014_v56 }
 0x671   :  { %3804 = vmatmul.bf16.gmra.mxu1 %v10404_v9 }
 0x674   :  { %4268 = vmatpush.bf16.msrb.mxu2 %v15023_v28 }
 0x676   :  { %v15008_v3 = vpop.f32.mrf.mxu1 }
 0x677   :  { %16019 = vst [vmem:[#allocation49_spill] sm:$0xff] %v15008_v3 }
 0x678   :  { %4269 = vmatpush.bf16.msrb.mxu2 %v15029_v2 }
 0x67b   :  { %v3643_v37 = vpop.f32.mrf.mxu2 }
 0x67e   :  { %v3405_v11 = vpop.f32.mrf.mxu1 }
 0x67f   :  { %v15018_v46 = vadd.f32 %v3405_v11, %v14871_v53  ;;  %v15037_v53 = vld [vmem:[%s15988_s20 + $0xe0] sm:$0xff] }
 0x680   :  { %4270 = vmatpush.bf16.msrb.mxu2 %v15037_v53 }
 0x681   :  { %3809 = vmatmul.bf16.gmra.mxu1 %v10420_v45  ;;  %v3737_v45 = vadd.f32 %v3736_v20, %v3688_v22 }
 0x682   :  { %v3692_v29 = vpop.f32.mrf.mxu3 }
 0x683   :  { %v3645_v27 = vpop.f32.mrf.mxu2  ;;  %v3693_v3 = vadd.f32 %v3692_v29, %v3643_v37 }
 0x684   :  { %4271 = vmatpush.bf16.msrb.mxu2 %v15043_v0 }
 0x686   :  { %v15032_v7 = vpop.f32.mrf.mxu1 }
 0x688   :  { %4272 = vmatpush.bf16.msrb.mxu2 %v15052_v60 }
 0x68a   :  { %v3694_v55 = vpop.f32.mrf.mxu3 }
 0x68b   :  { %v3648_v34 = vpop.f32.mrf.mxu2  ;;  %v3695_v63 = vadd.f32 %v3694_v55, %v3645_v27  ;;  %v13304_v27 = vld [vmem:[%s15988_s20 + $0x88] sm:$0xff] }
 0x68c   :  { %4273 = vmatpush.bf16.msrb.mxu2 %v15058_v47 }
 0x68e   :  { %v3410_v49 = vpop.f32.mrf.mxu1 }
 0x68f   :  { %v15047_v40 = vadd.f32 %v3410_v49, %v14880_v19  ;;  %v3738_v19 = vpop.f32.mrf.mxu0 }
 0x690   :  { %4274 = vmatpush.bf16.msrb.mxu2 %v15066_v10  ;;  %v3739_v50 = vadd.f32 %v3738_v19, %v3690_v41 }
 0x691   :  { %3814 = vmatmul.bf16.gmra.mxu1 %v10436_v15 }
 0x692   :  { %v3697_v39 = vpop.f32.mrf.mxu3 }
 0x693   :  { %v3650_v14 = vpop.f32.mrf.mxu2 }
 0x696   :  { %v15061_v44 = vpop.f32.mrf.mxu1 }
 0x697   :  { %v3741_v1 = vpop.f32.mrf.mxu0 }
 0x698   :  { %v3742_v36 = vadd.f32 %v3741_v1, %v3693_v3  ;;  %v3698_v3 = vadd.f32 %v3697_v39, %v3648_v34 }
 0x69a   :  { %v3699_v21 = vpop.f32.mrf.mxu3 }
 0x69b   :  { %v3653_v20 = vpop.f32.mrf.mxu2  ;;  %v3700_v29 = vadd.f32 %v3699_v21, %v3650_v14 }
 0x69e   :  { %v3415_v9 = vpop.f32.mrf.mxu1 }
 0x69f   :  { %v15070_v25 = vadd.f32 %v3415_v9, %v14888_v58  ;;  %v3743_v8 = vpop.f32.mrf.mxu0 }
 0x6a0   :  { %v3744_v54 = vadd.f32 %v3743_v8, %v3695_v63 }
 0x6a1   :  { %3819 = vmatmul.bf16.gmra.mxu1 %v10452_v5 }
 0x6a2   :  { %v3702_v4 = vpop.f32.mrf.mxu3 }
 0x6a3   :  { %v3703_v39 = vadd.f32 %v3702_v4, %v3653_v20 }
 0x6a6   :  { %v15072_v13 = vpop.f32.mrf.mxu1 }
 0x6a7   :  { %v3746_v11 = vpop.f32.mrf.mxu0 }
 0x6a8   :  { %v3747_v1 = vadd.f32 %v3746_v11, %v3698_v3 }
 0x6aa   :  { %v3704_v37 = vpop.f32.mrf.mxu3 }
 0x6ae   :  { %v3785_v33 = vpop.f32.mrf.mxu1 }
 0x6af   :  { %v3786_v15 = vadd.f32 %v3785_v33, %v3737_v45  ;;  %v3748_v9 = vpop.f32.mrf.mxu0 }
 0x6b6   :  { %v3787_v62 = vpop.f32.mrf.mxu1 }
 0x6b7   :  { %v3788_v49 = vadd.f32 %v3787_v62, %v3739_v50  ;;  %v3751_v41 = vpop.f32.mrf.mxu0 }
 0x6b8   :  { %v3752_v14 = vadd.f32 %v3751_v41, %v3703_v39 }
 0x6b9   :  { %v3825_v58 = vpack.c.bf16 %v3788_v49, %v3786_v15 }
 0x6bb   :  { %10453 = vmatmul.msk.bf16.vlgmr.msra.gmra.mxu2 %vm1315_vm2, %v3825_v58 }
 0x6bc   :  { %4709 = vmatpush.bf16.msra.mxu2 %v14896_v23  ;;  %v3655_v23 = vpop.f32.mrf.mxu2 }
 0x6bd   :  { %v3705_v11 = vadd.f32 %v3704_v37, %v3655_v23 }
 0x6be   :  { %v3790_v5 = vpop.f32.mrf.mxu1 }
 0x6bf   :  { %v3791_v33 = vadd.f32 %v3790_v5, %v3742_v36 }
 0x6c0   :  { %4710 = vmatpush.bf16.msra.mxu2 %v14902_v12 }
 0x6c4   :  { %4711 = vmatpush.bf16.msra.mxu2 %v14908_v24  ;;  %v3753_v24 = vpop.f32.mrf.mxu0  ;;  %v3658_v62 = vpop.f32.mrf.mxu2 }
 0x6c5   :  { %v3754_v21 = vadd.f32 %v3753_v24, %v3705_v11 }
 0x6c6   :  { %v3792_v19 = vpop.f32.mrf.mxu1 }
 0x6c7   :  { %v3793_v22 = vadd.f32 %v3792_v19, %v3744_v54 }
 0x6c8   :  { %4712 = vmatpush.bf16.msra.mxu2 %v14914_v32  ;;  %v3749_v32 = vadd.f32 %v3748_v9, %v3700_v29 }
 0x6c9   :  { %v3826_v45 = vpack.c.bf16 %v3793_v22, %v3791_v33 }
 0x6cb   :  { %10454 = vmatmul.msk.bf16.gmra.mxu2 %vm1315_vm2, %v3826_v45 }
 0x6cc   :  { %4713 = vmatpush.bf16.msra.mxu2 %v14921_v38  ;;  %v3707_v38 = vpop.f32.mrf.mxu3  ;;  %v3660_v49 = vpop.f32.mrf.mxu2 }
 0x6cd   :  { %v3708_v22 = vadd.f32 %v3707_v38, %v3658_v62 }
 0x6ce   :  { %v3795_v12 = vpop.f32.mrf.mxu1 }
 0x6cf   :  { %v3796_v8 = vadd.f32 %v3795_v12, %v3747_v1 }
 0x6d0   :  { %4714 = vmatpush.bf16.msra.mxu2 %v14927_v18  ;;  %v3756_v18 = vpop.f32.mrf.mxu0 }
 0x6d1   :  { %v3757_v3 = vadd.f32 %v3756_v18, %v3708_v22 }
 0x6d4   :  { %4715 = vmatpush.bf16.msra.mxu2 %v13304_v27  ;;  %v3709_v58 = vpop.f32.mrf.mxu3  ;;  %v3663_v19 = vpop.f32.mrf.mxu2 }
 0x6d5   :  { %v3710_v12 = vadd.f32 %v3709_v58, %v3660_v49 }
 0x6d6   :  { %v3797_v55 = vpop.f32.mrf.mxu1 }
 0x6d7   :  { %v3798_v50 = vadd.f32 %v3797_v55, %v3749_v32 }
 0x6d8   :  { %4716 = vmatpush.bf16.msra.mxu2 %v14934_v30  ;;  %v3758_v9 = vpop.f32.mrf.mxu0 }
 0x6d9   :  { %v3827_v15 = vpack.c.bf16 %v3798_v50, %v3796_v8  ;;  %v3759_v20 = vadd.f32 %v3758_v9, %v3710_v12 }
 0x6db   :  { %10455 = vmatmul.msk.bf16.gmra.mxu2 %vm1315_vm2, %v3827_v15 }
 0x6dc   :  { %v3712_v30 = vpop.f32.mrf.mxu3  ;;  %v3665_v4 = vpop.f32.mrf.mxu2 }
 0x6dd   :  { %v3713_v32 = vadd.f32 %v3712_v30, %v3663_v19 }
 0x6de   :  { %v3800_v34 = vpop.f32.mrf.mxu1 }
 0x6df   :  { %v3801_v63 = vadd.f32 %v3800_v34, %v3752_v14  ;;  %v10463_v14 = vld [vmem:[#allocation2 + $0x700] sm:$0xf] }
 0x6e0   :  { %v3761_v45 = vpop.f32.mrf.mxu0 }
 0x6e1   :  { %v3762_v15 = vadd.f32 %v3761_v45, %v3713_v32  ;;  %v12754_v32 = vld [vmem:[#allocation2 + $0x72c] sm:$0xf0] }
 0x6e4   :  { %v3714_v37 = vpop.f32.mrf.mxu3  ;;  %v3668_v55 = vpop.f32.mrf.mxu2 }
 0x6e5   :  { %v3715_v50 = vadd.f32 %v3714_v37, %v3665_v4 }
 0x6e6   :  { %v3802_v5 = vpop.f32.mrf.mxu1 }
 0x6e7   :  { %v3803_v36 = vadd.f32 %v3802_v5, %v3754_v21  ;;  %v12750_v21 = vld [vmem:[#allocation2 + $0x70c] sm:$0xf0]  ;;  %v12748_v5 = vld [vmem:[#allocation2 + $0x704] sm:$0xf] }
 0x6e8   :  { %v3763_v1 = vpop.f32.mrf.mxu0  ;;  %v10464_v9 = vor.u32 %v12750_v21, %v10463_v14  ;;  %v12755_v14 = vld [vmem:[#allocation2 + $0x734] sm:$0xf0] }
 0x6e9   :  { %v3828_v54 = vpack.c.bf16 %v3803_v36, %v3801_v63  ;;  %v3764_v38 = vadd.f32 %v3763_v1, %v3715_v50  ;;  %v10465_v63 = vld [vmem:[#allocation2 + $0x710] sm:$0xf0]  ;;  %v10471_v36 = vld [vmem:[#allocation2 + $0x708] sm:$0xf] }
 0x6ea   :  { %v10468_v19 = vor.u32 %v12748_v5, %v10465_v63  ;;  %4128 = vmatmul.bf16.vlgmr.msra.gmra.mxu3 %v10464_v9 }
 0x6eb   :  { %10456 = vmatmul.msk.bf16.gmra.mxu2 %vm1315_vm2, %v3828_v54  ;;  %v12751_v54 = vld [vmem:[#allocation2 + $0x714] sm:$0xf0] }
 0x6ec   :  { %v3717_v8 = vpop.f32.mrf.mxu3  ;;  %v3670_v49 = vpop.f32.mrf.mxu2  ;;  %v10472_v30 = vor.u32 %v12751_v54, %v10471_v36  ;;  %4177 = vmatmul.bf16.vlgmr.msrb.gmra.mxu0 %v10468_v19  ;;  %v10495_v19 = vld [vmem:[#allocation2 + $0x740] sm:$0xf] }
 0x6ed   :  { %v3718_v45 = vadd.f32 %v3717_v8, %v3668_v55 }
 0x6ee   :  { %v3805_v33 = vpop.f32.mrf.mxu1  ;;  %4226 = vmatmul.bf16.vlgmr.msrb.gmra.mxu1 %v10472_v30  ;;  %v12758_v30 = vld [vmem:[#allocation2 + $0x74c] sm:$0xf0] }
 0x6ef   :  { %v3806_v41 = vadd.f32 %v3805_v33, %v3757_v3 }
 0x6f0   :  { %v3766_v62 = vpop.f32.mrf.mxu0 }
 0x6f1   :  { %v3767_v3 = vadd.f32 %v3766_v62, %v3718_v45  ;;  %v10481_v62 = vld [vmem:[#allocation2 + $0x730] sm:$0xf0] }
 0x6f2   :  { %v10497_v45 = vld [vmem:[#allocation2 + $0x750] sm:$0xf0] }
 0x6f4   :  { %v3719_v58 = vpop.f32.mrf.mxu3 }
 0x6f5   :  { %v3720_v12 = vadd.f32 %v3719_v58, %v3670_v49  ;;  %v10487_v58 = vld [vmem:[#allocation2 + $0x728] sm:$0xf] }
 0x6f6   :  { %v3807_v23 = vpop.f32.mrf.mxu1  ;;  %v10488_v5 = vor.u32 %v12755_v14, %v10487_v58  ;;  %v10527_v58 = vld [vmem:[#allocation2 + $0x780] sm:$0xf] }
 0x6f7   :  { %v3808_v29 = vadd.f32 %v3807_v23, %v3759_v20  ;;  %v3673_v20 = vpop.f32.mrf.mxu2 }
 0x6f8   :  { %v3768_v33 = vpop.f32.mrf.mxu0 }
 0x6f9   :  { %v3829_v24 = vpack.c.bf16 %v3808_v29, %v3806_v41  ;;  %v3769_v23 = vadd.f32 %v3768_v33, %v3720_v12  ;;  %v10496_v33 = vor.u32 %v12758_v30, %v10495_v19  ;;  %v10505_v19 = vld [vmem:[#allocation2 + $0x758] sm:$0xf0]  ;;  %v10535_v30 = vld [vmem:[#allocation2 + $0x788] sm:$0xf] }
 0x6fb   :  { %10457 = vmatmul.msk.bf16.gmra.mxu2 %vm1315_vm2, %v3829_v24 }
 0x6fc   :  { %v3722_v4 = vpop.f32.mrf.mxu3 }
 0x6fd   :  { %v3723_v8 = vadd.f32 %v3722_v4, %v3673_v20  ;;  %v10473_v20 = vld [vmem:[#allocation2 + $0x718] sm:$0xf0]  ;;  %v10503_v4 = vld [vmem:[#allocation2 + $0x748] sm:$0xf] }
 0x6fe   :  { %v3810_v27 = vpop.f32.mrf.mxu1  ;;  %4231 = vmatmul.bf16.gmra.mxu1 %v10488_v5 }
 0x6ff   :  { %v3811_v18 = vadd.f32 %v3810_v27, %v3762_v15  ;;  %v10479_v27 = vld [vmem:[#allocation2 + $0x720] sm:$0xf]  ;;  %v3675_v50 = vpop.f32.mrf.mxu2 }
 0x700   :  { %v3771_v24 = vpop.f32.mrf.mxu0  ;;  %v10480_v15 = vor.u32 %v12754_v32, %v10479_v27 }
 0x701   :  { %v3772_v49 = vadd.f32 %v3771_v24, %v3723_v8  ;;  %v12762_v24 = vld [vmem:[#allocation2 + $0x76c] sm:$0xf0]  ;;  %v10489_v8 = vld [vmem:[#allocation2 + $0x738] sm:$0xf0] }
 0x702   :  { %4133 = vmatmul.bf16.gmra.mxu3 %v10480_v15  ;;  %v10513_v15 = vld [vmem:[#allocation2 + $0x770] sm:$0xf0] }
 0x706   :  { %v3812_v34 = vpop.f32.mrf.mxu1 }
 0x707   :  { %v3813_v39 = vadd.f32 %v3812_v34, %v3764_v38  ;;  %v3724_v38 = vpop.f32.mrf.mxu3  ;;  %v12752_v34 = vld [vmem:[#allocation2 + $0x724] sm:$0xf] }
 0x709   :  { %v3830_v11 = vpack.c.bf16 %v3813_v39, %v3811_v18  ;;  %v10484_v18 = vor.u32 %v12752_v34, %v10481_v62  ;;  %v3725_v39 = vadd.f32 %v3724_v38, %v3675_v50  ;;  %v12760_v50 = vld [vmem:[#allocation2 + $0x764] sm:$0xf]  ;;  %v10519_v34 = vld [vmem:[#allocation2 + $0x768] sm:$0xf]  ;;  %v12763_v62 = vld [vmem:[#allocation2 + $0x774] sm:$0xf0] }
 0x70a   :  { %v10516_v38 = vor.u32 %v12760_v50, %v10513_v15 }
 0x70b   :  { %10458 = vmatmul.msk.bf16.gmra.mxu2 %vm1315_vm2, %v3830_v11  ;;  %v3773_v11 = vpop.f32.mrf.mxu0  ;;  %4182 = vmatmul.bf16.gmra.mxu0 %v10484_v18  ;;  %v10520_v18 = vor.u32 %v12763_v62, %v10519_v34 }
 0x70c   :  { %v3774_v21 = vadd.f32 %v3773_v11, %v3725_v39 }
 0x70e   :  { %v3815_v22 = vpop.f32.mrf.mxu1 }
 0x70f   :  { %v3816_v41 = vadd.f32 %v3815_v22, %v3767_v3  ;;  %v12756_v22 = vld [vmem:[#allocation2 + $0x744] sm:$0xf]  ;;  %v12749_v3 = vld [vmem:[#allocation2 + $0x70c] sm:$0xf] }
 0x710   :  { %v10500_v12 = vor.u32 %v12756_v22, %v10497_v45 }
 0x712   :  { %4138 = vmatmul.bf16.gmra.mxu3 %v10496_v33 }
 0x716   :  { %v3817_v37 = vpop.f32.mrf.mxu1 }
 0x717   :  { %v3818_v29 = vadd.f32 %v3817_v37, %v3769_v23  ;;  %v12759_v23 = vld [vmem:[#allocation2 + $0x754] sm:$0xf0] }
 0x718   :  { %v10504_v37 = vor.u32 %v12759_v23, %v10503_v4 }
 0x719   :  { %v3831_v1 = vpack.c.bf16 %v3818_v29, %v3816_v41  ;;  %v10476_v41 = vor.u32 %v12749_v3, %v10473_v20  ;;  %v10511_v29 = vld [vmem:[#allocation2 + $0x760] sm:$0xf] }
 0x71a   :  { %4236 = vmatmul.bf16.gmra.mxu1 %v10504_v37  ;;  %v10543_v3 = vld [vmem:[#allocation2 + $0x7a0] sm:$0xf]  ;;  %v12768_v37 = vld [vmem:[#allocation2 + $0x7a4] sm:$0xf] }
 0x71b   :  { %10459 = vmatmul.msk.bf16.gmra.mxu2 %vm1315_vm2, %v3831_v1  ;;  %4187 = vmatmul.bf16.gmra.mxu0 %v10500_v12  ;;  %v10512_v1 = vor.u32 %v12762_v24, %v10511_v29  ;;  %v12761_v24 = vld [vmem:[#allocation2 + $0x76c] sm:$0xf] }
 0x71e   :  { %v3820_v55 = vpop.f32.mrf.mxu1 }
 0x71f   :  { %v3821_v63 = vadd.f32 %v3820_v55, %v3772_v49  ;;  %v12753_v55 = vld [vmem:[#allocation2 + $0x72c] sm:$0xf] }
 0x720   :  { %v10492_v49 = vor.u32 %v12753_v55, %v10489_v8  ;;  %v10559_v8 = vld [vmem:[#allocation2 + $0x7c0] sm:$0xf] }
 0x722   :  { %4143 = vmatmul.bf16.gmra.mxu3 %v10512_v1  ;;  %v10521_v1 = vld [vmem:[#allocation2 + $0x778] sm:$0xf0] }
 0x723   :  { %v10524_v55 = vor.u32 %v12761_v24, %v10521_v1  ;;  %v4325_v24 = vld [vmem:[#allocation5 + $0xe] sm:$0x3] }
 0x724   :  { %v4351_v1 = vand.u32 %v4325_v24, %v14135_v52 }
 0x726   :  { %v3822_v9 = vpop.f32.mrf.mxu1  ;;  %4360 = vmatpush.bf16.msrb.mxu3 %v4351_v1 }
 0x727   :  { %v3823_v36 = vadd.f32 %v3822_v9, %v3774_v21  ;;  %v12764_v9 = vld [vmem:[#allocation2 + $0x784] sm:$0xf] }
 0x729   :  { %v3832_v54 = vpack.c.bf16 %v3823_v36, %v3821_v63  ;;  %v10529_v63 = vld [vmem:[#allocation2 + $0x790] sm:$0xf0] }
 0x72a   :  { %4241 = vmatmul.bf16.gmra.mxu1 %v10520_v18  ;;  %v10532_v36 = vor.u32 %v12764_v9, %v10529_v63  ;;  %4758 = vmatpush.bf16.msra.mxu3 %v15014_v56 }
 0x72b   :  { %10460 = vmatmul.msk.bf16.gmra.mxu2 %vm1315_vm2, %v3832_v54  ;;  %4192 = vmatmul.bf16.gmra.mxu0 %v10516_v38  ;;  %v12757_v54 = vld [vmem:[#allocation2 + $0x74c] sm:$0xf] }
 0x72c   :  { %v10508_v12 = vor.u32 %v12757_v54, %v10505_v19  ;;  %v10575_v19 = vld [vmem:[#allocation2 + $0x7e0] sm:$0xf] }
 0x72e   :  { %4759 = vmatpush.bf16.msra.mxu3 %v15023_v28 }
 0x732   :  { %4760 = vmatpush.bf16.msra.mxu3 %v15029_v2 }
 0x736   :  { %4761 = vmatpush.bf16.msra.mxu3 %v15037_v53 }
 0x73a   :  { %4762 = vmatpush.bf16.msra.mxu3 %v15043_v0 }
 0x73b   :  { %4275 = vmatmul.bf16.vlgmr.msrb.gmra.mxu2 %v10476_v41  ;;  %4197 = vmatmul.bf16.gmra.mxu0 %v10532_v36  ;;  %v10545_v41 = vld [vmem:[#allocation2 + $0x7b0] sm:$0xf0] }
 0x73c   :  { %v10548_v29 = vor.u32 %v12768_v37, %v10545_v41 }
 0x73e   :  { %v3871_v27 = vpop.f32.mrf.mxu2  ;;  %4763 = vmatpush.bf16.msra.mxu3 %v15052_v60 }
 0x73f   :  { %v15093_v32 = vadd.f32 %v3871_v27, %v14968_v61  ;;  %v12766_v61 = vld [vmem:[#allocation2 + $0x78c] sm:$0xf0]  ;;  %v10551_v27 = vld [vmem:[#allocation2 + $0x7a8] sm:$0xf] }
 0x740   :  { %v10528_v14 = vor.u32 %v12766_v61, %v10527_v58  ;;  %v12765_v61 = vld [vmem:[#allocation2 + $0x78c] sm:$0xf] }
 0x742   :  { %4148 = vmatmul.bf16.gmra.mxu3 %v10528_v14  ;;  %v10537_v14 = vld [vmem:[#allocation2 + $0x798] sm:$0xf0] }
 0x743   :  { %v10540_v54 = vor.u32 %v12765_v61, %v10537_v14  ;;  %4764 = vmatpush.bf16.msra.mxu3 %v15058_v47 }
 0x746   :  { %v3873_v39 = vpop.f32.mrf.mxu2 }
 0x747   :  { %v15096_v11 = vadd.f32 %v3873_v39, %v14975_v35  ;;  %v12767_v35 = vld [vmem:[#allocation2 + $0x794] sm:$0xf0]  ;;  %v12772_v39 = vld [vmem:[#allocation2 + $0x7c4] sm:$0xf]  ;;  %4765 = vmatpush.bf16.msra.mxu3 %v15066_v10 }
 0x748   :  { %v10536_v33 = vor.u32 %v12767_v35, %v10535_v30 }
 0x74a   :  { %4246 = vmatmul.bf16.gmra.mxu1 %v10536_v33 }
 0x74b   :  { %4280 = vmatmul.bf16.gmra.mxu2 %v10492_v49  ;;  %4202 = vmatmul.bf16.gmra.mxu0 %v10548_v29  ;;  %v10561_v49 = vld [vmem:[#allocation2 + $0x7d0] sm:$0xf0] }
 0x74c   :  { %v10564_v58 = vor.u32 %v12772_v39, %v10561_v49  ;;  %v12777_v39 = vld [vmem:[#allocation2 + $0x7ec] sm:$0xf]  ;;  %v10585_v49 = vld [vmem:[#allocation2 + $0x7f8] sm:$0xf0] }
 0x74d   :  { %v10588_v61 = vor.u32 %v12777_v39, %v10585_v49 }
 0x74e   :  { %v3876_v21 = vpop.f32.mrf.mxu2 }
 0x74f   :  { %v15099_v5 = vadd.f32 %v3876_v21, %v14982_v48  ;;  %v12770_v48 = vld [vmem:[#allocation2 + $0x7ac] sm:$0xf0]  ;;  %v10567_v21 = vld [vmem:[#allocation2 + $0x7c8] sm:$0xf] }
 0x750   :  { %v10544_v20 = vor.u32 %v12770_v48, %v10543_v3  ;;  %v12769_v48 = vld [vmem:[#allocation2 + $0x7ac] sm:$0xf] }
 0x752   :  { %4153 = vmatmul.bf16.gmra.mxu3 %v10544_v20  ;;  %v10553_v20 = vld [vmem:[#allocation2 + $0x7b8] sm:$0xf0] }
 0x753   :  { %v10556_v29 = vor.u32 %v12769_v48, %v10553_v20 }
 0x756   :  { %v3878_v22 = vpop.f32.mrf.mxu2 }
 0x757   :  { %v15102_v45 = vadd.f32 %v3878_v22, %v14989_v6  ;;  %v12771_v6 = vld [vmem:[#allocation2 + $0x7b4] sm:$0xf0]  ;;  %v12776_v22 = vld [vmem:[#allocation2 + $0x7e4] sm:$0xf] }
 0x758   :  { %v10552_v50 = vor.u32 %v12771_v6, %v10551_v27  ;;  %v12773_v6 = vld [vmem:[#allocation2 + $0x7cc] sm:$0xf] }
 0x75a   :  { %4251 = vmatmul.bf16.gmra.mxu1 %v10552_v50  ;;  %v10569_v50 = vld [vmem:[#allocation2 + $0x7d8] sm:$0xf0] }
 0x75b   :  { %4285 = vmatmul.bf16.gmra.mxu2 %v10508_v12  ;;  %4207 = vmatmul.bf16.gmra.mxu0 %v10564_v58  ;;  %v10577_v12 = vld [vmem:[#allocation2 + $0x7f0] sm:$0xf0] }
 0x75c   :  { %v10580_v3 = vor.u32 %v12776_v22, %v10577_v12 }
 0x75e   :  { %v3881_v4 = vpop.f32.mrf.mxu2 }
 0x75f   :  { %v15105_v23 = vadd.f32 %v3881_v4, %v14994_v51  ;;  %v12774_v51 = vld [vmem:[#allocation2 + $0x7cc] sm:$0xf0]  ;;  %v10583_v4 = vld [vmem:[#allocation2 + $0x7e8] sm:$0xf] }
 0x760   :  { %v10560_v34 = vor.u32 %v12774_v51, %v10559_v8 }
 0x762   :  { %4158 = vmatmul.bf16.gmra.mxu3 %v10560_v34 }
 0x766   :  { %v3883_v15 = vpop.f32.mrf.mxu2 }
 0x767   :  { %v15108_v38 = vadd.f32 %v3883_v15, %v14997_v16  ;;  %v12775_v16 = vld [vmem:[#allocation2 + $0x7d4] sm:$0xf0] }
 0x768   :  { %v10568_v9 = vor.u32 %v12775_v16, %v10567_v21 }
 0x769   :  { %v4178_v8 = vpop.f32.mrf.mxu0 }
 0x76a   :  { %4256 = vmatmul.bf16.gmra.mxu1 %v10568_v9 }
 0x76b   :  { %4290 = vmatmul.bf16.gmra.mxu2 %v10524_v55  ;;  %4212 = vmatmul.bf16.gmra.mxu0 %v10580_v3  ;;  %v10572_v55 = vor.u32 %v12773_v6, %v10569_v50  ;;  %v4227_v34 = vpop.f32.mrf.mxu1 }
 0x76d   :  { %v4129_v51 = vpop.f32.mrf.mxu3 }
 0x76e   :  { %v3886_v62 = vpop.f32.mrf.mxu2 }
 0x76f   :  { %v15111_v18 = vadd.f32 %v3886_v62, %v15000_v31  ;;  %v12778_v31 = vld [vmem:[#allocation2 + $0x7ec] sm:$0xf0] }
 0x770   :  { %v10576_v30 = vor.u32 %v12778_v31, %v10575_v19  ;;  %v4179_v19 = vadd.f32 %v4178_v8, %v4129_v51 }
 0x771   :  { %v4180_v56 = vpop.f32.mrf.mxu0 }
 0x772   :  { %4163 = vmatmul.bf16.gmra.mxu3 %v10576_v30 }
 0x773   :  { %v4229_v2 = vpop.f32.mrf.mxu1 }
 0x775   :  { %v4131_v28 = vpop.f32.mrf.mxu3 }
 0x776   :  { %v3888_v63 = vpop.f32.mrf.mxu2  ;;  %v4181_v47 = vadd.f32 %v4180_v56, %v4131_v28 }
 0x777   :  { %v15114_v36 = vadd.f32 %v3888_v63, %v15003_v17  ;;  %v12779_v17 = vld [vmem:[#allocation2 + $0x7f4] sm:$0xf0] }
 0x778   :  { %v10584_v37 = vor.u32 %v12779_v17, %v10583_v4  ;;  %v4230_v12 = vadd.f32 %v4229_v2, %v4181_v47 }
 0x77a   :  { %4261 = vmatmul.bf16.gmra.mxu1 %v10584_v37 }
 0x77b   :  { %4295 = vmatmul.bf16.gmra.mxu2 %v10540_v54  ;;  %v4232_v21 = vpop.f32.mrf.mxu1 }
 0x77e   :  { %v3891_v35 = vpop.f32.mrf.mxu2 }
 0x77f   :  { %v15117_v33 = vadd.f32 %v3891_v35, %v15006_v26  ;;  %v4228_v35 = vadd.f32 %v4227_v34, %v4179_v19 }
 0x783   :  { %v4234_v63 = vpop.f32.mrf.mxu1 }
 0x786   :  { %v15119_v41 = vpop.f32.mrf.mxu2 }
 0x788   :  { %v4183_v53 = vpop.f32.mrf.mxu0 }
 0x78b   :  { %4300 = vmatmul.bf16.gmra.mxu2 %v10556_v29 }
 0x78e   :  { %v3896_v26 = vpop.f32.mrf.mxu2 }
 0x78f   :  { %v15123_v27 = vadd.f32 %v3896_v26, %v15018_v46 }
 0x790   :  { %v4185_v16 = vpop.f32.mrf.mxu0 }
 0x796   :  { %v15127_v15 = vpop.f32.mrf.mxu2 }
 0x797   :  { %v4237_v22 = vpop.f32.mrf.mxu1 }
 0x798   :  { %v4188_v31 = vpop.f32.mrf.mxu0 }
 0x79b   :  { %4305 = vmatmul.bf16.gmra.mxu2 %v10572_v55 }
 0x79e   :  { %v3901_v62 = vpop.f32.mrf.mxu2 }
 0x79f   :  { %v15132_v46 = vadd.f32 %v3901_v62, %v15047_v40  ;;  %v4134_v40 = vpop.f32.mrf.mxu3  ;;  %v4239_v37 = vpop.f32.mrf.mxu1 }
 0x7a0   :  { %v4184_v29 = vadd.f32 %v4183_v53, %v4134_v40 }
 0x7a2   :  { %v4233_v1 = vadd.f32 %v4232_v21, %v4184_v29 }
 0x7a6   :  { %v15136_v58 = vpop.f32.mrf.mxu2 }
 0x7a7   :  { %v4136_v9 = vpop.f32.mrf.mxu3  ;;  %v4242_v34 = vpop.f32.mrf.mxu1 }
 0x7a8   :  { %v4186_v24 = vadd.f32 %v4185_v16, %v4136_v9 }
 0x7aa   :  { %v4235_v50 = vadd.f32 %v4234_v63, %v4186_v24 }
 0x7ab   :  { %4310 = vmatmul.bf16.gmra.mxu2 %v10588_v61 }
 0x7ae   :  { %v3906_v14 = vpop.f32.mrf.mxu2 }
 0x7af   :  { %v15141_v0 = vadd.f32 %v3906_v14, %v15070_v25  ;;  %v4139_v30 = vpop.f32.mrf.mxu3  ;;  %v4190_v25 = vpop.f32.mrf.mxu0 }
 0x7b0   :  { %v4189_v49 = vadd.f32 %v4188_v31, %v4139_v30  ;;  %v4244_v61 = vpop.f32.mrf.mxu1 }
 0x7b2   :  { %v4238_v14 = vadd.f32 %v4237_v22, %v4189_v49 }
 0x7b6   :  { %v15143_v60 = vpop.f32.mrf.mxu2 }
 0x7b7   :  { %v4141_v4 = vpop.f32.mrf.mxu3  ;;  %v4193_v26 = vpop.f32.mrf.mxu0 }
 0x7b8   :  { %v4191_v2 = vadd.f32 %v4190_v25, %v4141_v4 }
 0x7ba   :  { %v4240_v53 = vadd.f32 %v4239_v37, %v4191_v2 }
 0x7be   :  { %v4276_v54 = vpop.f32.mrf.mxu2 }
 0x7bf   :  { %v4277_v3 = vadd.f32 %v4276_v54, %v4228_v35  ;;  %v4144_v6 = vpop.f32.mrf.mxu3  ;;  %v4195_v56 = vpop.f32.mrf.mxu0 }
 0x7c0   :  { %v4194_v35 = vadd.f32 %v4193_v26, %v4144_v6 }
 0x7c6   :  { %v4278_v10 = vpop.f32.mrf.mxu2 }
 0x7c7   :  { %v4279_v48 = vadd.f32 %v4278_v10, %v4230_v12  ;;  %v4146_v39 = vpop.f32.mrf.mxu3  ;;  %v4198_v9 = vpop.f32.mrf.mxu0 }
 0x7c8   :  { %v4247_v19 = vpop.f32.mrf.mxu1  ;;  %v4196_v12 = vadd.f32 %v4195_v56, %v4146_v39 }
 0x7c9   :  { %v4316_v20 = vpack.c.bf16 %v4279_v48, %v4277_v3  ;;  %v4243_v48 = vadd.f32 %v4242_v34, %v4194_v35  ;;  %v10607_v35 = vld [vmem:[#allocation2 + $0x808] sm:$0xf] }
 0x7ca   :  { %v4245_v31 = vadd.f32 %v4244_v61, %v4196_v12  ;;  %v12783_v12 = vld [vmem:[#allocation2 + $0x814] sm:$0xf0] }
 0x7cb   :  { %10589 = vmatmul.msk.bf16.vlgmr.msrb.gmra.mxu3 %vm1315_vm2, %v4316_v20 }
 0x7ce   :  { %v4281_v17 = vpop.f32.mrf.mxu2 }
 0x7cf   :  { %v4282_v8 = vadd.f32 %v4281_v17, %v4233_v1  ;;  %v4149_v63 = vpop.f32.mrf.mxu3  ;;  %v4200_v10 = vpop.f32.mrf.mxu0 }
 0x7d0   :  { %v4249_v20 = vpop.f32.mrf.mxu1  ;;  %v4199_v24 = vadd.f32 %v4198_v9, %v4149_v63 }
 0x7d6   :  { %v4283_v55 = vpop.f32.mrf.mxu2 }
 0x7d7   :  { %v4284_v51 = vadd.f32 %v4283_v55, %v4235_v50  ;;  %v4151_v3 = vpop.f32.mrf.mxu3  ;;  %v4203_v17 = vpop.f32.mrf.mxu0  ;;  %v4248_v55 = vadd.f32 %v4247_v19, %v4199_v24 }
 0x7d8   :  { %v4252_v1 = vpop.f32.mrf.mxu1  ;;  %v4201_v50 = vadd.f32 %v4200_v10, %v4151_v3  ;;  %v10599_v10 = vld [vmem:[#allocation2 + $0x800] sm:$0xf]  ;;  %v10608_v3 = vor.u32 %v12783_v12, %v10607_v35 }
 0x7d9   :  { %v4317_v62 = vpack.c.bf16 %v4284_v51, %v4282_v8 }
 0x7da   :  { %v4250_v26 = vadd.f32 %v4249_v20, %v4201_v50  ;;  %4717 = vmatmul.bf16.vlgmr.msra.gmra.mxu2 %v10608_v3  ;;  %v10639_v3 = vld [vmem:[#allocation2 + $0x848] sm:$0xf] }
 0x7db   :  { %10590 = vmatmul.msk.bf16.gmra.mxu3 %vm1315_vm2, %v4317_v62 }
 0x7de   :  { %v4286_v28 = vpop.f32.mrf.mxu2 }
 0x7df   :  { %v4287_v21 = vadd.f32 %v4286_v28, %v4238_v14  ;;  %v4154_v37 = vpop.f32.mrf.mxu3  ;;  %v4205_v6 = vpop.f32.mrf.mxu0 }
 0x7e0   :  { %v4254_v28 = vpop.f32.mrf.mxu1  ;;  %v4204_v49 = vadd.f32 %v4203_v17, %v4154_v37 }
 0x7e6   :  { %v4288_v40 = vpop.f32.mrf.mxu2 }
 0x7e7   :  { %v4289_v16 = vadd.f32 %v4288_v40, %v4240_v53  ;;  %v4156_v51 = vpop.f32.mrf.mxu3  ;;  %v4208_v2 = vpop.f32.mrf.mxu0  ;;  %v4253_v53 = vadd.f32 %v4252_v1, %v4204_v49 }
 0x7e8   :  { %v4206_v14 = vadd.f32 %v4205_v6, %v4156_v51  ;;  %v4257_v40 = vpop.f32.mrf.mxu1 }
 0x7e9   :  { %v4318_v54 = vpack.c.bf16 %v4289_v16, %v4287_v21 }
 0x7ea   :  { %v4255_v21 = vadd.f32 %v4254_v28, %v4206_v14  ;;  %v10623_v28 = vld [vmem:[#allocation2 + $0x828] sm:$0xf]  ;;  %v12786_v14 = vld [vmem:[#allocation2 + $0x82c] sm:$0xf0] }
 0x7eb   :  { %10591 = vmatmul.msk.bf16.gmra.mxu3 %vm1315_vm2, %v4318_v54 }
 0x7ee   :  { %v4291_v47 = vpop.f32.mrf.mxu2 }
 0x7ef   :  { %v4292_v22 = vadd.f32 %v4291_v47, %v4243_v48  ;;  %v4159_v61 = vpop.f32.mrf.mxu3  ;;  %v4210_v19 = vpop.f32.mrf.mxu0  ;;  %v12782_v48 = vld [vmem:[#allocation2 + $0x80c] sm:$0xf0] }
 0x7f0   :  { %v10600_v20 = vor.u32 %v12782_v48, %v10599_v10  ;;  %v4209_v17 = vadd.f32 %v4208_v2, %v4159_v61  ;;  %v10615_v61 = vld [vmem:[#allocation2 + $0x820] sm:$0xf]  ;;  %v12791_v48 = vld [vmem:[#allocation2 + $0x854] sm:$0xf0] }
 0x7f2   :  { %4619 = vmatmul.bf16.vlgmr.msra.gmra.mxu0 %v10600_v20  ;;  %v12790_v20 = vld [vmem:[#allocation2 + $0x84c] sm:$0xf0] }
 0x7f6   :  { %v4293_v30 = vpop.f32.mrf.mxu2 }
 0x7f7   :  { %v4294_v25 = vadd.f32 %v4293_v30, %v4245_v31  ;;  %v4161_v47 = vpop.f32.mrf.mxu3  ;;  %v12780_v31 = vld [vmem:[#allocation2 + $0x804] sm:$0xf]  ;;  %v10601_v30 = vld [vmem:[#allocation2 + $0x810] sm:$0xf0]  ;;  %v4213_v24 = vpop.f32.mrf.mxu0 }
 0x7f8   :  { %v4211_v37 = vadd.f32 %v4210_v19, %v4161_v47 }
 0x7f9   :  { %v4319_v4 = vpack.c.bf16 %v4294_v25, %v4292_v22  ;;  %v10604_v22 = vor.u32 %v12780_v31, %v10601_v30  ;;  %v4259_v25 = vpop.f32.mrf.mxu1  ;;  %v10640_v31 = vor.u32 %v12791_v48, %v10639_v3  ;;  %v10631_v30 = vld [vmem:[#allocation2 + $0x840] sm:$0xf] }
 0x7fa   :  { %v4260_v50 = vadd.f32 %v4259_v25, %v4211_v37  ;;  %v10632_v25 = vor.u32 %v12790_v20, %v10631_v30  ;;  %v12781_v37 = vld [vmem:[#allocation2 + $0x80c] sm:$0xf]  ;;  %v12803_v30 = vld [vmem:[#allocation2 + $0x8b4] sm:$0xf0] }
 0x7fb   :  { %10592 = vmatmul.msk.bf16.gmra.mxu3 %vm1315_vm2, %v4319_v4  ;;  %4668 = vmatmul.bf16.vlgmr.msra.gmra.mxu1 %v10604_v22  ;;  %v12788_v22 = vld [vmem:[#allocation2 + $0x844] sm:$0xf] }
 0x7fe   :  { %v4296_v29 = vpop.f32.mrf.mxu2 }
 0x7ff   :  { %v4297_v34 = vadd.f32 %v4296_v29, %v4248_v55  ;;  %v4258_v29 = vadd.f32 %v4257_v40, %v4209_v17  ;;  %v4164_v1 = vpop.f32.mrf.mxu3  ;;  %v10616_v40 = vor.u32 %v12786_v14, %v10615_v61 }
 0x800   :  { %v4214_v49 = vadd.f32 %v4213_v24, %v4164_v1 }
 0x802   :  { %4624 = vmatmul.bf16.gmra.mxu0 %v10616_v40  ;;  %v12799_v40 = vld [vmem:[#allocation2 + $0x894] sm:$0xf0] }
 0x806   :  { %v4298_v8 = vpop.f32.mrf.mxu2 }
 0x807   :  { %v4299_v62 = vadd.f32 %v4298_v8, %v4250_v26  ;;  %v4262_v8 = vpop.f32.mrf.mxu1 }
 0x809   :  { %v4320_v56 = vpack.c.bf16 %v4299_v62, %v4297_v34  ;;  %v4215_v34 = vpop.f32.mrf.mxu0  ;;  %v4166_v62 = vpop.f32.mrf.mxu3 }
 0x80b   :  { %10593 = vmatmul.msk.bf16.gmra.mxu3 %vm1315_vm2, %v4320_v56 }
 0x80e   :  { %v4301_v39 = vpop.f32.mrf.mxu2 }
 0x80f   :  { %v4302_v9 = vadd.f32 %v4301_v39, %v4253_v53  ;;  %v12787_v39 = vld [vmem:[#allocation2 + $0x834] sm:$0xf0]  ;;  %v12784_v53 = vld [vmem:[#allocation2 + $0x824] sm:$0xf] }
 0x810   :  { %v10624_v2 = vor.u32 %v12787_v39, %v10623_v28  ;;  %v12785_v39 = vld [vmem:[#allocation2 + $0x82c] sm:$0xf] }
 0x812   :  { %4722 = vmatmul.bf16.gmra.mxu2 %v10624_v2  ;;  %4629 = vmatmul.bf16.gmra.mxu0 %v10632_v25  ;;  %v10679_v25 = vld [vmem:[#allocation2 + $0x8a0] sm:$0xf] }
 0x816   :  { %v4303_v16 = vpop.f32.mrf.mxu2 }
 0x817   :  { %v4304_v63 = vadd.f32 %v4303_v16, %v4255_v21  ;;  %v10617_v21 = vld [vmem:[#allocation2 + $0x830] sm:$0xf0]  ;;  %v4216_v16 = vadd.f32 %v4215_v34, %v4166_v62  ;;  %v12792_v34 = vld [vmem:[#allocation2 + $0x864] sm:$0xf] }
 0x819   :  { %v4321_v54 = vpack.c.bf16 %v4304_v63, %v4302_v9  ;;  %v10620_v9 = vor.u32 %v12784_v53, %v10617_v21  ;;  %v4264_v63 = vpop.f32.mrf.mxu1  ;;  %v10671_v53 = vld [vmem:[#allocation2 + $0x888] sm:$0xf] }
 0x81a   :  { %v4265_v19 = vadd.f32 %v4264_v63, %v4216_v16  ;;  %v10672_v16 = vor.u32 %v12799_v40, %v10671_v53  ;;  %v12798_v63 = vld [vmem:[#allocation2 + $0x88c] sm:$0xf0] }
 0x81b   :  { %10594 = vmatmul.msk.bf16.gmra.mxu3 %vm1315_vm2, %v4321_v54  ;;  %v4263_v54 = vadd.f32 %v4262_v8, %v4214_v49  ;;  %4673 = vmatmul.bf16.gmra.mxu1 %v10620_v9  ;;  %v10647_v8 = vld [vmem:[#allocation2 + $0x860] sm:$0xf]  ;;  %v10625_v49 = vld [vmem:[#allocation2 + $0x838] sm:$0xf0] }
 0x81c   :  { %v10628_v14 = vor.u32 %v12785_v39, %v10625_v49  ;;  %v10663_v9 = vld [vmem:[#allocation2 + $0x880] sm:$0xf]  ;;  %v12804_v39 = vld [vmem:[#allocation2 + $0x8c4] sm:$0xf] }
 0x81e   :  { %v4306_v4 = vpop.f32.mrf.mxu2 }
 0x81f   :  { %v4307_v26 = vadd.f32 %v4306_v4, %v4258_v29  ;;  %v10633_v4 = vld [vmem:[#allocation2 + $0x850] sm:$0xf0]  ;;  %v10609_v29 = vld [vmem:[#allocation2 + $0x818] sm:$0xf0] }
 0x820   :  { %v10636_v17 = vor.u32 %v12788_v22, %v10633_v4  ;;  %v10612_v24 = vor.u32 %v12781_v37, %v10609_v29  ;;  %v12802_v4 = vld [vmem:[#allocation2 + $0x8ac] sm:$0xf0]  ;;  %v10681_v29 = vld [vmem:[#allocation2 + $0x8b0] sm:$0xf0] }
 0x821   :  { %v10680_v37 = vor.u32 %v12802_v4, %v10679_v25 }
 0x822   :  { %4727 = vmatmul.bf16.gmra.mxu2 %v10640_v31  ;;  %v10687_v31 = vld [vmem:[#allocation2 + $0x8a8] sm:$0xf] }
 0x823   :  { %v10688_v22 = vor.u32 %v12803_v30, %v10687_v31 }
 0x826   :  { %v4308_v55 = vpop.f32.mrf.mxu2 }
 0x827   :  { %v4309_v6 = vadd.f32 %v4308_v55, %v4260_v50  ;;  %v10655_v50 = vld [vmem:[#allocation2 + $0x868] sm:$0xf]  ;;  %v12795_v55 = vld [vmem:[#allocation2 + $0x874] sm:$0xf0] }
 0x829   :  { %v4322_v51 = vpack.c.bf16 %v4309_v6, %v4307_v26  ;;  %v10656_v6 = vor.u32 %v12795_v55, %v10655_v50 }
 0x82b   :  { %10595 = vmatmul.msk.bf16.gmra.mxu3 %vm1315_vm2, %v4322_v51  ;;  %4678 = vmatmul.bf16.gmra.mxu1 %v10636_v17  ;;  %v12794_v51 = vld [vmem:[#allocation2 + $0x86c] sm:$0xf0]  ;;  %v12800_v17 = vld [vmem:[#allocation2 + $0x8a4] sm:$0xf] }
 0x82c   :  { %v10648_v62 = vor.u32 %v12794_v51, %v10647_v8  ;;  %v10703_v8 = vld [vmem:[#allocation2 + $0x8c8] sm:$0xf]  ;;  %v12807_v51 = vld [vmem:[#allocation2 + $0x8d4] sm:$0xf0] }
 0x82e   :  { %v4311_v56 = vpop.f32.mrf.mxu2  ;;  %4634 = vmatmul.bf16.gmra.mxu0 %v10648_v62  ;;  %v10704_v62 = vor.u32 %v12807_v51, %v10703_v8  ;;  %v12809_v51 = vld [vmem:[#allocation2 + $0x8ec] sm:$0xf] }
 0x82f   :  { %v4312_v35 = vadd.f32 %v4311_v56, %v4263_v54  ;;  %v10649_v56 = vld [vmem:[#allocation2 + $0x870] sm:$0xf0]  ;;  %v12796_v54 = vld [vmem:[#allocation2 + $0x884] sm:$0xf] }
 0x830   :  { %v10652_v28 = vor.u32 %v12792_v34, %v10649_v56  ;;  %v10695_v56 = vld [vmem:[#allocation2 + $0x8c0] sm:$0xf] }
 0x832   :  { %4732 = vmatmul.bf16.gmra.mxu2 %v10656_v6 }
 0x836   :  { %v4313_v47 = vpop.f32.mrf.mxu2 }
 0x837   :  { %v4314_v12 = vadd.f32 %v4313_v47, %v4265_v19  ;;  %v10664_v19 = vor.u32 %v12798_v63, %v10663_v9  ;;  %v10665_v47 = vld [vmem:[#allocation2 + $0x890] sm:$0xf0]  ;;  %v10719_v9 = vld [vmem:[#allocation2 + $0x8e8] sm:$0xf]  ;;  %v12811_v63 = vld [vmem:[#allocation2 + $0x8f4] sm:$0xf0] }
 0x839   :  { %v4323_v10 = vpack.c.bf16 %v4314_v12, %v4312_v35  ;;  %v10668_v35 = vor.u32 %v12796_v54, %v10665_v47  ;;  %v10641_v12 = vld [vmem:[#allocation2 + $0x858] sm:$0xf0]  ;;  %v10711_v47 = vld [vmem:[#allocation2 + $0x8e0] sm:$0xf] }
 0x83b   :  { %10596 = vmatmul.msk.bf16.gmra.mxu3 %vm1315_vm2, %v4323_v10  ;;  %4683 = vmatmul.bf16.gmra.mxu1 %v10652_v28  ;;  %v12806_v28 = vld [vmem:[#allocation2 + $0x8cc] sm:$0xf0] }
 0x83c   :  { %v10696_v49 = vor.u32 %v12806_v28, %v10695_v56 }
 0x83e   :  { %4639 = vmatmul.bf16.gmra.mxu0 %v10664_v19  ;;  %v10720_v19 = vor.u32 %v12811_v63, %v10719_v9 }
 0x842   :  { %4737 = vmatmul.bf16.gmra.mxu2 %v10672_v16 }
 0x84b   :  { %4766 = vmatmul.bf16.vlgmr.msra.gmra.mxu3 %v10612_v24  ;;  %4688 = vmatmul.bf16.gmra.mxu1 %v10668_v35  ;;  %v10684_v24 = vor.u32 %v12800_v17, %v10681_v29  ;;  %v12810_v35 = vld [vmem:[#allocation2 + $0x8ec] sm:$0xf0]  ;;  %v12805_v17 = vld [vmem:[#allocation2 + $0x8cc] sm:$0xf] }
 0x84e   :  { %v4362_v1 = vpop.f32.mrf.mxu3  ;;  %4644 = vmatmul.bf16.gmra.mxu0 %v10680_v37  ;;  %v10705_v37 = vld [vmem:[#allocation2 + $0x8d8] sm:$0xf0] }
 0x84f   :  { %v15154_v26 = vadd.f32 %v4362_v1, %v15093_v32  ;;  %v10657_v1 = vld [vmem:[#allocation2 + $0x878] sm:$0xf0] }
 0x852   :  { %4742 = vmatmul.bf16.gmra.mxu2 %v10688_v22  ;;  %v4816_v22 = vld [vmem:[#allocation5 + $0x10] sm:$0x3] }
 0x856   :  { %v4364_v2 = vpop.f32.mrf.mxu3 }
 0x857   :  { %v15157_v61 = vadd.f32 %v4364_v2, %v15096_v11  ;;  %v12789_v11 = vld [vmem:[#allocation2 + $0x84c] sm:$0xf]  ;;  %v10697_v2 = vld [vmem:[#allocation2 + $0x8d0] sm:$0xf0] }
 0x858   :  { %v10644_v48 = vor.u32 %v12789_v11, %v10641_v12  ;;  %v12808_v11 = vld [vmem:[#allocation2 + $0x8e4] sm:$0xf]  ;;  %v10712_v12 = vor.u32 %v12810_v35, %v10711_v47 }
 0x85b   :  { %4771 = vmatmul.bf16.gmra.mxu3 %v10628_v14  ;;  %4693 = vmatmul.bf16.gmra.mxu1 %v10684_v24  ;;  %v10700_v14 = vor.u32 %v12804_v39, %v10697_v2  ;;  %v10708_v24 = vor.u32 %v12805_v17, %v10705_v37 }
 0x85e   :  { %v4367_v32 = vpop.f32.mrf.mxu3  ;;  %4649 = vmatmul.bf16.gmra.mxu0 %v10696_v49 }
 0x85f   :  { %v15160_v21 = vadd.f32 %v4367_v32, %v15099_v5  ;;  %v10673_v32 = vld [vmem:[#allocation2 + $0x898] sm:$0xf0] }
 0x862   :  { %4747 = vmatmul.bf16.gmra.mxu2 %v10704_v62  ;;  %v10721_v62 = vld [vmem:[#allocation2 + $0x8f8] sm:$0xf0] }
 0x863   :  { %v10724_v28 = vor.u32 %v12809_v51, %v10721_v62 }
 0x866   :  { %v4369_v10 = vpop.f32.mrf.mxu3 }
 0x867   :  { %v15163_v3 = vadd.f32 %v4369_v10, %v15102_v45  ;;  %v12793_v45 = vld [vmem:[#allocation2 + $0x86c] sm:$0xf]  ;;  %v10713_v10 = vld [vmem:[#allocation2 + $0x8f0] sm:$0xf0] }
 0x868   :  { %v10660_v6 = vor.u32 %v12793_v45, %v10657_v1 }
 0x86b   :  { %4776 = vmatmul.bf16.gmra.mxu3 %v10644_v48  ;;  %4698 = vmatmul.bf16.gmra.mxu1 %v10700_v14  ;;  %v10716_v48 = vor.u32 %v12808_v11, %v10713_v10 }
 0x86e   :  { %v4372_v5 = vpop.f32.mrf.mxu3  ;;  %4654 = vmatmul.bf16.gmra.mxu0 %v10712_v12 }
 0x86f   :  { %v15166_v20 = vadd.f32 %v4372_v5, %v15105_v23  ;;  %v10689_v5 = vld [vmem:[#allocation2 + $0x8b8] sm:$0xf0]  ;;  %v4620_v45 = vpop.f32.mrf.mxu0 }
 0x872   :  { %4752 = vmatmul.bf16.gmra.mxu2 %v10720_v19 }
 0x876   :  { %v4374_v50 = vpop.f32.mrf.mxu3 }
 0x877   :  { %v15169_v55 = vadd.f32 %v4374_v50, %v15108_v38  ;;  %v12797_v38 = vld [vmem:[#allocation2 + $0x88c] sm:$0xf]  ;;  %v4718_v50 = vpop.f32.mrf.mxu2  ;;  %v4622_v8 = vpop.f32.mrf.mxu0 }
 0x878   :  { %v10676_v16 = vor.u32 %v12797_v38, %v10673_v32  ;;  %v4669_v1 = vpop.f32.mrf.mxu1 }
 0x879   :  { %v4670_v9 = vadd.f32 %v4669_v1, %v4620_v45 }
 0x87b   :  { %4781 = vmatmul.bf16.gmra.mxu3 %v10660_v6  ;;  %4703 = vmatmul.bf16.gmra.mxu1 %v10716_v48  ;;  %v4719_v35 = vadd.f32 %v4718_v50, %v4670_v9 }
 0x87e   :  { %v4377_v23 = vpop.f32.mrf.mxu3 }
 0x87f   :  { %v15172_v34 = vadd.f32 %v4377_v23, %v15111_v18  ;;  %v4625_v39 = vpop.f32.mrf.mxu0 }
 0x886   :  { %v4379_v53 = vpop.f32.mrf.mxu3 }
 0x887   :  { %v15175_v40 = vadd.f32 %v4379_v53, %v15114_v36  ;;  %v12801_v36 = vld [vmem:[#allocation2 + $0x8ac] sm:$0xf]  ;;  %v4627_v32 = vpop.f32.mrf.mxu0 }
 0x888   :  { %v10692_v30 = vor.u32 %v12801_v36, %v10689_v5 }
 0x88b   :  { %4786 = vmatmul.bf16.gmra.mxu3 %v10676_v16 }
 0x88e   :  { %v4382_v18 = vpop.f32.mrf.mxu3 }
 0x88f   :  { %v15178_v54 = vadd.f32 %v4382_v18, %v15117_v33  ;;  %v4842_v33 = vand.u32 %v4816_v22, %v14135_v52  ;;  %v4671_v52 = vpop.f32.mrf.mxu1  ;;  %v4630_v63 = vpop.f32.mrf.mxu0 }
 0x890   :  { %v4672_v47 = vadd.f32 %v4671_v52, %v4622_v8 }
 0x891   :  { %4851 = vmatpush.bf16.msrb.mxu0 %v4842_v33 }
 0x896   :  { %v15180_v31 = vpop.f32.mrf.mxu3 }
 0x898   :  { %v4674_v49 = vpop.f32.mrf.mxu1 }
 0x89b   :  { %4791 = vmatmul.bf16.gmra.mxu3 %v10692_v30 }
 0x89e   :  { %v4387_v25 = vpop.f32.mrf.mxu3 }
 0x89f   :  { %v15184_v4 = vadd.f32 %v4387_v25, %v15123_v27  ;;  %v4720_v27 = vpop.f32.mrf.mxu2  ;;  %v4675_v25 = vadd.f32 %v4674_v49, %v4625_v39 }
 0x8a0   :  { %v4721_v12 = vadd.f32 %v4720_v27, %v4672_v47 }
 0x8a6   :  { %v15186_v29 = vpop.f32.mrf.mxu3 }
 0x8a7   :  { %v4723_v38 = vpop.f32.mrf.mxu2 }
 0x8a8   :  { %v4724_v37 = vadd.f32 %v4723_v38, %v4675_v25 }
 0x8ab   :  { %4796 = vmatmul.bf16.gmra.mxu3 %v10708_v24 }
 0x8ae   :  { %v4392_v6 = vpop.f32.mrf.mxu3 }
 0x8af   :  { %v15189_v23 = vadd.f32 %v4392_v6, %v15132_v46  ;;  %v4676_v46 = vpop.f32.mrf.mxu1  ;;  %v4725_v16 = vpop.f32.mrf.mxu2 }
 0x8b0   :  { %v4677_v17 = vadd.f32 %v4676_v46, %v4627_v32 }
 0x8b2   :  { %v4726_v1 = vadd.f32 %v4725_v16, %v4677_v17 }
 0x8b6   :  { %v15191_v56 = vpop.f32.mrf.mxu3 }
 0x8b7   :  { %v4679_v19 = vpop.f32.mrf.mxu1  ;;  %v4728_v11 = vpop.f32.mrf.mxu2 }
 0x8bb   :  { %4801 = vmatmul.bf16.gmra.mxu3 %v10724_v28 }
 0x8be   :  { %v4397_v2 = vpop.f32.mrf.mxu3 }
 0x8bf   :  { %v15194_v14 = vadd.f32 %v4397_v2, %v15141_v0  ;;  %v4632_v0 = vpop.f32.mrf.mxu0  ;;  %v4681_v30 = vpop.f32.mrf.mxu1  ;;  %v4680_v2 = vadd.f32 %v4679_v19, %v4630_v63 }
 0x8c0   :  { %v4730_v33 = vpop.f32.mrf.mxu2 }
 0x8c1   :  { %v4729_v47 = vadd.f32 %v4728_v11, %v4680_v2 }
 0x8c6   :  { %v15196_v53 = vpop.f32.mrf.mxu3 }
 0x8c7   :  { %v4635_v24 = vpop.f32.mrf.mxu0  ;;  %v4684_v45 = vpop.f32.mrf.mxu1 }
 0x8c8   :  { %v4733_v52 = vpop.f32.mrf.mxu2 }
 0x8ce   :  { %v4767_v18 = vpop.f32.mrf.mxu3 }
 0x8cf   :  { %v4768_v48 = vadd.f32 %v4767_v18, %v4719_v35  ;;  %v4637_v62 = vpop.f32.mrf.mxu0  ;;  %v4686_v28 = vpop.f32.mrf.mxu1  ;;  %v4682_v18 = vadd.f32 %v4681_v30, %v4632_v0 }
 0x8d0   :  { %v4735_v9 = vpop.f32.mrf.mxu2 }
 0x8d1   :  { %v4731_v39 = vadd.f32 %v4730_v33, %v4682_v18 }
 0x8d6   :  { %v4769_v10 = vpop.f32.mrf.mxu3 }
 0x8d7   :  { %v4770_v36 = vadd.f32 %v4769_v10, %v4721_v12  ;;  %v4640_v46 = vpop.f32.mrf.mxu0  ;;  %v4689_v16 = vpop.f32.mrf.mxu1 }
 0x8d8   :  { %v4738_v12 = vpop.f32.mrf.mxu2 }
 0x8d9   :  { %v4807_v5 = vpack.c.bf16 %v4770_v36, %v4768_v48  ;;  %v4685_v48 = vadd.f32 %v4684_v45, %v4635_v24  ;;  %v4687_v36 = vadd.f32 %v4686_v28, %v4637_v62 }
 0x8db   :  { %10725 = vmatmul.msk.bf16.vlgmr.msrb.gmra.mxu0 %vm1315_vm2, %v4807_v5  ;;  %v4734_v25 = vadd.f32 %v4733_v52, %v4685_v48  ;;  %v4736_v63 = vadd.f32 %v4735_v9, %v4687_v36 }
 0x8de   :  { %v4772_v22 = vpop.f32.mrf.mxu3 }
 0x8df   :  { %v4773_v50 = vadd.f32 %v4772_v22, %v4724_v37  ;;  %v4642_v5 = vpop.f32.mrf.mxu0  ;;  %v4691_v22 = vpop.f32.mrf.mxu1 }
 0x8e0   :  { %v4740_v0 = vpop.f32.mrf.mxu2 }
 0x8e6   :  { %v4774_v6 = vpop.f32.mrf.mxu3 }
 0x8e7   :  { %v4775_v8 = vadd.f32 %v4774_v6, %v4726_v1  ;;  %v4645_v17 = vpop.f32.mrf.mxu0  ;;  %v4694_v37 = vpop.f32.mrf.mxu1  ;;  %v4690_v6 = vadd.f32 %v4689_v16, %v4640_v46 }
 0x8e9   :  { %v4808_v51 = vpack.c.bf16 %v4775_v8, %v4773_v50  ;;  %v4743_v50 = vpop.f32.mrf.mxu2  ;;  %v4692_v8 = vadd.f32 %v4691_v22, %v4642_v5 }
 0x8eb   :  { %10726 = vmatmul.msk.bf16.gmra.mxu0 %vm1315_vm2, %v4808_v51  ;;  %v4739_v51 = vadd.f32 %v4738_v12, %v4690_v6  ;;  %v4741_v24 = vadd.f32 %v4740_v0, %v4692_v8 }
 0x8ee   :  { %v4777_v27 = vpop.f32.mrf.mxu3 }
 0x8ef   :  { %v4778_v38 = vadd.f32 %v4777_v27, %v4729_v47  ;;  %v4647_v45 = vpop.f32.mrf.mxu0  ;;  %v4696_v27 = vpop.f32.mrf.mxu1  ;;  %v4695_v47 = vadd.f32 %v4694_v37, %v4645_v17 }
 0x8f1   :  { %v4745_v18 = vpop.f32.mrf.mxu2 }
 0x8f6   :  { %v4779_v49 = vpop.f32.mrf.mxu3 }
 0x8f7   :  { %v4780_v32 = vadd.f32 %v4779_v49, %v4731_v39  ;;  %v4650_v39 = vpop.f32.mrf.mxu0  ;;  %v4699_v49 = vpop.f32.mrf.mxu1 }
 0x8f9   :  { %v4809_v35 = vpack.c.bf16 %v4780_v32, %v4778_v38  ;;  %v4697_v38 = vadd.f32 %v4696_v27, %v4647_v45  ;;  %v4744_v32 = vadd.f32 %v4743_v50, %v4695_v47  ;;  %v4748_v46 = vpop.f32.mrf.mxu2 }
 0x8fb   :  { %10727 = vmatmul.msk.bf16.gmra.mxu0 %vm1315_vm2, %v4809_v35  ;;  %v4746_v16 = vadd.f32 %v4745_v18, %v4697_v38  ;;  %v15207_v38 = vld [vmem:[#allocation7] ss:$0 sm:$0xff] }
 0x8fe   :  { %v4782_v10 = vpop.f32.mrf.mxu3 }
 0x8ff   :  { %v4783_v11 = vadd.f32 %v4782_v10, %v4734_v25  ;;  %v4652_v36 = vpop.f32.mrf.mxu0  ;;  %v4701_v5 = vpop.f32.mrf.mxu1 }
 0x901   :  { %v4750_v22 = vpop.f32.mrf.mxu2 }
 0x906   :  { %v4784_v19 = vpop.f32.mrf.mxu3 }
 0x907   :  { %v4785_v30 = vadd.f32 %v4784_v19, %v4736_v63  ;;  %v4700_v63 = vadd.f32 %v4699_v49, %v4650_v39  ;;  %v4702_v19 = vadd.f32 %v4701_v5, %v4652_v36 }
 0x909   :  { %v4810_v33 = vpack.c.bf16 %v4785_v30, %v4783_v11  ;;  %v4749_v0 = vadd.f32 %v4748_v46, %v4700_v63  ;;  %v4655_v11 = vpop.f32.mrf.mxu0  ;;  %v4704_v30 = vpop.f32.mrf.mxu1 }
 0x90a   :  { %v4753_v6 = vpop.f32.mrf.mxu2  ;;  %v4705_v45 = vadd.f32 %v4704_v30, %v4655_v11 }
 0x90b   :  { %10728 = vmatmul.msk.bf16.gmra.mxu0 %vm1315_vm2, %v4810_v33  ;;  %v4751_v33 = vadd.f32 %v4750_v22, %v4702_v19 }
 0x90e   :  { %v4787_v1 = vpop.f32.mrf.mxu3 }
 0x90f   :  { %v4788_v52 = vadd.f32 %v4787_v1, %v4739_v51 }
 0x911   :  { %v4657_v8 = vpop.f32.mrf.mxu0  ;;  %v4706_v51 = vpop.f32.mrf.mxu1 }
 0x912   :  { %v4755_v27 = vpop.f32.mrf.mxu2 }
 0x916   :  { %v4789_v62 = vpop.f32.mrf.mxu3 }
 0x917   :  { %v4790_v28 = vadd.f32 %v4789_v62, %v4741_v24  ;;  %v4707_v62 = vadd.f32 %v4706_v51, %v4657_v8 }
 0x919   :  { %v4811_v2 = vpack.c.bf16 %v4790_v28, %v4788_v52  ;;  %v4754_v52 = vadd.f32 %v4753_v6, %v4705_v45  ;;  %v4756_v28 = vadd.f32 %v4755_v27, %v4707_v62 }
 0x91b   :  { %10729 = vmatmul.msk.bf16.gmra.mxu0 %vm1315_vm2, %v4811_v2 }
 0x91e   :  { %v4792_v9 = vpop.f32.mrf.mxu3 }
 0x91f   :  { %v4793_v12 = vadd.f32 %v4792_v9, %v4744_v32 }
 0x926   :  { %v4794_v35 = vpop.f32.mrf.mxu3 }
 0x927   :  { %v4795_v10 = vadd.f32 %v4794_v35, %v4746_v16 }
 0x929   :  { %v4812_v48 = vpack.c.bf16 %v4795_v10, %v4793_v12 }
 0x92b   :  { %10730 = vmatmul.msk.bf16.gmra.mxu0 %vm1315_vm2, %v4812_v48 }
 0x92e   :  { %v4797_v25 = vpop.f32.mrf.mxu3 }
 0x92f   :  { %v4798_v37 = vadd.f32 %v4797_v25, %v4749_v0 }
 0x936   :  { %v4799_v17 = vpop.f32.mrf.mxu3 }
 0x937   :  { %v4800_v1 = vadd.f32 %v4799_v17, %v4751_v33 }
 0x939   :  { %v4813_v50 = vpack.c.bf16 %v4800_v1, %v4798_v37 }
 0x93b   :  { %10731 = vmatmul.msk.bf16.gmra.mxu0 %vm1315_vm2, %v4813_v50 }
 0x93e   :  { %v4802_v24 = vpop.f32.mrf.mxu3 }
 0x93f   :  { %v4803_v18 = vadd.f32 %v4802_v24, %v4754_v52 }
 0x946   :  { %v4804_v2 = vpop.f32.mrf.mxu3 }
 0x947   :  { %v4805_v9 = vadd.f32 %v4804_v2, %v4756_v28 }
 0x949   :  { %v4814_v47 = vpack.c.bf16 %v4805_v9, %v4803_v18 }
 0x94b   :  { %10732 = vmatmul.msk.bf16.gmra.mxu0 %vm1315_vm2, %v4814_v47 }
 0x958   :  { %v4853_v39 = vpop.f32.mrf.mxu0 }
 0x959   :  { %v4893_v49 = vadd.f32 %v4853_v39, %v15154_v26 }
 0x95b   :  { %v4913_v46 = vadd.f32 %v15207_v38, %v4893_v49  ;;  %v16021_v49 = vld [vmem:[#allocation38_spill] sm:$0xff] }
 0x95d   :  { %v4929_v12 = vmax.f32 %v4913_v46, 0.0  ;;  %v16022_v46 = vld [vmem:[#allocation45_spill] sm:$0xff] }
 0x960   :  { %v4855_v32 = vpop.f32.mrf.mxu0 }
 0x961   :  { %v4894_v16 = vadd.f32 %v4855_v32, %v15157_v61 }
 0x963   :  { %v4914_v35 = vadd.f32 %v15207_v38, %v4894_v16  ;;  %v16023_v16 = vld [vmem:[#allocation40_spill] sm:$0xff] }
 0x965   :  { %v4930_v10 = vmax.f32 %v4914_v35, 0.0  ;;  %v16024_v35 = vld [vmem:[#allocation48_spill] sm:$0xff] }
 0x967   :  { %v15212_v48 = vpack.c.bf16 %v4930_v10, %v4929_v12  ;;  %v16025_v10 = vld [vmem:[#allocation39_spill] sm:$0xff] }
 0x968   :  { %v4858_v36 = vpop.f32.mrf.mxu0 }
 0x969   :  { %v4895_v5 = vadd.f32 %v4858_v36, %v15160_v21  ;;  %v16026_v36 = vld [vmem:[#allocation36_spill] sm:$0xff] }
 0x96b   :  { %v4915_v25 = vadd.f32 %v15207_v38, %v4895_v5  ;;  %v1460_v5 = vadd.f32 %v16026_v36, %v16025_v10 }
 0x96d   :  { %v4931_v19 = vmax.f32 %v4915_v25, 0.0 }
 0x970   :  { %v4860_v22 = vpop.f32.mrf.mxu0 }
 0x971   :  { %v4896_v26 = vadd.f32 %v4860_v22, %v15163_v3  ;;  %v16027_v22 = vld [vmem:[#allocation42_spill] sm:$0xff] }
 0x973   :  { %v4916_v63 = vadd.f32 %v15207_v38, %v4896_v26  ;;  %v16028_v26 = vld [vmem:[#allocation50_spill] sm:$0xff] }
 0x975   :  { %v4932_v0 = vmax.f32 %v4916_v63, 0.0  ;;  %v16029_v63 = vld [vmem:[#allocation47_spill] sm:$0xff] }
 0x977   :  { %v15218_v11 = vpack.c.bf16 %v4932_v0, %v4931_v19  ;;  %v1958_v19 = vadd.f32 %v16029_v63, %v1460_v5  ;;  %v16030_v0 = vld [vmem:[#allocation54_spill] sm:$0xff] }
 0x978   :  { %v4863_v61 = vpop.f32.mrf.mxu0  ;;  %v12812_v63 = vld [vmem:[#allocation8] sm:$0xff] }
 0x979   :  { %v4897_v30 = vadd.f32 %v4863_v61, %v15166_v20 }
 0x97b   :  { %v4917_v17 = vadd.f32 %v15207_v38, %v4897_v30 }
 0x97d   :  { %v4933_v1 = vmax.f32 %v4917_v17, 0.0  ;;  %v16032_v17 = vld [vmem:[#allocation35_spill] sm:$0xff] }
 0x980   :  { %v4865_v33 = vpop.f32.mrf.mxu0 }
 0x981   :  { %v4898_v37 = vadd.f32 %v4865_v33, %v15169_v55  ;;  %v16031_v33 = vld [vmem:[#allocation37_spill] sm:$0xff] }
 0x983   :  { %v4918_v21 = vadd.f32 %v15207_v38, %v4898_v37  ;;  %v1455_v37 = vadd.f32 %v16032_v17, %v16031_v33  ;;  %v12827_v33 = vld [vmem:[#allocation10 + $0x38] sm:$0xff]  ;;  %v12826_v17 = vld [vmem:[#allocation10 + $0x30] sm:$0xff] }
 0x985   :  { %v4934_v6 = vmax.f32 %v4918_v21, 0.0 }
 0x987   :  { %v15224_v50 = vpack.c.bf16 %v4934_v6, %v4933_v1  ;;  %v16033_v1 = vld [vmem:[#allocation43_spill] sm:$0xff] }
 0x988   :  { %v4868_v3 = vpop.f32.mrf.mxu0  ;;  %v2449_v6 = vadd.f32 %v16033_v1, %v1958_v19  ;;  %v12816_v19 = vld [vmem:[#allocation8 + $0x10] sm:$0xff]  ;;  %v12819_v1 = vld [vmem:[#allocation10 + $0x18] sm:$0xff] }
 0x989   :  { %v4899_v8 = vadd.f32 %v4868_v3, %v15172_v34  ;;  %v16020_v34 = vld [vmem:[#allocation41_spill] sm:$0xff] }
 0x98a   :  { %v1465_v32 = vadd.f32 %v16021_v49, %v16020_v34 }
 0x98b   :  { %v4919_v24 = vadd.f32 %v15207_v38, %v4899_v8 }
 0x98c   :  { %v1960_v12 = vadd.f32 %v16024_v35, %v1465_v32 }
 0x98d   :  { %v4935_v62 = vmax.f32 %v4919_v24, 0.0 }
 0x990   :  { %v4870_v51 = vpop.f32.mrf.mxu0 }
 0x991   :  { %v4900_v45 = vadd.f32 %v4870_v51, %v15175_v40  ;;  %v1470_v40 = vadd.f32 %v16023_v16, %v16022_v46  ;;  %v16034_v51 = vld [vmem:[#allocation46_spill] sm:$0xff] }
 0x992   :  { %v1956_v24 = vadd.f32 %v16034_v51, %v1455_v37  ;;  %v12820_v37 = vld [vmem:[#allocation8 + $0x20] sm:$0xff] }
 0x993   :  { %v4920_v20 = vadd.f32 %v15207_v38, %v4900_v45  ;;  %v1962_v25 = vadd.f32 %v16027_v22, %v1470_v40  ;;  %v2940_v45 = vadd.f32 %v14875_v59, %v2449_v6  ;;  %v12818_v6 = vld [vmem:[#allocation10 + $0x10] sm:$0xff] }
 0x995   :  { %v4936_v27 = vmax.f32 %v4920_v20, 0.0  ;;  %v2453_v61 = vadd.f32 %v16030_v0, %v1962_v25  ;;  %v12813_v0 = vld [vmem:[#allocation8 + $0x8] sm:$0xff] }
 0x997   :  { %v15230_v52 = vpack.c.bf16 %v4936_v27, %v4935_v62  ;;  %v2944_v3 = vadd.f32 %v14890_v57, %v2453_v61  ;;  %v16035_v27 = vld [vmem:[#allocation44_spill] sm:$0xff] }
 0x998   :  { %v4873_v55 = vpop.f32.mrf.mxu0  ;;  %v12814_v61 = vld [vmem:[#allocation10] sm:$0xff] }
 0x999   :  { %v4901_v28 = vadd.f32 %v4873_v55, %v15178_v54  ;;  %v2451_v54 = vadd.f32 %v16028_v26, %v1960_v12  ;;  %v3435_v20 = vadd.f32 %v15072_v13, %v2944_v3  ;;  %v3431_v55 = vadd.f32 %v15032_v7, %v2940_v45  ;;  %v16036_v13 = vld [vmem:[#allocation49_spill] sm:$0xff] }
 0x99a   :  { %v12823_v3 = vld [vmem:[#allocation10 + $0x28] sm:$0xff] }
 0x99b   :  { %v2942_v30 = vadd.f32 %v14884_v42, %v2451_v54  ;;  %v2447_v42 = vadd.f32 %v16035_v27, %v1956_v24  ;;  %v3926_v34 = vadd.f32 %v15143_v60, %v3435_v20  ;;  %v3922_v32 = vadd.f32 %v15127_v15, %v3431_v55 }
 0x99d   :  { %v3433_v8 = vadd.f32 %v15061_v44, %v2942_v30  ;;  %v2938_v44 = vadd.f32 %v14866_v43, %v2447_v42  ;;  %v4417_v59 = vadd.f32 %v15196_v53, %v3926_v34  ;;  %v4413_v40 = vadd.f32 %v15186_v29, %v3922_v32  ;;  %v12817_v30 = vld [vmem:[#allocation8 + $0x18] sm:$0xff]  ;;  %v12824_v32 = vld [vmem:[#allocation8 + $0x30] sm:$0xff] }
 0x99f   :  { %v3924_v62 = vadd.f32 %v15136_v58, %v3433_v8  ;;  %v3429_v16 = vadd.f32 %v16036_v13, %v2938_v44  ;;  %v12822_v8 = vld [vmem:[#allocation10 + $0x20] sm:$0xff] }
 0x9a0   :  { %v4875_v2 = vpop.f32.mrf.mxu0 }
 0x9a1   :  { %v4415_v49 = vadd.f32 %v15191_v56, %v3924_v62  ;;  %v3920_v56 = vadd.f32 %v15119_v41, %v3429_v16  ;;  %v12825_v16 = vld [vmem:[#allocation8 + $0x38] sm:$0xff] }
 0x9a3   :  { %v4411_v53 = vadd.f32 %v15180_v31, %v3920_v56 }
 0x9a5   :  { %v4902_v36 = vadd.f32 %v4875_v2, %v4411_v53 }
 0x9a7   :  { %v4922_v31 = vadd.f32 %v15207_v38, %v4902_v36 }
 0x9a8   :  { %v4878_v18 = vpop.f32.mrf.mxu0 }
 0x9a9   :  { %v4938_v25 = vmax.f32 %v4922_v31, 0.0 }
 0x9b0   :  { %v4880_v9 = vpop.f32.mrf.mxu0 }
 0x9b8   :  { %v4883_v47 = vpop.f32.mrf.mxu0 }
 0x9b9   :  { %v4905_v7 = vadd.f32 %v4883_v47, %v15189_v23 }
 0x9bb   :  { %v4925_v12 = vadd.f32 %v15207_v38, %v4905_v7 }
 0x9c0   :  { %v4885_v39 = vpop.f32.mrf.mxu0 }
 0x9c1   :  { %v4906_v46 = vadd.f32 %v4885_v39, %v4415_v49  ;;  %v4903_v39 = vadd.f32 %v4878_v18, %v15184_v4  ;;  %v4921_v18 = vadd.f32 %v15207_v38, %v4901_v28  ;;  %v12815_v28 = vld [vmem:[#allocation10 + $0x8] sm:$0xff] }
 0x9c3   :  { %v4926_v43 = vadd.f32 %v15207_v38, %v4906_v46  ;;  %v4923_v41 = vadd.f32 %v15207_v38, %v4903_v39  ;;  %v4937_v54 = vmax.f32 %v4921_v18, 0.0 }
 0x9c5   :  { %v4942_v47 = vmax.f32 %v4926_v43, 0.0  ;;  %v4939_v22 = vmax.f32 %v4923_v41, 0.0 }
 0x9c8   :  { %v4888_v21 = vpop.f32.mrf.mxu0 }
 0x9c9   :  { %v4907_v57 = vadd.f32 %v4888_v21, %v15194_v14  ;;  %v4904_v14 = vadd.f32 %v4880_v9, %v4413_v40  ;;  %v4941_v9 = vmax.f32 %v4925_v12, 0.0  ;;  %v12821_v21 = vld [vmem:[#allocation8 + $0x28] sm:$0xff] }
 0x9cb   :  { %v4927_v60 = vadd.f32 %v15207_v38, %v4907_v57  ;;  %v4924_v23 = vadd.f32 %v15207_v38, %v4904_v14  ;;  %v15281_v2 = vpack.c.bf16 %v4942_v47, %v4941_v9  ;;  %v12836_v9 = vld [vmem:[#allocation8 + $0x60] sm:$0xff] }
 0x9cd   :  { %v4943_v10 = vmax.f32 %v4927_v60, 0.0  ;;  %v4940_v4 = vmax.f32 %v4924_v23, 0.0  ;;  %v12828_v60 = vld [vmem:[#allocation8 + $0x40] sm:$0xff] }
 0x9cf   :  { %v15288_v26 = vpack.c.bf16 %v4940_v4, %v4939_v22  ;;  %v12831_v4 = vld [vmem:[#allocation10 + $0x48] sm:$0xff] }
 0x9d0   :  { %v4890_v58 = vpop.f32.mrf.mxu0 }
 0x9d1   :  { %v4908_v35 = vadd.f32 %v4890_v58, %v4417_v59 }
 0x9d3   :  { %v4928_v15 = vadd.f32 %v15207_v38, %v4908_v35  ;;  %v15294_v38 = vpack.c.bf16 %v4938_v25, %v4937_v54  ;;  %v12829_v35 = vld [vmem:[#allocation8 + $0x48] sm:$0xff]  ;;  %v12830_v25 = vld [vmem:[#allocation10 + $0x40] sm:$0xff] }
 0x9d5   :  { %v4944_v29 = vmax.f32 %v4928_v15, 0.0 }
 0x9d7   :  { %v15273_v5 = vpack.c.bf16 %v4944_v29, %v4943_v10 }
 0x9d9   :  { %4969 = vmatpush.bf16.msrb.mxu1 %v15273_v5  ;;  %13172 = vmatpush.bf16.msrb.mxu3 %v15273_v5 }
 0x9da   :  { %5011 = vmatpush.bf16.msrb.mxu2 %v15273_v5  ;;  %5465 = vmatpush.bf16.msra.mxu0 %v15273_v5 }
 0x9dd   :  { %4970 = vmatpush.bf16.msrb.mxu1 %v15281_v2  ;;  %13173 = vmatpush.bf16.msrb.mxu3 %v15281_v2 }
 0x9de   :  { %5012 = vmatpush.bf16.msrb.mxu2 %v15281_v2  ;;  %5466 = vmatpush.bf16.msra.mxu0 %v15281_v2 }
 0x9e1   :  { %4971 = vmatpush.bf16.msrb.mxu1 %v15288_v26  ;;  %13174 = vmatpush.bf16.msrb.mxu3 %v15288_v26 }
 0x9e2   :  { %5013 = vmatpush.bf16.msrb.mxu2 %v15288_v26  ;;  %5467 = vmatpush.bf16.msra.mxu0 %v15288_v26 }
 0x9e5   :  { %4972 = vmatpush.bf16.msrb.mxu1 %v15294_v38  ;;  %13175 = vmatpush.bf16.msrb.mxu3 %v15294_v38 }
 0x9e6   :  { %5014 = vmatpush.bf16.msrb.mxu2 %v15294_v38  ;;  %5468 = vmatpush.bf16.msra.mxu0 %v15294_v38 }
 0x9e9   :  { %4973 = vmatpush.bf16.msrb.mxu1 %v15230_v52  ;;  %13176 = vmatpush.bf16.msrb.mxu3 %v15230_v52 }
 0x9ea   :  { %5015 = vmatpush.bf16.msrb.mxu2 %v15230_v52  ;;  %5469 = vmatpush.bf16.msra.mxu0 %v15230_v52 }
 0x9ed   :  { %4974 = vmatpush.bf16.msrb.mxu1 %v15224_v50  ;;  %13177 = vmatpush.bf16.msrb.mxu3 %v15224_v50 }
 0x9ee   :  { %5016 = vmatpush.bf16.msrb.mxu2 %v15224_v50  ;;  %5470 = vmatpush.bf16.msra.mxu0 %v15224_v50 }
 0x9f1   :  { %4975 = vmatpush.bf16.msrb.mxu1 %v15218_v11  ;;  %13178 = vmatpush.bf16.msrb.mxu3 %v15218_v11 }
 0x9f2   :  { %5017 = vmatpush.bf16.msrb.mxu2 %v15218_v11  ;;  %5471 = vmatpush.bf16.msra.mxu0 %v15218_v11 }
 0x9f5   :  { %4976 = vmatpush.bf16.msrb.mxu1 %v15212_v48  ;;  %13179 = vmatpush.bf16.msrb.mxu3 %v15212_v48 }
 0x9f6   :  { %5018 = vmatpush.bf16.msrb.mxu2 %v15212_v48  ;;  %5472 = vmatpush.bf16.msra.mxu0 %v15212_v48 }
 0x9f8   :  { %4977 = vmatmul.bf16.vlgmr.msrb.gmra.mxu1 %v12812_v63  ;;  %4982 = vmatmul.bf16.vlgmr.msrb.gmra.mxu3 %v12813_v0  ;;  %v12832_v0 = vld [vmem:[#allocation8 + $0x50] sm:$0xff] }
 0x9f9   :  { %5099 = vmatpush.bf16.msra.mxu1 %v12815_v28  ;;  %5019 = vmatmul.bf16.vlgmr.msrb.gmra.mxu2 %v12816_v19  ;;  %v12837_v19 = vld [vmem:[#allocation8 + $0x68] sm:$0xff] }
 0x9fa   :  { %5129 = vmatpush.bf16.msra.mxu2 %v15273_v5  ;;  %5633 = vmatpush.bf16.msrb.mxu0 %v15273_v5 }
 0x9fb   :  { %5062 = vmatpush.bf16.msra.mxu3 %v12819_v1  ;;  %5473 = vmatmul.bf16.vlgmr.msra.gmra.mxu0 %v12836_v9 }
 0x9fd   :  { %5100 = vmatpush.bf16.msra.mxu1 %v12814_v61 }
 0x9fe   :  { %5130 = vmatpush.bf16.msra.mxu2 %v15281_v2  ;;  %5634 = vmatpush.bf16.msrb.mxu0 %v15281_v2 }
 0x9ff   :  { %5063 = vmatpush.bf16.msra.mxu3 %v12818_v6  ;;  %v12839_v6 = vld [vmem:[#allocation10 + $0x68] sm:$0xff] }
 0xa01   :  { %5213 = vmatpush.bf16.msrb.mxu1 %v15273_v5 }
 0xa02   :  { %5131 = vmatpush.bf16.msra.mxu2 %v15288_v26  ;;  %5635 = vmatpush.bf16.msrb.mxu0 %v15288_v26 }
 0xa03   :  { %5179 = vmatpush.bf16.msrb.mxu3 %v12823_v3 }
 0xa05   :  { %5214 = vmatpush.bf16.msrb.mxu1 %v15281_v2 }
 0xa06   :  { %5132 = vmatpush.bf16.msra.mxu2 %v15294_v38  ;;  %5636 = vmatpush.bf16.msrb.mxu0 %v15294_v38 }
 0xa07   :  { %5180 = vmatpush.bf16.msrb.mxu3 %v12822_v8  ;;  %v12835_v8 = vld [vmem:[#allocation10 + $0x58] sm:$0xff] }
 0xa09   :  { %5215 = vmatpush.bf16.msrb.mxu1 %v15288_v26  ;;  %5024 = vmatmul.bf16.gmra.mxu2 %v12817_v30 }
 0xa0a   :  { %5133 = vmatpush.bf16.msra.mxu2 %v15230_v52  ;;  %5637 = vmatpush.bf16.msrb.mxu0 %v15230_v52 }
 0xa0b   :  { %5478 = vmatmul.bf16.gmra.mxu0 %v12837_v19 }
 0xa0d   :  { %5216 = vmatpush.bf16.msrb.mxu1 %v15294_v38 }
 0xa0e   :  { %5134 = vmatpush.bf16.msra.mxu2 %v15224_v50  ;;  %5638 = vmatpush.bf16.msrb.mxu0 %v15224_v50 }
 0xa11   :  { %5217 = vmatpush.bf16.msrb.mxu1 %v15230_v52 }
 0xa12   :  { %5135 = vmatpush.bf16.msra.mxu2 %v15218_v11  ;;  %5639 = vmatpush.bf16.msrb.mxu0 %v15218_v11 }
 0xa15   :  { %5218 = vmatpush.bf16.msrb.mxu1 %v15224_v50 }
 0xa16   :  { %5136 = vmatpush.bf16.msra.mxu2 %v15212_v48  ;;  %5640 = vmatpush.bf16.msrb.mxu0 %v15212_v48 }
 0xa19   :  { %5219 = vmatpush.bf16.msrb.mxu1 %v15218_v11  ;;  %5137 = vmatmul.bf16.vlgmr.msra.gmra.mxu2 %v12820_v37 }
 0xa1a   :  { %5263 = vmatpush.bf16.msrb.mxu2 %v12827_v33 }
 0xa1d   :  { %5220 = vmatpush.bf16.msrb.mxu1 %v15212_v48 }
 0xa1e   :  { %5264 = vmatpush.bf16.msrb.mxu2 %v12826_v17  ;;  %v12833_v17 = vld [vmem:[#allocation8 + $0x58] sm:$0xff] }
 0xa22   :  { %5381 = vmatpush.bf16.msra.mxu2 %v15273_v5 }
 0xa26   :  { %5382 = vmatpush.bf16.msra.mxu2 %v15281_v2 }
 0xa29   :  { %5142 = vmatmul.bf16.gmra.mxu2 %v12821_v21  ;;  %v12840_v21 = vld [vmem:[#allocation8 + $0x70] sm:$0xff] }
 0xa2a   :  { %5383 = vmatpush.bf16.msra.mxu2 %v15288_v26 }
 0xa2e   :  { %5384 = vmatpush.bf16.msra.mxu2 %v15294_v38 }
 0xa32   :  { %5385 = vmatpush.bf16.msra.mxu2 %v15230_v52 }
 0xa36   :  { %5386 = vmatpush.bf16.msra.mxu2 %v15224_v50 }
 0xa3a   :  { %5387 = vmatpush.bf16.msra.mxu2 %v15218_v11 }
 0xa3e   :  { %5388 = vmatpush.bf16.msra.mxu2 %v15212_v48 }
 0xa75   :  { %v4978_v51 = vpop.f32.mrf.mxu1 }
 0xa78   :  { %v5474_v1 = vpop.f32.mrf.mxu0 }
 0xa7b   :  { %v4983_v62 = vpop.f32.mrf.mxu3 }
 0xa7c   :  { %v5020_v24 = vpop.f32.mrf.mxu2 }
 0xa7d   :  { %v4980_v45 = vpop.f32.mrf.mxu1 }
 0xa7e   :  { %v4988_v20 = vpack.c.bf16 %v4980_v45, %v4978_v51 }
 0xa80   :  { %10767 = vmatmul.msk.bf16.vlgmr.msra.gmra.mxu1 %vm5049_vm3, %v4988_v20  ;;  %v5476_v45 = vpop.f32.mrf.mxu0 }
 0xa81   :  { %5347 = vmatpush.bf16.msra.mxu1 %v12831_v4  ;;  %v5484_v20 = vpack.c.bf16 %v5476_v45, %v5474_v1 }
 0xa83   :  { %v4985_v55 = vpop.f32.mrf.mxu3 }
 0xa84   :  { %v5022_v27 = vpop.f32.mrf.mxu2  ;;  %v4989_v49 = vpack.c.bf16 %v4985_v55, %v4983_v62 }
 0xa85   :  { %v5030_v42 = vpack.c.bf16 %v5022_v27, %v5020_v24  ;;  %5348 = vmatpush.bf16.msra.mxu1 %v12830_v25  ;;  %v12838_v24 = vld [vmem:[#allocation10 + $0x60] sm:$0xff]  ;;  %v12834_v27 = vld [vmem:[#allocation10 + $0x50] sm:$0xff] }
 0xa87   :  { %10757 = vmatmul.msk.bf16.vlgmr.msra.gmra.mxu3 %vm5049_vm3, %v5030_v42 }
 0xa88   :  { %5297 = vmatpush.bf16.msra.mxu3 %v15273_v5  ;;  %v5479_v42 = vpop.f32.mrf.mxu0 }
 0xa8c   :  { %5298 = vmatpush.bf16.msra.mxu3 %v15281_v2  ;;  %v5025_v34 = vpop.f32.mrf.mxu2 }
 0xa90   :  { %5299 = vmatpush.bf16.msra.mxu3 %v15288_v26  ;;  %10768 = vmatmul.msk.bf16.gmra.mxu1 %vm5049_vm3, %v4989_v49  ;;  %v5481_v49 = vpop.f32.mrf.mxu0 }
 0xa94   :  { %5300 = vmatpush.bf16.msra.mxu3 %v15294_v38  ;;  %v5027_v57 = vpop.f32.mrf.mxu2 }
 0xa95   :  { %v5031_v44 = vpack.c.bf16 %v5027_v57, %v5025_v34  ;;  %v5485_v57 = vpack.c.bf16 %v5481_v49, %v5479_v42 }
 0xa97   :  { %10758 = vmatmul.msk.bf16.gmra.mxu3 %vm5049_vm3, %v5031_v44 }
 0xa98   :  { %5301 = vmatpush.bf16.msra.mxu3 %v15230_v52 }
 0xa9c   :  { %5302 = vmatpush.bf16.msra.mxu3 %v15224_v50  ;;  %v5138_v59 = vpop.f32.mrf.mxu2 }
 0xaa0   :  { %5303 = vmatpush.bf16.msra.mxu3 %v15218_v11  ;;  %5221 = vmatmul.bf16.vlgmr.msrb.gmra.mxu1 %v12824_v32 }
 0xaa1   :  { %5515 = vmatpush.bf16.msrb.mxu1 %v12839_v6 }
 0xaa4   :  { %5304 = vmatpush.bf16.msra.mxu3 %v15212_v48  ;;  %v5140_v46 = vpop.f32.mrf.mxu2 }
 0xaa5   :  { %v5148_v13 = vpack.c.bf16 %v5140_v46, %v5138_v59  ;;  %5516 = vmatpush.bf16.msrb.mxu1 %v12838_v24  ;;  %v12847_v59 = vld [vmem:[#allocation10 + $0x88] sm:$0xff] }
 0xaa7   :  { %10785 = vmatmul.msk.bf16.vlgmr.msrb.gmra.mxu3 %vm5049_vm3, %v5148_v13  ;;  %v12843_v13 = vld [vmem:[#allocation10 + $0x78] sm:$0xff] }
 0xaa8   :  { %5431 = vmatpush.bf16.msrb.mxu3 %v12835_v8 }
 0xaac   :  { %v5143_v58 = vpop.f32.mrf.mxu2  ;;  %5432 = vmatpush.bf16.msrb.mxu3 %v12834_v27 }
 0xab0   :  { %5226 = vmatmul.bf16.gmra.mxu1 %v12825_v16  ;;  %v12846_v16 = vld [vmem:[#allocation10 + $0x80] sm:$0xff] }
 0xab4   :  { %v5145_v40 = vpop.f32.mrf.mxu2 }
 0xab5   :  { %v5149_v7 = vpack.c.bf16 %v5145_v40, %v5143_v58 }
 0xab7   :  { %10786 = vmatmul.msk.bf16.gmra.mxu3 %vm5049_vm3, %v5149_v7 }
 0xac7   :  { %5305 = vmatmul.bf16.vlgmr.msra.gmra.mxu3 %v12828_v60 }
 0xac8   :  { %5599 = vmatpush.bf16.msra.mxu3 %v12843_v13 }
 0xad7   :  { %5310 = vmatmul.bf16.gmra.mxu3 %v12829_v35 }
 0xafd   :  { %v5102_v56 = vpop.f32.mrf.mxu1 }
 0xb05   :  { %v15362_v14 = vpop.f32.mrf.mxu1 }
 0xb0a   :  { %v5065_v43 = vpop.f32.mrf.mxu3 }
 0xb0b   :  { %v5103_v15 = vadd.f32 %v5102_v56, %v5065_v43  ;;  %v12842_v43 = vld [vmem:[#allocation10 + $0x70] sm:$0xff] }
 0xb0c   :  { %5600 = vmatpush.bf16.msra.mxu3 %v12842_v43 }
 0xb0d   :  { %v5107_v53 = vpop.f32.mrf.mxu1 }
 0xb12   :  { %v15364_v39 = vpop.f32.mrf.mxu3 }
 0xb15   :  { %v15366_v12 = vpop.f32.mrf.mxu1 }
 0xb1a   :  { %v5070_v10 = vpop.f32.mrf.mxu3 }
 0xb1b   :  { %v5108_v29 = vadd.f32 %v5107_v53, %v5070_v10 }
 0xb1d   :  { %v5222_v36 = vpop.f32.mrf.mxu1 }
 0xb22   :  { %v15368_v23 = vpop.f32.mrf.mxu3 }
 0xb23   :  { %v5110_v1 = vadd.f32 %v15366_v12, %v15368_v23 }
 0xb25   :  { %v5224_v47 = vpop.f32.mrf.mxu1 }
 0xb26   :  { %v5232_v41 = vpack.c.bf16 %v5224_v47, %v5222_v36 }
 0xb28   :  { %10803 = vmatmul.msk.bf16.vlgmr.msrb.gmra.mxu2 %vm5049_vm3, %v5232_v41 }
 0xb29   :  { %5549 = vmatpush.bf16.msrb.mxu2 %v15273_v5 }
 0xb2a   :  { %v5182_v31 = vpop.f32.mrf.mxu3 }
 0xb2b   :  { %v5192_v18 = vadd.f32 %v5182_v31, %v5103_v15 }
 0xb2d   :  { %5550 = vmatpush.bf16.msrb.mxu2 %v15281_v2  ;;  %v5227_v22 = vpop.f32.mrf.mxu1 }
 0xb31   :  { %5551 = vmatpush.bf16.msrb.mxu2 %v15288_v26 }
 0xb32   :  { %v15374_v54 = vpop.f32.mrf.mxu3 }
 0xb35   :  { %5552 = vmatpush.bf16.msrb.mxu2 %v15294_v38  ;;  %v5229_v28 = vpop.f32.mrf.mxu1  ;;  %v12844_v38 = vld [vmem:[#allocation8 + $0x80] sm:$0xff] }
 0xb36   :  { %v5233_v63 = vpack.c.bf16 %v5229_v28, %v5227_v22  ;;  %5641 = vmatmul.bf16.vlgmr.msrb.gmra.mxu0 %v12844_v38 }
 0xb38   :  { %10804 = vmatmul.msk.bf16.gmra.mxu2 %vm5049_vm3, %v5233_v63 }
 0xb39   :  { %5553 = vmatpush.bf16.msrb.mxu2 %v15230_v52  ;;  %v12845_v52 = vld [vmem:[#allocation8 + $0x88] sm:$0xff] }
 0xb3a   :  { %v5187_v5 = vpop.f32.mrf.mxu3 }
 0xb3b   :  { %v5194_v2 = vadd.f32 %v5187_v5, %v5108_v29 }
 0xb3d   :  { %5554 = vmatpush.bf16.msrb.mxu2 %v15224_v50 }
 0xb41   :  { %5555 = vmatpush.bf16.msrb.mxu2 %v15218_v11 }
 0xb42   :  { %v15381_v26 = vpop.f32.mrf.mxu3 }
 0xb45   :  { %5556 = vmatpush.bf16.msrb.mxu2 %v15212_v48  ;;  %v12841_v48 = vld [vmem:[#allocation8 + $0x78] sm:$0xff] }
 0xb46   :  { %5646 = vmatmul.bf16.gmra.mxu0 %v12845_v52 }
 0xb48   :  { %5389 = vmatmul.bf16.vlgmr.msra.gmra.mxu2 %v12832_v0 }
 0xb4a   :  { %v5306_v61 = vpop.f32.mrf.mxu3 }
 0xb52   :  { %v5308_v30 = vpop.f32.mrf.mxu3 }
 0xb53   :  { %v5316_v33 = vpack.c.bf16 %v5308_v30, %v5306_v61 }
 0xb55   :  { %10821 = vmatmul.msk.bf16.vlgmr.msra.gmra.mxu1 %vm5049_vm3, %v5316_v33 }
 0xb56   :  { %5683 = vmatpush.bf16.msra.mxu1 %v12847_v59  ;;  %v13206_v59 = vld [vmem:[#allocation11] ss:$0 sm:$0xff] }
 0xb58   :  { %5394 = vmatmul.bf16.gmra.mxu2 %v12833_v17 }
 0xb5a   :  { %v5311_v50 = vpop.f32.mrf.mxu3  ;;  %5684 = vmatpush.bf16.msra.mxu1 %v12846_v16 }
 0xb62   :  { %v5313_v37 = vpop.f32.mrf.mxu3 }
 0xb63   :  { %v5317_v11 = vpack.c.bf16 %v5313_v37, %v5311_v50 }
 0xb65   :  { %10822 = vmatmul.msk.bf16.gmra.mxu1 %vm5049_vm3, %v5317_v11  ;;  %v5105_v11 = vadd.f32 %v15362_v14, %v15364_v39 }
 0xb68   :  { %5557 = vmatmul.bf16.vlgmr.msrb.gmra.mxu2 %v12840_v21 }
 0xb75   :  { %10857 = vmatmul.msk.bf16.vlgmr.msrb.gmra.mxu1 %vm5049_vm3, %v5484_v20 }
 0xb78   :  { %5562 = vmatmul.bf16.gmra.mxu2 %v12841_v48  ;;  %v5193_v48 = vadd.f32 %v15374_v54, %v5105_v11 }
 0xb85   :  { %10858 = vmatmul.msk.bf16.gmra.mxu1 %vm5049_vm3, %v5485_v57 }
 0xbab   :  { %v5266_v3 = vpop.f32.mrf.mxu2 }
 0xbac   :  { %v5276_v51 = vadd.f32 %v5266_v3, %v5192_v18  ;;  %v5195_v3 = vadd.f32 %v15381_v26, %v5110_v1  ;;  %v6264_v1 = vld [vmem:[#allocation13 + $0x20] sm:$0xf] }
 0xbb3   :  { %v15387_v62 = vpop.f32.mrf.mxu2  ;;  %v5642_v32 = vpop.f32.mrf.mxu0 }
 0xbb4   :  { %v5277_v6 = vadd.f32 %v15387_v62, %v5193_v48  ;;  %v5919_v48 = vld [vmem:[#allocation13 + $0xc] sm:$0xf] }
 0xbbb   :  { %v5271_v55 = vpop.f32.mrf.mxu2  ;;  %v5644_v58 = vpop.f32.mrf.mxu0 }
 0xbbc   :  { %v5278_v34 = vadd.f32 %v5271_v55, %v5194_v2  ;;  %v5652_v40 = vpack.c.bf16 %v5644_v58, %v5642_v32 }
 0xbbe   :  { %10893 = vmatmul.msk.bf16.vlgmr.msra.gmra.mxu1 %vm5049_vm3, %v5652_v40 }
 0xbc3   :  { %v5273_v44 = vpop.f32.mrf.mxu2  ;;  %v5647_v15 = vpop.f32.mrf.mxu0 }
 0xbc4   :  { %v5279_v24 = vadd.f32 %v5273_v44, %v5195_v3  ;;  %v6195_v3 = vld [vmem:[#allocation13 + $0x1c] sm:$0xf] }
 0xbcb   :  { %v5390_v46 = vpop.f32.mrf.mxu2  ;;  %v5649_v29 = vpop.f32.mrf.mxu0 }
 0xbcc   :  { %v5653_v36 = vpack.c.bf16 %v5649_v29, %v5647_v15 }
 0xbce   :  { %10894 = vmatmul.msk.bf16.gmra.mxu1 %vm5049_vm3, %v5653_v36  ;;  %v5741_v36 = vld [vmem:[#allocation13 + $0x4] sm:$0xf] }
 0xbd2   :  { %v5350_v7 = vpop.f32.mrf.mxu1 }
 0xbd3   :  { %v5392_v60 = vpop.f32.mrf.mxu2  ;;  %v5360_v35 = vadd.f32 %v5350_v7, %v5276_v51 }
 0xbd4   :  { %v5400_v56 = vpack.c.bf16 %v5392_v60, %v5390_v46 }
 0xbd6   :  { %10839 = vmatmul.msk.bf16.vlgmr.msrb.gmra.mxu3 %vm5049_vm3, %v5400_v56 }
 0xbda   :  { %v5352_v53 = vpop.f32.mrf.mxu1 }
 0xbdb   :  { %v5395_v10 = vpop.f32.mrf.mxu2  ;;  %v5361_v8 = vadd.f32 %v5352_v53, %v5277_v6  ;;  %v6057_v6 = vld [vmem:[#allocation13 + $0x14] sm:$0xf] }
 0xbe2   :  { %v5355_v47 = vpop.f32.mrf.mxu1 }
 0xbe3   :  { %v5397_v41 = vpop.f32.mrf.mxu2  ;;  %v5362_v9 = vadd.f32 %v5355_v47, %v5278_v34  ;;  %v5714_v47 = vld [vmem:[#allocation13] sm:$0xf] }
 0xbe4   :  { %v5401_v31 = vpack.c.bf16 %v5397_v41, %v5395_v10  ;;  %v12855_v10 = vld [vmem:[#allocation14 + $0x38] sm:$0xff]  ;;  %v5850_v41 = vld [vmem:[#allocation13 + $0x8] sm:$0xf] }
 0xbe6   :  { %10840 = vmatmul.msk.bf16.gmra.mxu3 %vm5049_vm3, %v5401_v31  ;;  %v12853_v31 = vld [vmem:[#allocation14 + $0x28] sm:$0xff] }
 0xbea   :  { %v5357_v19 = vpop.f32.mrf.mxu1 }
 0xbeb   :  { %v5558_v4 = vpop.f32.mrf.mxu2  ;;  %v5363_v42 = vadd.f32 %v5357_v19, %v5279_v24  ;;  %v12848_v19 = vld [vmem:[#allocation14] sm:$0xff]  ;;  %v12862_v24 = vld [vmem:[#allocation14 + $0x70] sm:$0xff] }
 0xbf2   :  { %v5518_v5 = vpop.f32.mrf.mxu1 }
 0xbf3   :  { %v5560_v18 = vpop.f32.mrf.mxu2 }
 0xbf4   :  { %v5568_v22 = vpack.c.bf16 %v5560_v18, %v5558_v4  ;;  %v12852_v4 = vld [vmem:[#allocation14 + $0x20] sm:$0xff]  ;;  %v5988_v18 = vld [vmem:[#allocation13 + $0x10] sm:$0xf] }
 0xbf6   :  { %10875 = vmatmul.msk.bf16.vlgmr.msra.gmra.mxu3 %vm5049_vm3, %v5568_v22  ;;  %v12851_v22 = vld [vmem:[#allocation14 + $0x18] sm:$0xff] }
 0xbfa   :  { %v5520_v2 = vpop.f32.mrf.mxu1 }
 0xbfb   :  { %v5563_v25 = vpop.f32.mrf.mxu2 }
 0xc02   :  { %v5523_v61 = vpop.f32.mrf.mxu1 }
 0xc03   :  { %v5565_v28 = vpop.f32.mrf.mxu2 }
 0xc04   :  { %v5569_v63 = vpack.c.bf16 %v5565_v28, %v5563_v25  ;;  %v12850_v25 = vld [vmem:[#allocation14 + $0x10] sm:$0xff]  ;;  %v12849_v28 = vld [vmem:[#allocation14 + $0x8] sm:$0xff] }
 0xc06   :  { %10876 = vmatmul.msk.bf16.gmra.mxu3 %vm5049_vm3, %v5569_v63  ;;  %v12859_v63 = vld [vmem:[#allocation14 + $0x58] sm:$0xff] }
 0xc07   :  { %5908 = vmatpush.bf16.msrb.mxu1 %v12859_v63 }
 0xc0a   :  { %v5525_v33 = vpop.f32.mrf.mxu1 }
 0xc3b   :  { %v5686_v52 = vpop.f32.mrf.mxu1 }
 0xc43   :  { %v5688_v37 = vpop.f32.mrf.mxu1 }
 0xc4b   :  { %v5691_v27 = vpop.f32.mrf.mxu1 }
 0xc53   :  { %v5693_v13 = vpop.f32.mrf.mxu1 }
 0xc59   :  { %v5434_v0 = vpop.f32.mrf.mxu3 }
 0xc5a   :  { %v5444_v55 = vadd.f32 %v5434_v0, %v5360_v35  ;;  %v12856_v0 = vld [vmem:[#allocation14 + $0x40] sm:$0xff] }
 0xc5c   :  { %v5528_v54 = vadd.f32 %v5518_v5, %v5444_v55  ;;  %v12858_v5 = vld [vmem:[#allocation14 + $0x50] sm:$0xff]  ;;  %v12864_v55 = vld [vmem:[#allocation14 + $0x80] sm:$0xff] }
 0xc5d   :  { %5909 = vmatpush.bf16.msrb.mxu1 %v12858_v5 }
 0xc61   :  { %v5436_v38 = vpop.f32.mrf.mxu3 }
 0xc62   :  { %v5445_v45 = vadd.f32 %v5436_v38, %v5361_v8  ;;  %v12863_v8 = vld [vmem:[#allocation14 + $0x78] sm:$0xff] }
 0xc64   :  { %v5529_v14 = vadd.f32 %v5520_v2, %v5445_v45  ;;  %v12857_v2 = vld [vmem:[#allocation14 + $0x48] sm:$0xff]  ;;  %v12866_v45 = vld [vmem:[#allocation14 + $0x90] sm:$0xff] }
 0xc65   :  { %5910 = vmatpush.bf16.msrb.mxu1 %v12857_v2 }
 0xc69   :  { %v5439_v30 = vpop.f32.mrf.mxu3  ;;  %5911 = vmatpush.bf16.msrb.mxu1 %v12856_v0 }
 0xc6a   :  { %v5446_v51 = vadd.f32 %v5439_v30, %v5362_v9  ;;  %v12854_v9 = vld [vmem:[#allocation14 + $0x30] sm:$0xff] }
 0xc6c   :  { %v5530_v34 = vadd.f32 %v5523_v61, %v5446_v51  ;;  %v12867_v51 = vld [vmem:[#allocation14 + $0x98] sm:$0xff] }
 0xc6d   :  { %6046 = vmatpush.bf16.msra.mxu1 %v12867_v51 }
 0xc71   :  { %v5441_v17 = vpop.f32.mrf.mxu3  ;;  %6047 = vmatpush.bf16.msra.mxu1 %v12866_v45  ;;  %v12907_v45 = vld [vmem:[#allocation19 + $0xb4] sm:$0xf0] }
 0xc72   :  { %v5447_v39 = vadd.f32 %v5441_v17, %v5363_v42  ;;  %v12860_v42 = vld [vmem:[#allocation14 + $0x60] sm:$0xff] }
 0xc74   :  { %v5531_v32 = vadd.f32 %v5525_v33, %v5447_v39 }
 0xc79   :  { %v5602_v50 = vpop.f32.mrf.mxu3 }
 0xc7a   :  { %v5612_v12 = vadd.f32 %v5602_v50, %v5528_v54  ;;  %v6126_v50 = vld [vmem:[#allocation13 + $0x18] sm:$0xf] }
 0xc7c   :  { %v5696_v44 = vadd.f32 %v5686_v52, %v5612_v12  ;;  %v12869_v12 = vld [vmem:[#allocation14 + $0xa8] sm:$0xff] }
 0xc7e   :  { %v5704_v60 = vadd.f32 %v13206_v59, %v5696_v44  ;;  %v12872_v44 = vld [vmem:[#allocation14 + $0xc0] sm:$0xff] }
 0xc80   :  { %v5708_v53 = vmax.f32 %v5704_v60, 0.0  ;;  %v12883_v60 = vld [vmem:[#allocation14 + $0x118] sm:$0xff] }
 0xc81   :  { %v5604_v21 = vpop.f32.mrf.mxu3 }
 0xc82   :  { %v5613_v57 = vadd.f32 %v5604_v21, %v5529_v14 }
 0xc84   :  { %v5697_v26 = vadd.f32 %v5688_v37, %v5613_v57  ;;  %v12870_v57 = vld [vmem:[#allocation14 + $0xb0] sm:$0xff] }
 0xc86   :  { %v5705_v40 = vadd.f32 %v13206_v59, %v5697_v26 }
 0xc88   :  { %v5709_v43 = vmax.f32 %v5705_v40, 0.0 }
 0xc89   :  { %v5607_v20 = vpop.f32.mrf.mxu3 }
 0xc8a   :  { %v5614_v49 = vadd.f32 %v5607_v20, %v5530_v34  ;;  %v15408_v29 = vpack.c.bf16 %v5709_v43, %v5708_v53  ;;  %v12861_v20 = vld [vmem:[#allocation14 + $0x68] sm:$0xff]  ;;  %v12871_v34 = vld [vmem:[#allocation14 + $0xb8] sm:$0xff]  ;;  %v12882_v43 = vld [vmem:[#allocation14 + $0x110] sm:$0xff] }
 0xc8b   :  { %v12881_v53 = vld [vmem:[#allocation14 + $0x108] sm:$0xff] }
 0xc8c   :  { %v5698_v23 = vadd.f32 %v5691_v27, %v5614_v49  ;;  %v12865_v27 = vld [vmem:[#allocation14 + $0x88] sm:$0xff]  ;;  %v12875_v49 = vld [vmem:[#allocation14 + $0xd8] sm:$0xff] }
 0xc8d   :  { %6048 = vmatpush.bf16.msra.mxu1 %v12865_v27 }
 0xc8e   :  { %v5706_v16 = vadd.f32 %v13206_v59, %v5698_v23 }
 0xc90   :  { %v5710_v35 = vmax.f32 %v5706_v16, 0.0 }
 0xc91   :  { %v5609_v62 = vpop.f32.mrf.mxu3  ;;  %6049 = vmatpush.bf16.msra.mxu1 %v12864_v55  ;;  %v11077_v55 = vld [vmem:[#allocation19 + $0xa0] sm:$0xf] }
 0xc92   :  { %v5615_v46 = vadd.f32 %v5609_v62, %v5531_v32  ;;  %v12874_v32 = vld [vmem:[#allocation14 + $0xd0] sm:$0xff]  ;;  %v12873_v62 = vld [vmem:[#allocation14 + $0xc8] sm:$0xff] }
 0xc94   :  { %v5699_v58 = vadd.f32 %v5693_v13, %v5615_v46  ;;  %v12868_v13 = vld [vmem:[#allocation14 + $0xa0] sm:$0xff] }
 0xc96   :  { %v5707_v7 = vadd.f32 %v13206_v59, %v5699_v58 }
 0xc98   :  { %v5711_v56 = vmax.f32 %v5707_v7, 0.0 }
 0xc9a   :  { %v15403_v15 = vpack.c.bf16 %v5711_v56, %v5710_v35 }
 0xc9c   :  { %5724 = vmatpush.bf16.msra.mxu2 %v15403_v15  ;;  %5751 = vmatpush.bf16.msrb.mxu3 %v15403_v15 }
 0xc9d   :  { %5860 = vmatpush.bf16.msra.mxu0 %v15403_v15 }
 0xca0   :  { %5725 = vmatpush.bf16.msra.mxu2 %v15408_v29  ;;  %5752 = vmatpush.bf16.msrb.mxu3 %v15408_v29 }
 0xca1   :  { %5861 = vmatpush.bf16.msra.mxu0 %v15408_v29 }
 0xca3   :  { %10896 = vmatmul.msk.bf16.vlgmr.msrb.gmra.mxu3 %vm5049_vm3, %v5741_v36  ;;  %10895 = vmatmul.msk.bf16.vlgmr.msra.gmra.mxu2 %vm5049_vm3, %v5714_v47  ;;  %v12880_v47 = vld [vmem:[#allocation14 + $0x100] sm:$0xff] }
 0xca4   :  { %5800 = vmatpush.bf16.msrb.mxu2 %v12855_v10  ;;  %10931 = vmatmul.msk.bf16.vlgmr.msra.gmra.mxu0 %vm5049_vm3, %v5850_v41 }
 0xca5   :  { %5998 = vmatpush.bf16.msrb.mxu0 %v15403_v15  ;;  %5840 = vmatpush.bf16.msra.mxu3 %v12851_v22 }
 0xca8   :  { %5801 = vmatpush.bf16.msrb.mxu2 %v12854_v9  ;;  %v12878_v9 = vld [vmem:[#allocation14 + $0xf0] sm:$0xff] }
 0xca9   :  { %5999 = vmatpush.bf16.msrb.mxu0 %v15408_v29  ;;  %5841 = vmatpush.bf16.msra.mxu3 %v12850_v25  ;;  %v12876_v25 = vld [vmem:[#allocation14 + $0xe0] sm:$0xff] }
 0xcac   :  { %5802 = vmatpush.bf16.msrb.mxu2 %v12853_v31 }
 0xcad   :  { %6136 = vmatpush.bf16.msra.mxu0 %v15403_v15  ;;  %5842 = vmatpush.bf16.msra.mxu3 %v12849_v28 }
 0xcb0   :  { %5803 = vmatpush.bf16.msrb.mxu2 %v12852_v4 }
 0xcb1   :  { %6137 = vmatpush.bf16.msra.mxu0 %v15408_v29  ;;  %5843 = vmatpush.bf16.msra.mxu3 %v12848_v19 }
 0xcb4   :  { %5929 = vmatpush.bf16.msra.mxu2 %v15403_v15  ;;  %10967 = vmatmul.msk.bf16.vlgmr.msrb.gmra.mxu0 %vm5049_vm3, %v5988_v18  ;;  %v12877_v18 = vld [vmem:[#allocation14 + $0xe8] sm:$0xff] }
 0xcb5   :  { %6274 = vmatpush.bf16.msrb.mxu0 %v15403_v15  ;;  %5977 = vmatpush.bf16.msrb.mxu3 %v12863_v8  ;;  %v12909_v8 = vld [vmem:[#allocation19 + $0xc4] sm:$0xf0] }
 0xcb8   :  { %5930 = vmatpush.bf16.msra.mxu2 %v15408_v29 }
 0xcb9   :  { %6275 = vmatpush.bf16.msrb.mxu0 %v15408_v29  ;;  %5978 = vmatpush.bf16.msrb.mxu3 %v12862_v24  ;;  %v11085_v24 = vld [vmem:[#allocation19 + $0xb0] sm:$0xf] }
 0xcba   :  { %v11086_v27 = vor.u32 %v12907_v45, %v11085_v24  ;;  %v12904_v45 = vld [vmem:[#allocation19 + $0xa4] sm:$0xf] }
 0xcbd   :  { %5979 = vmatpush.bf16.msrb.mxu3 %v12861_v20 }
 0xcc1   :  { %5980 = vmatpush.bf16.msrb.mxu3 %v12860_v42 }
 0xcc4   :  { %11003 = vmatmul.msk.bf16.vlgmr.msra.gmra.mxu0 %vm5049_vm3, %v6126_v50  ;;  %v11109_v50 = vld [vmem:[#allocation19 + $0xe0] sm:$0xf] }
 0xcd4   :  { %11039 = vmatmul.msk.bf16.vlgmr.msrb.gmra.mxu0 %vm5049_vm3, %v6264_v1 }
 0xd21   :  { %v5863_v38 = vpop.f32.mrf.mxu0 }
 0xd22   :  { %v5867_v61 = vpack.c.bf16 %v5863_v38, %v5863_v38 }
 0xd24   :  { %10948 = vmatmul.msk.bf16.vlgmr.msrb.gmra.mxu1 %vm5792_vm4, %v5867_v61 }
 0xd25   :  { %6184 = vmatpush.bf16.msrb.mxu1 %v12875_v49  ;;  %v11069_v49 = vld [vmem:[#allocation19 + $0x90] sm:$0xf] }
 0xd26   :  { %v5754_v30 = vpop.f32.mrf.mxu3  ;;  %v5727_v33 = vpop.f32.mrf.mxu2 }
 0xd27   :  { %v5758_v17 = vpack.c.bf16 %v5754_v30, %v5754_v30  ;;  %v5731_v52 = vpack.c.bf16 %v5727_v33, %v5727_v33  ;;  %v11117_v30 = vld [vmem:[#allocation19 + $0xf0] sm:$0xf]  ;;  %v12915_v33 = vld [vmem:[#allocation19 + $0xf4] sm:$0xf0] }
 0xd29   :  { %10913 = vmatmul.msk.bf16.vlgmr.msrb.gmra.mxu2 %vm5792_vm4, %v5758_v17  ;;  %10930 = vmatmul.msk.bf16.vlgmr.msra.gmra.mxu3 %vm5792_vm4, %v5731_v52  ;;  %v5865_v37 = vpop.f32.mrf.mxu0  ;;  %v11118_v17 = vor.u32 %v12915_v33, %v11117_v30  ;;  %v12892_v30 = vld [vmem:[#allocation19 + $0x44] sm:$0xf]  ;;  %v11159_v33 = vld [vmem:[#allocation19 + $0x48] sm:$0xf0] }
 0xd2a   :  { %6067 = vmatpush.bf16.msrb.mxu2 %v15403_v15  ;;  %6115 = vmatpush.bf16.msra.mxu3 %v12871_v34  ;;  %v12913_v37 = vld [vmem:[#allocation19 + $0xe4] sm:$0xf0] }
 0xd2b   :  { %6185 = vmatpush.bf16.msrb.mxu1 %v12874_v32  ;;  %6494 = vmatpush.bf16.msra.mxu0 %v11118_v17  ;;  %v12905_v34 = vld [vmem:[#allocation19 + $0xa4] sm:$0xf0] }
 0xd2e   :  { %6068 = vmatpush.bf16.msrb.mxu2 %v15408_v29  ;;  %v5756_v11 = vpop.f32.mrf.mxu3  ;;  %v5729_v21 = vpop.f32.mrf.mxu2  ;;  %6116 = vmatpush.bf16.msra.mxu3 %v12870_v57 }
 0xd2f   :  { %6186 = vmatpush.bf16.msrb.mxu1 %v12873_v62  ;;  %v11101_v11 = vld [vmem:[#allocation19 + $0xd0] sm:$0xf]  ;;  %v11110_v21 = vor.u32 %v12913_v37, %v11109_v50  ;;  %v11095_v50 = vld [vmem:[#allocation19 + $0xc8] sm:$0xf0]  ;;  %v11162_v37 = vor.u32 %v12892_v30, %v11159_v33 }
 0xd30   :  { %v11149_v33 = vld [vmem:[#allocation19 + $0x30] sm:$0xf] }
 0xd31   :  { %v6001_v14 = vpop.f32.mrf.mxu0  ;;  %6495 = vmatpush.bf16.msra.mxu0 %v11110_v21  ;;  %v11151_v21 = vld [vmem:[#allocation19 + $0x38] sm:$0xf0] }
 0xd32   :  { %v6005_v39 = vpack.c.bf16 %v6001_v14, %v6001_v14  ;;  %6117 = vmatpush.bf16.msra.mxu3 %v12869_v12  ;;  %v11078_v14 = vor.u32 %v12905_v34, %v11077_v55  ;;  %v11061_v12 = vld [vmem:[#allocation19 + $0x80] sm:$0xf]  ;;  %v11135_v55 = vld [vmem:[#allocation19 + $0x18] sm:$0xf0] }
 0xd33   :  { %6187 = vmatpush.bf16.msrb.mxu1 %v12872_v44 }
 0xd34   :  { %10984 = vmatmul.msk.bf16.vlgmr.msra.gmra.mxu1 %vm5792_vm4, %v6005_v39 }
 0xd36   :  { %6118 = vmatpush.bf16.msra.mxu3 %v12868_v13 }
 0xd37   :  { %6322 = vmatpush.bf16.msra.mxu1 %v12883_v60  ;;  %v13207_v60 = vld [vmem:[#allocation16] ss:$0 sm:$0xff] }
 0xd39   :  { %10949 = vmatmul.msk.bf16.vlgmr.msra.gmra.mxu2 %vm5049_vm3, %v5919_v48  ;;  %v6003_v23 = vpop.f32.mrf.mxu0  ;;  %v12911_v48 = vld [vmem:[#allocation19 + $0xd4] sm:$0xf0] }
 0xd3a   :  { %6205 = vmatpush.bf16.msra.mxu2 %v15403_v15  ;;  %v12901_v23 = vld [vmem:[#allocation19 + $0x84] sm:$0xf0] }
 0xd3b   :  { %6323 = vmatpush.bf16.msra.mxu1 %v12882_v43  ;;  %v11062_v62 = vor.u32 %v12901_v23, %v11061_v12  ;;  %v12898_v43 = vld [vmem:[#allocation19 + $0x74] sm:$0xf]  ;;  %v12900_v12 = vld [vmem:[#allocation19 + $0x84] sm:$0xf]  ;;  %v11063_v23 = vld [vmem:[#allocation19 + $0x88] sm:$0xf0] }
 0xd3e   :  { %6206 = vmatpush.bf16.msra.mxu2 %v15408_v29  ;;  %v12879_v29 = vld [vmem:[#allocation14 + $0xf8] sm:$0xff] }
 0xd3f   :  { %6324 = vmatpush.bf16.msra.mxu1 %v12881_v53 }
 0xd41   :  { %v6139_v58 = vpop.f32.mrf.mxu0 }
 0xd42   :  { %v6143_v7 = vpack.c.bf16 %v6139_v58, %v6139_v58 }
 0xd43   :  { %6325 = vmatpush.bf16.msra.mxu1 %v12880_v47  ;;  %v12896_v47 = vld [vmem:[#allocation19 + $0x64] sm:$0xf] }
 0xd44   :  { %11020 = vmatmul.msk.bf16.vlgmr.msrb.gmra.mxu1 %vm5792_vm4, %v6143_v7 }
 0xd49   :  { %10985 = vmatmul.msk.bf16.vlgmr.msrb.gmra.mxu2 %vm5049_vm3, %v6057_v6  ;;  %v6141_v15 = vpop.f32.mrf.mxu0  ;;  %v11102_v6 = vor.u32 %v12911_v48, %v11101_v11  ;;  %v12890_v11 = vld [vmem:[#allocation19 + $0x34] sm:$0xf] }
 0xd4a   :  { %v11183_v15 = vld [vmem:[#allocation19 + $0x78] sm:$0xf0] }
 0xd4b   :  { %6496 = vmatpush.bf16.msra.mxu0 %v11102_v6  ;;  %v11087_v6 = vld [vmem:[#allocation19 + $0xb8] sm:$0xf0] }
 0xd51   :  { %v6277_v41 = vpop.f32.mrf.mxu0 }
 0xd52   :  { %v6281_v31 = vpack.c.bf16 %v6277_v41, %v6277_v41  ;;  %v11175_v41 = vld [vmem:[#allocation19 + $0x68] sm:$0xf0] }
 0xd54   :  { %11056 = vmatmul.msk.bf16.vlgmr.msra.gmra.mxu1 %vm5792_vm4, %v6281_v31 }
 0xd59   :  { %11021 = vmatmul.msk.bf16.vlgmr.msra.gmra.mxu2 %vm5049_vm3, %v6195_v3  ;;  %v6279_v22 = vpop.f32.mrf.mxu0  ;;  %v11093_v3 = vld [vmem:[#allocation19 + $0xc0] sm:$0xf] }
 0xd5a   :  { %v11094_v51 = vor.u32 %v12909_v8, %v11093_v3  ;;  %v11111_v22 = vld [vmem:[#allocation19 + $0xe8] sm:$0xf0]  ;;  %v11154_v3 = vor.u32 %v12890_v11, %v11151_v21  ;;  %v12888_v8 = vld [vmem:[#allocation19 + $0x24] sm:$0xf]  ;;  %v11133_v21 = vld [vmem:[#allocation19 + $0x10] sm:$0xf] }
 0xd5c   :  { %6497 = vmatpush.bf16.msra.mxu0 %v11094_v51  ;;  %v11143_v51 = vld [vmem:[#allocation19 + $0x28] sm:$0xf0] }
 0xd60   :  { %6498 = vmatpush.bf16.msra.mxu0 %v11086_v27  ;;  %v11146_v27 = vor.u32 %v12888_v8, %v11143_v51  ;;  %v11190_v8 = vld [vmem:[#allocation19 + $0x100] sm:$0xf]  ;;  %v12917_v51 = vld [vmem:[#allocation19 + $0x104] sm:$0xf0] }
 0xd64   :  { %6499 = vmatpush.bf16.msra.mxu0 %v11078_v14  ;;  %v12902_v14 = vld [vmem:[#allocation19 + $0x94] sm:$0xf] }
 0xda1   :  { %v5913_v54 = vpop.f32.mrf.mxu1 }
 0xda9   :  { %v5915_v59 = vpop.f32.mrf.mxu1 }
 0xdac   :  { %v5805_v26 = vpop.f32.mrf.mxu2  ;;  %v5845_v46 = vpop.f32.mrf.mxu3 }
 0xdad   :  { %v5846_v16 = vadd.f32 %v5845_v46, %v5805_v26 }
 0xdaf   :  { %v15438_v40 = vadd.f32 %v5913_v54, %v5846_v16  ;;  %v12903_v54 = vld [vmem:[#allocation19 + $0x94] sm:$0xf0] }
 0xdb0   :  { %v11070_v32 = vor.u32 %v12903_v54, %v11069_v49  ;;  %v12884_v54 = vld [vmem:[#allocation19 + $0x4] sm:$0xf] }
 0xdb1   :  { %v6051_v38 = vpop.f32.mrf.mxu1 }
 0xdb2   :  { %6500 = vmatpush.bf16.msra.mxu0 %v11070_v32 }
 0xdb4   :  { %v5807_v35 = vpop.f32.mrf.mxu2  ;;  %v5847_v56 = vpop.f32.mrf.mxu3 }
 0xdb6   :  { %6501 = vmatpush.bf16.msra.mxu0 %v11062_v62  ;;  %v11246_v62 = vld [vmem:[#allocation19 + $0x170] sm:$0xf] }
 0xdb9   :  { %v6053_v61 = vpop.f32.mrf.mxu1 }
 0xdbc   :  { %v5932_v10 = vpop.f32.mrf.mxu2 }
 0xdbd   :  { %v5936_v36 = vpack.c.bf16 %v5932_v10, %v5932_v10 }
 0xdbf   :  { %10966 = vmatmul.msk.bf16.vlgmr.msrb.gmra.mxu3 %vm5792_vm4, %v5936_v36  ;;  %v11186_v36 = vor.u32 %v12898_v43, %v11183_v15  ;;  %v12925_v43 = vld [vmem:[#allocation19 + $0x144] sm:$0xf0] }
 0xdc0   :  { %6253 = vmatpush.bf16.msrb.mxu3 %v12879_v29 }
 0xdc1   :  { %v6189_v52 = vpop.f32.mrf.mxu1 }
 0xdc4   :  { %v5934_v4 = vpop.f32.mrf.mxu2  ;;  %6254 = vmatpush.bf16.msrb.mxu3 %v12878_v9  ;;  %v12914_v9 = vld [vmem:[#allocation19 + $0xf4] sm:$0xf] }
 0xdc8   :  { %6255 = vmatpush.bf16.msrb.mxu3 %v12877_v18  ;;  %v12912_v18 = vld [vmem:[#allocation19 + $0xe4] sm:$0xf] }
 0xdc9   :  { %v6191_v1 = vpop.f32.mrf.mxu1 }
 0xdca   :  { %v12906_v1 = vld [vmem:[#allocation19 + $0xb4] sm:$0xf] }
 0xdcb   :  { %v11090_v24 = vor.u32 %v12906_v1, %v11087_v6  ;;  %v11125_v6 = vld [vmem:[#allocation19] sm:$0xf] }
 0xdcc   :  { %v6070_v28 = vpop.f32.mrf.mxu2  ;;  %6256 = vmatpush.bf16.msrb.mxu3 %v12876_v25  ;;  %v6339_v25 = vld [vmem:[#allocation17] sm:$0x1] }
 0xdcd   :  { %v6074_v63 = vpack.c.bf16 %v6070_v28, %v6070_v28  ;;  %v6379_v28 = vld [vmem:[#allocation17 + $0x1] sm:$0x1] }
 0xdcf   :  { %11002 = vmatmul.msk.bf16.vlgmr.msra.gmra.mxu3 %vm5792_vm4, %v6074_v63  ;;  %v11178_v63 = vor.u32 %v12896_v47, %v11175_v41  ;;  %v12921_v47 = vld [vmem:[#allocation19 + $0x124] sm:$0xf0] }
 0xdd1   :  { %v6327_v20 = vpop.f32.mrf.mxu1 }
 0xdd4   :  { %v6072_v19 = vpop.f32.mrf.mxu2 }
 0xdd5   :  { %v12894_v19 = vld [vmem:[#allocation19 + $0x54] sm:$0xf] }
 0xdd9   :  { %v6329_v39 = vpop.f32.mrf.mxu1 }
 0xdda   :  { %v11071_v39 = vld [vmem:[#allocation19 + $0x98] sm:$0xf0] }
 0xddb   :  { %v11074_v32 = vor.u32 %v12902_v14, %v11071_v39  ;;  %v12926_v39 = vld [vmem:[#allocation19 + $0x154] sm:$0xf] }
 0xddc   :  { %v6208_v5 = vpop.f32.mrf.mxu2 }
 0xddd   :  { %v6212_v2 = vpack.c.bf16 %v6208_v5, %v6208_v5  ;;  %v11167_v5 = vld [vmem:[#allocation19 + $0x58] sm:$0xf0] }
 0xdde   :  { %v11170_v61 = vor.u32 %v12894_v19, %v11167_v5  ;;  %v11165_v5 = vld [vmem:[#allocation19 + $0x50] sm:$0xf] }
 0xddf   :  { %11038 = vmatmul.msk.bf16.vlgmr.msrb.gmra.mxu3 %vm5792_vm4, %v6212_v2  ;;  %v11114_v2 = vor.u32 %v12912_v18, %v11111_v22  ;;  %v11181_v18 = vld [vmem:[#allocation19 + $0x70] sm:$0xf]  ;;  %v12899_v22 = vld [vmem:[#allocation19 + $0x74] sm:$0xf0] }
 0xde4   :  { %v6210_v0 = vpop.f32.mrf.mxu2 }
 0xde5   :  { %v12910_v0 = vld [vmem:[#allocation19 + $0xd4] sm:$0xf] }
 0xe42   :  { %v5982_v42 = vpop.f32.mrf.mxu3 }
 0xe43   :  { %v5986_v26 = vadd.f32 %v5982_v42, %v15438_v40  ;;  %v11119_v40 = vld [vmem:[#allocation19 + $0xf8] sm:$0xf0]  ;;  %v12886_v42 = vld [vmem:[#allocation19 + $0x14] sm:$0xf] }
 0xe44   :  { %v11122_v4 = vor.u32 %v12914_v9, %v11119_v40  ;;  %v11138_v49 = vor.u32 %v12886_v42, %v11135_v55  ;;  %v11198_v9 = vld [vmem:[#allocation19 + $0x110] sm:$0xf]  ;;  %v12919_v40 = vld [vmem:[#allocation19 + $0x114] sm:$0xf0]  ;;  %v12928_v42 = vld [vmem:[#allocation19 + $0x164] sm:$0xf] }
 0xe45   :  { %v6055_v13 = vadd.f32 %v6051_v38, %v5986_v26  ;;  %v11103_v38 = vld [vmem:[#allocation19 + $0xd8] sm:$0xf0] }
 0xe46   :  { %6507 = vmatpush.bf16.msrb.mxu1 %v11122_v4  ;;  %v11106_v17 = vor.u32 %v12910_v0, %v11103_v38  ;;  %v11199_v4 = vor.u32 %v12919_v40, %v11198_v9  ;;  %v11157_v38 = vld [vmem:[#allocation19 + $0x40] sm:$0xf]  ;;  %v12920_v9 = vld [vmem:[#allocation19 + $0x124] sm:$0xf]  ;;  %v11208_v40 = vld [vmem:[#allocation19 + $0x128] sm:$0xf0] }
 0xe4a   :  { %v5984_v57 = vpop.f32.mrf.mxu3  ;;  %6508 = vmatpush.bf16.msrb.mxu1 %v11114_v2  ;;  %v12895_v2 = vld [vmem:[#allocation19 + $0x54] sm:$0xf0] }
 0xe4b   :  { %v11127_v57 = vld [vmem:[#allocation19 + $0x8] sm:$0xf0]  ;;  %v11166_v0 = vor.u32 %v12895_v2, %v11165_v5  ;;  %v11200_v5 = vld [vmem:[#allocation19 + $0x118] sm:$0xf0] }
 0xe4c   :  { %v11130_v26 = vor.u32 %v12884_v54, %v11127_v57  ;;  %v12946_v57 = vld [vmem:[#allocation19 + $0x1f4] sm:$0xf] }
 0xe4e   :  { %6509 = vmatpush.bf16.msrb.mxu1 %v11106_v17  ;;  %v12891_v17 = vld [vmem:[#allocation19 + $0x34] sm:$0xf0] }
 0xe52   :  { %v6120_v59 = vpop.f32.mrf.mxu3 }
 0xe53   :  { %v6124_v44 = vadd.f32 %v6120_v59, %v6055_v13  ;;  %v12931_v59 = vld [vmem:[#allocation19 + $0x174] sm:$0xf0] }
 0xe54   :  { %v11247_v13 = vor.u32 %v12931_v59, %v11246_v62  ;;  %v11311_v62 = vld [vmem:[#allocation19 + $0x1f0] sm:$0xf]  ;;  %v12947_v59 = vld [vmem:[#allocation19 + $0x1f4] sm:$0xf0] }
 0xe55   :  { %v6193_v16 = vadd.f32 %v6189_v52, %v6124_v44  ;;  %v12908_v52 = vld [vmem:[#allocation19 + $0xc4] sm:$0xf]  ;;  %v11238_v44 = vld [vmem:[#allocation19 + $0x160] sm:$0xf] }
 0xe56   :  { %v11098_v48 = vor.u32 %v12908_v52, %v11095_v50  ;;  %v11150_v52 = vor.u32 %v12891_v17, %v11149_v33  ;;  %v11141_v50 = vld [vmem:[#allocation19 + $0x20] sm:$0xf]  ;;  %v11192_v33 = vld [vmem:[#allocation19 + $0x108] sm:$0xf0]  ;;  %v6627_v17 = vld [vmem:[#allocation17 + $0x2] sm:$0x1] }
 0xe58   :  { %6510 = vmatpush.bf16.msrb.mxu1 %v11098_v48  ;;  %v12887_v48 = vld [vmem:[#allocation19 + $0x14] sm:$0xf0] }
 0xe59   :  { %v11134_v1 = vor.u32 %v12887_v48, %v11133_v21  ;;  %v12936_v21 = vld [vmem:[#allocation19 + $0x1a4] sm:$0xf]  ;;  %v11273_v48 = vld [vmem:[#allocation19 + $0x1a8] sm:$0xf0] }
 0xe5a   :  { %v6122_v46 = vpop.f32.mrf.mxu3 }
 0xe5b   :  { %v11066_v46 = vor.u32 %v12900_v12, %v11063_v23  ;;  %v12924_v12 = vld [vmem:[#allocation19 + $0x144] sm:$0xf]  ;;  %v11224_v23 = vld [vmem:[#allocation19 + $0x148] sm:$0xf0] }
 0xe5c   :  { %6511 = vmatpush.bf16.msrb.mxu1 %v11090_v24 }
 0xe62   :  { %v6258_v58 = vpop.f32.mrf.mxu3 }
 0xe63   :  { %v6262_v7 = vadd.f32 %v6258_v58, %v6193_v16  ;;  %v12929_v16 = vld [vmem:[#allocation19 + $0x164] sm:$0xf0] }
 0xe64   :  { %v11239_v58 = vor.u32 %v12929_v16, %v11238_v44 }
 0xe65   :  { %v6331_v35 = vadd.f32 %v6327_v20, %v6262_v7  ;;  %v11079_v20 = vld [vmem:[#allocation19 + $0xa8] sm:$0xf0]  ;;  %v11230_v7 = vld [vmem:[#allocation19 + $0x150] sm:$0xf] }
 0xe66   :  { %v11082_v34 = vor.u32 %v12904_v45, %v11079_v20  ;;  %v11191_v45 = vor.u32 %v12917_v51, %v11190_v8  ;;  %v12930_v20 = vld [vmem:[#allocation19 + $0x174] sm:$0xf]  ;;  %v12961_v8 = vld [vmem:[#allocation19 + $0x264] sm:$0xf0]  ;;  %v11276_v51 = vor.u32 %v12936_v21, %v11273_v48 }
 0xe67   :  { %v6336_v56 = vadd.f32 %v13207_v60, %v6331_v35  ;;  %v12927_v60 = vld [vmem:[#allocation19 + $0x154] sm:$0xf0]  ;;  %v12949_v21 = vld [vmem:[#allocation19 + $0x204] sm:$0xf0] }
 0xe68   :  { %6512 = vmatpush.bf16.msrb.mxu1 %v11082_v34  ;;  %v11231_v35 = vor.u32 %v12927_v60, %v11230_v7  ;;  %v11240_v34 = vld [vmem:[#allocation19 + $0x168] sm:$0xf0]  ;;  %v11227_v60 = vor.u32 %v12924_v12, %v11224_v23  ;;  %v11433_v12 = vld [vmem:[#allocation19 + $0x2e0] sm:$0xf]  ;;  %v12977_v23 = vld [vmem:[#allocation19 + $0x2e4] sm:$0xf0] }
 0xe69   :  { %v6337_v53 = vmax.f32 %v6336_v56, 0.0  ;;  %v11222_v56 = vld [vmem:[#allocation19 + $0x140] sm:$0xf]  ;;  %v11243_v14 = vor.u32 %v12928_v42, %v11240_v34  ;;  %v11305_v7 = vld [vmem:[#allocation19 + $0x1e8] sm:$0xf0] }
 0xe6a   :  { %v6260_v10 = vpop.f32.mrf.mxu3  ;;  %v11223_v15 = vor.u32 %v12925_v43, %v11222_v56  ;;  %v11312_v56 = vor.u32 %v12947_v59, %v11311_v62  ;;  %v11216_v43 = vld [vmem:[#allocation19 + $0x138] sm:$0xf0]  ;;  %v12959_v42 = vld [vmem:[#allocation19 + $0x254] sm:$0xf0]  ;;  %v12932_v34 = vld [vmem:[#allocation19 + $0x184] sm:$0xf]  ;;  %v11434_v59 = vor.u32 %v12977_v23, %v11433_v12 }
 0xe6b   :  { %v6338_v29 = vpack.c.bf16 %v6337_v53, %v6337_v53  ;;  %v11214_v53 = vld [vmem:[#allocation19 + $0x130] sm:$0xf]  ;;  %v12923_v10 = vld [vmem:[#allocation19 + $0x134] sm:$0xf0] }
 0xe6c   :  { %6513 = vmatpush.bf16.msrb.mxu1 %v11074_v32  ;;  %v11313_v32 = vld [vmem:[#allocation19 + $0x1f8] sm:$0xf0]  ;;  %v11295_v62 = vld [vmem:[#allocation19 + $0x1d0] sm:$0xf] }
 0xe6d   :  { %v15446_v31 = vsel %vm6344_vm5, %v6338_v29, 0  ;;  %v11215_v29 = vor.u32 %v12923_v10, %v11214_v53  ;;  %v11316_v16 = vor.u32 %v12946_v57, %v11313_v32  ;;  %v12945_v53 = vld [vmem:[#allocation19 + $0x1e4] sm:$0xf0] }
 0xe6e   :  { %6355 = vmatpush.bf16.msrb.mxu2 %v15446_v31  ;;  %6390 = vmatpush.bf16.msra.mxu3 %v15446_v31 }
 0xe6f   :  { %6638 = vmatpush.bf16.msrb.mxu0 %v15446_v31 }
 0xe70   :  { %6514 = vmatpush.bf16.msrb.mxu1 %v11066_v46 }
 0xe71   :  { %11057 = vmatmul.msk.bf16.vlgmr.msrb.gmra.mxu2 %vm6340_vm6, %v6339_v25  ;;  %11058 = vmatmul.msk.bf16.vlgmr.msra.gmra.mxu3 %vm6340_vm6, %v6379_v28  ;;  %v11182_v25 = vor.u32 %v12899_v22, %v11181_v18  ;;  %v11173_v28 = vld [vmem:[#allocation19 + $0x60] sm:$0xf] }
 0xe72   :  { %6613 = vmatpush.bf16.msrb.mxu3 %v11186_v36  ;;  %v11206_v36 = vld [vmem:[#allocation19 + $0x120] sm:$0xf] }
 0xe73   :  { %v11207_v41 = vor.u32 %v12921_v47, %v11206_v36  ;;  %6600 = vmatpush.bf16.msra.mxu2 %v11182_v25  ;;  %v11297_v36 = vld [vmem:[#allocation19 + $0x1d8] sm:$0xf0]  ;;  %v12940_v25 = vld [vmem:[#allocation19 + $0x1c4] sm:$0xf] }
 0xe74   :  { %6742 = vmatpush.bf16.msra.mxu1 %v11247_v13 }
 0xe76   :  { %6614 = vmatpush.bf16.msrb.mxu3 %v11178_v63  ;;  %v12897_v63 = vld [vmem:[#allocation19 + $0x64] sm:$0xf0] }
 0xe77   :  { %v11174_v19 = vor.u32 %v12897_v63, %v11173_v28  ;;  %v11289_v28 = vld [vmem:[#allocation19 + $0x1c8] sm:$0xf0]  ;;  %v11211_v63 = vor.u32 %v12920_v9, %v11208_v40  ;;  %v12939_v9 = vld [vmem:[#allocation19 + $0x1b4] sm:$0xf0]  ;;  %v11336_v40 = vld [vmem:[#allocation19 + $0x220] sm:$0xf] }
 0xe78   :  { %6743 = vmatpush.bf16.msra.mxu1 %v11239_v58  ;;  %v12944_v58 = vld [vmem:[#allocation19 + $0x1e4] sm:$0xf]  ;;  %v11292_v2 = vor.u32 %v12940_v25, %v11289_v28  ;;  %v11409_v25 = vld [vmem:[#allocation19 + $0x2b0] sm:$0xf]  ;;  %v12971_v28 = vld [vmem:[#allocation19 + $0x2b4] sm:$0xf0] }
 0xe79   :  { %6601 = vmatpush.bf16.msra.mxu2 %v11174_v19  ;;  %v11308_v10 = vor.u32 %v12944_v58, %v11305_v7  ;;  %v12918_v19 = vld [vmem:[#allocation19 + $0x114] sm:$0xf]  ;;  %v11425_v58 = vld [vmem:[#allocation19 + $0x2d0] sm:$0xf]  ;;  %v12975_v7 = vld [vmem:[#allocation19 + $0x2d4] sm:$0xf0] }
 0xe7a   :  { %6615 = vmatpush.bf16.msrb.mxu3 %v11170_v61  ;;  %v12893_v61 = vld [vmem:[#allocation19 + $0x44] sm:$0xf0] }
 0xe7b   :  { %v11158_v30 = vor.u32 %v12893_v61, %v11157_v38  ;;  %v11281_v38 = vld [vmem:[#allocation19 + $0x1b8] sm:$0xf0]  ;;  %v11203_v61 = vor.u32 %v12918_v19, %v11200_v5  ;;  %v11271_v19 = vld [vmem:[#allocation19 + $0x1a0] sm:$0xf]  ;;  %v12937_v5 = vld [vmem:[#allocation19 + $0x1a4] sm:$0xf0] }
 0xe7c   :  { %6744 = vmatpush.bf16.msra.mxu1 %v11231_v35  ;;  %v12922_v35 = vld [vmem:[#allocation19 + $0x134] sm:$0xf] }
 0xe7d   :  { %6602 = vmatpush.bf16.msra.mxu2 %v11166_v0  ;;  %v11219_v47 = vor.u32 %v12922_v35, %v11216_v43  ;;  %v12938_v0 = vld [vmem:[#allocation19 + $0x1b4] sm:$0xf]  ;;  %v11287_v35 = vld [vmem:[#allocation19 + $0x1c0] sm:$0xf]  ;;  %v11344_v43 = vld [vmem:[#allocation19 + $0x230] sm:$0xf] }
 0xe7e   :  { %6616 = vmatpush.bf16.msrb.mxu3 %v11162_v37  ;;  %v12889_v37 = vld [vmem:[#allocation19 + $0x24] sm:$0xf0] }
 0xe7f   :  { %v11142_v11 = vor.u32 %v12889_v37, %v11141_v50  ;;  %v12963_v50 = vld [vmem:[#allocation19 + $0x274] sm:$0xf0] }
 0xe80   :  { %6745 = vmatpush.bf16.msra.mxu1 %v11223_v15  ;;  %v11303_v15 = vld [vmem:[#allocation19 + $0x1e0] sm:$0xf]  ;;  %v6771_v37 = vld [vmem:[#allocation17 + $0x3] sm:$0x1] }
 0xe81   :  { %6603 = vmatpush.bf16.msra.mxu2 %v11158_v30  ;;  %v12916_v30 = vld [vmem:[#allocation19 + $0x104] sm:$0xf] }
 0xe82   :  { %6617 = vmatpush.bf16.msrb.mxu3 %v11154_v3  ;;  %v12885_v3 = vld [vmem:[#allocation19 + $0x4] sm:$0xf0] }
 0xe83   :  { %v11126_v24 = vor.u32 %v12885_v3, %v11125_v6  ;;  %v11368_v3 = vld [vmem:[#allocation19 + $0x260] sm:$0xf] }
 0xe84   :  { %6746 = vmatpush.bf16.msra.mxu1 %v11215_v29  ;;  %v12942_v29 = vld [vmem:[#allocation19 + $0x1d4] sm:$0xf] }
 0xe85   :  { %6604 = vmatpush.bf16.msra.mxu2 %v11150_v52  ;;  %v11300_v22 = vor.u32 %v12942_v29, %v11297_v36  ;;  %v11376_v52 = vld [vmem:[#allocation19 + $0x270] sm:$0xf]  ;;  %v11417_v29 = vld [vmem:[#allocation19 + $0x2c0] sm:$0xf]  ;;  %v12973_v36 = vld [vmem:[#allocation19 + $0x2c4] sm:$0xf0] }
 0xe86   :  { %6618 = vmatpush.bf16.msrb.mxu3 %v11146_v27  ;;  %v11248_v27 = vld [vmem:[#allocation19 + $0x178] sm:$0xf0]  ;;  %v11377_v6 = vor.u32 %v12963_v50, %v11376_v52  ;;  %v11263_v52 = vld [vmem:[#allocation19 + $0x190] sm:$0xf]  ;;  %v12935_v50 = vld [vmem:[#allocation19 + $0x194] sm:$0xf0] }
 0xe87   :  { %v11251_v55 = vor.u32 %v12930_v20, %v11248_v27  ;;  %v11369_v20 = vor.u32 %v12961_v8, %v11368_v3  ;;  %v11360_v27 = vld [vmem:[#allocation19 + $0x250] sm:$0xf]  ;;  %v11255_v8 = vld [vmem:[#allocation19 + $0x180] sm:$0xf] }
 0xe88   :  { %6747 = vmatpush.bf16.msra.mxu1 %v11207_v41  ;;  %v11304_v41 = vor.u32 %v12945_v53, %v11303_v15  ;;  %v12955_v53 = vld [vmem:[#allocation19 + $0x234] sm:$0xf0] }
 0xe89   :  { %6605 = vmatpush.bf16.msra.mxu2 %v11142_v11  ;;  %v11284_v11 = vor.u32 %v12938_v0, %v11281_v38  ;;  %v11272_v0 = vor.u32 %v12937_v5, %v11271_v19  ;;  %v12951_v38 = vld [vmem:[#allocation19 + $0x214] sm:$0xf0]  ;;  %v11322_v19 = vld [vmem:[#allocation19 + $0x208] sm:$0xf0]  ;;  %v11506_v5 = vld [vmem:[#allocation19 + $0x370] sm:$0xf] }
 0xe8a   :  { %6619 = vmatpush.bf16.msrb.mxu3 %v11138_v49  ;;  %v11232_v49 = vld [vmem:[#allocation19 + $0x158] sm:$0xf0] }
 0xe8b   :  { %v11235_v54 = vor.u32 %v12926_v39, %v11232_v49  ;;  %v11441_v39 = vld [vmem:[#allocation19 + $0x2f0] sm:$0xf]  ;;  %v12979_v49 = vld [vmem:[#allocation19 + $0x2f4] sm:$0xf0] }
 0xe8c   :  { %6748 = vmatpush.bf16.msra.mxu1 %v11199_v4  ;;  %v11442_v32 = vor.u32 %v12979_v49, %v11441_v39 }
 0xe8d   :  { %6606 = vmatpush.bf16.msra.mxu2 %v11134_v1  ;;  %v11195_v1 = vor.u32 %v12916_v30, %v11192_v33  ;;  %v11401_v30 = vld [vmem:[#allocation19 + $0x2a0] sm:$0xf]  ;;  %v12969_v33 = vld [vmem:[#allocation19 + $0x2a4] sm:$0xf0] }
 0xe8e   :  { %6620 = vmatpush.bf16.msrb.mxu3 %v11130_v26 }
 0xe90   :  { %6749 = vmatpush.bf16.msra.mxu1 %v11191_v45  ;;  %v11265_v45 = vld [vmem:[#allocation19 + $0x198] sm:$0xf0] }
 0xe91   :  { %6607 = vmatpush.bf16.msra.mxu2 %v11126_v24  ;;  %v12934_v24 = vld [vmem:[#allocation19 + $0x194] sm:$0xf] }
 0xe92   :  { %6782 = vmatpush.bf16.msra.mxu3 %v15446_v31 }
 0xe95   :  { %6755 = vmatpush.bf16.msrb.mxu2 %v11251_v55  ;;  %v11268_v55 = vor.u32 %v12934_v24, %v11265_v45  ;;  %v11385_v45 = vld [vmem:[#allocation19 + $0x280] sm:$0xf] }
 0xe99   :  { %6756 = vmatpush.bf16.msrb.mxu2 %v11243_v14  ;;  %v11257_v14 = vld [vmem:[#allocation19 + $0x188] sm:$0xf0] }
 0xe9a   :  { %v11260_v57 = vor.u32 %v12932_v34, %v11257_v14 }
 0xe9d   :  { %6757 = vmatpush.bf16.msrb.mxu2 %v11235_v54  ;;  %v11361_v54 = vor.u32 %v12959_v42, %v11360_v27 }
 0xea1   :  { %6758 = vmatpush.bf16.msrb.mxu2 %v11227_v60  ;;  %v11426_v60 = vor.u32 %v12975_v7, %v11425_v58 }
 0xea5   :  { %6759 = vmatpush.bf16.msrb.mxu2 %v11219_v47  ;;  %v11279_v47 = vld [vmem:[#allocation19 + $0x1b0] sm:$0xf] }
 0xea9   :  { %6760 = vmatpush.bf16.msrb.mxu2 %v11211_v63  ;;  %v11410_v63 = vor.u32 %v12971_v28, %v11409_v25  ;;  %v11330_v25 = vld [vmem:[#allocation19 + $0x218] sm:$0xf0] }
 0xead   :  { %6761 = vmatpush.bf16.msrb.mxu2 %v11203_v61 }
 0xeb1   :  { %6762 = vmatpush.bf16.msrb.mxu2 %v11195_v1  ;;  %v11393_v1 = vld [vmem:[#allocation19 + $0x290] sm:$0xf] }
 0xef4   :  { %v6357_v26 = vpop.f32.mrf.mxu2  ;;  %v6392_v46 = vpop.f32.mrf.mxu3 }
 0xef5   :  { %v6361_v13 = vpack.c.bf16 %v6357_v26, %v6357_v26  ;;  %v6396_v44 = vpack.c.bf16 %v6392_v46, %v6392_v46  ;;  %v12943_v26 = vld [vmem:[#allocation19 + $0x1d4] sm:$0xf0]  ;;  %v11352_v46 = vld [vmem:[#allocation19 + $0x240] sm:$0xf] }
 0xef7   :  { %6502 = vmatmul.bf16.vlgmr.msra.gmra.mxu0 %v6396_v44  ;;  %6515 = vmatmul.bf16.vlgmr.msrb.gmra.mxu1 %v6396_v44  ;;  %v11296_v44 = vor.u32 %v12943_v26, %v11295_v62  ;;  %v11378_v26 = vld [vmem:[#allocation19 + $0x278] sm:$0xf0] }
 0xef8   :  { %6621 = vmatmul.bf16.vlgmr.msrb.gmra.mxu3 %v6361_v13  ;;  %6926 = vmatpush.bf16.msrb.mxu1 %v15446_v31 }
 0xef9   :  { %6608 = vmatmul.bf16.vlgmr.msra.gmra.mxu2 %v6361_v13  ;;  %6899 = vmatpush.bf16.msrb.mxu3 %v11316_v16  ;;  %v12957_v13 = vld [vmem:[#allocation19 + $0x244] sm:$0xf0] }
 0xefa   :  { %6886 = vmatpush.bf16.msra.mxu0 %v11312_v56  ;;  %7030 = vmatpush.bf16.msra.mxu2 %v11377_v6  ;;  %v11353_v16 = vor.u32 %v12957_v13, %v11352_v46  ;;  %v12941_v56 = vld [vmem:[#allocation19 + $0x1c4] sm:$0xf0]  ;;  %v12967_v6 = vld [vmem:[#allocation19 + $0x294] sm:$0xf0]  ;;  %v12960_v13 = vld [vmem:[#allocation19 + $0x264] sm:$0xf] }
 0xefb   :  { %v11288_v15 = vor.u32 %v12941_v56, %v11287_v35  ;;  %v11394_v3 = vor.u32 %v12967_v6, %v11393_v1  ;;  %v12958_v35 = vld [vmem:[#allocation19 + $0x254] sm:$0xf]  ;;  %v11362_v56 = vld [vmem:[#allocation19 + $0x258] sm:$0xf0] }
 0xefc   :  { %v6394_v4 = vpop.f32.mrf.mxu3  ;;  %v6359_v18 = vpop.f32.mrf.mxu2  ;;  %v11443_v6 = vld [vmem:[#allocation19 + $0x2f8] sm:$0xf0] }
 0xefd   :  { %6900 = vmatpush.bf16.msrb.mxu3 %v11308_v10  ;;  %v11345_v10 = vor.u32 %v12955_v53, %v11344_v43  ;;  %v12953_v4 = vld [vmem:[#allocation19 + $0x224] sm:$0xf0]  ;;  %v11280_v18 = vor.u32 %v12939_v9, %v11279_v47  ;;  %v11365_v43 = vor.u32 %v12958_v35, %v11362_v56  ;;  %v11354_v53 = vld [vmem:[#allocation19 + $0x248] sm:$0xf0]  ;;  %v12954_v47 = vld [vmem:[#allocation19 + $0x234] sm:$0xf] }
 0xefe   :  { %6887 = vmatpush.bf16.msra.mxu0 %v11304_v41  ;;  %7031 = vmatpush.bf16.msra.mxu2 %v11369_v20  ;;  %v11418_v41 = vor.u32 %v12973_v36, %v11417_v29  ;;  %v12965_v20 = vld [vmem:[#allocation19 + $0x284] sm:$0xf0]  ;;  %v6915_v36 = vld [vmem:[#allocation17 + $0x4] sm:$0x1]  ;;  %v11403_v35 = vld [vmem:[#allocation19 + $0x2a8] sm:$0xf0] }
 0xeff   :  { %v11386_v27 = vor.u32 %v12965_v20, %v11385_v45  ;;  %v12976_v45 = vld [vmem:[#allocation19 + $0x2e4] sm:$0xf]  ;;  %v11435_v20 = vld [vmem:[#allocation19 + $0x2e8] sm:$0xf0]  ;;  %v12966_v56 = vld [vmem:[#allocation19 + $0x294] sm:$0xf] }
 0xf01   :  { %6901 = vmatpush.bf16.msrb.mxu3 %v11300_v22  ;;  %v11337_v22 = vor.u32 %v12953_v4, %v11336_v40  ;;  %v12952_v40 = vld [vmem:[#allocation19 + $0x224] sm:$0xf]  ;;  %v11338_v4 = vld [vmem:[#allocation19 + $0x228] sm:$0xf0] }
 0xf02   :  { %7032 = vmatpush.bf16.msra.mxu2 %v11361_v54  ;;  %6888 = vmatpush.bf16.msra.mxu0 %v11296_v44  ;;  %v11370_v44 = vld [vmem:[#allocation19 + $0x268] sm:$0xf0] }
 0xf03   :  { %v11373_v58 = vor.u32 %v12960_v13, %v11370_v44  ;;  %v12981_v13 = vld [vmem:[#allocation19 + $0x304] sm:$0xf0] }
 0xf05   :  { %6902 = vmatpush.bf16.msrb.mxu3 %v11292_v2  ;;  %v11328_v2 = vld [vmem:[#allocation19 + $0x210] sm:$0xf] }
 0xf06   :  { %7033 = vmatpush.bf16.msra.mxu2 %v11353_v16  ;;  %6889 = vmatpush.bf16.msra.mxu0 %v11288_v15  ;;  %v11329_v61 = vor.u32 %v12951_v38, %v11328_v2  ;;  %v12956_v15 = vld [vmem:[#allocation19 + $0x244] sm:$0xf]  ;;  %v12995_v2 = vld [vmem:[#allocation19 + $0x374] sm:$0xf0] }
 0xf07   :  { %11187 = vmatmul.msk.bf16.vlgmr.msrb.gmra.mxu0 %vm6340_vm6, %v6627_v17  ;;  %v11402_v17 = vor.u32 %v12969_v33, %v11401_v30  ;;  %v7059_v38 = vld [vmem:[#allocation17 + $0x5] sm:$0x1]  ;;  %v11498_v30 = vld [vmem:[#allocation19 + $0x360] sm:$0xf]  ;;  %v12993_v33 = vld [vmem:[#allocation19 + $0x364] sm:$0xf0] }
 0xf08   :  { %11252 = vmatmul.msk.bf16.vlgmr.msra.gmra.mxu3 %vm6340_vm6, %v6771_v37  ;;  %v11320_v37 = vld [vmem:[#allocation19 + $0x200] sm:$0xf] }
 0xf09   :  { %6903 = vmatpush.bf16.msrb.mxu3 %v11284_v11  ;;  %v11264_v11 = vor.u32 %v12935_v50, %v11263_v52  ;;  %v11321_v48 = vor.u32 %v12949_v21, %v11320_v37  ;;  %v11490_v52 = vld [vmem:[#allocation19 + $0x350] sm:$0xf]  ;;  %v12991_v50 = vld [vmem:[#allocation19 + $0x354] sm:$0xf0]  ;;  %v12989_v21 = vld [vmem:[#allocation19 + $0x344] sm:$0xf0] }
 0xf0a   :  { %7034 = vmatpush.bf16.msra.mxu2 %v11345_v10  ;;  %6890 = vmatpush.bf16.msra.mxu0 %v11280_v18  ;;  %v11357_v10 = vor.u32 %v12956_v15, %v11354_v53  ;;  %v11341_v18 = vor.u32 %v12952_v40, %v11338_v4  ;;  %v11491_v37 = vor.u32 %v12991_v50, %v11490_v52  ;;  %v11395_v15 = vld [vmem:[#allocation19 + $0x298] sm:$0xf0] }
 0xf0b   :  { %v11398_v53 = vor.u32 %v12966_v56, %v11395_v15  ;;  %v12980_v15 = vld [vmem:[#allocation19 + $0x304] sm:$0xf] }
 0xf0d   :  { %6904 = vmatpush.bf16.msrb.mxu3 %v11276_v51  ;;  %v12933_v51 = vld [vmem:[#allocation19 + $0x184] sm:$0xf0] }
 0xf0e   :  { %7035 = vmatpush.bf16.msra.mxu2 %v11337_v22  ;;  %6891 = vmatpush.bf16.msra.mxu0 %v11272_v0  ;;  %v11256_v24 = vor.u32 %v12933_v51, %v11255_v8  ;;  %v12950_v22 = vld [vmem:[#allocation19 + $0x214] sm:$0xf]  ;;  %v11474_v8 = vld [vmem:[#allocation19 + $0x330] sm:$0xf]  ;;  %v12987_v51 = vld [vmem:[#allocation19 + $0x334] sm:$0xf0] }
 0xf0f   :  { %v11333_v28 = vor.u32 %v12950_v22, %v11330_v25 }
 0xf11   :  { %6905 = vmatpush.bf16.msrb.mxu3 %v11268_v55 }
 0xf12   :  { %7036 = vmatpush.bf16.msra.mxu2 %v11329_v61  ;;  %6892 = vmatpush.bf16.msra.mxu0 %v11264_v11  ;;  %v11507_v61 = vor.u32 %v12995_v2, %v11506_v5  ;;  %v11482_v11 = vld [vmem:[#allocation19 + $0x340] sm:$0xf] }
 0xf13   :  { %v11483_v1 = vor.u32 %v12989_v21, %v11482_v11  ;;  %v7347_v21 = vld [vmem:[#allocation17 + $0x7] sm:$0x1] }
 0xf15   :  { %6906 = vmatpush.bf16.msrb.mxu3 %v11260_v57 }
 0xf16   :  { %7037 = vmatpush.bf16.msra.mxu2 %v11321_v48  ;;  %6893 = vmatpush.bf16.msra.mxu0 %v11256_v24  ;;  %v12978_v48 = vld [vmem:[#allocation19 + $0x2f4] sm:$0xf]  ;;  %v11475_v24 = vor.u32 %v12987_v51, %v11474_v8 }
 0xf17   :  { %v12986_v51 = vld [vmem:[#allocation19 + $0x334] sm:$0xf] }
 0xf19   :  { %7174 = vmatpush.bf16.msra.mxu3 %v11442_v32 }
 0xf1d   :  { %7175 = vmatpush.bf16.msra.mxu3 %v11434_v59  ;;  %v12962_v59 = vld [vmem:[#allocation19 + $0x274] sm:$0xf] }
 0xf1e   :  { %v11381_v46 = vor.u32 %v12962_v59, %v11378_v26  ;;  %v11419_v59 = vld [vmem:[#allocation19 + $0x2c8] sm:$0xf0] }
 0xf20   :  { %7043 = vmatpush.bf16.msrb.mxu0 %v11381_v46  ;;  %v11450_v46 = vld [vmem:[#allocation19 + $0x300] sm:$0xf] }
 0xf21   :  { %7176 = vmatpush.bf16.msra.mxu3 %v11426_v60  ;;  %v11451_v44 = vor.u32 %v12981_v13, %v11450_v46  ;;  %v12982_v13 = vld [vmem:[#allocation19 + $0x314] sm:$0xf] }
 0xf24   :  { %7044 = vmatpush.bf16.msrb.mxu0 %v11373_v58  ;;  %v11411_v58 = vld [vmem:[#allocation19 + $0x2b8] sm:$0xf0] }
 0xf25   :  { %7177 = vmatpush.bf16.msra.mxu3 %v11418_v41  ;;  %v11346_v41 = vld [vmem:[#allocation19 + $0x238] sm:$0xf0] }
 0xf26   :  { %v11349_v9 = vor.u32 %v12954_v47, %v11346_v41 }
 0xf28   :  { %7045 = vmatpush.bf16.msrb.mxu0 %v11365_v43 }
 0xf29   :  { %7178 = vmatpush.bf16.msra.mxu3 %v11410_v63  ;;  %v12948_v63 = vld [vmem:[#allocation19 + $0x204] sm:$0xf] }
 0xf2a   :  { %v11325_v0 = vor.u32 %v12948_v63, %v11322_v19 }
 0xf2c   :  { %7046 = vmatpush.bf16.msrb.mxu0 %v11357_v10 }
 0xf2d   :  { %7179 = vmatpush.bf16.msra.mxu3 %v11402_v17  ;;  %v11499_v17 = vor.u32 %v12993_v33, %v11498_v30 }
 0xf30   :  { %7047 = vmatpush.bf16.msrb.mxu0 %v11349_v9 }
 0xf31   :  { %7180 = vmatpush.bf16.msra.mxu3 %v11394_v3  ;;  %v11446_v3 = vor.u32 %v12978_v48, %v11443_v6  ;;  %v12990_v48 = vld [vmem:[#allocation19 + $0x354] sm:$0xf]  ;;  %v12988_v6 = vld [vmem:[#allocation19 + $0x344] sm:$0xf] }
 0xf34   :  { %7048 = vmatpush.bf16.msrb.mxu0 %v11341_v18 }
 0xf35   :  { %7181 = vmatpush.bf16.msra.mxu3 %v11386_v27  ;;  %v11466_v27 = vld [vmem:[#allocation19 + $0x320] sm:$0xf] }
 0xf38   :  { %7049 = vmatpush.bf16.msrb.mxu0 %v11333_v28 }
 0xf3c   :  { %7050 = vmatpush.bf16.msrb.mxu0 %v11325_v0  ;;  %v12994_v0 = vld [vmem:[#allocation19 + $0x374] sm:$0xf] }
 0xf74   :  { %v6503_v42 = vpop.f32.mrf.mxu0  ;;  %v6516_v55 = vpop.f32.mrf.mxu1 }
 0xf7b   :  { %v6622_v34 = vpop.f32.mrf.mxu3 }
 0xf7c   :  { %v6505_v14 = vpop.f32.mrf.mxu0  ;;  %v15457_v39 = vadd.f32 %v6622_v34, %v6516_v55  ;;  %v6518_v49 = vpop.f32.mrf.mxu1  ;;  %v12985_v55 = vld [vmem:[#allocation19 + $0x324] sm:$0xf0] }
 0xf7d   :  { %v6609_v54 = vpop.f32.mrf.mxu2  ;;  %v11467_v34 = vor.u32 %v12985_v55, %v11466_v27  ;;  %v12974_v14 = vld [vmem:[#allocation19 + $0x2d4] sm:$0xf]  ;;  %v11427_v49 = vld [vmem:[#allocation19 + $0x2d8] sm:$0xf0] }
 0xf7e   :  { %v15459_v57 = vadd.f32 %v6609_v54, %v6503_v42  ;;  %v11438_v42 = vor.u32 %v12976_v45, %v11435_v20  ;;  %v11430_v54 = vor.u32 %v12974_v14, %v11427_v49  ;;  %v11571_v45 = vld [vmem:[#allocation19 + $0x3f0] sm:$0xf]  ;;  %v13011_v20 = vld [vmem:[#allocation19 + $0x3f4] sm:$0xf0]  ;;  %v13010_v27 = vld [vmem:[#allocation19 + $0x3f4] sm:$0xf] }
 0xf7f   :  { %v12984_v49 = vld [vmem:[#allocation19 + $0x324] sm:$0xf] }
 0xf83   :  { %v6624_v32 = vpop.f32.mrf.mxu3 }
 0xf84   :  { %v6640_v12 = vpop.f32.mrf.mxu0  ;;  %v11458_v32 = vld [vmem:[#allocation19 + $0x310] sm:$0xf] }
 0xf85   :  { %v6644_v23 = vpack.c.bf16 %v6640_v12, %v6640_v12  ;;  %v6611_v62 = vpop.f32.mrf.mxu2  ;;  %v12983_v12 = vld [vmem:[#allocation19 + $0x314] sm:$0xf0] }
 0xf86   :  { %v12972_v62 = vld [vmem:[#allocation19 + $0x2c4] sm:$0xf] }
 0xf87   :  { %6750 = vmatmul.bf16.vlgmr.msra.gmra.mxu1 %v6644_v23  ;;  %6763 = vmatmul.bf16.vlgmr.msrb.gmra.mxu2 %v6644_v23  ;;  %v11459_v23 = vor.u32 %v12983_v12, %v11458_v32  ;;  %v11422_v26 = vor.u32 %v12972_v62, %v11419_v59  ;;  %v11563_v32 = vld [vmem:[#allocation19 + $0x3e0] sm:$0xf]  ;;  %v13008_v62 = vld [vmem:[#allocation19 + $0x3e4] sm:$0xf]  ;;  %v11565_v59 = vld [vmem:[#allocation19 + $0x3e8] sm:$0xf0] }
 0xf88   :  { %7070 = vmatpush.bf16.msra.mxu1 %v15446_v31  ;;  %7214 = vmatpush.bf16.msrb.mxu2 %v15446_v31  ;;  %v11568_v46 = vor.u32 %v13008_v62, %v11565_v59  ;;  %v11638_v62 = vld [vmem:[#allocation19 + $0x478] sm:$0xf0] }
 0xf8b   :  { %v6784_v16 = vpop.f32.mrf.mxu3 }
 0xf8c   :  { %v6788_v7 = vpack.c.bf16 %v6784_v16, %v6784_v16  ;;  %v6642_v60 = vpop.f32.mrf.mxu0  ;;  %v12970_v16 = vld [vmem:[#allocation19 + $0x2b4] sm:$0xf] }
 0xf8d   :  { %v12968_v60 = vld [vmem:[#allocation19 + $0x2a4] sm:$0xf] }
 0xf8e   :  { %6894 = vmatmul.bf16.vlgmr.msra.gmra.mxu0 %v6788_v7  ;;  %6907 = vmatmul.bf16.vlgmr.msrb.gmra.mxu3 %v6788_v7  ;;  %v11414_v7 = vor.u32 %v12970_v16, %v11411_v58  ;;  %v11406_v43 = vor.u32 %v12968_v60, %v11403_v35  ;;  %v11555_v16 = vld [vmem:[#allocation19 + $0x3d0] sm:$0xf]  ;;  %v13006_v60 = vld [vmem:[#allocation19 + $0x3d4] sm:$0xf]  ;;  %v11557_v35 = vld [vmem:[#allocation19 + $0x3d8] sm:$0xf0] }
 0xf8f   :  { %7358 = vmatpush.bf16.msrb.mxu3 %v15446_v31  ;;  %7318 = vmatpush.bf16.msra.mxu0 %v11507_v61 }
 0xf93   :  { %v6786_v29 = vpop.f32.mrf.mxu3  ;;  %7319 = vmatpush.bf16.msra.mxu0 %v11499_v17 }
 0xf94   :  { %v12964_v29 = vld [vmem:[#allocation19 + $0x284] sm:$0xf] }
 0xf97   :  { %11317 = vmatmul.msk.bf16.vlgmr.msrb.gmra.mxu1 %vm6340_vm6, %v6915_v36  ;;  %7320 = vmatpush.bf16.msra.mxu0 %v11491_v37  ;;  %v11387_v36 = vld [vmem:[#allocation19 + $0x288] sm:$0xf0]  ;;  %v7203_v37 = vld [vmem:[#allocation17 + $0x6] sm:$0x1] }
 0xf98   :  { %7187 = vmatpush.bf16.msrb.mxu1 %v11446_v3  ;;  %v11390_v41 = vor.u32 %v12964_v29, %v11387_v36  ;;  %v11484_v3 = vld [vmem:[#allocation19 + $0x348] sm:$0xf0]  ;;  %v13005_v36 = vld [vmem:[#allocation19 + $0x3c4] sm:$0xf0] }
 0xf99   :  { %v11487_v8 = vor.u32 %v12988_v6, %v11484_v3  ;;  %v12996_v6 = vld [vmem:[#allocation19 + $0x384] sm:$0xf] }
 0xf9b   :  { %7321 = vmatpush.bf16.msra.mxu0 %v11483_v1 }
 0xf9c   :  { %7188 = vmatpush.bf16.msrb.mxu1 %v11438_v42  ;;  %v11573_v42 = vld [vmem:[#allocation19 + $0x3f8] sm:$0xf0] }
 0xf9d   :  { %v11576_v14 = vor.u32 %v13010_v27, %v11573_v42  ;;  %v11628_v42 = vld [vmem:[#allocation19 + $0x460] sm:$0xf] }
 0xf9f   :  { %7322 = vmatpush.bf16.msra.mxu0 %v11475_v24  ;;  %v11476_v24 = vld [vmem:[#allocation19 + $0x338] sm:$0xf0] }
 0xfa0   :  { %7189 = vmatpush.bf16.msrb.mxu1 %v11430_v54  ;;  %v11479_v55 = vor.u32 %v12986_v51, %v11476_v24  ;;  %v11468_v54 = vld [vmem:[#allocation19 + $0x328] sm:$0xf0] }
 0xfa1   :  { %v11471_v12 = vor.u32 %v12984_v49, %v11468_v54  ;;  %v11517_v51 = vld [vmem:[#allocation19 + $0x388] sm:$0xf0]  ;;  %v11620_v49 = vld [vmem:[#allocation19 + $0x450] sm:$0xf]  ;;  %v13023_v54 = vld [vmem:[#allocation19 + $0x454] sm:$0xf0] }
 0xfa2   :  { %v11520_v24 = vor.u32 %v12996_v6, %v11517_v51  ;;  %v13012_v6 = vld [vmem:[#allocation19 + $0x404] sm:$0xf] }
 0xfa3   :  { %7323 = vmatpush.bf16.msra.mxu0 %v11467_v34  ;;  %v11572_v34 = vor.u32 %v13011_v20, %v11571_v45  ;;  %v11636_v20 = vld [vmem:[#allocation19 + $0x470] sm:$0xf] }
 0xfa4   :  { %7190 = vmatpush.bf16.msrb.mxu1 %v11422_v26 }
 0xfa7   :  { %11382 = vmatmul.msk.bf16.vlgmr.msra.gmra.mxu1 %vm6340_vm6, %v7059_v38  ;;  %7324 = vmatpush.bf16.msra.mxu0 %v11459_v23  ;;  %v12992_v38 = vld [vmem:[#allocation19 + $0x364] sm:$0xf]  ;;  %v13009_v23 = vld [vmem:[#allocation19 + $0x3e4] sm:$0xf0] }
 0xfa8   :  { %7191 = vmatpush.bf16.msrb.mxu1 %v11414_v7  ;;  %v11564_v26 = vor.u32 %v13009_v23, %v11563_v32  ;;  %v13007_v7 = vld [vmem:[#allocation19 + $0x3d4] sm:$0xf0]  ;;  %v13026_v23 = vld [vmem:[#allocation19 + $0x474] sm:$0xf] }
 0xfa9   :  { %v11556_v56 = vor.u32 %v13007_v7, %v11555_v16  ;;  %v13024_v16 = vld [vmem:[#allocation19 + $0x464] sm:$0xf] }
 0xfab   :  { %7325 = vmatpush.bf16.msra.mxu0 %v11451_v44  ;;  %v11460_v44 = vld [vmem:[#allocation19 + $0x318] sm:$0xf0] }
 0xfac   :  { %7192 = vmatpush.bf16.msrb.mxu1 %v11406_v43  ;;  %v11463_v58 = vor.u32 %v12982_v13, %v11460_v44  ;;  %v11560_v43 = vor.u32 %v13006_v60, %v11557_v35  ;;  %v11641_v13 = vor.u32 %v13026_v23, %v11638_v62  ;;  %v13022_v35 = vld [vmem:[#allocation19 + $0x454] sm:$0xf] }
 0xfb0   :  { %7193 = vmatpush.bf16.msrb.mxu1 %v11398_v53  ;;  %v11452_v53 = vld [vmem:[#allocation19 + $0x308] sm:$0xf0] }
 0xfb1   :  { %v11455_v29 = vor.u32 %v12980_v15, %v11452_v53 }
 0xfb4   :  { %7194 = vmatpush.bf16.msrb.mxu1 %v11390_v41  ;;  %v11549_v41 = vld [vmem:[#allocation19 + $0x3c8] sm:$0xf0] }
 0xfb8   :  { %7462 = vmatpush.bf16.msra.mxu1 %v11572_v34 }
 0xfbc   :  { %7463 = vmatpush.bf16.msra.mxu1 %v11564_v26 }
 0xfc0   :  { %7464 = vmatpush.bf16.msra.mxu1 %v11556_v56  ;;  %v11622_v56 = vld [vmem:[#allocation19 + $0x458] sm:$0xf0] }
 0xfc1   :  { %v11625_v53 = vor.u32 %v13022_v35, %v11622_v56 }
0x1004   :  { %v6751_v10 = vpop.f32.mrf.mxu1 }
0x1005   :  { %v6768_v47 = vadd.f32 %v6751_v10, %v15459_v57  ;;  %v11508_v57 = vld [vmem:[#allocation19 + $0x378] sm:$0xf0]  ;;  %v11547_v10 = vld [vmem:[#allocation19 + $0x3c0] sm:$0xf] }
0x1006   :  { %v11511_v61 = vor.u32 %v12994_v0, %v11508_v57  ;;  %v13001_v0 = vld [vmem:[#allocation19 + $0x3a4] sm:$0xf0]  ;;  %v13000_v57 = vld [vmem:[#allocation19 + $0x3a4] sm:$0xf] }
0x100a   :  { %v6764_v9 = vpop.f32.mrf.mxu2 }
0x100b   :  { %v6769_v40 = vadd.f32 %v6764_v9, %v15457_v39  ;;  %v6895_v4 = vpop.f32.mrf.mxu0  ;;  %v11500_v39 = vld [vmem:[#allocation19 + $0x368] sm:$0xf0]  ;;  %v11548_v9 = vor.u32 %v13005_v36, %v11547_v10  ;;  %v7491_v36 = vld [vmem:[#allocation17 + $0x8] sm:$0x1] }
0x100c   :  { %v15468_v18 = vadd.f32 %v6895_v4, %v6768_v47  ;;  %v6753_v22 = vpop.f32.mrf.mxu1  ;;  %v11503_v33 = vor.u32 %v12992_v38, %v11500_v39  ;;  %v13004_v47 = vld [vmem:[#allocation19 + $0x3c4] sm:$0xf]  ;;  %v11539_v4 = vld [vmem:[#allocation19 + $0x3b0] sm:$0xf] }
0x100d   :  { %7465 = vmatpush.bf16.msra.mxu1 %v11548_v9  ;;  %v13003_v22 = vld [vmem:[#allocation19 + $0x3b4] sm:$0xf0]  ;;  %v11523_v39 = vld [vmem:[#allocation19 + $0x390] sm:$0xf]  ;;  %v13021_v9 = vld [vmem:[#allocation19 + $0x444] sm:$0xf0] }
0x1011   :  { %v6908_v25 = vpop.f32.mrf.mxu3 }
0x1012   :  { %v15470_v28 = vadd.f32 %v6908_v25, %v6769_v40  ;;  %v6766_v63 = vpop.f32.mrf.mxu2  ;;  %v11552_v40 = vor.u32 %v13004_v47, %v11549_v41  ;;  %v13002_v25 = vld [vmem:[#allocation19 + $0x3b4] sm:$0xf]  ;;  %v11612_v41 = vld [vmem:[#allocation19 + $0x440] sm:$0xf] }
0x1013   :  { %v6897_v19 = vpop.f32.mrf.mxu0  ;;  %v11540_v63 = vor.u32 %v13003_v22, %v11539_v4  ;;  %v11613_v4 = vor.u32 %v13021_v9, %v11612_v41  ;;  %v11614_v22 = vld [vmem:[#allocation19 + $0x448] sm:$0xf0]  ;;  %v13043_v9 = vld [vmem:[%s15978_s14 + $0x78] sm:$0xff] }
0x1014   :  { %v6928_v5 = vpop.f32.mrf.mxu1  ;;  %v11541_v19 = vld [vmem:[#allocation19 + $0x3b8] sm:$0xf0] }
0x1015   :  { %v6932_v2 = vpack.c.bf16 %v6928_v5, %v6928_v5  ;;  %v11544_v5 = vor.u32 %v13002_v25, %v11541_v19  ;;  %7466 = vmatpush.bf16.msra.mxu1 %v11540_v63  ;;  %v11604_v63 = vld [vmem:[#allocation19 + $0x430] sm:$0xf]  ;;  %v13019_v19 = vld [vmem:[#allocation19 + $0x434] sm:$0xf0] }
0x1017   :  { %7038 = vmatmul.bf16.vlgmr.msra.gmra.mxu2 %v6932_v2  ;;  %7051 = vmatmul.bf16.vlgmr.msrb.gmra.mxu0 %v6932_v2  ;;  %v11531_v2 = vld [vmem:[#allocation19 + $0x3a0] sm:$0xf] }
0x1018   :  { %7502 = vmatpush.bf16.msrb.mxu0 %v15446_v31  ;;  %7331 = vmatpush.bf16.msra.mxu2 %v11511_v61  ;;  %v11492_v31 = vld [vmem:[#allocation19 + $0x358] sm:$0xf0]  ;;  %v11532_v38 = vor.u32 %v13001_v0, %v11531_v2  ;;  %v11533_v61 = vld [vmem:[#allocation19 + $0x3a8] sm:$0xf0]  ;;  %v11605_v2 = vor.u32 %v13019_v19, %v11604_v63 }
0x1019   :  { %v6910_v30 = vpop.f32.mrf.mxu3  ;;  %v11495_v1 = vor.u32 %v12990_v48, %v11492_v31  ;;  %v11515_v31 = vld [vmem:[#allocation19 + $0x380] sm:$0xf]  ;;  %v11606_v0 = vld [vmem:[#allocation19 + $0x438] sm:$0xf0]  ;;  %v13050_v19 = vld [vmem:[%s15978_s14 + $0xb0] sm:$0xff] }
0x101a   :  { %v12999_v30 = vld [vmem:[#allocation19 + $0x394] sm:$0xf0]  ;;  %7467 = vmatpush.bf16.msra.mxu1 %v11532_v38  ;;  %v11596_v38 = vld [vmem:[#allocation19 + $0x420] sm:$0xf] }
0x101c   :  { %v6930_v17 = vpop.f32.mrf.mxu1  ;;  %7332 = vmatpush.bf16.msra.mxu2 %v11503_v33 }
0x101d   :  { %v11536_v17 = vor.u32 %v13000_v57, %v11533_v61  ;;  %v13017_v61 = vld [vmem:[#allocation19 + $0x424] sm:$0xf0] }
0x1020   :  { %7333 = vmatpush.bf16.msra.mxu2 %v11495_v1  ;;  %v12997_v1 = vld [vmem:[#allocation19 + $0x384] sm:$0xf0] }
0x1024   :  { %v7072_v52 = vpop.f32.mrf.mxu1  ;;  %7334 = vmatpush.bf16.msra.mxu2 %v11487_v8  ;;  %v11516_v8 = vor.u32 %v12997_v1, %v11515_v31  ;;  %v11580_v31 = vld [vmem:[#allocation19 + $0x400] sm:$0xf]  ;;  %v13013_v1 = vld [vmem:[#allocation19 + $0x404] sm:$0xf0] }
0x1025   :  { %v7076_v50 = vpack.c.bf16 %v7072_v52, %v7072_v52  ;;  %v12998_v52 = vld [vmem:[#allocation19 + $0x394] sm:$0xf] }
0x1027   :  { %7182 = vmatmul.bf16.vlgmr.msra.gmra.mxu3 %v7076_v50  ;;  %7195 = vmatmul.bf16.vlgmr.msrb.gmra.mxu1 %v7076_v50  ;;  %v11525_v50 = vld [vmem:[#allocation19 + $0x398] sm:$0xf0] }
0x1028   :  { %11447 = vmatmul.msk.bf16.vlgmr.msrb.gmra.mxu2 %vm6340_vm6, %v7203_v37  ;;  %7475 = vmatpush.bf16.msra.mxu3 %v11576_v14 }
0x1029   :  { %7335 = vmatpush.bf16.msra.mxu2 %v11479_v55  ;;  %v13025_v55 = vld [vmem:[#allocation19 + $0x464] sm:$0xf0] }
0x102a   :  { %v11629_v34 = vor.u32 %v13025_v55, %v11628_v42  ;;  %v13056_v42 = vld [vmem:[%s15978_s14 + $0xe0] sm:$0xff] }
0x102c   :  { %v7074_v11 = vpop.f32.mrf.mxu1  ;;  %7476 = vmatpush.bf16.msra.mxu3 %v11568_v46 }
0x102d   :  { %7336 = vmatpush.bf16.msra.mxu2 %v11471_v12  ;;  %v11524_v11 = vor.u32 %v12999_v30, %v11523_v39  ;;  %v13016_v39 = vld [vmem:[#allocation19 + $0x424] sm:$0xf]  ;;  %v11597_v30 = vor.u32 %v13017_v61, %v11596_v38  ;;  %v13035_v61 = vld [vmem:[%s15978_s14 + $0x38] sm:$0xff] }
0x102e   :  { %v13049_v38 = vld [vmem:[%s15978_s14 + $0xa8] sm:$0xff] }
0x102f   :  { %7468 = vmatpush.bf16.msra.mxu1 %v11524_v11  ;;  %v11590_v11 = vld [vmem:[#allocation19 + $0x418] sm:$0xf0] }
0x1030   :  { %7477 = vmatpush.bf16.msra.mxu3 %v11560_v43 }
0x1031   :  { %7337 = vmatpush.bf16.msra.mxu2 %v11463_v58  ;;  %v11630_v58 = vld [vmem:[#allocation19 + $0x468] sm:$0xf0] }
0x1032   :  { %v11633_v60 = vor.u32 %v13024_v16, %v11630_v58  ;;  %v13054_v16 = vld [vmem:[%s15978_s14 + $0xd0] sm:$0xff]  ;;  %v13052_v58 = vld [vmem:[%s15978_s14 + $0xc0] sm:$0xff] }
0x1033   :  { %7469 = vmatpush.bf16.msra.mxu1 %v11516_v8  ;;  %v11582_v8 = vld [vmem:[#allocation19 + $0x408] sm:$0xf0] }
0x1034   :  { %7478 = vmatpush.bf16.msra.mxu3 %v11552_v40  ;;  %v13020_v40 = vld [vmem:[#allocation19 + $0x444] sm:$0xf]  ;;  %v11585_v51 = vor.u32 %v13012_v6, %v11582_v8  ;;  %v13030_v8 = vld [vmem:[%s15978_s14 + $0x10] sm:$0xff] }
0x1035   :  { %7338 = vmatpush.bf16.msra.mxu2 %v11455_v29  ;;  %v11617_v25 = vor.u32 %v13020_v40, %v11614_v22  ;;  %v7646_v22 = vld [vmem:[#allocation22] sm:$0x1] }
0x1036   :  { %v13037_v6 = vld [vmem:[%s15978_s14 + $0x48] sm:$0xff] }
0x1037   :  { %11512 = vmatmul.msk.bf16.vlgmr.msrb.gmra.mxu3 %vm6340_vm6, %v7347_v21  ;;  %v11528_v21 = vor.u32 %v12998_v52, %v11525_v50  ;;  %v13015_v52 = vld [vmem:[#allocation19 + $0x414] sm:$0xf0] }
0x1038   :  { %7479 = vmatpush.bf16.msra.mxu3 %v11544_v5  ;;  %v13018_v5 = vld [vmem:[#allocation19 + $0x434] sm:$0xf] }
0x1039   :  { %v11609_v57 = vor.u32 %v13018_v5, %v11606_v0  ;;  %v13042_v5 = vld [vmem:[%s15978_s14 + $0x70] sm:$0xff] }
0x103c   :  { %7480 = vmatpush.bf16.msra.mxu3 %v11536_v17  ;;  %v11588_v17 = vld [vmem:[#allocation19 + $0x410] sm:$0xf] }
0x1040   :  { %7481 = vmatpush.bf16.msra.mxu3 %v11528_v21  ;;  %v11589_v21 = vor.u32 %v13015_v52, %v11588_v17  ;;  %v13040_v17 = vld [vmem:[%s15978_s14 + $0x60] sm:$0xff]  ;;  %v13047_v52 = vld [vmem:[%s15978_s14 + $0x98] sm:$0xff] }
0x1044   :  { %7482 = vmatpush.bf16.msra.mxu3 %v11520_v24  ;;  %v13059_v24 = vld [vmem:[%s15978_s14 + $0xf8] sm:$0xff] }
0x1094   :  { %v7052_v33 = vpop.f32.mrf.mxu0 }
0x1095   :  { %v7057_v37 = vadd.f32 %v7052_v33, %v15470_v28  ;;  %v13027_v28 = vld [vmem:[#allocation19 + $0x474] sm:$0xf0]  ;;  %v11598_v33 = vld [vmem:[#allocation19 + $0x428] sm:$0xf0] }
0x1096   :  { %v11637_v27 = vor.u32 %v13027_v28, %v11636_v20  ;;  %v11601_v50 = vor.u32 %v13016_v39, %v11598_v33  ;;  %v13057_v20 = vld [vmem:[%s15978_s14 + $0xe8] sm:$0xff]  ;;  %v13034_v33 = vld [vmem:[%s15978_s14 + $0x30] sm:$0xff] }
0x1097   :  { %v13041_v39 = vld [vmem:[%s15978_s14 + $0x68] sm:$0xff] }
0x1098   :  { %7606 = vmatpush.bf16.msrb.mxu2 %v11637_v27 }
0x109a   :  { %v7039_v48 = vpop.f32.mrf.mxu2 }
0x109b   :  { %v7056_v3 = vadd.f32 %v7039_v48, %v15468_v18  ;;  %v11621_v18 = vor.u32 %v13023_v54, %v11620_v49 }
0x109c   :  { %v7054_v45 = vpop.f32.mrf.mxu0  ;;  %7607 = vmatpush.bf16.msrb.mxu2 %v11629_v34  ;;  %v13055_v34 = vld [vmem:[%s15978_s14 + $0xd8] sm:$0xff] }
0x109d   :  { %v13058_v45 = vld [vmem:[%s15978_s14 + $0xf0] sm:$0xff] }
0x10a0   :  { %7608 = vmatpush.bf16.msrb.mxu2 %v11621_v18 }
0x10a2   :  { %v7041_v14 = vpop.f32.mrf.mxu2 }
0x10a4   :  { %v7196_v32 = vpop.f32.mrf.mxu1  ;;  %7609 = vmatpush.bf16.msrb.mxu2 %v11613_v4 }
0x10a5   :  { %v15477_v12 = vadd.f32 %v7196_v32, %v7057_v37  ;;  %v13014_v37 = vld [vmem:[#allocation19 + $0x414] sm:$0xf] }
0x10a6   :  { %v11593_v48 = vor.u32 %v13014_v37, %v11590_v11  ;;  %v13039_v37 = vld [vmem:[%s15978_s14 + $0x58] sm:$0xff]  ;;  %v13046_v11 = vld [vmem:[%s15978_s14 + $0x90] sm:$0xff] }
0x10a8   :  { %7610 = vmatpush.bf16.msrb.mxu2 %v11605_v2 }
0x10aa   :  { %v7183_v59 = vpop.f32.mrf.mxu3 }
0x10ab   :  { %v15479_v26 = vadd.f32 %v7183_v59, %v7056_v3  ;;  %v7216_v46 = vpop.f32.mrf.mxu2  ;;  %v11581_v3 = vor.u32 %v13013_v1, %v11580_v31  ;;  %v13045_v31 = vld [vmem:[%s15978_s14 + $0x88] sm:$0xff]  ;;  %v13031_v1 = vld [vmem:[%s15978_s14 + $0x18] sm:$0xff] }
0x10ac   :  { %v7220_v44 = vpack.c.bf16 %v7216_v46, %v7216_v46  ;;  %v7198_v7 = vpop.f32.mrf.mxu1  ;;  %7611 = vmatpush.bf16.msrb.mxu2 %v11597_v30  ;;  %v13048_v30 = vld [vmem:[%s15978_s14 + $0xa0] sm:$0xff] }
0x10ad   :  { %v7634_v7 = vld [vmem:[#allocation20] sm:$0x3] }
0x10ae   :  { %7326 = vmatmul.bf16.vlgmr.msra.gmra.mxu0 %v7220_v44  ;;  %7339 = vmatmul.bf16.vlgmr.msra.gmra.mxu2 %v7220_v44 }
0x10af   :  { %7619 = vmatpush.bf16.msra.mxu0 %v11641_v13 }
0x10b0   :  { %7612 = vmatpush.bf16.msrb.mxu2 %v11589_v21  ;;  %v13032_v21 = vld [vmem:[%s15978_s14 + $0x20] sm:$0xff] }
0x10b2   :  { %v7185_v43 = vpop.f32.mrf.mxu3 }
0x10b3   :  { %v7218_v15 = vpop.f32.mrf.mxu2  ;;  %7620 = vmatpush.bf16.msra.mxu0 %v11633_v60  ;;  %v7637_v60 = vperm.slane %v7634_v7, 1 }
0x10b4   :  { %7613 = vmatpush.bf16.msrb.mxu2 %v11581_v3  ;;  %v13044_v3 = vld [vmem:[%s15978_s14 + $0x80] sm:$0xff] }
0x10b7   :  { %7621 = vmatpush.bf16.msra.mxu0 %v11625_v53  ;;  %v7636_v53 = vperm.slane %v7634_v7, 0 }
0x10ba   :  { %v7360_v10 = vpop.f32.mrf.mxu3 }
0x10bb   :  { %v7364_v29 = vpack.c.bf16 %v7360_v10, %v7360_v10  ;;  %7622 = vmatpush.bf16.msra.mxu0 %v11617_v25  ;;  %v7718_v25 = vld [vmem:[#allocation22 + $0x1] sm:$0x1] }
0x10bd   :  { %7470 = vmatmul.bf16.vlgmr.msra.gmra.mxu1 %v7364_v29  ;;  %7483 = vmatmul.bf16.vlgmr.msra.gmra.mxu3 %v7364_v29 }
0x10be   :  { %11577 = vmatmul.msk.bf16.vlgmr.msrb.gmra.mxu0 %vm6340_vm6, %v7491_v36 }
0x10bf   :  { %7623 = vmatpush.bf16.msra.mxu0 %v11609_v57 }
0x10c2   :  { %v7362_v47 = vpop.f32.mrf.mxu3 }
0x10c3   :  { %7624 = vmatpush.bf16.msra.mxu0 %v11601_v50  ;;  %v13051_v47 = vld [vmem:[%s15978_s14 + $0xb8] sm:$0xff]  ;;  %v13033_v50 = vld [vmem:[%s15978_s14 + $0x28] sm:$0xff] }
0x10c7   :  { %7625 = vmatpush.bf16.msra.mxu0 %v11593_v48  ;;  %v13038_v48 = vld [vmem:[%s15978_s14 + $0x50] sm:$0xff] }
0x10cb   :  { %7626 = vmatpush.bf16.msra.mxu0 %v11585_v51  ;;  %v13036_v51 = vld [vmem:[%s15978_s14 + $0x40] sm:$0xff] }
0x10cf   :  { %7892 = vmatpush.bf16.msrb.mxu0 %v13059_v24  ;;  %v13075_v24 = vld [vmem:[%s15978_s14 + $0x178] sm:$0xff] }
0x10d3   :  { %7893 = vmatpush.bf16.msrb.mxu0 %v13058_v45  ;;  %v13029_v45 = vld [vmem:[%s15978_s14 + $0x8] sm:$0xff] }
0x10d7   :  { %7894 = vmatpush.bf16.msrb.mxu0 %v13057_v20  ;;  %v13074_v20 = vld [vmem:[%s15978_s14 + $0x170] sm:$0xff] }
0x10db   :  { %7895 = vmatpush.bf16.msrb.mxu0 %v13056_v42  ;;  %v13073_v42 = vld [vmem:[%s15978_s14 + $0x168] sm:$0xff] }
0x10df   :  { %7896 = vmatpush.bf16.msrb.mxu0 %v13055_v34  ;;  %v13072_v34 = vld [vmem:[%s15978_s14 + $0x160] sm:$0xff] }
0x10e3   :  { %7897 = vmatpush.bf16.msrb.mxu0 %v13054_v16 }
0x112b   :  { %v7327_v28 = vpop.f32.mrf.mxu0 }
0x112c   :  { %v7344_v27 = vadd.f32 %v7327_v28, %v15479_v26  ;;  %v13028_v28 = vld [vmem:[%s15978_s14] sm:$0xff] }
0x1131   :  { %v7340_v55 = vpop.f32.mrf.mxu2 }
0x1132   :  { %v7345_v14 = vadd.f32 %v7340_v55, %v15477_v12  ;;  %v13053_v12 = vld [vmem:[%s15978_s14 + $0xc8] sm:$0xff]  ;;  %v13066_v55 = vld [vmem:[%s15978_s14 + $0x130] sm:$0xff] }
0x1133   :  { %v7329_v49 = vpop.f32.mrf.mxu0  ;;  %7898 = vmatpush.bf16.msrb.mxu0 %v13053_v12 }
0x1134   :  { %v13071_v49 = vld [vmem:[%s15978_s14 + $0x158] sm:$0xff] }
0x1137   :  { %7899 = vmatpush.bf16.msrb.mxu0 %v13052_v58 }
0x1139   :  { %v7342_v54 = vpop.f32.mrf.mxu2 }
0x113a   :  { %v7471_v32 = vpop.f32.mrf.mxu1  ;;  %v13064_v54 = vld [vmem:[%s15978_s14 + $0x120] sm:$0xff] }
0x113b   :  { %v7488_v18 = vadd.f32 %v7471_v32, %v7344_v27  ;;  %v7504_v23 = vpop.f32.mrf.mxu0  ;;  %v13067_v27 = vld [vmem:[%s15978_s14 + $0x138] sm:$0xff]  ;;  %v13070_v32 = vld [vmem:[%s15978_s14 + $0x150] sm:$0xff] }
0x113c   :  { %v7508_v62 = vpack.c.bf16 %v7504_v23, %v7504_v23  ;;  %v13069_v23 = vld [vmem:[%s15978_s14 + $0x148] sm:$0xff] }
0x113e   :  { %7614 = vmatmul.bf16.vlgmr.msrb.gmra.mxu2 %v7508_v62  ;;  %7627 = vmatmul.bf16.vlgmr.msra.gmra.mxu0 %v7508_v62  ;;  %v13062_v62 = vld [vmem:[%s15978_s14 + $0x110] sm:$0xff] }
0x1140   :  { %v7484_v59 = vpop.f32.mrf.mxu3 }
0x1141   :  { %v7489_v26 = vadd.f32 %v7484_v59, %v7345_v14  ;;  %v13065_v14 = vld [vmem:[%s15978_s14 + $0x128] sm:$0xff] }
0x1142   :  { %v7473_v46 = vpop.f32.mrf.mxu1  ;;  %v13061_v59 = vld [vmem:[%s15978_s14 + $0x108] sm:$0xff] }
0x1143   :  { %v7506_v13 = vpop.f32.mrf.mxu0  ;;  %v13068_v46 = vld [vmem:[%s15978_s14 + $0x140] sm:$0xff] }
0x1148   :  { %v7486_v44 = vpop.f32.mrf.mxu3 }
0x11bb   :  { %v7628_v35 = vpop.f32.mrf.mxu0 }
0x11bc   :  { %v7633_v56 = vadd.f32 %v7628_v35, %v7489_v26  ;;  %v13060_v26 = vld [vmem:[%s15978_s14 + $0x100] sm:$0xff] }
0x11be   :  { %v7641_v43 = vadd.f32 %v7637_v60, %v7633_v56 }
0x11c0   :  { %v7643_v15 = vmax.f32 %v7641_v43, 0.0 }
0x11c1   :  { %v7615_v10 = vpop.f32.mrf.mxu2 }
0x11c2   :  { %v7645_v29 = vpack.c.bf16 %v7643_v15, %v7643_v15  ;;  %v7632_v36 = vadd.f32 %v7615_v10, %v7488_v18  ;;  %v13063_v18 = vld [vmem:[%s15978_s14 + $0x118] sm:$0xff] }
0x11c3   :  { %v7630_v41 = vpop.f32.mrf.mxu0  ;;  %v13091_v10 = vld [vmem:[%s15978_s14 + $0x1f8] sm:$0xff] }
0x11c4   :  { %v15515_v40 = vsel %vm1340_vm0, %v7645_v29, 0  ;;  %v7640_v4 = vadd.f32 %v7636_v53, %v7632_v36  ;;  %v8028_v53 = vld [vmem:[#allocation22 + $0x2] sm:$0x1]  ;;  %v13090_v29 = vld [vmem:[%s15978_s14 + $0x1f0] sm:$0xff]  ;;  %v13088_v41 = vld [vmem:[%s15978_s14 + $0x1e0] sm:$0xff] }
0x11c5   :  { %7677 = vmatpush.bf16.msrb.mxu3 %v15515_v40  ;;  %7742 = vmatpush.bf16.msra.mxu2 %v15515_v40 }
0x11c6   :  { %v7642_v63 = vmax.f32 %v7640_v4, 0.0  ;;  %8052 = vmatpush.bf16.msra.mxu0 %v15515_v40  ;;  %v8217_v4 = vld [vmem:[#allocation22 + $0x3] sm:$0x1] }
0x11c8   :  { %v7644_v2 = vpack.c.bf16 %v7642_v63, %v7642_v63  ;;  %11643 = vmatmul.msk.bf16.vlgmr.msrb.gmra.mxu3 %vm7647_vm7, %v7646_v22  ;;  %11645 = vmatmul.msk.bf16.vlgmr.msra.gmra.mxu2 %vm7647_vm7, %v7718_v25  ;;  %v13086_v63 = vld [vmem:[%s15978_s14 + $0x1d0] sm:$0xff] }
0x11c9   :  { %7879 = vmatpush.bf16.msra.mxu3 %v13051_v47  ;;  %8014 = vmatpush.bf16.msrb.mxu2 %v13043_v9  ;;  %v7617_v0 = vpop.f32.mrf.mxu2  ;;  %v13089_v47 = vld [vmem:[%s15978_s14 + $0x1e8] sm:$0xff]  ;;  %v13083_v9 = vld [vmem:[%s15978_s14 + $0x1b8] sm:$0xff] }
0x11ca   :  { %v15529_v57 = vsel %vm1340_vm0, %v7644_v2, 0  ;;  %v13080_v2 = vld [vmem:[%s15978_s14 + $0x1a0] sm:$0xff] }
0x11cb   :  { %7664 = vmatpush.bf16.msrb.mxu1 %v15529_v57  ;;  %v13084_v0 = vld [vmem:[%s15978_s14 + $0x1c0] sm:$0xff] }
0x11cd   :  { %7880 = vmatpush.bf16.msra.mxu3 %v13050_v19  ;;  %8015 = vmatpush.bf16.msrb.mxu2 %v13042_v5  ;;  %v13081_v19 = vld [vmem:[%s15978_s14 + $0x1a8] sm:$0xff] }
0x11ce   :  { %11642 = vmatmul.msk.bf16.vlgmr.msrb.gmra.mxu1 %vm7647_vm7, %v7646_v22  ;;  %v13087_v22 = vld [vmem:[%s15978_s14 + $0x1d8] sm:$0xff]  ;;  %v13085_v5 = vld [vmem:[%s15978_s14 + $0x1c8] sm:$0xff] }
0x11cf   :  { %7729 = vmatpush.bf16.msra.mxu1 %v15529_v57 }
0x11d1   :  { %7881 = vmatpush.bf16.msra.mxu3 %v13049_v38  ;;  %8016 = vmatpush.bf16.msrb.mxu2 %v13041_v39  ;;  %v13079_v38 = vld [vmem:[%s15978_s14 + $0x198] sm:$0xff]  ;;  %v13077_v39 = vld [vmem:[%s15978_s14 + $0x188] sm:$0xff] }
0x11d3   :  { %8001 = vmatpush.bf16.msrb.mxu1 %v13035_v61  ;;  %v13078_v61 = vld [vmem:[%s15978_s14 + $0x190] sm:$0xff] }
0x11d5   :  { %7882 = vmatpush.bf16.msra.mxu3 %v13048_v30  ;;  %8017 = vmatpush.bf16.msrb.mxu2 %v13040_v17  ;;  %v13076_v30 = vld [vmem:[%s15978_s14 + $0x180] sm:$0xff] }
0x11d7   :  { %8002 = vmatpush.bf16.msrb.mxu1 %v13034_v33 }
0x11d9   :  { %7883 = vmatpush.bf16.msra.mxu3 %v13047_v52  ;;  %8018 = vmatpush.bf16.msrb.mxu2 %v13039_v37 }
0x11db   :  { %8003 = vmatpush.bf16.msrb.mxu1 %v13033_v50 }
0x11dd   :  { %7884 = vmatpush.bf16.msra.mxu3 %v13046_v11  ;;  %8019 = vmatpush.bf16.msrb.mxu2 %v13038_v48  ;;  %v13107_v48 = vld [vmem:[%s15978_s14 + $0x278] sm:$0xff] }
0x11de   :  { %11644 = vmatmul.msk.bf16.vlgmr.msra.gmra.mxu1 %vm7647_vm7, %v7718_v25  ;;  %v13082_v25 = vld [vmem:[%s15978_s14 + $0x1b0] sm:$0xff] }
0x11df   :  { %8004 = vmatpush.bf16.msrb.mxu1 %v13032_v21 }
0x11e1   :  { %7885 = vmatpush.bf16.msra.mxu3 %v13045_v31  ;;  %8020 = vmatpush.bf16.msrb.mxu2 %v13037_v6 }
0x11e3   :  { %8005 = vmatpush.bf16.msrb.mxu1 %v13031_v1  ;;  %v13106_v1 = vld [vmem:[%s15978_s14 + $0x270] sm:$0xff] }
0x11e5   :  { %7886 = vmatpush.bf16.msra.mxu3 %v13044_v3  ;;  %8021 = vmatpush.bf16.msrb.mxu2 %v13036_v51  ;;  %v13105_v51 = vld [vmem:[%s15978_s14 + $0x268] sm:$0xff] }
0x11e7   :  { %8006 = vmatpush.bf16.msrb.mxu1 %v13030_v8 }
0x11e9   :  { %8039 = vmatpush.bf16.msrb.mxu3 %v15529_v57  ;;  %8202 = vmatpush.bf16.msra.mxu2 %v13075_v24 }
0x11eb   :  { %8007 = vmatpush.bf16.msrb.mxu1 %v13029_v45 }
0x11ed   :  { %8203 = vmatpush.bf16.msra.mxu2 %v13074_v20  ;;  %v13104_v20 = vld [vmem:[%s15978_s14 + $0x260] sm:$0xff] }
0x11ef   :  { %8008 = vmatpush.bf16.msrb.mxu1 %v13028_v28 }
0x11f1   :  { %8204 = vmatpush.bf16.msra.mxu2 %v13073_v42  ;;  %v8406_v42 = vld [vmem:[#allocation22 + $0x4] sm:$0x1] }
0x11f3   :  { %8189 = vmatpush.bf16.msra.mxu1 %v13067_v27 }
0x11f5   :  { %8205 = vmatpush.bf16.msra.mxu2 %v13072_v34  ;;  %v13123_v34 = vld [vmem:[%s15978_s14 + $0x2f8] sm:$0xff] }
0x11f7   :  { %8190 = vmatpush.bf16.msra.mxu1 %v13066_v55  ;;  %v13103_v55 = vld [vmem:[%s15978_s14 + $0x258] sm:$0xff] }
0x11f9   :  { %8206 = vmatpush.bf16.msra.mxu2 %v13071_v49  ;;  %v13102_v49 = vld [vmem:[%s15978_s14 + $0x250] sm:$0xff] }
0x11fb   :  { %8191 = vmatpush.bf16.msra.mxu1 %v13065_v14 }
0x11fd   :  { %8207 = vmatpush.bf16.msra.mxu2 %v13070_v32 }
0x11ff   :  { %8192 = vmatpush.bf16.msra.mxu1 %v13064_v54  ;;  %v13122_v54 = vld [vmem:[%s15978_s14 + $0x2f0] sm:$0xff] }
0x1201   :  { %8208 = vmatpush.bf16.msra.mxu2 %v13069_v23  ;;  %v13099_v23 = vld [vmem:[%s15978_s14 + $0x238] sm:$0xff] }
0x1203   :  { %8193 = vmatpush.bf16.msra.mxu1 %v13063_v18 }
0x1205   :  { %8209 = vmatpush.bf16.msra.mxu2 %v13068_v46  ;;  %v13098_v46 = vld [vmem:[%s15978_s14 + $0x230] sm:$0xff] }
0x1207   :  { %8194 = vmatpush.bf16.msra.mxu1 %v13062_v62  ;;  %v13101_v62 = vld [vmem:[%s15978_s14 + $0x248] sm:$0xff] }
0x120b   :  { %8195 = vmatpush.bf16.msra.mxu1 %v13061_v59  ;;  %v13121_v59 = vld [vmem:[%s15978_s14 + $0x2e8] sm:$0xff] }
0x120f   :  { %8196 = vmatpush.bf16.msra.mxu1 %v13060_v26 }
0x124b   :  { %v7666_v13 = vpop.f32.mrf.mxu1  ;;  %v7679_v44 = vpop.f32.mrf.mxu3 }
0x124c   :  { %v7683_v16 = vpack.c.bf16 %v7666_v13, %v7666_v13  ;;  %v7684_v12 = vpack.c.bf16 %v7679_v44, %v7679_v44  ;;  %v7744_v58 = vpop.f32.mrf.mxu2  ;;  %v13100_v13 = vld [vmem:[%s15978_s14 + $0x240] sm:$0xff] }
0x124d   :  { %v7749_v7 = vpack.c.bf16 %v7744_v58, %v7744_v58  ;;  %v13120_v44 = vld [vmem:[%s15978_s14 + $0x2e0] sm:$0xff]  ;;  %v13119_v58 = vld [vmem:[%s15978_s14 + $0x2d8] sm:$0xff] }
0x124e   :  { %8009 = vmatmul.bf16.vlgmr.msrb.gmra.mxu1 %v7683_v16  ;;  %8022 = vmatmul.bf16.vlgmr.msrb.gmra.mxu2 %v7684_v12  ;;  %v13097_v12 = vld [vmem:[%s15978_s14 + $0x228] sm:$0xff] }
0x124f   :  { %7900 = vmatmul.bf16.vlgmr.msrb.gmra.mxu0 %v7749_v7  ;;  %8417 = vmatpush.bf16.msrb.mxu1 %v15529_v57  ;;  %v8595_v7 = vld [vmem:[#allocation22 + $0x5] sm:$0x1] }
0x1250   :  { %8241 = vmatpush.bf16.msrb.mxu0 %v15515_v40  ;;  %8430 = vmatpush.bf16.msrb.mxu2 %v15515_v40 }
0x1253   :  { %v7668_v60 = vpop.f32.mrf.mxu1  ;;  %v7681_v35 = vpop.f32.mrf.mxu3 }
0x1254   :  { %v7746_v56 = vpop.f32.mrf.mxu2  ;;  %v13096_v60 = vld [vmem:[%s15978_s14 + $0x220] sm:$0xff]  ;;  %v13118_v35 = vld [vmem:[%s15978_s14 + $0x2d0] sm:$0xff] }
0x125b   :  { %v7731_v43 = vpop.f32.mrf.mxu1 }
0x125c   :  { %v7748_v15 = vpack.c.bf16 %v7731_v43, %v7731_v43  ;;  %v13115_v43 = vld [vmem:[%s15978_s14 + $0x2b8] sm:$0xff] }
0x125e   :  { %7887 = vmatmul.bf16.vlgmr.msra.gmra.mxu3 %v7748_v15 }
0x125f   :  { %11807 = vmatmul.msk.bf16.vlgmr.msra.gmra.mxu0 %vm7647_vm7, %v8028_v53  ;;  %8228 = vmatpush.bf16.msra.mxu3 %v15529_v57 }
0x1260   :  { %8391 = vmatpush.bf16.msra.mxu0 %v13091_v10  ;;  %v13117_v10 = vld [vmem:[%s15978_s14 + $0x2c8] sm:$0xff] }
0x1263   :  { %v7733_v36 = vpop.f32.mrf.mxu1 }
0x1264   :  { %8392 = vmatpush.bf16.msra.mxu0 %v13090_v29  ;;  %v13114_v29 = vld [vmem:[%s15978_s14 + $0x2b0] sm:$0xff] }
0x1265   :  { %v13094_v36 = vld [vmem:[%s15978_s14 + $0x210] sm:$0xff] }
0x1268   :  { %8393 = vmatpush.bf16.msra.mxu0 %v13089_v47  ;;  %v13116_v47 = vld [vmem:[%s15978_s14 + $0x2c0] sm:$0xff] }
0x126c   :  { %8394 = vmatpush.bf16.msra.mxu0 %v13088_v41  ;;  %v13113_v41 = vld [vmem:[%s15978_s14 + $0x2a8] sm:$0xff] }
0x126e   :  { %11806 = vmatmul.msk.bf16.vlgmr.msrb.gmra.mxu3 %vm7647_vm7, %v8028_v53  ;;  %v13095_v53 = vld [vmem:[%s15978_s14 + $0x218] sm:$0xff] }
0x126f   :  { %11905 = vmatmul.msk.bf16.vlgmr.msrb.gmra.mxu0 %vm7647_vm7, %v8217_v4  ;;  %8378 = vmatpush.bf16.msrb.mxu3 %v13083_v9 }
0x1270   :  { %8395 = vmatpush.bf16.msra.mxu0 %v13087_v22  ;;  %v13112_v22 = vld [vmem:[%s15978_s14 + $0x2a0] sm:$0xff] }
0x1273   :  { %8379 = vmatpush.bf16.msrb.mxu3 %v13082_v25  ;;  %v13092_v25 = vld [vmem:[%s15978_s14 + $0x200] sm:$0xff] }
0x1274   :  { %8396 = vmatpush.bf16.msra.mxu0 %v13086_v63  ;;  %v13111_v63 = vld [vmem:[%s15978_s14 + $0x298] sm:$0xff] }
0x1277   :  { %8380 = vmatpush.bf16.msrb.mxu3 %v13081_v19  ;;  %v13110_v19 = vld [vmem:[%s15978_s14 + $0x290] sm:$0xff] }
0x1278   :  { %8397 = vmatpush.bf16.msra.mxu0 %v13085_v5  ;;  %v13109_v5 = vld [vmem:[%s15978_s14 + $0x288] sm:$0xff] }
0x127b   :  { %8381 = vmatpush.bf16.msrb.mxu3 %v13080_v2  ;;  %v13108_v2 = vld [vmem:[%s15978_s14 + $0x280] sm:$0xff] }
0x127c   :  { %8398 = vmatpush.bf16.msra.mxu0 %v13084_v0 }
0x127e   :  { %11904 = vmatmul.msk.bf16.vlgmr.msra.gmra.mxu3 %vm7647_vm7, %v8217_v4  ;;  %v13093_v4 = vld [vmem:[%s15978_s14 + $0x208] sm:$0xff] }
0x127f   :  { %8382 = vmatpush.bf16.msrb.mxu3 %v13079_v38 }
0x1280   :  { %8619 = vmatpush.bf16.msrb.mxu0 %v15515_v40 }
0x1283   :  { %8383 = vmatpush.bf16.msrb.mxu3 %v13078_v61 }
0x1287   :  { %8384 = vmatpush.bf16.msrb.mxu3 %v13077_v39 }
0x128b   :  { %8385 = vmatpush.bf16.msrb.mxu3 %v13076_v30 }
0x128f   :  { %8606 = vmatpush.bf16.msra.mxu3 %v15529_v57 }
0x12cb   :  { %v8010_v33 = vpop.f32.mrf.mxu1 }
0x12cc   :  { %v7901_v17 = vpop.f32.mrf.mxu0 }
0x12d1   :  { %v8023_v52 = vpop.f32.mrf.mxu2 }
0x12d3   :  { %v8012_v50 = vpop.f32.mrf.mxu1 }
0x12d4   :  { %v7903_v37 = vpop.f32.mrf.mxu0 }
0x12d9   :  { %v8025_v11 = vpop.f32.mrf.mxu2 }
0x12da   :  { %v13138_v11 = vld [vmem:[%s15978_s14 + $0x370] sm:$0xff] }
0x12dc   :  { %v8054_v21 = vpop.f32.mrf.mxu0 }
0x12dd   :  { %v8059_v31 = vpack.c.bf16 %v8054_v21, %v8054_v21 }
0x12df   :  { %8210 = vmatmul.bf16.vlgmr.msra.gmra.mxu2 %v8059_v31 }
0x12e0   :  { %8580 = vmatpush.bf16.msra.mxu2 %v13107_v48  ;;  %v13137_v48 = vld [vmem:[%s15978_s14 + $0x368] sm:$0xff] }
0x12e1   :  { %v7888_v6 = vpop.f32.mrf.mxu3 }
0x12e2   :  { %v7902_v3 = vadd.f32 %v7901_v17, %v7888_v6 }
0x12e4   :  { %8581 = vmatpush.bf16.msra.mxu2 %v13106_v1  ;;  %v8056_v8 = vpop.f32.mrf.mxu0  ;;  %v8011_v24 = vadd.f32 %v8010_v33, %v7902_v3  ;;  %v13139_v33 = vld [vmem:[%s15978_s14 + $0x378] sm:$0xff]  ;;  %v13136_v1 = vld [vmem:[%s15978_s14 + $0x360] sm:$0xff] }
0x12e6   :  { %v15711_v45 = vadd.f32 %v8023_v52, %v8011_v24  ;;  %v13131_v24 = vld [vmem:[%s15978_s14 + $0x338] sm:$0xff] }
0x12e8   :  { %8582 = vmatpush.bf16.msra.mxu2 %v13105_v51  ;;  %v8784_v51 = vld [vmem:[#allocation22 + $0x6] sm:$0x1] }
0x12e9   :  { %v7890_v28 = vpop.f32.mrf.mxu3 }
0x12ea   :  { %v13130_v28 = vld [vmem:[%s15978_s14 + $0x330] sm:$0xff] }
0x12ec   :  { %8583 = vmatpush.bf16.msra.mxu2 %v13104_v20  ;;  %v8243_v27 = vpop.f32.mrf.mxu0 }
0x12ed   :  { %v8248_v14 = vpack.c.bf16 %v8243_v27, %v8243_v27  ;;  %v13134_v27 = vld [vmem:[%s15978_s14 + $0x350] sm:$0xff] }
0x12ef   :  { %8399 = vmatmul.bf16.vlgmr.msra.gmra.mxu0 %v8248_v14  ;;  %12003 = vmatmul.msk.bf16.vlgmr.msrb.gmra.mxu2 %vm7647_vm7, %v8406_v42 }
0x12f0   :  { %8584 = vmatpush.bf16.msra.mxu2 %v13103_v55  ;;  %8769 = vmatpush.bf16.msra.mxu0 %v13123_v34 }
0x12f1   :  { %v8041_v32 = vpop.f32.mrf.mxu3 }
0x12f2   :  { %v8058_v18 = vpack.c.bf16 %v8041_v32, %v8041_v32 }
0x12f4   :  { %8585 = vmatpush.bf16.msra.mxu2 %v13102_v49  ;;  %8770 = vmatpush.bf16.msra.mxu0 %v13122_v54  ;;  %v8245_v26 = vpop.f32.mrf.mxu0  ;;  %v13129_v49 = vld [vmem:[%s15978_s14 + $0x328] sm:$0xff] }
0x12f5   :  { %8197 = vmatmul.bf16.vlgmr.msra.gmra.mxu1 %v8058_v18  ;;  %v13133_v54 = vld [vmem:[%s15978_s14 + $0x348] sm:$0xff]  ;;  %v13128_v18 = vld [vmem:[%s15978_s14 + $0x320] sm:$0xff]  ;;  %v13127_v26 = vld [vmem:[%s15978_s14 + $0x318] sm:$0xff] }
0x12f6   :  { %8567 = vmatpush.bf16.msra.mxu1 %v13099_v23  ;;  %v13132_v23 = vld [vmem:[%s15978_s14 + $0x340] sm:$0xff] }
0x12f8   :  { %8586 = vmatpush.bf16.msra.mxu2 %v13101_v62  ;;  %8771 = vmatpush.bf16.msra.mxu0 %v13121_v59  ;;  %v8973_v59 = vld [vmem:[#allocation22 + $0x7] sm:$0x1] }
0x12f9   :  { %v8043_v16 = vpop.f32.mrf.mxu3 }
0x12fa   :  { %8568 = vmatpush.bf16.msra.mxu1 %v13098_v46  ;;  %v13126_v46 = vld [vmem:[%s15978_s14 + $0x310] sm:$0xff]  ;;  %v13125_v16 = vld [vmem:[%s15978_s14 + $0x308] sm:$0xff] }
0x12fc   :  { %8587 = vmatpush.bf16.msra.mxu2 %v13100_v13  ;;  %8772 = vmatpush.bf16.msra.mxu0 %v13120_v44 }
0x12fe   :  { %8569 = vmatpush.bf16.msra.mxu1 %v13097_v12 }
0x12ff   :  { %12101 = vmatmul.msk.bf16.vlgmr.msrb.gmra.mxu0 %vm7647_vm7, %v8595_v7 }
0x1300   :  { %8808 = vmatpush.bf16.msrb.mxu2 %v15515_v40  ;;  %8773 = vmatpush.bf16.msra.mxu0 %v13119_v58  ;;  %v13147_v58 = vld [vmem:[%s15978_s14 + $0x3b8] sm:$0xff] }
0x1301   :  { %v8230_v56 = vpop.f32.mrf.mxu3 }
0x1302   :  { %8570 = vmatpush.bf16.msra.mxu1 %v13096_v60  ;;  %v8247_v15 = vpack.c.bf16 %v8230_v56, %v8230_v56  ;;  %v13155_v60 = vld [vmem:[%s15978_s14 + $0x3f8] sm:$0xff]  ;;  %v13154_v56 = vld [vmem:[%s15978_s14 + $0x3f0] sm:$0xff] }
0x1304   :  { %8774 = vmatpush.bf16.msra.mxu0 %v13118_v35  ;;  %8386 = vmatmul.bf16.vlgmr.msrb.gmra.mxu3 %v8247_v15 }
0x1305   :  { %12002 = vmatmul.msk.bf16.vlgmr.msrb.gmra.mxu1 %vm7647_vm7, %v8406_v42  ;;  %8756 = vmatpush.bf16.msrb.mxu3 %v13115_v43  ;;  %v13144_v43 = vld [vmem:[%s15978_s14 + $0x3a0] sm:$0xff] }
0x1306   :  { %8571 = vmatpush.bf16.msra.mxu1 %v13095_v53  ;;  %v13153_v53 = vld [vmem:[%s15978_s14 + $0x3e8] sm:$0xff] }
0x1308   :  { %8775 = vmatpush.bf16.msra.mxu0 %v13117_v10 }
0x1309   :  { %8757 = vmatpush.bf16.msrb.mxu3 %v13114_v29  ;;  %v8232_v9 = vpop.f32.mrf.mxu3  ;;  %v13143_v29 = vld [vmem:[%s15978_s14 + $0x398] sm:$0xff] }
0x130a   :  { %8572 = vmatpush.bf16.msra.mxu1 %v13094_v36  ;;  %v13152_v36 = vld [vmem:[%s15978_s14 + $0x3e0] sm:$0xff] }
0x130c   :  { %8776 = vmatpush.bf16.msra.mxu0 %v13116_v47 }
0x130d   :  { %8758 = vmatpush.bf16.msrb.mxu3 %v13113_v41 }
0x130e   :  { %8573 = vmatpush.bf16.msra.mxu1 %v13093_v4  ;;  %v13142_v4 = vld [vmem:[%s15978_s14 + $0x390] sm:$0xff] }
0x1310   :  { %8997 = vmatpush.bf16.msrb.mxu0 %v15515_v40 }
0x1311   :  { %8759 = vmatpush.bf16.msrb.mxu3 %v13112_v22  ;;  %v13151_v22 = vld [vmem:[%s15978_s14 + $0x3d8] sm:$0xff] }
0x1312   :  { %8574 = vmatpush.bf16.msra.mxu1 %v13092_v25 }
0x1314   :  { %12100 = vmatmul.msk.bf16.vlgmr.msra.gmra.mxu3 %vm7647_vm7, %v8595_v7  ;;  %v13146_v7 = vld [vmem:[%s15978_s14 + $0x3b0] sm:$0xff] }
0x1315   :  { %8760 = vmatpush.bf16.msrb.mxu3 %v13111_v63  ;;  %v13141_v63 = vld [vmem:[%s15978_s14 + $0x388] sm:$0xff] }
0x1316   :  { %8795 = vmatpush.bf16.msrb.mxu1 %v15529_v57 }
0x1319   :  { %8761 = vmatpush.bf16.msrb.mxu3 %v13110_v19 }
0x131d   :  { %8762 = vmatpush.bf16.msrb.mxu3 %v13109_v5 }
0x1321   :  { %8763 = vmatpush.bf16.msrb.mxu3 %v13108_v2  ;;  %v13150_v2 = vld [vmem:[%s15978_s14 + $0x3d0] sm:$0xff] }
0x1325   :  { %8984 = vmatpush.bf16.msra.mxu3 %v15529_v57 }
0x1362   :  { %v8211_v0 = vpop.f32.mrf.mxu2 }
0x136a   :  { %v8213_v38 = vpop.f32.mrf.mxu2 }
0x136b   :  { %v13140_v38 = vld [vmem:[%s15978_s14 + $0x380] sm:$0xff] }
0x136c   :  { %v8400_v61 = vpop.f32.mrf.mxu0 }
0x1372   :  { %v8198_v39 = vpop.f32.mrf.mxu1  ;;  %v8432_v30 = vpop.f32.mrf.mxu2 }
0x1373   :  { %v8212_v17 = vadd.f32 %v8211_v0, %v8198_v39  ;;  %v8437_v52 = vpack.c.bf16 %v8432_v30, %v8432_v30 }
0x1374   :  { %v8402_v50 = vpop.f32.mrf.mxu0 }
0x1375   :  { %v8215_v37 = vadd.f32 %v8212_v17, %v15711_v45  ;;  %8588 = vmatmul.bf16.vlgmr.msra.gmra.mxu2 %v8437_v52  ;;  %v13135_v45 = vld [vmem:[%s15978_s14 + $0x358] sm:$0xff]  ;;  %v13148_v17 = vld [vmem:[%s15978_s14 + $0x3c0] sm:$0xff]  ;;  %v13170_v50 = vld [vmem:[%s15978_s14 + $0x470] sm:$0xff] }
0x1376   :  { %8958 = vmatpush.bf16.msra.mxu2 %v13139_v33  ;;  %v13171_v33 = vld [vmem:[%s15978_s14 + $0x478] sm:$0xff] }
0x137a   :  { %8959 = vmatpush.bf16.msra.mxu2 %v13138_v11  ;;  %v8200_v21 = vpop.f32.mrf.mxu1  ;;  %v8434_v31 = vpop.f32.mrf.mxu2 }
0x137b   :  { %v13162_v31 = vld [vmem:[%s15978_s14 + $0x430] sm:$0xff] }
0x137c   :  { %v8621_v6 = vpop.f32.mrf.mxu0 }
0x137d   :  { %v8626_v3 = vpack.c.bf16 %v8621_v6, %v8621_v6 }
0x137e   :  { %8960 = vmatpush.bf16.msra.mxu2 %v13137_v48  ;;  %v13169_v48 = vld [vmem:[%s15978_s14 + $0x468] sm:$0xff] }
0x137f   :  { %8777 = vmatmul.bf16.vlgmr.msra.gmra.mxu0 %v8626_v3 }
0x1380   :  { %9147 = vmatpush.bf16.msra.mxu0 %v13155_v60 }
0x1382   :  { %8961 = vmatpush.bf16.msra.mxu2 %v13136_v1  ;;  %v8419_v8 = vpop.f32.mrf.mxu1  ;;  %v9162_v1 = vld [vmem:[#allocation22 + $0x8] sm:$0x1] }
0x1383   :  { %v8436_v20 = vpack.c.bf16 %v8419_v8, %v8419_v8 }
0x1384   :  { %v8623_v42 = vpop.f32.mrf.mxu0  ;;  %9148 = vmatpush.bf16.msra.mxu0 %v13154_v56 }
0x1385   :  { %8575 = vmatmul.bf16.vlgmr.msra.gmra.mxu1 %v8436_v20  ;;  %12199 = vmatmul.msk.bf16.vlgmr.msrb.gmra.mxu2 %vm7647_vm7, %v8784_v51  ;;  %v13168_v42 = vld [vmem:[%s15978_s14 + $0x460] sm:$0xff] }
0x1386   :  { %8945 = vmatpush.bf16.msra.mxu1 %v13131_v24  ;;  %8962 = vmatpush.bf16.msra.mxu2 %v13135_v45 }
0x1387   :  { %v8387_v55 = vpop.f32.mrf.mxu3 }
0x1388   :  { %v8401_v34 = vadd.f32 %v8400_v61, %v8387_v55  ;;  %9149 = vmatpush.bf16.msra.mxu0 %v13153_v53  ;;  %v13149_v61 = vld [vmem:[%s15978_s14 + $0x3c8] sm:$0xff] }
0x1389   :  { %v13161_v55 = vld [vmem:[%s15978_s14 + $0x428] sm:$0xff] }
0x138a   :  { %v8404_v14 = vadd.f32 %v8401_v34, %v8215_v37  ;;  %8946 = vmatpush.bf16.msra.mxu1 %v13130_v28  ;;  %8963 = vmatpush.bf16.msra.mxu2 %v13134_v27  ;;  %v8421_v32 = vpop.f32.mrf.mxu1  ;;  %v13163_v37 = vld [vmem:[%s15978_s14 + $0x438] sm:$0xff] }
0x138b   :  { %v13167_v34 = vld [vmem:[%s15978_s14 + $0x458] sm:$0xff]  ;;  %v13165_v32 = vld [vmem:[%s15978_s14 + $0x448] sm:$0xff] }
0x138c   :  { %9150 = vmatpush.bf16.msra.mxu0 %v13152_v36 }
0x138e   :  { %8947 = vmatpush.bf16.msra.mxu1 %v13129_v49  ;;  %8964 = vmatpush.bf16.msra.mxu2 %v13133_v54  ;;  %v13166_v49 = vld [vmem:[%s15978_s14 + $0x450] sm:$0xff]  ;;  %v13159_v54 = vld [vmem:[%s15978_s14 + $0x418] sm:$0xff] }
0x138f   :  { %v8389_v62 = vpop.f32.mrf.mxu3  ;;  %12297 = vmatmul.msk.bf16.vlgmr.msrb.gmra.mxu0 %vm7647_vm7, %v8973_v59 }
0x1390   :  { %9151 = vmatpush.bf16.msra.mxu0 %v13151_v22  ;;  %v13157_v62 = vld [vmem:[%s15978_s14 + $0x408] sm:$0xff] }
0x1392   :  { %8948 = vmatpush.bf16.msra.mxu1 %v13128_v18  ;;  %8965 = vmatpush.bf16.msra.mxu2 %v13132_v23  ;;  %v13158_v18 = vld [vmem:[%s15978_s14 + $0x410] sm:$0xff]  ;;  %v13164_v23 = vld [vmem:[%s15978_s14 + $0x440] sm:$0xff] }
0x1394   :  { %9152 = vmatpush.bf16.msra.mxu0 %v13150_v2 }
0x1395   :  { %12198 = vmatmul.msk.bf16.vlgmr.msrb.gmra.mxu1 %vm7647_vm7, %v8784_v51 }
0x1396   :  { %9186 = vmatpush.bf16.msrb.mxu2 %v15515_v40  ;;  %8949 = vmatpush.bf16.msra.mxu1 %v13127_v26  ;;  %v13124_v40 = vld [vmem:[%s15978_s14 + $0x300] sm:$0xff] }
0x1397   :  { %v8608_v13 = vpop.f32.mrf.mxu3 }
0x1398   :  { %v8625_v44 = vpack.c.bf16 %v8608_v13, %v8608_v13  ;;  %9153 = vmatpush.bf16.msra.mxu0 %v13149_v61 }
0x139a   :  { %8950 = vmatpush.bf16.msra.mxu1 %v13126_v46  ;;  %8764 = vmatmul.bf16.vlgmr.msrb.gmra.mxu3 %v8625_v44 }
0x139b   :  { %9134 = vmatpush.bf16.msrb.mxu3 %v13147_v58 }
0x139c   :  { %9154 = vmatpush.bf16.msra.mxu0 %v13148_v17 }
0x139e   :  { %8951 = vmatpush.bf16.msra.mxu1 %v13125_v16 }
0x139f   :  { %v8610_v12 = vpop.f32.mrf.mxu3  ;;  %9135 = vmatpush.bf16.msrb.mxu3 %v13146_v7 }
0x13a2   :  { %8952 = vmatpush.bf16.msra.mxu1 %v13124_v40 }
0x13a6   :  { %9173 = vmatpush.bf16.msrb.mxu1 %v15529_v57  ;;  %v13145_v57 = vld [vmem:[%s15978_s14 + $0x3a8] sm:$0xff] }
0x13a7   :  { %9136 = vmatpush.bf16.msrb.mxu3 %v13145_v57 }
0x13aa   :  { %12296 = vmatmul.msk.bf16.vlgmr.msra.gmra.mxu3 %vm7647_vm7, %v8973_v59  ;;  %v13156_v59 = vld [vmem:[%s15978_s14 + $0x400] sm:$0xff] }
0x13ab   :  { %9137 = vmatpush.bf16.msrb.mxu3 %v13144_v43 }
0x13af   :  { %9138 = vmatpush.bf16.msrb.mxu3 %v13143_v29 }
0x13b3   :  { %9139 = vmatpush.bf16.msrb.mxu3 %v13142_v4 }
0x13b7   :  { %9140 = vmatpush.bf16.msrb.mxu3 %v13141_v63 }
0x13bb   :  { %9141 = vmatpush.bf16.msrb.mxu3 %v13140_v38 }
0x13f8   :  { %v8589_v35 = vpop.f32.mrf.mxu2 }
0x13fc   :  { %v8778_v15 = vpop.f32.mrf.mxu0 }
0x1400   :  { %v8591_v10 = vpop.f32.mrf.mxu2 }
0x1402   :  { %v8576_v47 = vpop.f32.mrf.mxu1 }
0x1403   :  { %v8590_v41 = vadd.f32 %v8589_v35, %v8576_v47 }
0x1404   :  { %v8780_v25 = vpop.f32.mrf.mxu0 }
0x1405   :  { %v8593_v9 = vadd.f32 %v8590_v41, %v8404_v14  ;;  %v13160_v14 = vld [vmem:[%s15978_s14 + $0x420] sm:$0xff]  ;;  %s13707_s14 = smov [#allocation25]  }
0x1406   :  { %s9362_s21 = sshll.u32 %s13707_s14, 4  ;;  %s9363_s21 = int_to_ptr.vmem [resolvable:$true] %s9362_s21 }
0x1408   :  { %v8810_v19 = vpop.f32.mrf.mxu2 }
0x1409   :  { %v8815_v5 = vpack.c.bf16 %v8810_v19, %v8810_v19 }
0x140a   :  { %v8578_v0 = vpop.f32.mrf.mxu1 }
0x140b   :  { %8966 = vmatmul.bf16.vlgmr.msra.gmra.mxu2 %v8815_v5 }
0x140c   :  { %v8999_v39 = vpop.f32.mrf.mxu0  ;;  %9336 = vmatpush.bf16.msra.mxu2 %v13171_v33 }
0x140d   :  { %v9004_v21 = vpack.c.bf16 %v8999_v39, %v8999_v39 }
0x140f   :  { %9155 = vmatmul.bf16.vlgmr.msra.gmra.mxu0 %v9004_v21 }
0x1410   :  { %v8812_v30 = vpop.f32.mrf.mxu2  ;;  %9337 = vmatpush.bf16.msra.mxu2 %v13170_v50 }
0x1412   :  { %v8797_v52 = vpop.f32.mrf.mxu1 }
0x1413   :  { %v8814_v11 = vpack.c.bf16 %v8797_v52, %v8797_v52 }
0x1414   :  { %v9001_v6 = vpop.f32.mrf.mxu0  ;;  %9338 = vmatpush.bf16.msra.mxu2 %v13169_v48 }
0x1415   :  { %8953 = vmatmul.bf16.vlgmr.msra.gmra.mxu1 %v8814_v11 }
0x1416   :  { %9323 = vmatpush.bf16.msra.mxu1 %v13163_v37 }
0x1418   :  { %9339 = vmatpush.bf16.msra.mxu2 %v13168_v42 }
0x141a   :  { %v8799_v3 = vpop.f32.mrf.mxu1  ;;  %9324 = vmatpush.bf16.msra.mxu1 %v13162_v31 }
0x141b   :  { %12395 = vmatmul.msk.bf16.vlgmr.msrb.gmra.mxu2 %vm7647_vm7, %v9162_v1 }
0x141c   :  { %9340 = vmatpush.bf16.msra.mxu2 %v13167_v34 }
0x141d   :  { %v8765_v8 = vpop.f32.mrf.mxu3 }
0x141e   :  { %v8779_v51 = vadd.f32 %v8778_v15, %v8765_v8  ;;  %9325 = vmatpush.bf16.msra.mxu1 %v13161_v55 }
0x1420   :  { %v8782_v24 = vadd.f32 %v8779_v51, %v8593_v9  ;;  %9341 = vmatpush.bf16.msra.mxu2 %v13166_v49  ;;  %v13208_v9 = vld [vmem:[#allocation23] ss:$0 sm:$0xff] }
0x1422   :  { %9326 = vmatpush.bf16.msra.mxu1 %v13160_v14 }
0x1424   :  { %9342 = vmatpush.bf16.msra.mxu2 %v13165_v32 }
0x1425   :  { %v8767_v45 = vpop.f32.mrf.mxu3  ;;  %12394 = vmatmul.msk.bf16.vlgmr.msrb.gmra.mxu1 %vm7647_vm7, %v9162_v1 }
0x1426   :  { %9327 = vmatpush.bf16.msra.mxu1 %v13159_v54 }
0x1428   :  { %9343 = vmatpush.bf16.msra.mxu2 %v13164_v23 }
0x142a   :  { %9328 = vmatpush.bf16.msra.mxu1 %v13158_v18 }
0x142d   :  { %v8986_v20 = vpop.f32.mrf.mxu3 }
0x142e   :  { %v9003_v28 = vpack.c.bf16 %v8986_v20, %v8986_v20  ;;  %9329 = vmatpush.bf16.msra.mxu1 %v13157_v62 }
0x1430   :  { %9142 = vmatmul.bf16.vlgmr.msrb.gmra.mxu3 %v9003_v28 }
0x1432   :  { %9330 = vmatpush.bf16.msra.mxu1 %v13156_v59 }
0x1435   :  { %v8988_v27 = vpop.f32.mrf.mxu3 }
0x148c   :  { %v9156_v16 = vpop.f32.mrf.mxu0 }
0x148e   :  { %v8967_v26 = vpop.f32.mrf.mxu2 }
0x1492   :  { %v8954_v46 = vpop.f32.mrf.mxu1 }
0x1493   :  { %v8968_v13 = vadd.f32 %v8967_v26, %v8954_v46 }
0x1494   :  { %v9158_v58 = vpop.f32.mrf.mxu0 }
0x1495   :  { %v8971_v44 = vadd.f32 %v8968_v13, %v8782_v24 }
0x1496   :  { %v8969_v40 = vpop.f32.mrf.mxu2 }
0x149a   :  { %v8956_v12 = vpop.f32.mrf.mxu1 }
0x149e   :  { %v9188_v7 = vpop.f32.mrf.mxu2 }
0x149f   :  { %v9193_v60 = vpack.c.bf16 %v9188_v7, %v9188_v7 }
0x14a1   :  { %9344 = vmatmul.bf16.vlgmr.msra.gmra.mxu2 %v9193_v60 }
0x14a2   :  { %v9175_v57 = vpop.f32.mrf.mxu1 }
0x14a3   :  { %v9192_v35 = vpack.c.bf16 %v9175_v57, %v9175_v57 }
0x14a5   :  { %9331 = vmatmul.bf16.vlgmr.msra.gmra.mxu1 %v9192_v35 }
0x14a6   :  { %v9190_v56 = vpop.f32.mrf.mxu2 }
0x14aa   :  { %v9177_v43 = vpop.f32.mrf.mxu1 }
0x14b3   :  { %v9143_v15 = vpop.f32.mrf.mxu3 }
0x14b4   :  { %v9157_v53 = vadd.f32 %v9156_v16, %v9143_v15 }
0x14b6   :  { %v9160_v10 = vadd.f32 %v9157_v53, %v8971_v44 }
0x14bb   :  { %v9145_v29 = vpop.f32.mrf.mxu3 }
0x1522   :  { %v9332_v36 = vpop.f32.mrf.mxu1 }
0x1524   :  { %v9345_v47 = vpop.f32.mrf.mxu2 }
0x1525   :  { %v9346_v41 = vadd.f32 %v9345_v47, %v9332_v36 }
0x1527   :  { %v9349_v4 = vadd.f32 %v9346_v41, %v9160_v10 }
0x1529   :  { %v9354_v22 = vadd.f32 %v13208_v9, %v9349_v4 }
0x152a   :  { %v9334_v25 = vpop.f32.mrf.mxu1 }
0x152b   :  { %9356 = vst.msk [vmem:[#allocation25] sm:$0x3] %vm9355_vm8, %v9354_v22 }
0x152c   :  { %v9347_v63 = vpop.f32.mrf.mxu2  ;;  %9367 = dma.vmem_to_hbm [thread:$0]  %s9363_s21, 32, %s9365_s4, [#allocation4]  }
0x152d   :  { %13681 = dma.done.wait [#allocation4], 32  }
0x152e   :  { %13682 = vsyncadd [#allocation4], 4294967264 }
0x152f   :  { %9372 = vsyncpa [#allocation3], 1 }
0x1530   :  { %9373 = vsyncpa [#allocation6], 1 }
0x1531   :  { %9374 = vsyncpa [#allocation9], 1 }
0x1532   :  { %9375 = vsyncpa [#allocation12], 1 }
0x1533   :  { %9376 = vsyncpa [#allocation15], 1 }
0x1534   :  { %9377 = vsyncpa [#allocation18], 1 }
0x1535   :  { %9378 = vsyncpa [#allocation21], 1 }
0x1536   :  { %9379 = vsyncpa [#allocation24], 1 }
0x1537   :  { %9380 = vsyncpa [#allocation4], 1 }

</bundles_post_ra>
